<compile_context>
chip_gen: v7x
topology: tpu7x:2x2x1
jax: 0.10.0
libtpu: 0.0.40
codegen_flags: <defaults>
</compile_context>

<pallas_src>
from functools import partial

import numpy as np
import jax
import jax.numpy as jnp
from jax.experimental import pallas as pl
from jax.experimental.pallas import tpu as pltpu

# ---------------- small synthetic config (scaled-down DOFA ViT-base) ----------------
IMG = 16            # image_resolution (224 in the real wrapper)
PATCH = 8           # patch / dynamic-conv kernel size (16 in the real model)
EMBED = 64          # ViT embed_dim (768 for 'base')
DEPTH = 2           # number of ViT blocks (12 for 'base')
HEADS = 4           # ViT num_heads (12 for 'base')
MLP_RATIO = 4
WV = 32             # wv_planes (128 in the real model)
WG_HEADS = 4        # TransformerWeightGenerator num_heads
WG_FF = 128         # nn.TransformerEncoderLayer dim_feedforward (scaled down from 2048)
WT_NUM = 128        # number of weight tokens (hardcoded in TransformerWeightGenerator)
NUM_PATCHES = (IMG // PATCH) ** 2
S2_WAVES = [0.665, 0.56, 0.49, 0.705, 0.74, 0.783, 0.842, 1.61, 2.19]
S1_WAVES = [3.75, 3.75]
CHANNEL_IDS = [3, 2, 1, 4, 5, 6, 7, 11, 12]
SCALER = 0.01

# MXU operand dtype (f32 accumulation everywhere).  bf16 halves weight DMA and uses the
# fast MXU path on v5e/v6e/v7x; set jnp.float32 for closer fp32 parity with PyTorch.
MXU_DTYPE = jnp.bfloat16

B_TILE_MAX = 4                      # per-core batch rows amortizing the weight stream
VIT_VMEM_LIMIT = 48 * 1024 * 1024   # fits v7x 64 MiB physical, lifts v5e/v6e scoped default


# ============================ small helpers ============================

def _round_up(x, m):
    return ((x + m - 1) // m) * m


def _largest_divisor_leq(n, cap):
    for t in range(min(cap, n), 0, -1):
        if n % t == 0:
            return t
    return 1


def _pick_tile(dim, cap, align):
    """Largest tile <= cap dividing dim and multiple of align; dim itself if dim <= cap
    (full-extent blocks are always legal); None if no divisor exists (caller pads)."""
    if dim <= cap:
        return dim
    t = (cap // align) * align
    while t >= align:
        if dim % t == 0:
            return t
        t -= align
    return None


# ============================ in-kernel math helpers ============================

def _gelu(x):
    # exact (erf) GELU, matching torch.nn.functional.gelu default
    return 0.5 * x * (1.0 + jax.lax.erf(x * 0.7071067811865476))


def _ln(x, g, b, eps):
    mu = jnp.mean(x, axis=-1, keepdims=True)
    var = jnp.mean(jnp.square(x - mu), axis=-1, keepdims=True)
    return (x - mu) * jax.lax.rsqrt(var + eps) * g + b


def _mha_concat(qkv, heads):
    """Multi-head self attention from fused qkv (S, 3E).
    Returns the lane-concatenated per-head outputs (S, E) in MXU_DTYPE; the caller issues
    ONE full-K projection matmul (no per-head fold through K=Dh weight slices)."""
    S, E3 = qkv.shape
    E = E3 // 3
    Dh = E // heads
    scale = 1.0 / float(Dh) ** 0.5
    outs = []
    for h in range(heads):
        qh = qkv[:, h * Dh:(h + 1) * Dh].astype(MXU_DTYPE)
        kh = qkv[:, E + h * Dh:E + (h + 1) * Dh].astype(MXU_DTYPE)
        vh = qkv[:, 2 * E + h * Dh:2 * E + (h + 1) * Dh].astype(MXU_DTYPE)
        s = jax.lax.dot_general(qh, kh, (((1,), (1,)), ((), ())),
                                preferred_element_type=jnp.float32) * scale
        m = jnp.max(s, axis=-1, keepdims=True)
        p = jnp.exp(s - m)
        p = p * pl.reciprocal(jnp.sum(p, axis=-1, keepdims=True), approx=True)
        oh = jnp.dot(p.astype(MXU_DTYPE), vh, preferred_element_type=jnp.float32)
        outs.append(oh.astype(MXU_DTYPE))
    return jnp.concatenate(outs, axis=-1)            # (S, E)


# ============================ generic tiled linear ============================

def _linear_kernel(x_ref, w_ref, b_ref, o_ref, *, act):
    y = jnp.dot(x_ref[...], w_ref[...], preferred_element_type=jnp.float32)
    y = y + b_ref[...]
    if act == "relu":
        y = jnp.maximum(y, 0.0)
    elif act == "gelu":
        y = _gelu(y)
    o_ref[...] = y


def pallas_linear(x, w, b=None, act="none", tile_m=256, tile_n=1024, vmem_limit=None):
    """y = act(x @ w + b), tiled over (M, N) with a parallel grid.
    Operands in MXU_DTYPE, f32 accumulation; divisor tiles preferred over padding."""
    M, K = x.shape
    K2, N = w.shape
    assert K == K2
    b2 = (jnp.zeros((1, N), jnp.float32) if b is None
          else jnp.asarray(b, jnp.float32).reshape(1, N))
    x = x.astype(MXU_DTYPE)
    w = w.astype(MXU_DTYPE)          # no-op when weights are pre-cast at init
    tm = _pick_tile(M, tile_m, 8)
    tn = _pick_tile(N, tile_n, 128)
    Mp, Np = M, N
    if tm is None:                   # no divisor tile -> pad (rare fallback)
        tm = tile_m
        Mp = _round_up(M, tm)
        x = jnp.pad(x, ((0, Mp - M), (0, 0)))
    if tn is None:
        tn = tile_n
        Np = _round_up(N, tn)
        w = jnp.pad(w, ((0, 0), (0, Np - N)))
        b2 = jnp.pad(b2, ((0, 0), (0, Np - N)))
    out = pl.pallas_call(
        partial(_linear_kernel, act=act),
        out_shape=jax.ShapeDtypeStruct((Mp, Np), jnp.float32),
        grid=(Mp // tm, Np // tn),
        in_specs=[
            pl.BlockSpec((tm, K), lambda i, j: (i, 0)),
            pl.BlockSpec((K, tn), lambda i, j: (0, j)),
            pl.BlockSpec((1, tn), lambda i, j: (0, j)),
        ],
        out_specs=pl.BlockSpec((tm, tn), lambda i, j: (i, j)),
        compiler_params=pltpu.CompilerParams(
            dimension_semantics=("parallel", "parallel"),
            vmem_limit_bytes=vmem_limit),
    )(x, w, b2)
    if Mp != M or Np != N:
        out = out[:M, :N]
    return out


# ============================ bilinear resize ============================

def _resize_kernel(x_ref, rwT_ref, rh_ref, o_ref, *, group):
    # bilinear resize = Rh @ (X @ Rw^T); both matmuls fused, GROUP images per grid step
    # so the interpolation matrices are loaded once per group and step overhead amortizes.
    rwT = rwT_ref[...]
    rh = rh_ref[...]
    for g in range(group):
        t = jnp.dot(x_ref[g], rwT, preferred_element_type=jnp.float32)   # (H, out_w)
        o_ref[g] = jnp.dot(rh, t, preferred_element_type=jnp.float32)    # (out_h, out_w)


def _resize_matrix(in_size, out_size):
    # PyTorch bilinear, align_corners=False (half-pixel centers, negative src clamped to 0)
    scale = in_size / out_size
    dst = np.arange(out_size, dtype=np.float64)
    src = np.maximum((dst + 0.5) * scale - 0.5, 0.0)
    i0 = np.minimum(np.floor(src).astype(np.int64), in_size - 1)
    i1 = np.minimum(i0 + 1, in_size - 1)
    w1 = src - i0
    w0 = 1.0 - w1
    m = np.zeros((out_size, in_size), np.float32)
    rows = np.arange(out_size)
    np.add.at(m, (rows, i0), w0)
    np.add.at(m, (rows, i1), w1)
    return jnp.asarray(m)


def bilinear_resize_nchw(img, out_h, out_w, group_cap=8):
    B, C, H, W = img.shape
    BC = B * C
    G = _largest_divisor_leq(BC, group_cap)
    RwT = _resize_matrix(W, out_w).T      # (W, out_w)
    Rh = _resize_matrix(H, out_h)         # (out_h, H)
    x = img.reshape(BC, H, W).astype(jnp.float32)
    out = pl.pallas_call(
        partial(_resize_kernel, group=G),
        out_shape=jax.ShapeDtypeStruct((BC, out_h, out_w), jnp.float32),
        grid=(BC // G,),
        in_specs=[
            pl.BlockSpec((G, H, W), lambda i: (i, 0, 0)),
            pl.BlockSpec((W, out_w), lambda i: (0, 0)),
            pl.BlockSpec((out_h, H), lambda i: (0, 0)),
        ],
        out_specs=pl.BlockSpec((G, out_h, out_w), lambda i: (i, 0, 0)),
        compiler_params=pltpu.CompilerParams(dimension_semantics=("parallel",)),
    )(x, RwT, Rh)
    return out.reshape(B, C, out_h, out_w)


# ============================ FCResLayer ============================

def _fcres_kernel(x_ref, w1, b1, w2, b2, o_ref):
    # FCResLayer: x + relu(W2 relu(W1 x + b1) + b2), fully fused
    x = x_ref[...]
    y = jnp.maximum(jnp.dot(x.astype(MXU_DTYPE), w1[...],
                            preferred_element_type=jnp.float32) + b1[...], 0.0)
    y = jnp.maximum(jnp.dot(y.astype(MXU_DTYPE), w2[...],
                            preferred_element_type=jnp.float32) + b2[...], 0.0)
    o_ref[...] = x + y


def fcres_forward(x, p):
    M, D = x.shape
    return pl.pallas_call(
        _fcres_kernel,
        out_shape=jax.ShapeDtypeStruct((M, D), jnp.float32),
        grid=(1,),
        in_specs=[
            pl.BlockSpec((M, D), lambda i: (0, 0)),
            pl.BlockSpec((D, D), lambda i: (0, 0)),
            pl.BlockSpec((1, D), lambda i: (0, 0)),
            pl.BlockSpec((D, D), lambda i: (0, 0)),
            pl.BlockSpec((1, D), lambda i: (0, 0)),
        ],
        out_specs=pl.BlockSpec((M, D), lambda i: (0, 0)),
    )(x.astype(jnp.float32), p["w1"], p["b1"], p["w2"], p["b2"])


# ============================ TransformerWeightGenerator ============================

def _wg_layer_kernel(x_ref, inw, inb, outw, outb, ln1g, ln1b,
                     ff1w, ff1b, ff2w, ff2b, ln2g, ln2b, o_ref):
    # One post-norm nn.TransformerEncoderLayer (MHA + FF, activation='gelu'), fully fused.
    x = x_ref[...]                                                   # (S, E) f32
    qkv = jnp.dot(x.astype(MXU_DTYPE), inw[...],
                  preferred_element_type=jnp.float32) + inb[...]
    heads_out = _mha_concat(qkv, WG_HEADS)                           # (S, E) MXU_DTYPE
    attn = jnp.dot(heads_out, outw[...],
                   preferred_element_type=jnp.float32) + outb[...]
    x = _ln(x + attn, ln1g[...], ln1b[...], 1e-5)
    h = _gelu(jnp.dot(x.astype(MXU_DTYPE), ff1w[...],
                      preferred_element_type=jnp.float32) + ff1b[...])
    h = jnp.dot(h.astype(MXU_DTYPE), ff2w[...],
                preferred_element_type=jnp.float32) + ff2b[...]
    o_ref[...] = _ln(x + h, ln2g[...], ln2b[...], 1e-5)


def weight_generator_forward(waves, p):
    # tokens -> fused post-norm encoder layer -> fc_weight / fc_bias
    x = jnp.concatenate([p["weight_tokens"], waves, p["bias_token"]], axis=0)  # (WT_NUM+C+1, WV)
    S, E = x.shape
    full2 = lambda a, b: pl.BlockSpec((a, b), lambda i: (0, 0))
    enc = pl.pallas_call(
        _wg_layer_kernel,
        out_shape=jax.ShapeDtypeStruct((S, E), jnp.float32),
        grid=(1,),
        in_specs=[
            full2(S, E),
            full2(E, 3 * E), full2(1, 3 * E),
            full2(E, E), full2(1, E),
            full2(1, E), full2(1, E),
            full2(E, WG_FF), full2(1, WG_FF),
            full2(WG_FF, E), full2(1, E),
            full2(1, E), full2(1, E),
        ],
        out_specs=full2(S, E),
    )(x, p["in_w"], p["in_b"], p["out_w"], p["out_b"], p["ln1_g"], p["ln1_b"],
      p["ff1_w"], p["ff1_b"], p["ff2_w"], p["ff2_b"], p["ln2_g"], p["ln2_b"])
    # fc_weight: N = K*K*EMBED is huge at real scale -> wide N tiles, pre-cast bf16 weight.
    weights = pallas_linear(enc[WT_NUM:-1] + waves, p["fcw_w"], p["fcw_b"],
                            tile_n=8192, vmem_limit=VIT_VMEM_LIMIT)   # (C, K*K*EMBED)
    bias = pallas_linear(enc[-1:], p["fcb_w"], p["fcb_b"])[0]         # (EMBED,)
    return weights, bias


# ============================ fused ViT block stack (+ pos add + mean-pool) ============================

def _vit_stack_kernel(x_ref, pos_ref, ln1g, ln1b, qkvw, qkvb, projw, projb,
                      ln2g, ln2b, fc1w, fc1b, fc2w, fc2b, o_ref, xbuf,
                      *, b_tile, heads):
    d = pl.program_id(1)

    # d == 0: initialize the carried activation (tokens + pos_embed) for all batch rows.
    @pl.when(d == 0)
    def _():
        pe = pos_ref[0]                                  # (S, E)
        for bi in range(b_tile):
            xbuf[bi] = x_ref[bi] + pe

    # per-depth weights: read once, reused for all b_tile batch rows in this step.
    g1, b1 = ln1g[0], ln1b[0]
    wqkv, bqkv = qkvw[0], qkvb[0]
    wproj, bproj = projw[0], projb[0]
    g2, b2 = ln2g[0], ln2b[0]
    wfc1, bfc1 = fc1w[0], fc1b[0]
    wfc2, bfc2 = fc2w[0], fc2b[0]

    for bi in range(b_tile):
        x = xbuf[bi]                                     # (S, E) f32

        # ---- pre-norm attention ----
        h = _ln(x, g1, b1, 1e-6)
        qkv = jnp.dot(h.astype(MXU_DTYPE), wqkv,
                      preferred_element_type=jnp.float32) + bqkv
        heads_out = _mha_concat(qkv, heads)              # (S, E), single full-K projection next
        x = x + jnp.dot(heads_out, wproj,
                        preferred_element_type=jnp.float32) + bproj

        # ---- pre-norm MLP ----
        h = _ln(x, g2, b2, 1e-6)
        h = _gelu(jnp.dot(h.astype(MXU_DTYPE), wfc1,
                          preferred_element_type=jnp.float32) + bfc1)
        h = jnp.dot(h.astype(MXU_DTYPE), wfc2,
                    preferred_element_type=jnp.float32) + bfc2
        xbuf[bi] = x + h

    # d == last: fused do_pool mean over ALL tokens (incl. CLS); the full (B,S,E)
    # activation never goes back to HBM.
    @pl.when(d == pl.num_programs(1) - 1)
    def _():
        o_ref[...] = jnp.mean(xbuf[...], axis=1, keepdims=True)


def vit_stack_forward(x, pos_embed, bp, b_tile):
    """All DEPTH ViT blocks + pos-embed add + mean-pool in a single pallas_call.
    grid=(B/b_tile, DEPTH): batch groups parallel (megacore), depth carried in VMEM."""
    B, S, E = x.shape
    HID = MLP_RATIO * E
    assert B % b_tile == 0
    ix = lambda g, d: (g, 0, 0)
    ic = lambda g, d: (0, 0, 0)
    iw = lambda g, d: (d, 0, 0)
    return pl.pallas_call(
        partial(_vit_stack_kernel, b_tile=b_tile, heads=HEADS),
        out_shape=jax.ShapeDtypeStruct((B, 1, E), jnp.float32),
        grid=(B // b_tile, DEPTH),
        in_specs=[
            pl.BlockSpec((b_tile, S, E), ix),             # tokens (cls + patches)
            pl.BlockSpec((1, S, E), ic),                  # pos_embed
            pl.BlockSpec((1, 1, E), iw),                  # ln1_g
            pl.BlockSpec((1, 1, E), iw),                  # ln1_b
            pl.BlockSpec((1, E, 3 * E), iw),              # qkv_w
            pl.BlockSpec((1, 1, 3 * E), iw),              # qkv_b
            pl.BlockSpec((1, E, E), iw),                  # proj_w
            pl.BlockSpec((1, 1, E), iw),                  # proj_b
            pl.BlockSpec((1, 1, E), iw),                  # ln2_g
            pl.BlockSpec((1, 1, E), iw),                  # ln2_b
            pl.BlockSpec((1, E, HID), iw),                # fc1_w
            pl.BlockSpec((1, 1, HID), iw),                # fc1_b
            pl.BlockSpec((1, HID, E), iw),                # fc2_w
            pl.BlockSpec((1, 1, E), iw),                  # fc2_b
        ],
        out_specs=pl.BlockSpec((b_tile, 1, E), lambda g, d: (g, 0, 0)),
        scratch_shapes=[pltpu.VMEM((b_tile, S, E), jnp.float32)],
        compiler_params=pltpu.CompilerParams(
            dimension_semantics=("parallel", "arbitrary"),
            vmem_limit_bytes=VIT_VMEM_LIMIT),
    )(x.astype(jnp.float32), pos_embed.astype(jnp.float32),
      bp["ln1_g"], bp["ln1_b"], bp["qkv_w"], bp["qkv_b"], bp["proj_w"], bp["proj_b"],
      bp["ln2_g"], bp["ln2_b"], bp["fc1_w"], bp["fc1_b"], bp["fc2_w"], bp["fc2_b"])


# ============================ JAX glue ============================

def sincos_pos_embed_1d(embed_dim, pos):
    # get_1d_sincos_pos_embed_from_grid_torch
    omega = jnp.arange(embed_dim // 2, dtype=jnp.float32) / (embed_dim / 2.0)
    omega = 1.0 / (10000.0 ** omega)
    out = pos.reshape(-1)[:, None] * omega[None, :]
    return jnp.concatenate([jnp.sin(out), jnp.cos(out)], axis=1)


def dynamic_patch_embed(img_feat, wvs, p):
    # Dynamic_MLP_OFA.forward: dynamic conv2d(stride=K, padding=1) via a reshape/transpose
    # im2col (stride == kernel -> non-overlapping) + tiled matmul.
    B, C, H, W = img_feat.shape
    waves = sincos_pos_embed_1d(WV, wvs * 1000.0)            # (C, WV)
    waves = fcres_forward(waves, p["fclayer"])
    weight, bias = weight_generator_forward(waves, p["wg"])
    # matches reference: weight.view(embed_dim, inplanes, K, K) * scaler
    dyn_w = weight.reshape(EMBED, C, PATCH, PATCH) * SCALER
    dyn_b = bias * SCALER

    padded = jnp.pad(img_feat, ((0, 0), (0, 0), (1, 1), (1, 1)))
    out_h = (H + 2 - PATCH) // PATCH + 1
    out_w = (W + 2 - PATCH) // PATCH + 1
    crop = padded[:, :, :out_h * PATCH, :out_w * PATCH]
    cols = crop.reshape(B, C, out_h, PATCH, out_w, PATCH)
    cols = cols.transpose(0, 2, 4, 1, 3, 5).reshape(B * out_h * out_w, C * PATCH * PATCH)
    wmat = dyn_w.reshape(EMBED, C * PATCH * PATCH).T
    out = pallas_linear(cols, wmat, dyn_b, vmem_limit=VIT_VMEM_LIMIT)   # (B*P, EMBED)
    x = out.reshape(B, out_h * out_w, EMBED)                 # == conv.flatten(2).transpose(1, 2)
    return x, waves


def forward_features_pooled(img, wave_list, p):
    """OFAViT.forward_features followed by output.mean(dim=1) (do_pool=True), with the
    pos-embed add and the mean-pool fused into the ViT-stack kernel."""
    wvs = jnp.asarray(wave_list, jnp.float32)
    patches, _ = dynamic_patch_embed(img, wvs, p)            # (B, P, E)
    B = patches.shape[0]
    cls = jnp.broadcast_to(p["cls_token"], (B, 1, EMBED)).astype(jnp.float32)
    x0 = jnp.concatenate([cls, patches], axis=1)             # (B, S, E); pos add inside kernel
    b_tile = _largest_divisor_leq(B, B_TILE_MAX)
    pooled = vit_stack_forward(x0, p["pos_embed"], p["blocks"], b_tile)  # (B, 1, E)
    return pooled[:, 0, :]


def dofa_wrapper_forward(s2, p):
    """DOFAWrapper.forward for 4-D s2 input, do_pool=True."""
    images = jnp.transpose(s2, (0, 3, 1, 2))                 # b h w c -> b c h w
    assert images.shape[1] in (13, 2)
    if images.shape[1] == 13:
        images = images[:, jnp.asarray(CHANNEL_IDS), :, :]
        waves = S2_WAVES
    else:
        waves = S1_WAVES
    images = bilinear_resize_nchw(images, IMG, IMG)
    return forward_features_pooled(images, waves, p)         # (B, EMBED)


# ============================ parameter init ============================
# TODO(synk): weights are synthetic (deterministic PRNG init); real module loads a .pth checkpoint.

def init_params(key):
    keys = iter(jax.random.split(key, 64))

    def nrm(shape, std=0.02):
        return (std * jax.random.normal(next(keys), shape)).astype(jnp.float32)

    def mxu(shape, std=0.02):
        return nrm(shape, std).astype(MXU_DTYPE)

    nk = PATCH * PATCH * EMBED
    HID = MLP_RATIO * EMBED
    p = {}
    p["fclayer"] = dict(
        w1=mxu((WV, WV)), b1=jnp.full((1, WV), 0.01, jnp.float32),
        w2=mxu((WV, WV)), b2=jnp.full((1, WV), 0.01, jnp.float32),
    )
    p["wg"] = dict(
        weight_tokens=nrm((WT_NUM, WV)),
        bias_token=nrm((1, WV)),
        in_w=mxu((WV, 3 * WV)), in_b=jnp.zeros((1, 3 * WV), jnp.float32),
        out_w=mxu((WV, WV)), out_b=jnp.full((1, WV), 0.01, jnp.float32),
        ff1_w=mxu((WV, WG_FF)), ff1_b=jnp.full((1, WG_FF), 0.01, jnp.float32),
        ff2_w=mxu((WG_FF, WV)), ff2_b=jnp.full((1, WV), 0.01, jnp.float32),
        ln1_g=jnp.ones((1, WV), jnp.float32), ln1_b=jnp.zeros((1, WV), jnp.float32),
        ln2_g=jnp.ones((1, WV), jnp.float32), ln2_b=jnp.zeros((1, WV), jnp.float32),
        # fc_weight / fc_bias generator weights pre-cast to MXU dtype (no per-call convert)
        fcw_w=mxu((WV, nk)), fcw_b=jnp.full((nk,), 0.01, jnp.float32),
        fcb_w=mxu((WV, EMBED)), fcb_b=jnp.full((EMBED,), 0.01, jnp.float32),
    )
    p["cls_token"] = nrm((1, 1, EMBED))
    p["pos_embed"] = nrm((1, NUM_PATCHES + 1, EMBED))
    # per-block weights pre-stacked along DEPTH for the single fused ViT-stack kernel
    p["blocks"] = dict(
        ln1_g=jnp.ones((DEPTH, 1, EMBED), jnp.float32),
        ln1_b=jnp.zeros((DEPTH, 1, EMBED), jnp.float32),
        qkv_w=jnp.stack([nrm((EMBED, 3 * EMBED)) for _ in range(DEPTH)]).astype(MXU_DTYPE),
        qkv_b=jnp.zeros((DEPTH, 1, 3 * EMBED), jnp.float32),
        proj_w=jnp.stack([nrm((EMBED, EMBED)) for _ in range(DEPTH)]).astype(MXU_DTYPE),
        proj_b=jnp.zeros((DEPTH, 1, EMBED), jnp.float32),
        ln2_g=jnp.ones((DEPTH, 1, EMBED), jnp.float32),
        ln2_b=jnp.zeros((DEPTH, 1, EMBED), jnp.float32),
        fc1_w=jnp.stack([nrm((EMBED, MLP_RATIO * EMBED)) for _ in range(DEPTH)]).astype(MXU_DTYPE),
        fc1_b=jnp.zeros((DEPTH, 1, HID), jnp.float32),
        fc2_w=jnp.stack([nrm((MLP_RATIO * EMBED, EMBED)) for _ in range(DEPTH)]).astype(MXU_DTYPE),
        fc2_b=jnp.zeros((DEPTH, 1, EMBED), jnp.float32),
    )
    return p


# ============================ main ============================

if __name__ == "__main__":
    key = jax.random.PRNGKey(0)
    pkey, xkey = jax.random.split(key)
    params = init_params(pkey)
    # s2 input, PyTorch layout (b, h, w, c) with 13 spectral channels
    s2 = jax.random.normal(xkey, (2, 12, 12, 13), jnp.float32)
    out = jax.jit(dofa_wrapper_forward)(s2, params)
    out = jax.block_until_ready(out)
    assert out.shape == (2, EMBED)
    assert bool(jnp.all(jnp.isfinite(out)))
    print("KERNEL_OK")
</pallas_src>

<mosaic_0001>
module attributes {stable_mosaic.version = 11 : i64} {
  func.func @_fcres_kernel(%arg0: i32, %arg1: memref<9x32xf32, #tpu.memory_space<vmem>>, %arg2: memref<32x32xbf16, #tpu.memory_space<vmem>>, %arg3: memref<1x32xf32, #tpu.memory_space<vmem>>, %arg4: memref<32x32xbf16, #tpu.memory_space<vmem>>, %arg5: memref<1x32xf32, #tpu.memory_space<vmem>>, %arg6: memref<9x32xf32, #tpu.memory_space<vmem>>) attributes {dimension_semantics = [#tpu.dimension_semantics<arbitrary>], iteration_bounds = array<i64: 1>, scalar_prefetch = 0 : i64, scratch_operands = 0 : i64, tpu.core_type = #tpu.core_type<tc>, window_params = [{pipeline_mode = #tpu.pipeline_mode<synchronous>, transform_indices = @transform_0, window_bounds = array<i64: 9, 32>}, {pipeline_mode = #tpu.pipeline_mode<synchronous>, transform_indices = @transform_1, window_bounds = array<i64: 32, 32>}, {pipeline_mode = #tpu.pipeline_mode<synchronous>, transform_indices = @transform_2, window_bounds = array<i64: 1, 32>}, {pipeline_mode = #tpu.pipeline_mode<synchronous>, transform_indices = @transform_3, window_bounds = array<i64: 32, 32>}, {pipeline_mode = #tpu.pipeline_mode<synchronous>, transform_indices = @transform_4, window_bounds = array<i64: 1, 32>}, {pipeline_mode = #tpu.pipeline_mode<synchronous>, transform_indices = @transform_5, window_bounds = array<i64: 9, 32>}]} {
    %c0 = arith.constant 0 : index
    %c0_0 = arith.constant 0 : index
    %0 = vector.load %arg1[%c0, %c0_0] : memref<9x32xf32, #tpu.memory_space<vmem>>, vector<9x32xf32>
    %1 = arith.truncf %0 : vector<9x32xf32> to vector<9x32xbf16>
    %c0_1 = arith.constant 0 : index
    %c0_2 = arith.constant 0 : index
    %2 = vector.load %arg2[%c0_1, %c0_2] : memref<32x32xbf16, #tpu.memory_space<vmem>>, vector<32x32xbf16>
    %cst = arith.constant dense<0.000000e+00> : vector<9x32xf32>
    %3 = tpu.matmul %1, %2, %cst {dimension_numbers = #tpu.dot_dimension_numbers<[1], [0], [0], [1], [0, 0, 1, 1], [], []>} : vector<9x32xbf16>, vector<32x32xbf16>, vector<9x32xf32> -> vector<9x32xf32>
    %c0_3 = arith.constant 0 : index
    %c0_4 = arith.constant 0 : index
    %4 = vector.load %arg3[%c0_3, %c0_4] : memref<1x32xf32, #tpu.memory_space<vmem>>, vector<1x32xf32>
    %5 = vector.broadcast %4 : vector<1x32xf32> to vector<9x32xf32>
    %6 = arith.addf %3, %5 : vector<9x32xf32>
    %cst_5 = arith.constant 0.000000e+00 : f32
    %7 = vector.broadcast %cst_5 : f32 to vector<9x32xf32>
    %8 = arith.maximumf %6, %7 : vector<9x32xf32>
    %9 = arith.truncf %8 : vector<9x32xf32> to vector<9x32xbf16>
    %c0_6 = arith.constant 0 : index
    %c0_7 = arith.constant 0 : index
    %10 = vector.load %arg4[%c0_6, %c0_7] : memref<32x32xbf16, #tpu.memory_space<vmem>>, vector<32x32xbf16>
    %cst_8 = arith.constant dense<0.000000e+00> : vector<9x32xf32>
    %11 = tpu.matmul %9, %10, %cst_8 {dimension_numbers = #tpu.dot_dimension_numbers<[1], [0], [0], [1], [0, 0, 1, 1], [], []>} : vector<9x32xbf16>, vector<32x32xbf16>, vector<9x32xf32> -> vector<9x32xf32>
    %c0_9 = arith.constant 0 : index
    %c0_10 = arith.constant 0 : index
    %12 = vector.load %arg5[%c0_9, %c0_10] : memref<1x32xf32, #tpu.memory_space<vmem>>, vector<1x32xf32>
    %13 = vector.broadcast %12 : vector<1x32xf32> to vector<9x32xf32>
    %14 = arith.addf %11, %13 : vector<9x32xf32>
    %cst_11 = arith.constant 0.000000e+00 : f32
    %15 = vector.broadcast %cst_11 : f32 to vector<9x32xf32>
    %16 = arith.maximumf %14, %15 : vector<9x32xf32>
    %17 = arith.addf %0, %16 : vector<9x32xf32>
    %c0_12 = arith.constant 0 : index
    %c0_13 = arith.constant 0 : index
    %18 = vector.load %arg6[%c0_12, %c0_13] : memref<9x32xf32, #tpu.memory_space<vmem>>, vector<9x32xf32>
    tpu.vector_store %arg6[%c0_12, %c0_13], %17 {strides = array<i32>} : memref<9x32xf32, #tpu.memory_space<vmem>>, vector<9x32xf32>,
    return
  }
  func.func @transform_0(%arg0: i32) -> (i32, i32) {
    %c0_i32 = arith.constant 0 : i32
    %c0_i32_0 = arith.constant 0 : i32
    %c0_i32_1 = arith.constant 0 : i32
    return %c0_i32, %c0_i32_0 : i32, i32
  }
  func.func @transform_1(%arg0: i32) -> (i32, i32) {
    %c0_i32 = arith.constant 0 : i32
    %c0_i32_0 = arith.constant 0 : i32
    %c0_i32_1 = arith.constant 0 : i32
    return %c0_i32, %c0_i32_0 : i32, i32
  }
  func.func @transform_2(%arg0: i32) -> (i32, i32) {
    %c0_i32 = arith.constant 0 : i32
    %c0_i32_0 = arith.constant 0 : i32
    %c0_i32_1 = arith.constant 0 : i32
    return %c0_i32, %c0_i32_0 : i32, i32
  }
  func.func @transform_3(%arg0: i32) -> (i32, i32) {
    %c0_i32 = arith.constant 0 : i32
    %c0_i32_0 = arith.constant 0 : i32
    %c0_i32_1 = arith.constant 0 : i32
    return %c0_i32, %c0_i32_0 : i32, i32
  }
  func.func @transform_4(%arg0: i32) -> (i32, i32) {
    %c0_i32 = arith.constant 0 : i32
    %c0_i32_0 = arith.constant 0 : i32
    %c0_i32_1 = arith.constant 0 : i32
    return %c0_i32, %c0_i32_0 : i32, i32
  }
  func.func @transform_5(%arg0: i32) -> (i32, i32) {
    %c0_i32 = arith.constant 0 : i32
    %c0_i32_0 = arith.constant 0 : i32
    %c0_i32_1 = arith.constant 0 : i32
    return %c0_i32, %c0_i32_0 : i32, i32
  }
}

module attributes {stable_mosaic.version = 11 : i64} {
  func.func @_linear_kernel(%arg0: i32, %arg1: i32, %arg2: memref<9x32xbf16, #tpu.memory_space<vmem>>, %arg3: memref<32x4096xbf16, #tpu.memory_space<vmem>>, %arg4: memref<1x4096xf32, #tpu.memory_space<vmem>>, %arg5: memref<9x4096xf32, #tpu.memory_space<vmem>>) attributes {dimension_semantics = [#tpu.dimension_semantics<parallel>, #tpu.dimension_semantics<parallel>], iteration_bounds = array<i64: 1, 1>, scalar_prefetch = 0 : i64, scratch_operands = 0 : i64, tpu.core_type = #tpu.core_type<tc>, window_params = [{transform_indices = @transform_0, window_bounds = array<i64: 9, 32>}, {transform_indices = @transform_1, window_bounds = array<i64: 32, 4096>}, {transform_indices = @transform_2, window_bounds = array<i64: 1, 4096>}, {transform_indices = @transform_3, window_bounds = array<i64: 9, 4096>}]} {
    %c0 = arith.constant 0 : index
    %c0_0 = arith.constant 0 : index
    %0 = vector.load %arg2[%c0, %c0_0] : memref<9x32xbf16, #tpu.memory_space<vmem>>, vector<9x32xbf16>
    %c0_1 = arith.constant 0 : index
    %c0_2 = arith.constant 0 : index
    %1 = vector.load %arg3[%c0_1, %c0_2] : memref<32x4096xbf16, #tpu.memory_space<vmem>>, vector<32x4096xbf16>
    %cst = arith.constant dense<0.000000e+00> : vector<9x4096xf32>
    %2 = tpu.matmul %0, %1, %cst {dimension_numbers = #tpu.dot_dimension_numbers<[1], [0], [0], [1], [0, 0, 1, 1], [], []>} : vector<9x32xbf16>, vector<32x4096xbf16>, vector<9x4096xf32> -> vector<9x4096xf32>
    %c0_3 = arith.constant 0 : index
    %c0_4 = arith.constant 0 : index
    %3 = vector.load %arg4[%c0_3, %c0_4] : memref<1x4096xf32, #tpu.memory_space<vmem>>, vector<1x4096xf32>
    %4 = vector.broadcast %3 : vector<1x4096xf32> to vector<9x4096xf32>
    %5 = arith.addf %2, %4 : vector<9x4096xf32>
    %c0_5 = arith.constant 0 : index
    %c0_6 = arith.constant 0 : index
    %6 = vector.load %arg5[%c0_5, %c0_6] : memref<9x4096xf32, #tpu.memory_space<vmem>>, vector<9x4096xf32>
    tpu.vector_store %arg5[%c0_5, %c0_6], %5 {strides = array<i32>} : memref<9x4096xf32, #tpu.memory_space<vmem>>, vector<9x4096xf32>,
    return
  }
  func.func @transform_0(%arg0: i32, %arg1: i32) -> (i32, i32) {
    %c0_i32 = arith.constant 0 : i32
    %c0_i32_0 = arith.constant 0 : i32
    return %arg0, %c0_i32 : i32, i32
  }
  func.func @transform_1(%arg0: i32, %arg1: i32) -> (i32, i32) {
    %c0_i32 = arith.constant 0 : i32
    %c0_i32_0 = arith.constant 0 : i32
    return %c0_i32, %arg1 : i32, i32
  }
  func.func @transform_2(%arg0: i32, %arg1: i32) -> (i32, i32) {
    %c0_i32 = arith.constant 0 : i32
    %c0_i32_0 = arith.constant 0 : i32
    return %c0_i32, %arg1 : i32, i32
  }
  func.func @transform_3(%arg0: i32, %arg1: i32) -> (i32, i32) {
    %c0_i32 = arith.constant 0 : i32
    return %arg0, %arg1 : i32, i32
  }
}

module attributes {stable_mosaic.version = 11 : i64} {
  func.func @_wg_layer_kernel(%arg0: i32, %arg1: memref<138x32xf32, #tpu.memory_space<vmem>>, %arg2: memref<32x96xbf16, #tpu.memory_space<vmem>>, %arg3: memref<1x96xf32, #tpu.memory_space<vmem>>, %arg4: memref<32x32xbf16, #tpu.memory_space<vmem>>, %arg5: memref<1x32xf32, #tpu.memory_space<vmem>>, %arg6: memref<1x32xf32, #tpu.memory_space<vmem>>, %arg7: memref<1x32xf32, #tpu.memory_space<vmem>>, %arg8: memref<32x128xbf16, #tpu.memory_space<vmem>>, %arg9: memref<1x128xf32, #tpu.memory_space<vmem>>, %arg10: memref<128x32xbf16, #tpu.memory_space<vmem>>, %arg11: memref<1x32xf32, #tpu.memory_space<vmem>>, %arg12: memref<1x32xf32, #tpu.memory_space<vmem>>, %arg13: memref<1x32xf32, #tpu.memory_space<vmem>>, %arg14: memref<138x32xf32, #tpu.memory_space<vmem>>) attributes {dimension_semantics = [#tpu.dimension_semantics<arbitrary>], iteration_bounds = array<i64: 1>, scalar_prefetch = 0 : i64, scratch_operands = 0 : i64, tpu.core_type = #tpu.core_type<tc>, window_params = [{pipeline_mode = #tpu.pipeline_mode<synchronous>, transform_indices = @transform_0, window_bounds = array<i64: 138, 32>}, {pipeline_mode = #tpu.pipeline_mode<synchronous>, transform_indices = @transform_1, window_bounds = array<i64: 32, 96>}, {pipeline_mode = #tpu.pipeline_mode<synchronous>, transform_indices = @transform_2, window_bounds = array<i64: 1, 96>}, {pipeline_mode = #tpu.pipeline_mode<synchronous>, transform_indices = @transform_3, window_bounds = array<i64: 32, 32>}, {pipeline_mode = #tpu.pipeline_mode<synchronous>, transform_indices = @transform_4, window_bounds = array<i64: 1, 32>}, {pipeline_mode = #tpu.pipeline_mode<synchronous>, transform_indices = @transform_5, window_bounds = array<i64: 1, 32>}, {pipeline_mode = #tpu.pipeline_mode<synchronous>, transform_indices = @transform_6, window_bounds = array<i64: 1, 32>}, {pipeline_mode = #tpu.pipeline_mode<synchronous>, transform_indices = @transform_7, window_bounds = array<i64: 32, 128>}, {pipeline_mode = #tpu.pipeline_mode<synchronous>, transform_indices = @transform_8, window_bounds = array<i64: 1, 128>}, {pipeline_mode = #tpu.pipeline_mode<synchronous>, transform_indices = @transform_9, window_bounds = array<i64: 128, 32>}, {pipeline_mode = #tpu.pipeline_mode<synchronous>, transform_indices = @transform_10, window_bounds = array<i64: 1, 32>}, {pipeline_mode = #tpu.pipeline_mode<synchronous>, transform_indices = @transform_11, window_bounds = array<i64: 1, 32>}, {pipeline_mode = #tpu.pipeline_mode<synchronous>, transform_indices = @transform_12, window_bounds = array<i64: 1, 32>}, {pipeline_mode = #tpu.pipeline_mode<synchronous>, transform_indices = @transform_13, window_bounds = array<i64: 138, 32>}]} {
    %c0 = arith.constant 0 : index
    %c0_0 = arith.constant 0 : index
    %0 = vector.load %arg1[%c0, %c0_0] : memref<138x32xf32, #tpu.memory_space<vmem>>, vector<138x32xf32>
    %1 = arith.truncf %0 : vector<138x32xf32> to vector<138x32xbf16>
    %c0_1 = arith.constant 0 : index
    %c0_2 = arith.constant 0 : index
    %2 = vector.load %arg2[%c0_1, %c0_2] : memref<32x96xbf16, #tpu.memory_space<vmem>>, vector<32x96xbf16>
    %cst = arith.constant dense<0.000000e+00> : vector<138x96xf32>
    %3 = tpu.matmul %1, %2, %cst {dimension_numbers = #tpu.dot_dimension_numbers<[1], [0], [0], [1], [0, 0, 1, 1], [], []>} : vector<138x32xbf16>, vector<32x96xbf16>, vector<138x96xf32> -> vector<138x96xf32>
    %c0_3 = arith.constant 0 : index
    %c0_4 = arith.constant 0 : index
    %4 = vector.load %arg3[%c0_3, %c0_4] : memref<1x96xf32, #tpu.memory_space<vmem>>, vector<1x96xf32>
    %5 = vector.broadcast %4 : vector<1x96xf32> to vector<138x96xf32>
    %6 = arith.addf %3, %5 : vector<138x96xf32>
    %7 = vector.extract_strided_slice %6 {offsets = [0, 0], sizes = [138, 8], strides = [1, 1]} : vector<138x96xf32> to vector<138x8xf32>
    %8 = arith.truncf %7 : vector<138x8xf32> to vector<138x8xbf16>
    %9 = vector.extract_strided_slice %6 {offsets = [0, 32], sizes = [138, 8], strides = [1, 1]} : vector<138x96xf32> to vector<138x8xf32>
    %10 = arith.truncf %9 : vector<138x8xf32> to vector<138x8xbf16>
    %11 = vector.extract_strided_slice %6 {offsets = [0, 64], sizes = [138, 8], strides = [1, 1]} : vector<138x96xf32> to vector<138x8xf32>
    %12 = arith.truncf %11 : vector<138x8xf32> to vector<138x8xbf16>
    %cst_5 = arith.constant dense<0.000000e+00> : vector<138x138xf32>
    %13 = tpu.matmul %8, %10, %cst_5 {dimension_numbers = #tpu.dot_dimension_numbers<[1], [1], [0], [0], [0, 0, 1, 0], [], []>} : vector<138x8xbf16>, vector<138x8xbf16>, vector<138x138xf32> -> vector<138x138xf32>
    %cst_6 = arith.constant 0.353553385 : f32
    %14 = vector.broadcast %cst_6 : f32 to vector<138x138xf32>
    %15 = arith.mulf %13, %14 : vector<138x138xf32>
    %cst_7 = arith.constant dense<0xFF800000> : vector<138xf32>
    %16 = vector.multi_reduction <maximumf>, %15, %cst_7 [1] : vector<138x138xf32> to vector<138xf32>
    %17 = vector.shape_cast %16 : vector<138xf32> to vector<138x1xf32>
    %18 = vector.broadcast %17 : vector<138x1xf32> to vector<138x138xf32>
    %19 = arith.subf %15, %18 : vector<138x138xf32>
    %20 = math.exp %19 : vector<138x138xf32>
    %cst_8 = arith.constant dense<0.000000e+00> : vector<138xf32>
    %21 = vector.multi_reduction <add>, %20, %cst_8 [1] : vector<138x138xf32> to vector<138xf32>
    %22 = vector.shape_cast %21 : vector<138xf32> to vector<138x1xf32>
    %23 = tpu.reciprocal %22 {approx = true} : vector<138x1xf32> -> vector<138x1xf32>
    %24 = vector.broadcast %23 : vector<138x1xf32> to vector<138x138xf32>
    %25 = arith.mulf %20, %24 : vector<138x138xf32>
    %26 = arith.truncf %25 : vector<138x138xf32> to vector<138x138xbf16>
    %cst_9 = arith.constant dense<0.000000e+00> : vector<138x8xf32>
    %27 = tpu.matmul %26, %12, %cst_9 {dimension_numbers = #tpu.dot_dimension_numbers<[1], [0], [0], [1], [0, 0, 1, 1], [], []>} : vector<138x138xbf16>, vector<138x8xbf16>, vector<138x8xf32> -> vector<138x8xf32>
    %28 = arith.truncf %27 : vector<138x8xf32> to vector<138x8xbf16>
    %29 = vector.extract_strided_slice %6 {offsets = [0, 8], sizes = [138, 8], strides = [1, 1]} : vector<138x96xf32> to vector<138x8xf32>
    %30 = arith.truncf %29 : vector<138x8xf32> to vector<138x8xbf16>
    %31 = vector.extract_strided_slice %6 {offsets = [0, 40], sizes = [138, 8], strides = [1, 1]} : vector<138x96xf32> to vector<138x8xf32>
    %32 = arith.truncf %31 : vector<138x8xf32> to vector<138x8xbf16>
    %33 = vector.extract_strided_slice %6 {offsets = [0, 72], sizes = [138, 8], strides = [1, 1]} : vector<138x96xf32> to vector<138x8xf32>
    %34 = arith.truncf %33 : vector<138x8xf32> to vector<138x8xbf16>
    %cst_10 = arith.constant dense<0.000000e+00> : vector<138x138xf32>
    %35 = tpu.matmul %30, %32, %cst_10 {dimension_numbers = #tpu.dot_dimension_numbers<[1], [1], [0], [0], [0, 0, 1, 0], [], []>} : vector<138x8xbf16>, vector<138x8xbf16>, vector<138x138xf32> -> vector<138x138xf32>
    %cst_11 = arith.constant 0.353553385 : f32
    %36 = vector.broadcast %cst_11 : f32 to vector<138x138xf32>
    %37 = arith.mulf %35, %36 : vector<138x138xf32>
    %cst_12 = arith.constant dense<0xFF800000> : vector<138xf32>
    %38 = vector.multi_reduction <maximumf>, %37, %cst_12 [1] : vector<138x138xf32> to vector<138xf32>
    %39 = vector.shape_cast %38 : vector<138xf32> to vector<138x1xf32>
    %40 = vector.broadcast %39 : vector<138x1xf32> to vector<138x138xf32>
    %41 = arith.subf %37, %40 : vector<138x138xf32>
    %42 = math.exp %41 : vector<138x138xf32>
    %cst_13 = arith.constant dense<0.000000e+00> : vector<138xf32>
    %43 = vector.multi_reduction <add>, %42, %cst_13 [1] : vector<138x138xf32> to vector<138xf32>
    %44 = vector.shape_cast %43 : vector<138xf32> to vector<138x1xf32>
    %45 = tpu.reciprocal %44 {approx = true} : vector<138x1xf32> -> vector<138x1xf32>
    %46 = vector.broadcast %45 : vector<138x1xf32> to vector<138x138xf32>
    %47 = arith.mulf %42, %46 : vector<138x138xf32>
    %48 = arith.truncf %47 : vector<138x138xf32> to vector<138x138xbf16>
    %cst_14 = arith.constant dense<0.000000e+00> : vector<138x8xf32>
    %49 = tpu.matmul %48, %34, %cst_14 {dimension_numbers = #tpu.dot_dimension_numbers<[1], [0], [0], [1], [0, 0, 1, 1], [], []>} : vector<138x138xbf16>, vector<138x8xbf16>, vector<138x8xf32> -> vector<138x8xf32>
    %50 = arith.truncf %49 : vector<138x8xf32> to vector<138x8xbf16>
    %51 = vector.extract_strided_slice %6 {offsets = [0, 16], sizes = [138, 8], strides = [1, 1]} : vector<138x96xf32> to vector<138x8xf32>
    %52 = arith.truncf %51 : vector<138x8xf32> to vector<138x8xbf16>
    %53 = vector.extract_strided_slice %6 {offsets = [0, 48], sizes = [138, 8], strides = [1, 1]} : vector<138x96xf32> to vector<138x8xf32>
    %54 = arith.truncf %53 : vector<138x8xf32> to vector<138x8xbf16>
    %55 = vector.extract_strided_slice %6 {offsets = [0, 80], sizes = [138, 8], strides = [1, 1]} : vector<138x96xf32> to vector<138x8xf32>
    %56 = arith.truncf %55 : vector<138x8xf32> to vector<138x8xbf16>
    %cst_15 = arith.constant dense<0.000000e+00> : vector<138x138xf32>
    %57 = tpu.matmul %52, %54, %cst_15 {dimension_numbers = #tpu.dot_dimension_numbers<[1], [1], [0], [0], [0, 0, 1, 0], [], []>} : vector<138x8xbf16>, vector<138x8xbf16>, vector<138x138xf32> -> vector<138x138xf32>
    %cst_16 = arith.constant 0.353553385 : f32
    %58 = vector.broadcast %cst_16 : f32 to vector<138x138xf32>
    %59 = arith.mulf %57, %58 : vector<138x138xf32>
    %cst_17 = arith.constant dense<0xFF800000> : vector<138xf32>
    %60 = vector.multi_reduction <maximumf>, %59, %cst_17 [1] : vector<138x138xf32> to vector<138xf32>
    %61 = vector.shape_cast %60 : vector<138xf32> to vector<138x1xf32>
    %62 = vector.broadcast %61 : vector<138x1xf32> to vector<138x138xf32>
    %63 = arith.subf %59, %62 : vector<138x138xf32>
    %64 = math.exp %63 : vector<138x138xf32>
    %cst_18 = arith.constant dense<0.000000e+00> : vector<138xf32>
    %65 = vector.multi_reduction <add>, %64, %cst_18 [1] : vector<138x138xf32> to vector<138xf32>
    %66 = vector.shape_cast %65 : vector<138xf32> to vector<138x1xf32>
    %67 = tpu.reciprocal %66 {approx = true} : vector<138x1xf32> -> vector<138x1xf32>
    %68 = vector.broadcast %67 : vector<138x1xf32> to vector<138x138xf32>
    %69 = arith.mulf %64, %68 : vector<138x138xf32>
    %70 = arith.truncf %69 : vector<138x138xf32> to vector<138x138xbf16>
    %cst_19 = arith.constant dense<0.000000e+00> : vector<138x8xf32>
    %71 = tpu.matmul %70, %56, %cst_19 {dimension_numbers = #tpu.dot_dimension_numbers<[1], [0], [0], [1], [0, 0, 1, 1], [], []>} : vector<138x138xbf16>, vector<138x8xbf16>, vector<138x8xf32> -> vector<138x8xf32>
    %72 = arith.truncf %71 : vector<138x8xf32> to vector<138x8xbf16>
    %73 = vector.extract_strided_slice %6 {offsets = [0, 24], sizes = [138, 8], strides = [1, 1]} : vector<138x96xf32> to vector<138x8xf32>
    %74 = arith.truncf %73 : vector<138x8xf32> to vector<138x8xbf16>
    %75 = vector.extract_strided_slice %6 {offsets = [0, 56], sizes = [138, 8], strides = [1, 1]} : vector<138x96xf32> to vector<138x8xf32>
    %76 = arith.truncf %75 : vector<138x8xf32> to vector<138x8xbf16>
    %77 = vector.extract_strided_slice %6 {offsets = [0, 88], sizes = [138, 8], strides = [1, 1]} : vector<138x96xf32> to vector<138x8xf32>
    %78 = arith.truncf %77 : vector<138x8xf32> to vector<138x8xbf16>
    %cst_20 = arith.constant dense<0.000000e+00> : vector<138x138xf32>
    %79 = tpu.matmul %74, %76, %cst_20 {dimension_numbers = #tpu.dot_dimension_numbers<[1], [1], [0], [0], [0, 0, 1, 0], [], []>} : vector<138x8xbf16>, vector<138x8xbf16>, vector<138x138xf32> -> vector<138x138xf32>
    %cst_21 = arith.constant 0.353553385 : f32
    %80 = vector.broadcast %cst_21 : f32 to vector<138x138xf32>
    %81 = arith.mulf %79, %80 : vector<138x138xf32>
    %cst_22 = arith.constant dense<0xFF800000> : vector<138xf32>
    %82 = vector.multi_reduction <maximumf>, %81, %cst_22 [1] : vector<138x138xf32> to vector<138xf32>
    %83 = vector.shape_cast %82 : vector<138xf32> to vector<138x1xf32>
    %84 = vector.broadcast %83 : vector<138x1xf32> to vector<138x138xf32>
    %85 = arith.subf %81, %84 : vector<138x138xf32>
    %86 = math.exp %85 : vector<138x138xf32>
    %cst_23 = arith.constant dense<0.000000e+00> : vector<138xf32>
    %87 = vector.multi_reduction <add>, %86, %cst_23 [1] : vector<138x138xf32> to vector<138xf32>
    %88 = vector.shape_cast %87 : vector<138xf32> to vector<138x1xf32>
    %89 = tpu.reciprocal %88 {approx = true} : vector<138x1xf32> -> vector<138x1xf32>
    %90 = vector.broadcast %89 : vector<138x1xf32> to vector<138x138xf32>
    %91 = arith.mulf %86, %90 : vector<138x138xf32>
    %92 = arith.truncf %91 : vector<138x138xf32> to vector<138x138xbf16>
    %cst_24 = arith.constant dense<0.000000e+00> : vector<138x8xf32>
    %93 = tpu.matmul %92, %78, %cst_24 {dimension_numbers = #tpu.dot_dimension_numbers<[1], [0], [0], [1], [0, 0, 1, 1], [], []>} : vector<138x138xbf16>, vector<138x8xbf16>, vector<138x8xf32> -> vector<138x8xf32>
    %94 = arith.truncf %93 : vector<138x8xf32> to vector<138x8xbf16>
    %95 = tpu.concatenate %28, %50, %72, %94 in 1 : vector<138x8xbf16>, vector<138x8xbf16>, vector<138x8xbf16>, vector<138x8xbf16> -> vector<138x32xbf16>
    %c0_25 = arith.constant 0 : index
    %c0_26 = arith.constant 0 : index
    %96 = vector.load %arg4[%c0_25, %c0_26] : memref<32x32xbf16, #tpu.memory_space<vmem>>, vector<32x32xbf16>
    %cst_27 = arith.constant dense<0.000000e+00> : vector<138x32xf32>
    %97 = tpu.matmul %95, %96, %cst_27 {dimension_numbers = #tpu.dot_dimension_numbers<[1], [0], [0], [1], [0, 0, 1, 1], [], []>} : vector<138x32xbf16>, vector<32x32xbf16>, vector<138x32xf32> -> vector<138x32xf32>
    %c0_28 = arith.constant 0 : index
    %c0_29 = arith.constant 0 : index
    %98 = vector.load %arg5[%c0_28, %c0_29] : memref<1x32xf32, #tpu.memory_space<vmem>>, vector<1x32xf32>
    %99 = vector.broadcast %98 : vector<1x32xf32> to vector<138x32xf32>
    %100 = arith.addf %97, %99 : vector<138x32xf32>
    %101 = arith.addf %0, %100 : vector<138x32xf32>
    %c0_30 = arith.constant 0 : index
    %c0_31 = arith.constant 0 : index
    %102 = vector.load %arg6[%c0_30, %c0_31] : memref<1x32xf32, #tpu.memory_space<vmem>>, vector<1x32xf32>
    %c0_32 = arith.constant 0 : index
    %c0_33 = arith.constant 0 : index
    %103 = vector.load %arg7[%c0_32, %c0_33] : memref<1x32xf32, #tpu.memory_space<vmem>>, vector<1x32xf32>
    %cst_34 = arith.constant dense<0.000000e+00> : vector<138xf32>
    %104 = vector.multi_reduction <add>, %101, %cst_34 [1] : vector<138x32xf32> to vector<138xf32>
    %105 = vector.shape_cast %104 : vector<138xf32> to vector<138x1xf32>
    %cst_35 = arith.constant 3.200000e+01 : f32
    %106 = vector.broadcast %cst_35 : f32 to vector<138x1xf32>
    %107 = arith.divf %105, %106 : vector<138x1xf32>
    %108 = vector.broadcast %107 : vector<138x1xf32> to vector<138x32xf32>
    %109 = arith.subf %101, %108 : vector<138x32xf32>
    %110 = arith.mulf %109, %109 : vector<138x32xf32>
    %cst_36 = arith.constant dense<0.000000e+00> : vector<138xf32>
    %111 = vector.multi_reduction <add>, %110, %cst_36 [1] : vector<138x32xf32> to vector<138xf32>
    %112 = vector.shape_cast %111 : vector<138xf32> to vector<138x1xf32>
    %cst_37 = arith.constant 3.200000e+01 : f32
    %113 = vector.broadcast %cst_37 : f32 to vector<138x1xf32>
    %114 = arith.divf %112, %113 : vector<138x1xf32>
    %115 = vector.broadcast %107 : vector<138x1xf32> to vector<138x32xf32>
    %116 = arith.subf %101, %115 : vector<138x32xf32>
    %cst_38 = arith.constant 9.99999974E-6 : f32
    %117 = vector.broadcast %cst_38 : f32 to vector<138x1xf32>
    %118 = arith.addf %114, %117 : vector<138x1xf32>
    %119 = math.rsqrt %118 : vector<138x1xf32>
    %120 = vector.broadcast %119 : vector<138x1xf32> to vector<138x32xf32>
    %121 = arith.mulf %116, %120 : vector<138x32xf32>
    %122 = vector.broadcast %102 : vector<1x32xf32> to vector<138x32xf32>
    %123 = arith.mulf %121, %122 : vector<138x32xf32>
    %124 = vector.broadcast %103 : vector<1x32xf32> to vector<138x32xf32>
    %125 = arith.addf %123, %124 : vector<138x32xf32>
    %126 = arith.truncf %125 : vector<138x32xf32> to vector<138x32xbf16>
    %c0_39 = arith.constant 0 : index
    %c0_40 = arith.constant 0 : index
    %127 = vector.load %arg8[%c0_39, %c0_40] : memref<32x128xbf16, #tpu.memory_space<vmem>>, vector<32x128xbf16>
    %cst_41 = arith.constant dense<0.000000e+00> : vector<138x128xf32>
    %128 = tpu.matmul %126, %127, %cst_41 {dimension_numbers = #tpu.dot_dimension_numbers<[1], [0], [0], [1], [0, 0, 1, 1], [], []>} : vector<138x32xbf16>, vector<32x128xbf16>, vector<138x128xf32> -> vector<138x128xf32>
    %c0_42 = arith.constant 0 : index
    %c0_43 = arith.constant 0 : index
    %129 = vector.load %arg9[%c0_42, %c0_43] : memref<1x128xf32, #tpu.memory_space<vmem>>, vector<1x128xf32>
    %130 = vector.broadcast %129 : vector<1x128xf32> to vector<138x128xf32>
    %131 = arith.addf %128, %130 : vector<138x128xf32>
    %cst_44 = arith.constant 5.000000e-01 : f32
    %132 = vector.broadcast %cst_44 : f32 to vector<138x128xf32>
    %133 = arith.mulf %132, %131 : vector<138x128xf32>
    %cst_45 = arith.constant 0.707106769 : f32
    %134 = vector.broadcast %cst_45 : f32 to vector<138x128xf32>
    %135 = arith.mulf %131, %134 : vector<138x128xf32>
    %136 = math.erf %135 : vector<138x128xf32>
    %cst_46 = arith.constant 1.000000e+00 : f32
    %137 = vector.broadcast %cst_46 : f32 to vector<138x128xf32>
    %138 = arith.addf %137, %136 : vector<138x128xf32>
    %139 = arith.mulf %133, %138 : vector<138x128xf32>
    %140 = arith.truncf %139 : vector<138x128xf32> to vector<138x128xbf16>
    %c0_47 = arith.constant 0 : index
    %c0_48 = arith.constant 0 : index
    %141 = vector.load %arg10[%c0_47, %c0_48] : memref<128x32xbf16, #tpu.memory_space<vmem>>, vector<128x32xbf16>
    %cst_49 = arith.constant dense<0.000000e+00> : vector<138x32xf32>
    %142 = tpu.matmul %140, %141, %cst_49 {dimension_numbers = #tpu.dot_dimension_numbers<[1], [0], [0], [1], [0, 0, 1, 1], [], []>} : vector<138x128xbf16>, vector<128x32xbf16>, vector<138x32xf32> -> vector<138x32xf32>
    %c0_50 = arith.constant 0 : index
    %c0_51 = arith.constant 0 : index
    %143 = vector.load %arg11[%c0_50, %c0_51] : memref<1x32xf32, #tpu.memory_space<vmem>>, vector<1x32xf32>
    %144 = vector.broadcast %143 : vector<1x32xf32> to vector<138x32xf32>
    %145 = arith.addf %142, %144 : vector<138x32xf32>
    %146 = arith.addf %125, %145 : vector<138x32xf32>
    %c0_52 = arith.constant 0 : index
    %c0_53 = arith.constant 0 : index
    %147 = vector.load %arg12[%c0_52, %c0_53] : memref<1x32xf32, #tpu.memory_space<vmem>>, vector<1x32xf32>
    %c0_54 = arith.constant 0 : index
    %c0_55 = arith.constant 0 : index
    %148 = vector.load %arg13[%c0_54, %c0_55] : memref<1x32xf32, #tpu.memory_space<vmem>>, vector<1x32xf32>
    %cst_56 = arith.constant dense<0.000000e+00> : vector<138xf32>
    %149 = vector.multi_reduction <add>, %146, %cst_56 [1] : vector<138x32xf32> to vector<138xf32>
    %150 = vector.shape_cast %149 : vector<138xf32> to vector<138x1xf32>
    %cst_57 = arith.constant 3.200000e+01 : f32
    %151 = vector.broadcast %cst_57 : f32 to vector<138x1xf32>
    %152 = arith.divf %150, %151 : vector<138x1xf32>
    %153 = vector.broadcast %152 : vector<138x1xf32> to vector<138x32xf32>
    %154 = arith.subf %146, %153 : vector<138x32xf32>
    %155 = arith.mulf %154, %154 : vector<138x32xf32>
    %cst_58 = arith.constant dense<0.000000e+00> : vector<138xf32>
    %156 = vector.multi_reduction <add>, %155, %cst_58 [1] : vector<138x32xf32> to vector<138xf32>
    %157 = vector.shape_cast %156 : vector<138xf32> to vector<138x1xf32>
    %cst_59 = arith.constant 3.200000e+01 : f32
    %158 = vector.broadcast %cst_59 : f32 to vector<138x1xf32>
    %159 = arith.divf %157, %158 : vector<138x1xf32>
    %160 = vector.broadcast %152 : vector<138x1xf32> to vector<138x32xf32>
    %161 = arith.subf %146, %160 : vector<138x32xf32>
    %cst_60 = arith.constant 9.99999974E-6 : f32
    %162 = vector.broadcast %cst_60 : f32 to vector<138x1xf32>
    %163 = arith.addf %159, %162 : vector<138x1xf32>
    %164 = math.rsqrt %163 : vector<138x1xf32>
    %165 = vector.broadcast %164 : vector<138x1xf32> to vector<138x32xf32>
    %166 = arith.mulf %161, %165 : vector<138x32xf32>
    %167 = vector.broadcast %147 : vector<1x32xf32> to vector<138x32xf32>
    %168 = arith.mulf %166, %167 : vector<138x32xf32>
    %169 = vector.broadcast %148 : vector<1x32xf32> to vector<138x32xf32>
    %170 = arith.addf %168, %169 : vector<138x32xf32>
    %c0_61 = arith.constant 0 : index
    %c0_62 = arith.constant 0 : index
    %171 = vector.load %arg14[%c0_61, %c0_62] : memref<138x32xf32, #tpu.memory_space<vmem>>, vector<138x32xf32>
    tpu.vector_store %arg14[%c0_61, %c0_62], %170 {strides = array<i32>} : memref<138x32xf32, #tpu.memory_space<vmem>>, vector<138x32xf32>,
    return
  }
  func.func @transform_0(%arg0: i32) -> (i32, i32) {
    %c0_i32 = arith.constant 0 : i32
    %c0_i32_0 = arith.constant 0 : i32
    %c0_i32_1 = arith.constant 0 : i32
    return %c0_i32, %c0_i32_0 : i32, i32
  }
  func.func @transform_1(%arg0: i32) -> (i32, i32) {
    %c0_i32 = arith.constant 0 : i32
    %c0_i32_0 = arith.constant 0 : i32
    %c0_i32_1 = arith.constant 0 : i32
    return %c0_i32, %c0_i32_0 : i32, i32
  }
  func.func @transform_2(%arg0: i32) -> (i32, i32) {
    %c0_i32 = arith.constant 0 : i32
    %c0_i32_0 = arith.constant 0 : i32
    %c0_i32_1 = arith.constant 0 : i32
    return %c0_i32, %c0_i32_0 : i32, i32
  }
  func.func @transform_3(%arg0: i32) -> (i32, i32) {
    %c0_i32 = arith.constant 0 : i32
    %c0_i32_0 = arith.constant 0 : i32
    %c0_i32_1 = arith.constant 0 : i32
    return %c0_i32, %c0_i32_0 : i32, i32
  }
  func.func @transform_4(%arg0: i32) -> (i32, i32) {
    %c0_i32 = arith.constant 0 : i32
    %c0_i32_0 = arith.constant 0 : i32
    %c0_i32_1 = arith.constant 0 : i32
    return %c0_i32, %c0_i32_0 : i32, i32
  }
  func.func @transform_5(%arg0: i32) -> (i32, i32) {
    %c0_i32 = arith.constant 0 : i32
    %c0_i32_0 = arith.constant 0 : i32
    %c0_i32_1 = arith.constant 0 : i32
    return %c0_i32, %c0_i32_0 : i32, i32
  }
  func.func @transform_6(%arg0: i32) -> (i32, i32) {
    %c0_i32 = arith.constant 0 : i32
    %c0_i32_0 = arith.constant 0 : i32
    %c0_i32_1 = arith.constant 0 : i32
    return %c0_i32, %c0_i32_0 : i32, i32
  }
  func.func @transform_7(%arg0: i32) -> (i32, i32) {
    %c0_i32 = arith.constant 0 : i32
    %c0_i32_0 = arith.constant 0 : i32
    %c0_i32_1 = arith.constant 0 : i32
    return %c0_i32, %c0_i32_0 : i32, i32
  }
  func.func @transform_8(%arg0: i32) -> (i32, i32) {
    %c0_i32 = arith.constant 0 : i32
    %c0_i32_0 = arith.constant 0 : i32
    %c0_i32_1 = arith.constant 0 : i32
    return %c0_i32, %c0_i32_0 : i32, i32
  }
  func.func @transform_9(%arg0: i32) -> (i32, i32) {
    %c0_i32 = arith.constant 0 : i32
    %c0_i32_0 = arith.constant 0 : i32
    %c0_i32_1 = arith.constant 0 : i32
    return %c0_i32, %c0_i32_0 : i32, i32
  }
  func.func @transform_10(%arg0: i32) -> (i32, i32) {
    %c0_i32 = arith.constant 0 : i32
    %c0_i32_0 = arith.constant 0 : i32
    %c0_i32_1 = arith.constant 0 : i32
    return %c0_i32, %c0_i32_0 : i32, i32
  }
  func.func @transform_11(%arg0: i32) -> (i32, i32) {
    %c0_i32 = arith.constant 0 : i32
    %c0_i32_0 = arith.constant 0 : i32
    %c0_i32_1 = arith.constant 0 : i32
    return %c0_i32, %c0_i32_0 : i32, i32
  }
  func.func @transform_12(%arg0: i32) -> (i32, i32) {
    %c0_i32 = arith.constant 0 : i32
    %c0_i32_0 = arith.constant 0 : i32
    %c0_i32_1 = arith.constant 0 : i32
    return %c0_i32, %c0_i32_0 : i32, i32
  }
  func.func @transform_13(%arg0: i32) -> (i32, i32) {
    %c0_i32 = arith.constant 0 : i32
    %c0_i32_0 = arith.constant 0 : i32
    %c0_i32_1 = arith.constant 0 : i32
    return %c0_i32, %c0_i32_0 : i32, i32
  }
}

module attributes {stable_mosaic.version = 11 : i64} {
  func.func @_linear_kernel(%arg0: i32, %arg1: i32, %arg2: memref<1x32xbf16, #tpu.memory_space<vmem>>, %arg3: memref<32x64xbf16, #tpu.memory_space<vmem>>, %arg4: memref<1x64xf32, #tpu.memory_space<vmem>>, %arg5: memref<1x64xf32, #tpu.memory_space<vmem>>) attributes {dimension_semantics = [#tpu.dimension_semantics<parallel>, #tpu.dimension_semantics<parallel>], iteration_bounds = array<i64: 1, 1>, scalar_prefetch = 0 : i64, scratch_operands = 0 : i64, tpu.core_type = #tpu.core_type<tc>, window_params = [{transform_indices = @transform_0, window_bounds = array<i64: 1, 32>}, {transform_indices = @transform_1, window_bounds = array<i64: 32, 64>}, {transform_indices = @transform_2, window_bounds = array<i64: 1, 64>}, {transform_indices = @transform_3, window_bounds = array<i64: 1, 64>}]} {
    %c0 = arith.constant 0 : index
    %c0_0 = arith.constant 0 : index
    %0 = vector.load %arg2[%c0, %c0_0] : memref<1x32xbf16, #tpu.memory_space<vmem>>, vector<1x32xbf16>
    %c0_1 = arith.constant 0 : index
    %c0_2 = arith.constant 0 : index
    %1 = vector.load %arg3[%c0_1, %c0_2] : memref<32x64xbf16, #tpu.memory_space<vmem>>, vector<32x64xbf16>
    %cst = arith.constant dense<0.000000e+00> : vector<1x64xf32>
    %2 = tpu.matmul %0, %1, %cst {dimension_numbers = #tpu.dot_dimension_numbers<[1], [0], [0], [1], [0, 0, 1, 1], [], []>} : vector<1x32xbf16>, vector<32x64xbf16>, vector<1x64xf32> -> vector<1x64xf32>
    %c0_3 = arith.constant 0 : index
    %c0_4 = arith.constant 0 : index
    %3 = vector.load %arg4[%c0_3, %c0_4] : memref<1x64xf32, #tpu.memory_space<vmem>>, vector<1x64xf32>
    %4 = arith.addf %2, %3 : vector<1x64xf32>
    %c0_5 = arith.constant 0 : index
    %c0_6 = arith.constant 0 : index
    %5 = vector.load %arg5[%c0_5, %c0_6] : memref<1x64xf32, #tpu.memory_space<vmem>>, vector<1x64xf32>
    tpu.vector_store %arg5[%c0_5, %c0_6], %4 {strides = array<i32>} : memref<1x64xf32, #tpu.memory_space<vmem>>, vector<1x64xf32>,
    return
  }
  func.func @transform_0(%arg0: i32, %arg1: i32) -> (i32, i32) {
    %c0_i32 = arith.constant 0 : i32
    %c0_i32_0 = arith.constant 0 : i32
    return %arg0, %c0_i32 : i32, i32
  }
  func.func @transform_1(%arg0: i32, %arg1: i32) -> (i32, i32) {
    %c0_i32 = arith.constant 0 : i32
    %c0_i32_0 = arith.constant 0 : i32
    return %c0_i32, %arg1 : i32, i32
  }
  func.func @transform_2(%arg0: i32, %arg1: i32) -> (i32, i32) {
    %c0_i32 = arith.constant 0 : i32
    %c0_i32_0 = arith.constant 0 : i32
    return %c0_i32, %arg1 : i32, i32
  }
  func.func @transform_3(%arg0: i32, %arg1: i32) -> (i32, i32) {
    %c0_i32 = arith.constant 0 : i32
    return %arg0, %arg1 : i32, i32
  }
}

module attributes {stable_mosaic.version = 11 : i64} {
  func.func @_resize_kernel(%arg0: i32, %arg1: memref<6x12x12xf32, #tpu.memory_space<vmem>>, %arg2: memref<12x16xf32, #tpu.memory_space<vmem>>, %arg3: memref<16x12xf32, #tpu.memory_space<vmem>>, %arg4: memref<6x16x16xf32, #tpu.memory_space<vmem>>) attributes {dimension_semantics = [#tpu.dimension_semantics<parallel>], iteration_bounds = array<i64: 3>, scalar_prefetch = 0 : i64, scratch_operands = 0 : i64, tpu.core_type = #tpu.core_type<tc>, window_params = [{transform_indices = @transform_0, window_bounds = array<i64: 6, 12, 12>}, {pipeline_mode = #tpu.pipeline_mode<synchronous>, transform_indices = @transform_1, window_bounds = array<i64: 12, 16>}, {pipeline_mode = #tpu.pipeline_mode<synchronous>, transform_indices = @transform_2, window_bounds = array<i64: 16, 12>}, {transform_indices = @transform_3, window_bounds = array<i64: 6, 16, 16>}]} {
    %c0 = arith.constant 0 : index
    %c0_0 = arith.constant 0 : index
    %0 = vector.load %arg2[%c0, %c0_0] : memref<12x16xf32, #tpu.memory_space<vmem>>, vector<12x16xf32>
    %c0_1 = arith.constant 0 : index
    %c0_2 = arith.constant 0 : index
    %1 = vector.load %arg3[%c0_1, %c0_2] : memref<16x12xf32, #tpu.memory_space<vmem>>, vector<16x12xf32>
    %c0_3 = arith.constant 0 : index
    %c0_4 = arith.constant 0 : index
    %c0_5 = arith.constant 0 : index
    %2 = vector.load %arg1[%c0_3, %c0_4, %c0_5] : memref<6x12x12xf32, #tpu.memory_space<vmem>>, vector<1x12x12xf32>
    %3 = vector.shape_cast %2 : vector<1x12x12xf32> to vector<12x12xf32>
    %cst = arith.constant dense<0.000000e+00> : vector<12x16xf32>
    %4 = tpu.matmul %3, %0, %cst {dimension_numbers = #tpu.dot_dimension_numbers<[1], [0], [0], [1], [0, 0, 1, 1], [], []>} : vector<12x12xf32>, vector<12x16xf32>, vector<12x16xf32> -> vector<12x16xf32>
    %cst_6 = arith.constant dense<0.000000e+00> : vector<16x16xf32>
    %5 = tpu.matmul %1, %4, %cst_6 {dimension_numbers = #tpu.dot_dimension_numbers<[1], [0], [0], [1], [0, 0, 1, 1], [], []>} : vector<16x12xf32>, vector<12x16xf32>, vector<16x16xf32> -> vector<16x16xf32>
    %c0_7 = arith.constant 0 : index
    %c0_8 = arith.constant 0 : index
    %c0_9 = arith.constant 0 : index
    %6 = vector.load %arg4[%c0_7, %c0_8, %c0_9] : memref<6x16x16xf32, #tpu.memory_space<vmem>>, vector<1x16x16xf32>
    %7 = vector.shape_cast %6 : vector<1x16x16xf32> to vector<16x16xf32>
    %8 = vector.shape_cast %5 : vector<16x16xf32> to vector<1x16x16xf32>
    tpu.vector_store %arg4[%c0_7, %c0_8, %c0_9], %8 {strides = array<i32>} : memref<6x16x16xf32, #tpu.memory_space<vmem>>, vector<1x16x16xf32>,
    %c1 = arith.constant 1 : index
    %c0_10 = arith.constant 0 : index
    %c0_11 = arith.constant 0 : index
    %9 = vector.load %arg1[%c1, %c0_10, %c0_11] : memref<6x12x12xf32, #tpu.memory_space<vmem>>, vector<1x12x12xf32>
    %10 = vector.shape_cast %9 : vector<1x12x12xf32> to vector<12x12xf32>
    %cst_12 = arith.constant dense<0.000000e+00> : vector<12x16xf32>
    %11 = tpu.matmul %10, %0, %cst_12 {dimension_numbers = #tpu.dot_dimension_numbers<[1], [0], [0], [1], [0, 0, 1, 1], [], []>} : vector<12x12xf32>, vector<12x16xf32>, vector<12x16xf32> -> vector<12x16xf32>
    %cst_13 = arith.constant dense<0.000000e+00> : vector<16x16xf32>
    %12 = tpu.matmul %1, %11, %cst_13 {dimension_numbers = #tpu.dot_dimension_numbers<[1], [0], [0], [1], [0, 0, 1, 1], [], []>} : vector<16x12xf32>, vector<12x16xf32>, vector<16x16xf32> -> vector<16x16xf32>
    %c1_14 = arith.constant 1 : index
    %c0_15 = arith.constant 0 : index
    %c0_16 = arith.constant 0 : index
    %13 = vector.load %arg4[%c1_14, %c0_15, %c0_16] : memref<6x16x16xf32, #tpu.memory_space<vmem>>, vector<1x16x16xf32>
    %14 = vector.shape_cast %13 : vector<1x16x16xf32> to vector<16x16xf32>
    %15 = vector.shape_cast %12 : vector<16x16xf32> to vector<1x16x16xf32>
    tpu.vector_store %arg4[%c1_14, %c0_15, %c0_16], %15 {strides = array<i32>} : memref<6x16x16xf32, #tpu.memory_space<vmem>>, vector<1x16x16xf32>,
    %c2 = arith.constant 2 : index
    %c0_17 = arith.constant 0 : index
    %c0_18 = arith.constant 0 : index
    %16 = vector.load %arg1[%c2, %c0_17, %c0_18] : memref<6x12x12xf32, #tpu.memory_space<vmem>>, vector<1x12x12xf32>
    %17 = vector.shape_cast %16 : vector<1x12x12xf32> to vector<12x12xf32>
    %cst_19 = arith.constant dense<0.000000e+00> : vector<12x16xf32>
    %18 = tpu.matmul %17, %0, %cst_19 {dimension_numbers = #tpu.dot_dimension_numbers<[1], [0], [0], [1], [0, 0, 1, 1], [], []>} : vector<12x12xf32>, vector<12x16xf32>, vector<12x16xf32> -> vector<12x16xf32>
    %cst_20 = arith.constant dense<0.000000e+00> : vector<16x16xf32>
    %19 = tpu.matmul %1, %18, %cst_20 {dimension_numbers = #tpu.dot_dimension_numbers<[1], [0], [0], [1], [0, 0, 1, 1], [], []>} : vector<16x12xf32>, vector<12x16xf32>, vector<16x16xf32> -> vector<16x16xf32>
    %c2_21 = arith.constant 2 : index
    %c0_22 = arith.constant 0 : index
    %c0_23 = arith.constant 0 : index
    %20 = vector.load %arg4[%c2_21, %c0_22, %c0_23] : memref<6x16x16xf32, #tpu.memory_space<vmem>>, vector<1x16x16xf32>
    %21 = vector.shape_cast %20 : vector<1x16x16xf32> to vector<16x16xf32>
    %22 = vector.shape_cast %19 : vector<16x16xf32> to vector<1x16x16xf32>
    tpu.vector_store %arg4[%c2_21, %c0_22, %c0_23], %22 {strides = array<i32>} : memref<6x16x16xf32, #tpu.memory_space<vmem>>, vector<1x16x16xf32>,
    %c3 = arith.constant 3 : index
    %c0_24 = arith.constant 0 : index
    %c0_25 = arith.constant 0 : index
    %23 = vector.load %arg1[%c3, %c0_24, %c0_25] : memref<6x12x12xf32, #tpu.memory_space<vmem>>, vector<1x12x12xf32>
    %24 = vector.shape_cast %23 : vector<1x12x12xf32> to vector<12x12xf32>
    %cst_26 = arith.constant dense<0.000000e+00> : vector<12x16xf32>
    %25 = tpu.matmul %24, %0, %cst_26 {dimension_numbers = #tpu.dot_dimension_numbers<[1], [0], [0], [1], [0, 0, 1, 1], [], []>} : vector<12x12xf32>, vector<12x16xf32>, vector<12x16xf32> -> vector<12x16xf32>
    %cst_27 = arith.constant dense<0.000000e+00> : vector<16x16xf32>
    %26 = tpu.matmul %1, %25, %cst_27 {dimension_numbers = #tpu.dot_dimension_numbers<[1], [0], [0], [1], [0, 0, 1, 1], [], []>} : vector<16x12xf32>, vector<12x16xf32>, vector<16x16xf32> -> vector<16x16xf32>
    %c3_28 = arith.constant 3 : index
    %c0_29 = arith.constant 0 : index
    %c0_30 = arith.constant 0 : index
    %27 = vector.load %arg4[%c3_28, %c0_29, %c0_30] : memref<6x16x16xf32, #tpu.memory_space<vmem>>, vector<1x16x16xf32>
    %28 = vector.shape_cast %27 : vector<1x16x16xf32> to vector<16x16xf32>
    %29 = vector.shape_cast %26 : vector<16x16xf32> to vector<1x16x16xf32>
    tpu.vector_store %arg4[%c3_28, %c0_29, %c0_30], %29 {strides = array<i32>} : memref<6x16x16xf32, #tpu.memory_space<vmem>>, vector<1x16x16xf32>,
    %c4 = arith.constant 4 : index
    %c0_31 = arith.constant 0 : index
    %c0_32 = arith.constant 0 : index
    %30 = vector.load %arg1[%c4, %c0_31, %c0_32] : memref<6x12x12xf32, #tpu.memory_space<vmem>>, vector<1x12x12xf32>
    %31 = vector.shape_cast %30 : vector<1x12x12xf32> to vector<12x12xf32>
    %cst_33 = arith.constant dense<0.000000e+00> : vector<12x16xf32>
    %32 = tpu.matmul %31, %0, %cst_33 {dimension_numbers = #tpu.dot_dimension_numbers<[1], [0], [0], [1], [0, 0, 1, 1], [], []>} : vector<12x12xf32>, vector<12x16xf32>, vector<12x16xf32> -> vector<12x16xf32>
    %cst_34 = arith.constant dense<0.000000e+00> : vector<16x16xf32>
    %33 = tpu.matmul %1, %32, %cst_34 {dimension_numbers = #tpu.dot_dimension_numbers<[1], [0], [0], [1], [0, 0, 1, 1], [], []>} : vector<16x12xf32>, vector<12x16xf32>, vector<16x16xf32> -> vector<16x16xf32>
    %c4_35 = arith.constant 4 : index
    %c0_36 = arith.constant 0 : index
    %c0_37 = arith.constant 0 : index
    %34 = vector.load %arg4[%c4_35, %c0_36, %c0_37] : memref<6x16x16xf32, #tpu.memory_space<vmem>>, vector<1x16x16xf32>
    %35 = vector.shape_cast %34 : vector<1x16x16xf32> to vector<16x16xf32>
    %36 = vector.shape_cast %33 : vector<16x16xf32> to vector<1x16x16xf32>
    tpu.vector_store %arg4[%c4_35, %c0_36, %c0_37], %36 {strides = array<i32>} : memref<6x16x16xf32, #tpu.memory_space<vmem>>, vector<1x16x16xf32>,
    %c5 = arith.constant 5 : index
    %c0_38 = arith.constant 0 : index
    %c0_39 = arith.constant 0 : index
    %37 = vector.load %arg1[%c5, %c0_38, %c0_39] : memref<6x12x12xf32, #tpu.memory_space<vmem>>, vector<1x12x12xf32>
    %38 = vector.shape_cast %37 : vector<1x12x12xf32> to vector<12x12xf32>
    %cst_40 = arith.constant dense<0.000000e+00> : vector<12x16xf32>
    %39 = tpu.matmul %38, %0, %cst_40 {dimension_numbers = #tpu.dot_dimension_numbers<[1], [0], [0], [1], [0, 0, 1, 1], [], []>} : vector<12x12xf32>, vector<12x16xf32>, vector<12x16xf32> -> vector<12x16xf32>
    %cst_41 = arith.constant dense<0.000000e+00> : vector<16x16xf32>
    %40 = tpu.matmul %1, %39, %cst_41 {dimension_numbers = #tpu.dot_dimension_numbers<[1], [0], [0], [1], [0, 0, 1, 1], [], []>} : vector<16x12xf32>, vector<12x16xf32>, vector<16x16xf32> -> vector<16x16xf32>
    %c5_42 = arith.constant 5 : index
    %c0_43 = arith.constant 0 : index
    %c0_44 = arith.constant 0 : index
    %41 = vector.load %arg4[%c5_42, %c0_43, %c0_44] : memref<6x16x16xf32, #tpu.memory_space<vmem>>, vector<1x16x16xf32>
    %42 = vector.shape_cast %41 : vector<1x16x16xf32> to vector<16x16xf32>
    %43 = vector.shape_cast %40 : vector<16x16xf32> to vector<1x16x16xf32>
    tpu.vector_store %arg4[%c5_42, %c0_43, %c0_44], %43 {strides = array<i32>} : memref<6x16x16xf32, #tpu.memory_space<vmem>>, vector<1x16x16xf32>,
    return
  }
  func.func @transform_0(%arg0: i32) -> (i32, i32, i32) {
    %c0_i32 = arith.constant 0 : i32
    %c0_i32_0 = arith.constant 0 : i32
    %c0_i32_1 = arith.constant 0 : i32
    return %arg0, %c0_i32, %c0_i32_0 : i32, i32, i32
  }
  func.func @transform_1(%arg0: i32) -> (i32, i32) {
    %c0_i32 = arith.constant 0 : i32
    %c0_i32_0 = arith.constant 0 : i32
    %c0_i32_1 = arith.constant 0 : i32
    return %c0_i32, %c0_i32_0 : i32, i32
  }
  func.func @transform_2(%arg0: i32) -> (i32, i32) {
    %c0_i32 = arith.constant 0 : i32
    %c0_i32_0 = arith.constant 0 : i32
    %c0_i32_1 = arith.constant 0 : i32
    return %c0_i32, %c0_i32_0 : i32, i32
  }
  func.func @transform_3(%arg0: i32) -> (i32, i32, i32) {
    %c0_i32 = arith.constant 0 : i32
    %c0_i32_0 = arith.constant 0 : i32
    %c0_i32_1 = arith.constant 0 : i32
    return %arg0, %c0_i32, %c0_i32_0 : i32, i32, i32
  }
}

module attributes {stable_mosaic.version = 11 : i64} {
  func.func @_linear_kernel(%arg0: i32, %arg1: i32, %arg2: memref<8x576xbf16, #tpu.memory_space<vmem>>, %arg3: memref<576x64xbf16, #tpu.memory_space<vmem>>, %arg4: memref<1x64xf32, #tpu.memory_space<vmem>>, %arg5: memref<8x64xf32, #tpu.memory_space<vmem>>) attributes {dimension_semantics = [#tpu.dimension_semantics<parallel>, #tpu.dimension_semantics<parallel>], iteration_bounds = array<i64: 1, 1>, scalar_prefetch = 0 : i64, scratch_operands = 0 : i64, tpu.core_type = #tpu.core_type<tc>, window_params = [{transform_indices = @transform_0, window_bounds = array<i64: 8, 576>}, {transform_indices = @transform_1, window_bounds = array<i64: 576, 64>}, {transform_indices = @transform_2, window_bounds = array<i64: 1, 64>}, {transform_indices = @transform_3, window_bounds = array<i64: 8, 64>}]} {
    %c0 = arith.constant 0 : index
    %c0_0 = arith.constant 0 : index
    %0 = vector.load %arg2[%c0, %c0_0] : memref<8x576xbf16, #tpu.memory_space<vmem>>, vector<8x576xbf16>
    %c0_1 = arith.constant 0 : index
    %c0_2 = arith.constant 0 : index
    %1 = vector.load %arg3[%c0_1, %c0_2] : memref<576x64xbf16, #tpu.memory_space<vmem>>, vector<576x64xbf16>
    %cst = arith.constant dense<0.000000e+00> : vector<8x64xf32>
    %2 = tpu.matmul %0, %1, %cst {dimension_numbers = #tpu.dot_dimension_numbers<[1], [0], [0], [1], [0, 0, 1, 1], [], []>} : vector<8x576xbf16>, vector<576x64xbf16>, vector<8x64xf32> -> vector<8x64xf32>
    %c0_3 = arith.constant 0 : index
    %c0_4 = arith.constant 0 : index
    %3 = vector.load %arg4[%c0_3, %c0_4] : memref<1x64xf32, #tpu.memory_space<vmem>>, vector<1x64xf32>
    %4 = vector.broadcast %3 : vector<1x64xf32> to vector<8x64xf32>
    %5 = arith.addf %2, %4 : vector<8x64xf32>
    %c0_5 = arith.constant 0 : index
    %c0_6 = arith.constant 0 : index
    %6 = vector.load %arg5[%c0_5, %c0_6] : memref<8x64xf32, #tpu.memory_space<vmem>>, vector<8x64xf32>
    tpu.vector_store %arg5[%c0_5, %c0_6], %5 {strides = array<i32>} : memref<8x64xf32, #tpu.memory_space<vmem>>, vector<8x64xf32>,
    return
  }
  func.func @transform_0(%arg0: i32, %arg1: i32) -> (i32, i32) {
    %c0_i32 = arith.constant 0 : i32
    %c0_i32_0 = arith.constant 0 : i32
    return %arg0, %c0_i32 : i32, i32
  }
  func.func @transform_1(%arg0: i32, %arg1: i32) -> (i32, i32) {
    %c0_i32 = arith.constant 0 : i32
    %c0_i32_0 = arith.constant 0 : i32
    return %c0_i32, %arg1 : i32, i32
  }
  func.func @transform_2(%arg0: i32, %arg1: i32) -> (i32, i32) {
    %c0_i32 = arith.constant 0 : i32
    %c0_i32_0 = arith.constant 0 : i32
    return %c0_i32, %arg1 : i32, i32
  }
  func.func @transform_3(%arg0: i32, %arg1: i32) -> (i32, i32) {
    %c0_i32 = arith.constant 0 : i32
    return %arg0, %arg1 : i32, i32
  }
}

module attributes {stable_mosaic.version = 11 : i64} {
  func.func @_vit_stack_kernel(%arg0: i32, %arg1: i32, %arg2: memref<2x5x64xf32, #tpu.memory_space<vmem>>, %arg3: memref<1x5x64xf32, #tpu.memory_space<vmem>>, %arg4: memref<1x1x64xf32, #tpu.memory_space<vmem>>, %arg5: memref<1x1x64xf32, #tpu.memory_space<vmem>>, %arg6: memref<1x64x192xbf16, #tpu.memory_space<vmem>>, %arg7: memref<1x1x192xf32, #tpu.memory_space<vmem>>, %arg8: memref<1x64x64xbf16, #tpu.memory_space<vmem>>, %arg9: memref<1x1x64xf32, #tpu.memory_space<vmem>>, %arg10: memref<1x1x64xf32, #tpu.memory_space<vmem>>, %arg11: memref<1x1x64xf32, #tpu.memory_space<vmem>>, %arg12: memref<1x64x256xbf16, #tpu.memory_space<vmem>>, %arg13: memref<1x1x256xf32, #tpu.memory_space<vmem>>, %arg14: memref<1x256x64xbf16, #tpu.memory_space<vmem>>, %arg15: memref<1x1x64xf32, #tpu.memory_space<vmem>>, %arg16: memref<2x1x64xf32, #tpu.memory_space<vmem>>, %arg17: memref<2x5x64xf32, #tpu.memory_space<vmem>>) attributes {dimension_semantics = [#tpu.dimension_semantics<parallel>, #tpu.dimension_semantics<arbitrary>], iteration_bounds = array<i64: 1, 2>, scalar_prefetch = 0 : i64, scratch_operands = 1 : i64, tpu.core_type = #tpu.core_type<tc>, window_params = [{transform_indices = @transform_0, window_bounds = array<i64: 2, 5, 64>}, {pipeline_mode = #tpu.pipeline_mode<synchronous>, transform_indices = @transform_1, window_bounds = array<i64: 1, 5, 64>}, {transform_indices = @transform_2, window_bounds = array<i64: 1, 1, 64>}, {transform_indices = @transform_3, window_bounds = array<i64: 1, 1, 64>}, {transform_indices = @transform_4, window_bounds = array<i64: 1, 64, 192>}, {transform_indices = @transform_5, window_bounds = array<i64: 1, 1, 192>}, {transform_indices = @transform_6, window_bounds = array<i64: 1, 64, 64>}, {transform_indices = @transform_7, window_bounds = array<i64: 1, 1, 64>}, {transform_indices = @transform_8, window_bounds = array<i64: 1, 1, 64>}, {transform_indices = @transform_9, window_bounds = array<i64: 1, 1, 64>}, {transform_indices = @transform_10, window_bounds = array<i64: 1, 64, 256>}, {transform_indices = @transform_11, window_bounds = array<i64: 1, 1, 256>}, {transform_indices = @transform_12, window_bounds = array<i64: 1, 256, 64>}, {transform_indices = @transform_13, window_bounds = array<i64: 1, 1, 64>}, {transform_indices = @transform_14, window_bounds = array<i64: 2, 1, 64>}]} {
    %c0_i32 = arith.constant 0 : i32
    %0 = arith.cmpi eq, %arg1, %c0_i32 : i32
    %1 = arith.extui %0 : i1 to i32
    %c0_i32_0 = arith.constant 0 : i32
    %2 = arith.cmpi ne, %1, %c0_i32_0 : i32
    scf.if %2 {
      %c0_121 = arith.constant 0 : index
      %c0_122 = arith.constant 0 : index
      %c0_123 = arith.constant 0 : index
      %356 = vector.load %arg3[%c0_121, %c0_122, %c0_123] : memref<1x5x64xf32, #tpu.memory_space<vmem>>, vector<1x5x64xf32>
      %357 = vector.shape_cast %356 : vector<1x5x64xf32> to vector<5x64xf32>
      %c0_124 = arith.constant 0 : index
      %c0_125 = arith.constant 0 : index
      %c0_126 = arith.constant 0 : index
      %358 = vector.load %arg2[%c0_124, %c0_125, %c0_126] : memref<2x5x64xf32, #tpu.memory_space<vmem>>, vector<1x5x64xf32>
      %359 = vector.shape_cast %358 : vector<1x5x64xf32> to vector<5x64xf32>
      %360 = arith.addf %359, %357 : vector<5x64xf32>
      %c0_127 = arith.constant 0 : index
      %c0_128 = arith.constant 0 : index
      %c0_129 = arith.constant 0 : index
      %361 = vector.load %arg17[%c0_127, %c0_128, %c0_129] : memref<2x5x64xf32, #tpu.memory_space<vmem>>, vector<1x5x64xf32>
      %362 = vector.shape_cast %361 : vector<1x5x64xf32> to vector<5x64xf32>
      %363 = vector.shape_cast %360 : vector<5x64xf32> to vector<1x5x64xf32>
      tpu.vector_store %arg17[%c0_127, %c0_128, %c0_129], %363 {strides = array<i32>} : memref<2x5x64xf32, #tpu.memory_space<vmem>>, vector<1x5x64xf32>,
      %c1_130 = arith.constant 1 : index
      %c0_131 = arith.constant 0 : index
      %c0_132 = arith.constant 0 : index
      %364 = vector.load %arg2[%c1_130, %c0_131, %c0_132] : memref<2x5x64xf32, #tpu.memory_space<vmem>>, vector<1x5x64xf32>
      %365 = vector.shape_cast %364 : vector<1x5x64xf32> to vector<5x64xf32>
      %366 = arith.addf %365, %357 : vector<5x64xf32>
      %c1_133 = arith.constant 1 : index
      %c0_134 = arith.constant 0 : index
      %c0_135 = arith.constant 0 : index
      %367 = vector.load %arg17[%c1_133, %c0_134, %c0_135] : memref<2x5x64xf32, #tpu.memory_space<vmem>>, vector<1x5x64xf32>
      %368 = vector.shape_cast %367 : vector<1x5x64xf32> to vector<5x64xf32>
      %369 = vector.shape_cast %366 : vector<5x64xf32> to vector<1x5x64xf32>
      tpu.vector_store %arg17[%c1_133, %c0_134, %c0_135], %369 {strides = array<i32>} : memref<2x5x64xf32, #tpu.memory_space<vmem>>, vector<1x5x64xf32>,
    } else {
    }
    %c0 = arith.constant 0 : index
    %c0_1 = arith.constant 0 : index
    %c0_2 = arith.constant 0 : index
    %3 = vector.load %arg4[%c0, %c0_1, %c0_2] : memref<1x1x64xf32, #tpu.memory_space<vmem>>, vector<1x1x64xf32>
    %4 = vector.shape_cast %3 : vector<1x1x64xf32> to vector<1x64xf32>
    %c0_3 = arith.constant 0 : index
    %c0_4 = arith.constant 0 : index
    %c0_5 = arith.constant 0 : index
    %5 = vector.load %arg5[%c0_3, %c0_4, %c0_5] : memref<1x1x64xf32, #tpu.memory_space<vmem>>, vector<1x1x64xf32>
    %6 = vector.shape_cast %5 : vector<1x1x64xf32> to vector<1x64xf32>
    %c0_6 = arith.constant 0 : index
    %c0_7 = arith.constant 0 : index
    %c0_8 = arith.constant 0 : index
    %7 = vector.load %arg6[%c0_6, %c0_7, %c0_8] : memref<1x64x192xbf16, #tpu.memory_space<vmem>>, vector<1x64x192xbf16>
    %8 = vector.shape_cast %7 : vector<1x64x192xbf16> to vector<64x192xbf16>
    %c0_9 = arith.constant 0 : index
    %c0_10 = arith.constant 0 : index
    %c0_11 = arith.constant 0 : index
    %9 = vector.load %arg7[%c0_9, %c0_10, %c0_11] : memref<1x1x192xf32, #tpu.memory_space<vmem>>, vector<1x1x192xf32>
    %10 = vector.shape_cast %9 : vector<1x1x192xf32> to vector<1x192xf32>
    %c0_12 = arith.constant 0 : index
    %c0_13 = arith.constant 0 : index
    %c0_14 = arith.constant 0 : index
    %11 = vector.load %arg8[%c0_12, %c0_13, %c0_14] : memref<1x64x64xbf16, #tpu.memory_space<vmem>>, vector<1x64x64xbf16>
    %12 = vector.shape_cast %11 : vector<1x64x64xbf16> to vector<64x64xbf16>
    %c0_15 = arith.constant 0 : index
    %c0_16 = arith.constant 0 : index
    %c0_17 = arith.constant 0 : index
    %13 = vector.load %arg9[%c0_15, %c0_16, %c0_17] : memref<1x1x64xf32, #tpu.memory_space<vmem>>, vector<1x1x64xf32>
    %14 = vector.shape_cast %13 : vector<1x1x64xf32> to vector<1x64xf32>
    %c0_18 = arith.constant 0 : index
    %c0_19 = arith.constant 0 : index
    %c0_20 = arith.constant 0 : index
    %15 = vector.load %arg10[%c0_18, %c0_19, %c0_20] : memref<1x1x64xf32, #tpu.memory_space<vmem>>, vector<1x1x64xf32>
    %16 = vector.shape_cast %15 : vector<1x1x64xf32> to vector<1x64xf32>
    %c0_21 = arith.constant 0 : index
    %c0_22 = arith.constant 0 : index
    %c0_23 = arith.constant 0 : index
    %17 = vector.load %arg11[%c0_21, %c0_22, %c0_23] : memref<1x1x64xf32, #tpu.memory_space<vmem>>, vector<1x1x64xf32>
    %18 = vector.shape_cast %17 : vector<1x1x64xf32> to vector<1x64xf32>
    %c0_24 = arith.constant 0 : index
    %c0_25 = arith.constant 0 : index
    %c0_26 = arith.constant 0 : index
    %19 = vector.load %arg12[%c0_24, %c0_25, %c0_26] : memref<1x64x256xbf16, #tpu.memory_space<vmem>>, vector<1x64x256xbf16>
    %20 = vector.shape_cast %19 : vector<1x64x256xbf16> to vector<64x256xbf16>
    %c0_27 = arith.constant 0 : index
    %c0_28 = arith.constant 0 : index
    %c0_29 = arith.constant 0 : index
    %21 = vector.load %arg13[%c0_27, %c0_28, %c0_29] : memref<1x1x256xf32, #tpu.memory_space<vmem>>, vector<1x1x256xf32>
    %22 = vector.shape_cast %21 : vector<1x1x256xf32> to vector<1x256xf32>
    %c0_30 = arith.constant 0 : index
    %c0_31 = arith.constant 0 : index
    %c0_32 = arith.constant 0 : index
    %23 = vector.load %arg14[%c0_30, %c0_31, %c0_32] : memref<1x256x64xbf16, #tpu.memory_space<vmem>>, vector<1x256x64xbf16>
    %24 = vector.shape_cast %23 : vector<1x256x64xbf16> to vector<256x64xbf16>
    %c0_33 = arith.constant 0 : index
    %c0_34 = arith.constant 0 : index
    %c0_35 = arith.constant 0 : index
    %25 = vector.load %arg15[%c0_33, %c0_34, %c0_35] : memref<1x1x64xf32, #tpu.memory_space<vmem>>, vector<1x1x64xf32>
    %26 = vector.shape_cast %25 : vector<1x1x64xf32> to vector<1x64xf32>
    %c0_36 = arith.constant 0 : index
    %c0_37 = arith.constant 0 : index
    %c0_38 = arith.constant 0 : index
    %27 = vector.load %arg17[%c0_36, %c0_37, %c0_38] : memref<2x5x64xf32, #tpu.memory_space<vmem>>, vector<1x5x64xf32>
    %28 = vector.shape_cast %27 : vector<1x5x64xf32> to vector<5x64xf32>
    %cst = arith.constant dense<0.000000e+00> : vector<5xf32>
    %29 = vector.multi_reduction <add>, %28, %cst [1] : vector<5x64xf32> to vector<5xf32>
    %30 = vector.shape_cast %29 : vector<5xf32> to vector<5x1xf32>
    %cst_39 = arith.constant 6.400000e+01 : f32
    %31 = vector.broadcast %cst_39 : f32 to vector<5x1xf32>
    %32 = arith.divf %30, %31 : vector<5x1xf32>
    %33 = vector.broadcast %32 : vector<5x1xf32> to vector<5x64xf32>
    %34 = arith.subf %28, %33 : vector<5x64xf32>
    %35 = arith.mulf %34, %34 : vector<5x64xf32>
    %cst_40 = arith.constant dense<0.000000e+00> : vector<5xf32>
    %36 = vector.multi_reduction <add>, %35, %cst_40 [1] : vector<5x64xf32> to vector<5xf32>
    %37 = vector.shape_cast %36 : vector<5xf32> to vector<5x1xf32>
    %cst_41 = arith.constant 6.400000e+01 : f32
    %38 = vector.broadcast %cst_41 : f32 to vector<5x1xf32>
    %39 = arith.divf %37, %38 : vector<5x1xf32>
    %40 = vector.broadcast %32 : vector<5x1xf32> to vector<5x64xf32>
    %41 = arith.subf %28, %40 : vector<5x64xf32>
    %cst_42 = arith.constant 9.99999997E-7 : f32
    %42 = vector.broadcast %cst_42 : f32 to vector<5x1xf32>
    %43 = arith.addf %39, %42 : vector<5x1xf32>
    %44 = math.rsqrt %43 : vector<5x1xf32>
    %45 = vector.broadcast %44 : vector<5x1xf32> to vector<5x64xf32>
    %46 = arith.mulf %41, %45 : vector<5x64xf32>
    %47 = vector.broadcast %4 : vector<1x64xf32> to vector<5x64xf32>
    %48 = arith.mulf %46, %47 : vector<5x64xf32>
    %49 = vector.broadcast %6 : vector<1x64xf32> to vector<5x64xf32>
    %50 = arith.addf %48, %49 : vector<5x64xf32>
    %51 = arith.truncf %50 : vector<5x64xf32> to vector<5x64xbf16>
    %cst_43 = arith.constant dense<0.000000e+00> : vector<5x192xf32>
    %52 = tpu.matmul %51, %8, %cst_43 {dimension_numbers = #tpu.dot_dimension_numbers<[1], [0], [0], [1], [0, 0, 1, 1], [], []>} : vector<5x64xbf16>, vector<64x192xbf16>, vector<5x192xf32> -> vector<5x192xf32>
    %53 = vector.broadcast %10 : vector<1x192xf32> to vector<5x192xf32>
    %54 = arith.addf %52, %53 : vector<5x192xf32>
    %55 = vector.extract_strided_slice %54 {offsets = [0, 0], sizes = [5, 16], strides = [1, 1]} : vector<5x192xf32> to vector<5x16xf32>
    %56 = arith.truncf %55 : vector<5x16xf32> to vector<5x16xbf16>
    %57 = vector.extract_strided_slice %54 {offsets = [0, 64], sizes = [5, 16], strides = [1, 1]} : vector<5x192xf32> to vector<5x16xf32>
    %58 = arith.truncf %57 : vector<5x16xf32> to vector<5x16xbf16>
    %59 = vector.extract_strided_slice %54 {offsets = [0, 128], sizes = [5, 16], strides = [1, 1]} : vector<5x192xf32> to vector<5x16xf32>
    %60 = arith.truncf %59 : vector<5x16xf32> to vector<5x16xbf16>
    %cst_44 = arith.constant dense<0.000000e+00> : vector<5x5xf32>
    %61 = tpu.matmul %56, %58, %cst_44 {dimension_numbers = #tpu.dot_dimension_numbers<[1], [1], [0], [0], [0, 0, 1, 0], [], []>} : vector<5x16xbf16>, vector<5x16xbf16>, vector<5x5xf32> -> vector<5x5xf32>
    %cst_45 = arith.constant 2.500000e-01 : f32
    %62 = vector.broadcast %cst_45 : f32 to vector<5x5xf32>
    %63 = arith.mulf %61, %62 : vector<5x5xf32>
    %cst_46 = arith.constant dense<0xFF800000> : vector<5xf32>
    %64 = vector.multi_reduction <maximumf>, %63, %cst_46 [1] : vector<5x5xf32> to vector<5xf32>
    %65 = vector.shape_cast %64 : vector<5xf32> to vector<5x1xf32>
    %66 = vector.broadcast %65 : vector<5x1xf32> to vector<5x5xf32>
    %67 = arith.subf %63, %66 : vector<5x5xf32>
    %68 = math.exp %67 : vector<5x5xf32>
    %cst_47 = arith.constant dense<0.000000e+00> : vector<5xf32>
    %69 = vector.multi_reduction <add>, %68, %cst_47 [1] : vector<5x5xf32> to vector<5xf32>
    %70 = vector.shape_cast %69 : vector<5xf32> to vector<5x1xf32>
    %71 = tpu.reciprocal %70 {approx = true} : vector<5x1xf32> -> vector<5x1xf32>
    %72 = vector.broadcast %71 : vector<5x1xf32> to vector<5x5xf32>
    %73 = arith.mulf %68, %72 : vector<5x5xf32>
    %74 = arith.truncf %73 : vector<5x5xf32> to vector<5x5xbf16>
    %cst_48 = arith.constant dense<0.000000e+00> : vector<5x16xf32>
    %75 = tpu.matmul %74, %60, %cst_48 {dimension_numbers = #tpu.dot_dimension_numbers<[1], [0], [0], [1], [0, 0, 1, 1], [], []>} : vector<5x5xbf16>, vector<5x16xbf16>, vector<5x16xf32> -> vector<5x16xf32>
    %76 = arith.truncf %75 : vector<5x16xf32> to vector<5x16xbf16>
    %77 = vector.extract_strided_slice %54 {offsets = [0, 16], sizes = [5, 16], strides = [1, 1]} : vector<5x192xf32> to vector<5x16xf32>
    %78 = arith.truncf %77 : vector<5x16xf32> to vector<5x16xbf16>
    %79 = vector.extract_strided_slice %54 {offsets = [0, 80], sizes = [5, 16], strides = [1, 1]} : vector<5x192xf32> to vector<5x16xf32>
    %80 = arith.truncf %79 : vector<5x16xf32> to vector<5x16xbf16>
    %81 = vector.extract_strided_slice %54 {offsets = [0, 144], sizes = [5, 16], strides = [1, 1]} : vector<5x192xf32> to vector<5x16xf32>
    %82 = arith.truncf %81 : vector<5x16xf32> to vector<5x16xbf16>
    %cst_49 = arith.constant dense<0.000000e+00> : vector<5x5xf32>
    %83 = tpu.matmul %78, %80, %cst_49 {dimension_numbers = #tpu.dot_dimension_numbers<[1], [1], [0], [0], [0, 0, 1, 0], [], []>} : vector<5x16xbf16>, vector<5x16xbf16>, vector<5x5xf32> -> vector<5x5xf32>
    %cst_50 = arith.constant 2.500000e-01 : f32
    %84 = vector.broadcast %cst_50 : f32 to vector<5x5xf32>
    %85 = arith.mulf %83, %84 : vector<5x5xf32>
    %cst_51 = arith.constant dense<0xFF800000> : vector<5xf32>
    %86 = vector.multi_reduction <maximumf>, %85, %cst_51 [1] : vector<5x5xf32> to vector<5xf32>
    %87 = vector.shape_cast %86 : vector<5xf32> to vector<5x1xf32>
    %88 = vector.broadcast %87 : vector<5x1xf32> to vector<5x5xf32>
    %89 = arith.subf %85, %88 : vector<5x5xf32>
    %90 = math.exp %89 : vector<5x5xf32>
    %cst_52 = arith.constant dense<0.000000e+00> : vector<5xf32>
    %91 = vector.multi_reduction <add>, %90, %cst_52 [1] : vector<5x5xf32> to vector<5xf32>
    %92 = vector.shape_cast %91 : vector<5xf32> to vector<5x1xf32>
    %93 = tpu.reciprocal %92 {approx = true} : vector<5x1xf32> -> vector<5x1xf32>
    %94 = vector.broadcast %93 : vector<5x1xf32> to vector<5x5xf32>
    %95 = arith.mulf %90, %94 : vector<5x5xf32>
    %96 = arith.truncf %95 : vector<5x5xf32> to vector<5x5xbf16>
    %cst_53 = arith.constant dense<0.000000e+00> : vector<5x16xf32>
    %97 = tpu.matmul %96, %82, %cst_53 {dimension_numbers = #tpu.dot_dimension_numbers<[1], [0], [0], [1], [0, 0, 1, 1], [], []>} : vector<5x5xbf16>, vector<5x16xbf16>, vector<5x16xf32> -> vector<5x16xf32>
    %98 = arith.truncf %97 : vector<5x16xf32> to vector<5x16xbf16>
    %99 = vector.extract_strided_slice %54 {offsets = [0, 32], sizes = [5, 16], strides = [1, 1]} : vector<5x192xf32> to vector<5x16xf32>
    %100 = arith.truncf %99 : vector<5x16xf32> to vector<5x16xbf16>
    %101 = vector.extract_strided_slice %54 {offsets = [0, 96], sizes = [5, 16], strides = [1, 1]} : vector<5x192xf32> to vector<5x16xf32>
    %102 = arith.truncf %101 : vector<5x16xf32> to vector<5x16xbf16>
    %103 = vector.extract_strided_slice %54 {offsets = [0, 160], sizes = [5, 16], strides = [1, 1]} : vector<5x192xf32> to vector<5x16xf32>
    %104 = arith.truncf %103 : vector<5x16xf32> to vector<5x16xbf16>
    %cst_54 = arith.constant dense<0.000000e+00> : vector<5x5xf32>
    %105 = tpu.matmul %100, %102, %cst_54 {dimension_numbers = #tpu.dot_dimension_numbers<[1], [1], [0], [0], [0, 0, 1, 0], [], []>} : vector<5x16xbf16>, vector<5x16xbf16>, vector<5x5xf32> -> vector<5x5xf32>
    %cst_55 = arith.constant 2.500000e-01 : f32
    %106 = vector.broadcast %cst_55 : f32 to vector<5x5xf32>
    %107 = arith.mulf %105, %106 : vector<5x5xf32>
    %cst_56 = arith.constant dense<0xFF800000> : vector<5xf32>
    %108 = vector.multi_reduction <maximumf>, %107, %cst_56 [1] : vector<5x5xf32> to vector<5xf32>
    %109 = vector.shape_cast %108 : vector<5xf32> to vector<5x1xf32>
    %110 = vector.broadcast %109 : vector<5x1xf32> to vector<5x5xf32>
    %111 = arith.subf %107, %110 : vector<5x5xf32>
    %112 = math.exp %111 : vector<5x5xf32>
    %cst_57 = arith.constant dense<0.000000e+00> : vector<5xf32>
    %113 = vector.multi_reduction <add>, %112, %cst_57 [1] : vector<5x5xf32> to vector<5xf32>
    %114 = vector.shape_cast %113 : vector<5xf32> to vector<5x1xf32>
    %115 = tpu.reciprocal %114 {approx = true} : vector<5x1xf32> -> vector<5x1xf32>
    %116 = vector.broadcast %115 : vector<5x1xf32> to vector<5x5xf32>
    %117 = arith.mulf %112, %116 : vector<5x5xf32>
    %118 = arith.truncf %117 : vector<5x5xf32> to vector<5x5xbf16>
    %cst_58 = arith.constant dense<0.000000e+00> : vector<5x16xf32>
    %119 = tpu.matmul %118, %104, %cst_58 {dimension_numbers = #tpu.dot_dimension_numbers<[1], [0], [0], [1], [0, 0, 1, 1], [], []>} : vector<5x5xbf16>, vector<5x16xbf16>, vector<5x16xf32> -> vector<5x16xf32>
    %120 = arith.truncf %119 : vector<5x16xf32> to vector<5x16xbf16>
    %121 = vector.extract_strided_slice %54 {offsets = [0, 48], sizes = [5, 16], strides = [1, 1]} : vector<5x192xf32> to vector<5x16xf32>
    %122 = arith.truncf %121 : vector<5x16xf32> to vector<5x16xbf16>
    %123 = vector.extract_strided_slice %54 {offsets = [0, 112], sizes = [5, 16], strides = [1, 1]} : vector<5x192xf32> to vector<5x16xf32>
    %124 = arith.truncf %123 : vector<5x16xf32> to vector<5x16xbf16>
    %125 = vector.extract_strided_slice %54 {offsets = [0, 176], sizes = [5, 16], strides = [1, 1]} : vector<5x192xf32> to vector<5x16xf32>
    %126 = arith.truncf %125 : vector<5x16xf32> to vector<5x16xbf16>
    %cst_59 = arith.constant dense<0.000000e+00> : vector<5x5xf32>
    %127 = tpu.matmul %122, %124, %cst_59 {dimension_numbers = #tpu.dot_dimension_numbers<[1], [1], [0], [0], [0, 0, 1, 0], [], []>} : vector<5x16xbf16>, vector<5x16xbf16>, vector<5x5xf32> -> vector<5x5xf32>
    %cst_60 = arith.constant 2.500000e-01 : f32
    %128 = vector.broadcast %cst_60 : f32 to vector<5x5xf32>
    %129 = arith.mulf %127, %128 : vector<5x5xf32>
    %cst_61 = arith.constant dense<0xFF800000> : vector<5xf32>
    %130 = vector.multi_reduction <maximumf>, %129, %cst_61 [1] : vector<5x5xf32> to vector<5xf32>
    %131 = vector.shape_cast %130 : vector<5xf32> to vector<5x1xf32>
    %132 = vector.broadcast %131 : vector<5x1xf32> to vector<5x5xf32>
    %133 = arith.subf %129, %132 : vector<5x5xf32>
    %134 = math.exp %133 : vector<5x5xf32>
    %cst_62 = arith.constant dense<0.000000e+00> : vector<5xf32>
    %135 = vector.multi_reduction <add>, %134, %cst_62 [1] : vector<5x5xf32> to vector<5xf32>
    %136 = vector.shape_cast %135 : vector<5xf32> to vector<5x1xf32>
    %137 = tpu.reciprocal %136 {approx = true} : vector<5x1xf32> -> vector<5x1xf32>
    %138 = vector.broadcast %137 : vector<5x1xf32> to vector<5x5xf32>
    %139 = arith.mulf %134, %138 : vector<5x5xf32>
    %140 = arith.truncf %139 : vector<5x5xf32> to vector<5x5xbf16>
    %cst_63 = arith.constant dense<0.000000e+00> : vector<5x16xf32>
    %141 = tpu.matmul %140, %126, %cst_63 {dimension_numbers = #tpu.dot_dimension_numbers<[1], [0], [0], [1], [0, 0, 1, 1], [], []>} : vector<5x5xbf16>, vector<5x16xbf16>, vector<5x16xf32> -> vector<5x16xf32>
    %142 = arith.truncf %141 : vector<5x16xf32> to vector<5x16xbf16>
    %143 = tpu.concatenate %76, %98, %120, %142 in 1 : vector<5x16xbf16>, vector<5x16xbf16>, vector<5x16xbf16>, vector<5x16xbf16> -> vector<5x64xbf16>
    %cst_64 = arith.constant dense<0.000000e+00> : vector<5x64xf32>
    %144 = tpu.matmul %143, %12, %cst_64 {dimension_numbers = #tpu.dot_dimension_numbers<[1], [0], [0], [1], [0, 0, 1, 1], [], []>} : vector<5x64xbf16>, vector<64x64xbf16>, vector<5x64xf32> -> vector<5x64xf32>
    %145 = arith.addf %28, %144 : vector<5x64xf32>
    %146 = vector.broadcast %14 : vector<1x64xf32> to vector<5x64xf32>
    %147 = arith.addf %145, %146 : vector<5x64xf32>
    %cst_65 = arith.constant dense<0.000000e+00> : vector<5xf32>
    %148 = vector.multi_reduction <add>, %147, %cst_65 [1] : vector<5x64xf32> to vector<5xf32>
    %149 = vector.shape_cast %148 : vector<5xf32> to vector<5x1xf32>
    %cst_66 = arith.constant 6.400000e+01 : f32
    %150 = vector.broadcast %cst_66 : f32 to vector<5x1xf32>
    %151 = arith.divf %149, %150 : vector<5x1xf32>
    %152 = vector.broadcast %151 : vector<5x1xf32> to vector<5x64xf32>
    %153 = arith.subf %147, %152 : vector<5x64xf32>
    %154 = arith.mulf %153, %153 : vector<5x64xf32>
    %cst_67 = arith.constant dense<0.000000e+00> : vector<5xf32>
    %155 = vector.multi_reduction <add>, %154, %cst_67 [1] : vector<5x64xf32> to vector<5xf32>
    %156 = vector.shape_cast %155 : vector<5xf32> to vector<5x1xf32>
    %cst_68 = arith.constant 6.400000e+01 : f32
    %157 = vector.broadcast %cst_68 : f32 to vector<5x1xf32>
    %158 = arith.divf %156, %157 : vector<5x1xf32>
    %159 = vector.broadcast %151 : vector<5x1xf32> to vector<5x64xf32>
    %160 = arith.subf %147, %159 : vector<5x64xf32>
    %cst_69 = arith.constant 9.99999997E-7 : f32
    %161 = vector.broadcast %cst_69 : f32 to vector<5x1xf32>
    %162 = arith.addf %158, %161 : vector<5x1xf32>
    %163 = math.rsqrt %162 : vector<5x1xf32>
    %164 = vector.broadcast %163 : vector<5x1xf32> to vector<5x64xf32>
    %165 = arith.mulf %160, %164 : vector<5x64xf32>
    %166 = vector.broadcast %16 : vector<1x64xf32> to vector<5x64xf32>
    %167 = arith.mulf %165, %166 : vector<5x64xf32>
    %168 = vector.broadcast %18 : vector<1x64xf32> to vector<5x64xf32>
    %169 = arith.addf %167, %168 : vector<5x64xf32>
    %170 = arith.truncf %169 : vector<5x64xf32> to vector<5x64xbf16>
    %cst_70 = arith.constant dense<0.000000e+00> : vector<5x256xf32>
    %171 = tpu.matmul %170, %20, %cst_70 {dimension_numbers = #tpu.dot_dimension_numbers<[1], [0], [0], [1], [0, 0, 1, 1], [], []>} : vector<5x64xbf16>, vector<64x256xbf16>, vector<5x256xf32> -> vector<5x256xf32>
    %172 = vector.broadcast %22 : vector<1x256xf32> to vector<5x256xf32>
    %173 = arith.addf %171, %172 : vector<5x256xf32>
    %cst_71 = arith.constant 5.000000e-01 : f32
    %174 = vector.broadcast %cst_71 : f32 to vector<5x256xf32>
    %175 = arith.mulf %174, %173 : vector<5x256xf32>
    %cst_72 = arith.constant 0.707106769 : f32
    %176 = vector.broadcast %cst_72 : f32 to vector<5x256xf32>
    %177 = arith.mulf %173, %176 : vector<5x256xf32>
    %178 = math.erf %177 : vector<5x256xf32>
    %cst_73 = arith.constant 1.000000e+00 : f32
    %179 = vector.broadcast %cst_73 : f32 to vector<5x256xf32>
    %180 = arith.addf %179, %178 : vector<5x256xf32>
    %181 = arith.mulf %175, %180 : vector<5x256xf32>
    %182 = arith.truncf %181 : vector<5x256xf32> to vector<5x256xbf16>
    %cst_74 = arith.constant dense<0.000000e+00> : vector<5x64xf32>
    %183 = tpu.matmul %182, %24, %cst_74 {dimension_numbers = #tpu.dot_dimension_numbers<[1], [0], [0], [1], [0, 0, 1, 1], [], []>} : vector<5x256xbf16>, vector<256x64xbf16>, vector<5x64xf32> -> vector<5x64xf32>
    %184 = vector.broadcast %26 : vector<1x64xf32> to vector<5x64xf32>
    %185 = arith.addf %183, %184 : vector<5x64xf32>
    %186 = arith.addf %147, %185 : vector<5x64xf32>
    %c0_75 = arith.constant 0 : index
    %c0_76 = arith.constant 0 : index
    %c0_77 = arith.constant 0 : index
    %187 = vector.load %arg17[%c0_75, %c0_76, %c0_77] : memref<2x5x64xf32, #tpu.memory_space<vmem>>, vector<1x5x64xf32>
    %188 = vector.shape_cast %187 : vector<1x5x64xf32> to vector<5x64xf32>
    %189 = vector.shape_cast %186 : vector<5x64xf32> to vector<1x5x64xf32>
    tpu.vector_store %arg17[%c0_75, %c0_76, %c0_77], %189 {strides = array<i32>} : memref<2x5x64xf32, #tpu.memory_space<vmem>>, vector<1x5x64xf32>,
    %c1 = arith.constant 1 : index
    %c0_78 = arith.constant 0 : index
    %c0_79 = arith.constant 0 : index
    %190 = vector.load %arg17[%c1, %c0_78, %c0_79] : memref<2x5x64xf32, #tpu.memory_space<vmem>>, vector<1x5x64xf32>
    %191 = vector.shape_cast %190 : vector<1x5x64xf32> to vector<5x64xf32>
    %cst_80 = arith.constant dense<0.000000e+00> : vector<5xf32>
    %192 = vector.multi_reduction <add>, %191, %cst_80 [1] : vector<5x64xf32> to vector<5xf32>
    %193 = vector.shape_cast %192 : vector<5xf32> to vector<5x1xf32>
    %cst_81 = arith.constant 6.400000e+01 : f32
    %194 = vector.broadcast %cst_81 : f32 to vector<5x1xf32>
    %195 = arith.divf %193, %194 : vector<5x1xf32>
    %196 = vector.broadcast %195 : vector<5x1xf32> to vector<5x64xf32>
    %197 = arith.subf %191, %196 : vector<5x64xf32>
    %198 = arith.mulf %197, %197 : vector<5x64xf32>
    %cst_82 = arith.constant dense<0.000000e+00> : vector<5xf32>
    %199 = vector.multi_reduction <add>, %198, %cst_82 [1] : vector<5x64xf32> to vector<5xf32>
    %200 = vector.shape_cast %199 : vector<5xf32> to vector<5x1xf32>
    %cst_83 = arith.constant 6.400000e+01 : f32
    %201 = vector.broadcast %cst_83 : f32 to vector<5x1xf32>
    %202 = arith.divf %200, %201 : vector<5x1xf32>
    %203 = vector.broadcast %195 : vector<5x1xf32> to vector<5x64xf32>
    %204 = arith.subf %191, %203 : vector<5x64xf32>
    %cst_84 = arith.constant 9.99999997E-7 : f32
    %205 = vector.broadcast %cst_84 : f32 to vector<5x1xf32>
    %206 = arith.addf %202, %205 : vector<5x1xf32>
    %207 = math.rsqrt %206 : vector<5x1xf32>
    %208 = vector.broadcast %207 : vector<5x1xf32> to vector<5x64xf32>
    %209 = arith.mulf %204, %208 : vector<5x64xf32>
    %210 = vector.broadcast %4 : vector<1x64xf32> to vector<5x64xf32>
    %211 = arith.mulf %209, %210 : vector<5x64xf32>
    %212 = vector.broadcast %6 : vector<1x64xf32> to vector<5x64xf32>
    %213 = arith.addf %211, %212 : vector<5x64xf32>
    %214 = arith.truncf %213 : vector<5x64xf32> to vector<5x64xbf16>
    %cst_85 = arith.constant dense<0.000000e+00> : vector<5x192xf32>
    %215 = tpu.matmul %214, %8, %cst_85 {dimension_numbers = #tpu.dot_dimension_numbers<[1], [0], [0], [1], [0, 0, 1, 1], [], []>} : vector<5x64xbf16>, vector<64x192xbf16>, vector<5x192xf32> -> vector<5x192xf32>
    %216 = vector.broadcast %10 : vector<1x192xf32> to vector<5x192xf32>
    %217 = arith.addf %215, %216 : vector<5x192xf32>
    %218 = vector.extract_strided_slice %217 {offsets = [0, 0], sizes = [5, 16], strides = [1, 1]} : vector<5x192xf32> to vector<5x16xf32>
    %219 = arith.truncf %218 : vector<5x16xf32> to vector<5x16xbf16>
    %220 = vector.extract_strided_slice %217 {offsets = [0, 64], sizes = [5, 16], strides = [1, 1]} : vector<5x192xf32> to vector<5x16xf32>
    %221 = arith.truncf %220 : vector<5x16xf32> to vector<5x16xbf16>
    %222 = vector.extract_strided_slice %217 {offsets = [0, 128], sizes = [5, 16], strides = [1, 1]} : vector<5x192xf32> to vector<5x16xf32>
    %223 = arith.truncf %222 : vector<5x16xf32> to vector<5x16xbf16>
    %cst_86 = arith.constant dense<0.000000e+00> : vector<5x5xf32>
    %224 = tpu.matmul %219, %221, %cst_86 {dimension_numbers = #tpu.dot_dimension_numbers<[1], [1], [0], [0], [0, 0, 1, 0], [], []>} : vector<5x16xbf16>, vector<5x16xbf16>, vector<5x5xf32> -> vector<5x5xf32>
    %cst_87 = arith.constant 2.500000e-01 : f32
    %225 = vector.broadcast %cst_87 : f32 to vector<5x5xf32>
    %226 = arith.mulf %224, %225 : vector<5x5xf32>
    %cst_88 = arith.constant dense<0xFF800000> : vector<5xf32>
    %227 = vector.multi_reduction <maximumf>, %226, %cst_88 [1] : vector<5x5xf32> to vector<5xf32>
    %228 = vector.shape_cast %227 : vector<5xf32> to vector<5x1xf32>
    %229 = vector.broadcast %228 : vector<5x1xf32> to vector<5x5xf32>
    %230 = arith.subf %226, %229 : vector<5x5xf32>
    %231 = math.exp %230 : vector<5x5xf32>
    %cst_89 = arith.constant dense<0.000000e+00> : vector<5xf32>
    %232 = vector.multi_reduction <add>, %231, %cst_89 [1] : vector<5x5xf32> to vector<5xf32>
    %233 = vector.shape_cast %232 : vector<5xf32> to vector<5x1xf32>
    %234 = tpu.reciprocal %233 {approx = true} : vector<5x1xf32> -> vector<5x1xf32>
    %235 = vector.broadcast %234 : vector<5x1xf32> to vector<5x5xf32>
    %236 = arith.mulf %231, %235 : vector<5x5xf32>
    %237 = arith.truncf %236 : vector<5x5xf32> to vector<5x5xbf16>
    %cst_90 = arith.constant dense<0.000000e+00> : vector<5x16xf32>
    %238 = tpu.matmul %237, %223, %cst_90 {dimension_numbers = #tpu.dot_dimension_numbers<[1], [0], [0], [1], [0, 0, 1, 1], [], []>} : vector<5x5xbf16>, vector<5x16xbf16>, vector<5x16xf32> -> vector<5x16xf32>
    %239 = arith.truncf %238 : vector<5x16xf32> to vector<5x16xbf16>
    %240 = vector.extract_strided_slice %217 {offsets = [0, 16], sizes = [5, 16], strides = [1, 1]} : vector<5x192xf32> to vector<5x16xf32>
    %241 = arith.truncf %240 : vector<5x16xf32> to vector<5x16xbf16>
    %242 = vector.extract_strided_slice %217 {offsets = [0, 80], sizes = [5, 16], strides = [1, 1]} : vector<5x192xf32> to vector<5x16xf32>
    %243 = arith.truncf %242 : vector<5x16xf32> to vector<5x16xbf16>
    %244 = vector.extract_strided_slice %217 {offsets = [0, 144], sizes = [5, 16], strides = [1, 1]} : vector<5x192xf32> to vector<5x16xf32>
    %245 = arith.truncf %244 : vector<5x16xf32> to vector<5x16xbf16>
    %cst_91 = arith.constant dense<0.000000e+00> : vector<5x5xf32>
    %246 = tpu.matmul %241, %243, %cst_91 {dimension_numbers = #tpu.dot_dimension_numbers<[1], [1], [0], [0], [0, 0, 1, 0], [], []>} : vector<5x16xbf16>, vector<5x16xbf16>, vector<5x5xf32> -> vector<5x5xf32>
    %cst_92 = arith.constant 2.500000e-01 : f32
    %247 = vector.broadcast %cst_92 : f32 to vector<5x5xf32>
    %248 = arith.mulf %246, %247 : vector<5x5xf32>
    %cst_93 = arith.constant dense<0xFF800000> : vector<5xf32>
    %249 = vector.multi_reduction <maximumf>, %248, %cst_93 [1] : vector<5x5xf32> to vector<5xf32>
    %250 = vector.shape_cast %249 : vector<5xf32> to vector<5x1xf32>
    %251 = vector.broadcast %250 : vector<5x1xf32> to vector<5x5xf32>
    %252 = arith.subf %248, %251 : vector<5x5xf32>
    %253 = math.exp %252 : vector<5x5xf32>
    %cst_94 = arith.constant dense<0.000000e+00> : vector<5xf32>
    %254 = vector.multi_reduction <add>, %253, %cst_94 [1] : vector<5x5xf32> to vector<5xf32>
    %255 = vector.shape_cast %254 : vector<5xf32> to vector<5x1xf32>
    %256 = tpu.reciprocal %255 {approx = true} : vector<5x1xf32> -> vector<5x1xf32>
    %257 = vector.broadcast %256 : vector<5x1xf32> to vector<5x5xf32>
    %258 = arith.mulf %253, %257 : vector<5x5xf32>
    %259 = arith.truncf %258 : vector<5x5xf32> to vector<5x5xbf16>
    %cst_95 = arith.constant dense<0.000000e+00> : vector<5x16xf32>
    %260 = tpu.matmul %259, %245, %cst_95 {dimension_numbers = #tpu.dot_dimension_numbers<[1], [0], [0], [1], [0, 0, 1, 1], [], []>} : vector<5x5xbf16>, vector<5x16xbf16>, vector<5x16xf32> -> vector<5x16xf32>
    %261 = arith.truncf %260 : vector<5x16xf32> to vector<5x16xbf16>
    %262 = vector.extract_strided_slice %217 {offsets = [0, 32], sizes = [5, 16], strides = [1, 1]} : vector<5x192xf32> to vector<5x16xf32>
    %263 = arith.truncf %262 : vector<5x16xf32> to vector<5x16xbf16>
    %264 = vector.extract_strided_slice %217 {offsets = [0, 96], sizes = [5, 16], strides = [1, 1]} : vector<5x192xf32> to vector<5x16xf32>
    %265 = arith.truncf %264 : vector<5x16xf32> to vector<5x16xbf16>
    %266 = vector.extract_strided_slice %217 {offsets = [0, 160], sizes = [5, 16], strides = [1, 1]} : vector<5x192xf32> to vector<5x16xf32>
    %267 = arith.truncf %266 : vector<5x16xf32> to vector<5x16xbf16>
    %cst_96 = arith.constant dense<0.000000e+00> : vector<5x5xf32>
    %268 = tpu.matmul %263, %265, %cst_96 {dimension_numbers = #tpu.dot_dimension_numbers<[1], [1], [0], [0], [0, 0, 1, 0], [], []>} : vector<5x16xbf16>, vector<5x16xbf16>, vector<5x5xf32> -> vector<5x5xf32>
    %cst_97 = arith.constant 2.500000e-01 : f32
    %269 = vector.broadcast %cst_97 : f32 to vector<5x5xf32>
    %270 = arith.mulf %268, %269 : vector<5x5xf32>
    %cst_98 = arith.constant dense<0xFF800000> : vector<5xf32>
    %271 = vector.multi_reduction <maximumf>, %270, %cst_98 [1] : vector<5x5xf32> to vector<5xf32>
    %272 = vector.shape_cast %271 : vector<5xf32> to vector<5x1xf32>
    %273 = vector.broadcast %272 : vector<5x1xf32> to vector<5x5xf32>
    %274 = arith.subf %270, %273 : vector<5x5xf32>
    %275 = math.exp %274 : vector<5x5xf32>
    %cst_99 = arith.constant dense<0.000000e+00> : vector<5xf32>
    %276 = vector.multi_reduction <add>, %275, %cst_99 [1] : vector<5x5xf32> to vector<5xf32>
    %277 = vector.shape_cast %276 : vector<5xf32> to vector<5x1xf32>
    %278 = tpu.reciprocal %277 {approx = true} : vector<5x1xf32> -> vector<5x1xf32>
    %279 = vector.broadcast %278 : vector<5x1xf32> to vector<5x5xf32>
    %280 = arith.mulf %275, %279 : vector<5x5xf32>
    %281 = arith.truncf %280 : vector<5x5xf32> to vector<5x5xbf16>
    %cst_100 = arith.constant dense<0.000000e+00> : vector<5x16xf32>
    %282 = tpu.matmul %281, %267, %cst_100 {dimension_numbers = #tpu.dot_dimension_numbers<[1], [0], [0], [1], [0, 0, 1, 1], [], []>} : vector<5x5xbf16>, vector<5x16xbf16>, vector<5x16xf32> -> vector<5x16xf32>
    %283 = arith.truncf %282 : vector<5x16xf32> to vector<5x16xbf16>
    %284 = vector.extract_strided_slice %217 {offsets = [0, 48], sizes = [5, 16], strides = [1, 1]} : vector<5x192xf32> to vector<5x16xf32>
    %285 = arith.truncf %284 : vector<5x16xf32> to vector<5x16xbf16>
    %286 = vector.extract_strided_slice %217 {offsets = [0, 112], sizes = [5, 16], strides = [1, 1]} : vector<5x192xf32> to vector<5x16xf32>
    %287 = arith.truncf %286 : vector<5x16xf32> to vector<5x16xbf16>
    %288 = vector.extract_strided_slice %217 {offsets = [0, 176], sizes = [5, 16], strides = [1, 1]} : vector<5x192xf32> to vector<5x16xf32>
    %289 = arith.truncf %288 : vector<5x16xf32> to vector<5x16xbf16>
    %cst_101 = arith.constant dense<0.000000e+00> : vector<5x5xf32>
    %290 = tpu.matmul %285, %287, %cst_101 {dimension_numbers = #tpu.dot_dimension_numbers<[1], [1], [0], [0], [0, 0, 1, 0], [], []>} : vector<5x16xbf16>, vector<5x16xbf16>, vector<5x5xf32> -> vector<5x5xf32>
    %cst_102 = arith.constant 2.500000e-01 : f32
    %291 = vector.broadcast %cst_102 : f32 to vector<5x5xf32>
    %292 = arith.mulf %290, %291 : vector<5x5xf32>
    %cst_103 = arith.constant dense<0xFF800000> : vector<5xf32>
    %293 = vector.multi_reduction <maximumf>, %292, %cst_103 [1] : vector<5x5xf32> to vector<5xf32>
    %294 = vector.shape_cast %293 : vector<5xf32> to vector<5x1xf32>
    %295 = vector.broadcast %294 : vector<5x1xf32> to vector<5x5xf32>
    %296 = arith.subf %292, %295 : vector<5x5xf32>
    %297 = math.exp %296 : vector<5x5xf32>
    %cst_104 = arith.constant dense<0.000000e+00> : vector<5xf32>
    %298 = vector.multi_reduction <add>, %297, %cst_104 [1] : vector<5x5xf32> to vector<5xf32>
    %299 = vector.shape_cast %298 : vector<5xf32> to vector<5x1xf32>
    %300 = tpu.reciprocal %299 {approx = true} : vector<5x1xf32> -> vector<5x1xf32>
    %301 = vector.broadcast %300 : vector<5x1xf32> to vector<5x5xf32>
    %302 = arith.mulf %297, %301 : vector<5x5xf32>
    %303 = arith.truncf %302 : vector<5x5xf32> to vector<5x5xbf16>
    %cst_105 = arith.constant dense<0.000000e+00> : vector<5x16xf32>
    %304 = tpu.matmul %303, %289, %cst_105 {dimension_numbers = #tpu.dot_dimension_numbers<[1], [0], [0], [1], [0, 0, 1, 1], [], []>} : vector<5x5xbf16>, vector<5x16xbf16>, vector<5x16xf32> -> vector<5x16xf32>
    %305 = arith.truncf %304 : vector<5x16xf32> to vector<5x16xbf16>
    %306 = tpu.concatenate %239, %261, %283, %305 in 1 : vector<5x16xbf16>, vector<5x16xbf16>, vector<5x16xbf16>, vector<5x16xbf16> -> vector<5x64xbf16>
    %cst_106 = arith.constant dense<0.000000e+00> : vector<5x64xf32>
    %307 = tpu.matmul %306, %12, %cst_106 {dimension_numbers = #tpu.dot_dimension_numbers<[1], [0], [0], [1], [0, 0, 1, 1], [], []>} : vector<5x64xbf16>, vector<64x64xbf16>, vector<5x64xf32> -> vector<5x64xf32>
    %308 = arith.addf %191, %307 : vector<5x64xf32>
    %309 = vector.broadcast %14 : vector<1x64xf32> to vector<5x64xf32>
    %310 = arith.addf %308, %309 : vector<5x64xf32>
    %cst_107 = arith.constant dense<0.000000e+00> : vector<5xf32>
    %311 = vector.multi_reduction <add>, %310, %cst_107 [1] : vector<5x64xf32> to vector<5xf32>
    %312 = vector.shape_cast %311 : vector<5xf32> to vector<5x1xf32>
    %cst_108 = arith.constant 6.400000e+01 : f32
    %313 = vector.broadcast %cst_108 : f32 to vector<5x1xf32>
    %314 = arith.divf %312, %313 : vector<5x1xf32>
    %315 = vector.broadcast %314 : vector<5x1xf32> to vector<5x64xf32>
    %316 = arith.subf %310, %315 : vector<5x64xf32>
    %317 = arith.mulf %316, %316 : vector<5x64xf32>
    %cst_109 = arith.constant dense<0.000000e+00> : vector<5xf32>
    %318 = vector.multi_reduction <add>, %317, %cst_109 [1] : vector<5x64xf32> to vector<5xf32>
    %319 = vector.shape_cast %318 : vector<5xf32> to vector<5x1xf32>
    %cst_110 = arith.constant 6.400000e+01 : f32
    %320 = vector.broadcast %cst_110 : f32 to vector<5x1xf32>
    %321 = arith.divf %319, %320 : vector<5x1xf32>
    %322 = vector.broadcast %314 : vector<5x1xf32> to vector<5x64xf32>
    %323 = arith.subf %310, %322 : vector<5x64xf32>
    %cst_111 = arith.constant 9.99999997E-7 : f32
    %324 = vector.broadcast %cst_111 : f32 to vector<5x1xf32>
    %325 = arith.addf %321, %324 : vector<5x1xf32>
    %326 = math.rsqrt %325 : vector<5x1xf32>
    %327 = vector.broadcast %326 : vector<5x1xf32> to vector<5x64xf32>
    %328 = arith.mulf %323, %327 : vector<5x64xf32>
    %329 = vector.broadcast %16 : vector<1x64xf32> to vector<5x64xf32>
    %330 = arith.mulf %328, %329 : vector<5x64xf32>
    %331 = vector.broadcast %18 : vector<1x64xf32> to vector<5x64xf32>
    %332 = arith.addf %330, %331 : vector<5x64xf32>
    %333 = arith.truncf %332 : vector<5x64xf32> to vector<5x64xbf16>
    %cst_112 = arith.constant dense<0.000000e+00> : vector<5x256xf32>
    %334 = tpu.matmul %333, %20, %cst_112 {dimension_numbers = #tpu.dot_dimension_numbers<[1], [0], [0], [1], [0, 0, 1, 1], [], []>} : vector<5x64xbf16>, vector<64x256xbf16>, vector<5x256xf32> -> vector<5x256xf32>
    %335 = vector.broadcast %22 : vector<1x256xf32> to vector<5x256xf32>
    %336 = arith.addf %334, %335 : vector<5x256xf32>
    %cst_113 = arith.constant 5.000000e-01 : f32
    %337 = vector.broadcast %cst_113 : f32 to vector<5x256xf32>
    %338 = arith.mulf %337, %336 : vector<5x256xf32>
    %cst_114 = arith.constant 0.707106769 : f32
    %339 = vector.broadcast %cst_114 : f32 to vector<5x256xf32>
    %340 = arith.mulf %336, %339 : vector<5x256xf32>
    %341 = math.erf %340 : vector<5x256xf32>
    %cst_115 = arith.constant 1.000000e+00 : f32
    %342 = vector.broadcast %cst_115 : f32 to vector<5x256xf32>
    %343 = arith.addf %342, %341 : vector<5x256xf32>
    %344 = arith.mulf %338, %343 : vector<5x256xf32>
    %345 = arith.truncf %344 : vector<5x256xf32> to vector<5x256xbf16>
    %cst_116 = arith.constant dense<0.000000e+00> : vector<5x64xf32>
    %346 = tpu.matmul %345, %24, %cst_116 {dimension_numbers = #tpu.dot_dimension_numbers<[1], [0], [0], [1], [0, 0, 1, 1], [], []>} : vector<5x256xbf16>, vector<256x64xbf16>, vector<5x64xf32> -> vector<5x64xf32>
    %347 = vector.broadcast %26 : vector<1x64xf32> to vector<5x64xf32>
    %348 = arith.addf %346, %347 : vector<5x64xf32>
    %349 = arith.addf %310, %348 : vector<5x64xf32>
    %c1_117 = arith.constant 1 : index
    %c0_118 = arith.constant 0 : index
    %c0_119 = arith.constant 0 : index
    %350 = vector.load %arg17[%c1_117, %c0_118, %c0_119] : memref<2x5x64xf32, #tpu.memory_space<vmem>>, vector<1x5x64xf32>
    %351 = vector.shape_cast %350 : vector<1x5x64xf32> to vector<5x64xf32>
    %352 = vector.shape_cast %349 : vector<5x64xf32> to vector<1x5x64xf32>
    tpu.vector_store %arg17[%c1_117, %c0_118, %c0_119], %352 {strides = array<i32>} : memref<2x5x64xf32, #tpu.memory_space<vmem>>, vector<1x5x64xf32>,
    %c1_i32 = arith.constant 1 : i32
    %353 = arith.cmpi eq, %arg1, %c1_i32 : i32
    %354 = arith.extui %353 : i1 to i32
    %c0_i32_120 = arith.constant 0 : i32
    %355 = arith.cmpi ne, %354, %c0_i32_120 : i32
    scf.if %355 {
      %c0_121 = arith.constant 0 : index
      %c0_122 = arith.constant 0 : index
      %c0_123 = arith.constant 0 : index
      %356 = vector.load %arg17[%c0_121, %c0_122, %c0_123] : memref<2x5x64xf32, #tpu.memory_space<vmem>>, vector<2x5x64xf32>
      %cst_124 = arith.constant dense<0.000000e+00> : vector<2x64xf32>
      %357 = vector.multi_reduction <add>, %356, %cst_124 [1] : vector<2x5x64xf32> to vector<2x64xf32>
      %358 = vector.shape_cast %357 : vector<2x64xf32> to vector<2x1x64xf32>
      %cst_125 = arith.constant 5.000000e+00 : f32
      %359 = vector.broadcast %cst_125 : f32 to vector<2x1x64xf32>
      %360 = arith.divf %358, %359 : vector<2x1x64xf32>
      %c0_126 = arith.constant 0 : index
      %c0_127 = arith.constant 0 : index
      %c0_128 = arith.constant 0 : index
      %361 = vector.load %arg16[%c0_126, %c0_127, %c0_128] : memref<2x1x64xf32, #tpu.memory_space<vmem>>, vector<2x1x64xf32>
      tpu.vector_store %arg16[%c0_126, %c0_127, %c0_128], %360 {strides = array<i32>} : memref<2x1x64xf32, #tpu.memory_space<vmem>>, vector<2x1x64xf32>,
    } else {
    }
    return
  }
  func.func @transform_0(%arg0: i32, %arg1: i32) -> (i32, i32, i32) {
    %c0_i32 = arith.constant 0 : i32
    %c0_i32_0 = arith.constant 0 : i32
    %c0_i32_1 = arith.constant 0 : i32
    return %arg0, %c0_i32, %c0_i32_0 : i32, i32, i32
  }
  func.func @transform_1(%arg0: i32, %arg1: i32) -> (i32, i32, i32) {
    %c0_i32 = arith.constant 0 : i32
    %c0_i32_0 = arith.constant 0 : i32
    %c0_i32_1 = arith.constant 0 : i32
    %c0_i32_2 = arith.constant 0 : i32
    return %c0_i32, %c0_i32_0, %c0_i32_1 : i32, i32, i32
  }
  func.func @transform_2(%arg0: i32, %arg1: i32) -> (i32, i32, i32) {
    %c0_i32 = arith.constant 0 : i32
    %c0_i32_0 = arith.constant 0 : i32
    %c0_i32_1 = arith.constant 0 : i32
    return %arg1, %c0_i32, %c0_i32_0 : i32, i32, i32
  }
  func.func @transform_3(%arg0: i32, %arg1: i32) -> (i32, i32, i32) {
    %c0_i32 = arith.constant 0 : i32
    %c0_i32_0 = arith.constant 0 : i32
    %c0_i32_1 = arith.constant 0 : i32
    return %arg1, %c0_i32, %c0_i32_0 : i32, i32, i32
  }
  func.func @transform_4(%arg0: i32, %arg1: i32) -> (i32, i32, i32) {
    %c0_i32 = arith.constant 0 : i32
    %c0_i32_0 = arith.constant 0 : i32
    %c0_i32_1 = arith.constant 0 : i32
    return %arg1, %c0_i32, %c0_i32_0 : i32, i32, i32
  }
  func.func @transform_5(%arg0: i32, %arg1: i32) -> (i32, i32, i32) {
    %c0_i32 = arith.constant 0 : i32
    %c0_i32_0 = arith.constant 0 : i32
    %c0_i32_1 = arith.constant 0 : i32
    return %arg1, %c0_i32, %c0_i32_0 : i32, i32, i32
  }
  func.func @transform_6(%arg0: i32, %arg1: i32) -> (i32, i32, i32) {
    %c0_i32 = arith.constant 0 : i32
    %c0_i32_0 = arith.constant 0 : i32
    %c0_i32_1 = arith.constant 0 : i32
    return %arg1, %c0_i32, %c0_i32_0 : i32, i32, i32
  }
  func.func @transform_7(%arg0: i32, %arg1: i32) -> (i32, i32, i32) {
    %c0_i32 = arith.constant 0 : i32
    %c0_i32_0 = arith.constant 0 : i32
    %c0_i32_1 = arith.constant 0 : i32
    return %arg1, %c0_i32, %c0_i32_0 : i32, i32, i32
  }
  func.func @transform_8(%arg0: i32, %arg1: i32) -> (i32, i32, i32) {
    %c0_i32 = arith.constant 0 : i32
    %c0_i32_0 = arith.constant 0 : i32
    %c0_i32_1 = arith.constant 0 : i32
    return %arg1, %c0_i32, %c0_i32_0 : i32, i32, i32
  }
  func.func @transform_9(%arg0: i32, %arg1: i32) -> (i32, i32, i32) {
    %c0_i32 = arith.constant 0 : i32
    %c0_i32_0 = arith.constant 0 : i32
    %c0_i32_1 = arith.constant 0 : i32
    return %arg1, %c0_i32, %c0_i32_0 : i32, i32, i32
  }
  func.func @transform_10(%arg0: i32, %arg1: i32) -> (i32, i32, i32) {
    %c0_i32 = arith.constant 0 : i32
    %c0_i32_0 = arith.constant 0 : i32
    %c0_i32_1 = arith.constant 0 : i32
    return %arg1, %c0_i32, %c0_i32_0 : i32, i32, i32
  }
  func.func @transform_11(%arg0: i32, %arg1: i32) -> (i32, i32, i32) {
    %c0_i32 = arith.constant 0 : i32
    %c0_i32_0 = arith.constant 0 : i32
    %c0_i32_1 = arith.constant 0 : i32
    return %arg1, %c0_i32, %c0_i32_0 : i32, i32, i32
  }
  func.func @transform_12(%arg0: i32, %arg1: i32) -> (i32, i32, i32) {
    %c0_i32 = arith.constant 0 : i32
    %c0_i32_0 = arith.constant 0 : i32
    %c0_i32_1 = arith.constant 0 : i32
    return %arg1, %c0_i32, %c0_i32_0 : i32, i32, i32
  }
  func.func @transform_13(%arg0: i32, %arg1: i32) -> (i32, i32, i32) {
    %c0_i32 = arith.constant 0 : i32
    %c0_i32_0 = arith.constant 0 : i32
    %c0_i32_1 = arith.constant 0 : i32
    return %arg1, %c0_i32, %c0_i32_0 : i32, i32, i32
  }
  func.func @transform_14(%arg0: i32, %arg1: i32) -> (i32, i32, i32) {
    %c0_i32 = arith.constant 0 : i32
    %c0_i32_0 = arith.constant 0 : i32
    %c0_i32_1 = arith.constant 0 : i32
    return %arg0, %c0_i32, %c0_i32_0 : i32, i32, i32
  }
}

</mosaic_0001>

<bundles_post_ra>
// kernel: dofa_wrapper_forward.8
= control target key start
LH: loop header
LB: loop body
LE: loop exit
PB: predicated region body
PF: predicated region fallthrough
CT: control target
= control target key end

     0   :  { %v209_v0 = vmov 0.0   ;;  %vm210_vm0 = vmmov 0   ;;  %vm47_vm1 = vcmask 261120   ;;  %vm167_vm2 = vcmask 253952   ;;  %s274_s1 = inlined_call_operand.vmem [shape: bf16[32,32], index: 1, kind: input, shape index: {}]   ;;  %s275_s0 = inlined_call_operand.vmem [shape: f32[9,32], index: 0, kind: input, shape index: {}]   ;;  %s276_s3 = inlined_call_operand.vmem [shape: bf16[32,32], index: 3, kind: input, shape index: {}]   ;;  %s277_s2 = inlined_call_operand.vmem [shape: f32[1,32], index: 2, kind: input, shape index: {}]   ;;  %s278_s4 = inlined_call_operand.vmem [shape: f32[1,32], index: 4, kind: input, shape index: {}]   ;;  %s279_s5 = inlined_call_operand.vmem [shape: f32[9,32], index: 5, kind: output, shape index: {}]  }
   0x1   :  { %187 = vmatprep.subr.bf16.mxu0 %v209_v0  ;;  %v205_v1 = vld [vmem:[%s274_s1] sm:$0xff]   ;;  %191 = vmatprep.mubr.msk.bf16.mxu0 %vm210_vm0, %v209_v0  ;;  %v206_v2 = vld [vmem:[%s274_s1 + $0x8] sm:$0xff]  }
   0x2   :  { %195 = vmatprep.subr.bf16.mxu1 %v209_v0  ;;  %199 = vmatprep.mubr.msk.bf16.mxu1 %vm210_vm0, %v209_v0  ;;  %v21_v3 = vld [vmem:[%s275_s0] sm:$0xff]  ;;  %v22_v4 = vld [vmem:[%s275_s0 + $0x8] sm:$0x1] }
   0x3   :  { %188 = vmatpush3.bf16.msra.mxu0 %v205_v1  ;;  %v23_v5 = vpack.c.bf16 %v22_v4, %v21_v3  ;;  %v207_v6 = vld [vmem:[%s276_s3] sm:$0xff]   ;;  %v208_v7 = vld [vmem:[%s276_s3 + $0x8] sm:$0xff]  }
   0x4   :  { %189 = vmatprep.subr.bf16.mxu0 %v209_v0  ;;  %196 = vmatpush3.bf16.msra.mxu1 %v207_v6  ;;  %v173_v8 = vld [vmem:[%s277_s2] ss:$0 sm:$0xff] }
   0x5   :  { %197 = vmatprep.subr.bf16.mxu1 %v209_v0  ;;  %v177_v18 = vld [vmem:[%s278_s4] ss:$0 sm:$0xff] }
   0x7   :  { %190 = vmatpush3.bf16.msra.mxu0 %v206_v2 }
   0x8   :  { %198 = vmatpush3.bf16.msra.mxu1 %v208_v7 }
   0xa   :  { %192 = vmatmul.mubr.msk.bf16.vlgmr.msra.gmra.mrb[0].mxu0 %vm47_vm1, %v23_v5 }
  0xdd   :  { %v85_v9 = vpop.f32.mrb[0].mxu0 }
  0xde   :  { %v86_v10 = vadd.f32 %v173_v8, %v85_v9  ;;  %v193_v11 = vpop.f32.mrb[1].mxu0 }
  0xdf   :  { %v88_v12 = vpop.f32.mrb[2].mxu0 }
  0xe0   :  { %v89_v13 = vadd.f32 %v173_v8, %v88_v12  ;;  %v194_v14 = vpop.f32.mrb[3].mxu0  ;;  %v92_v15 = vmax.f32 %v86_v10, 0.0 }
  0xe2   :  { %v93_v16 = vmax.f32 %v89_v13, 0.0 }
  0xe4   :  { %v94_v17 = vpack.c.bf16 %v93_v16, %v92_v15 }
  0xe6   :  { %200 = vmatmul.mubr.msk.bf16.vlgmr.msra.gmra.mrb[0].mxu1 %vm47_vm1, %v94_v17 }
 0x1b9   :  { %v155_v19 = vpop.f32.mrb[0].mxu1 }
 0x1ba   :  { %v156_v20 = vadd.f32 %v177_v18, %v155_v19  ;;  %v201_v21 = vpop.f32.mrb[1].mxu1 }
 0x1bb   :  { %v158_v22 = vpop.f32.mrb[2].mxu1 }
 0x1bc   :  { %v162_v23 = vmax.f32 %v156_v20, 0.0  ;;  %v159_v24 = vadd.f32 %v177_v18, %v158_v22  ;;  %v202_v25 = vpop.f32.mrb[3].mxu1 }
 0x1be   :  { %v164_v26 = vadd.f32 %v162_v23, %v21_v3  ;;  %v163_v27 = vmax.f32 %v159_v24, 0.0 }
 0x1c0   :  { %166 = vst.msk [vmem:[%s279_s5] sm:$0xff] %vm47_vm1, %v164_v26  ;;  %v165_v28 = vadd.f32 %v163_v27, %v22_v4 }
 0x1c2   :  { %168 = vst.msk [vmem:[%s279_s5 + $0x8] sm:$0x1] %vm167_vm2, %v165_v28 }

// kernel: dofa_wrapper_forward.10
= control target key start
LH: loop header
LB: loop body
LE: loop exit
PB: predicated region body
PF: predicated region fallthrough
CT: control target
= control target key end

     0   :  { %v1417_v3 = vmov 0   ;;  %vm574_vm0 = vcmask 261120   ;;  %s1935_s1 = inlined_call_operand.vmem [shape: bf16[32,4096], index: 1, kind: input, shape index: {}]   ;;  %s1936_s0 = inlined_call_operand.vmem [shape: bf16[9,32], index: 0, kind: input, shape index: {}]   ;;  %s1937_s2 = inlined_call_operand.vmem [shape: f32[1,4096], index: 2, kind: input, shape index: {}]   ;;  %s1938_s3 = inlined_call_operand.vmem [shape: f32[9,4096], index: 3, kind: output, shape index: {}]  }
   0x1   :  { %v17_v0 = vld [vmem:[%s1935_s1] sm:$0xff]  ;;  %v18_v2 = vld [vmem:[%s1935_s1 + $0x8] sm:$0xff]  ;;  %610 = vmatprep.mubr.bf16.mxu0 %v1417_v3  ;;  %653 = vmatprep.mubr.bf16.mxu1 %v1417_v3  ;;  %v19_v15 = vld [vmem:[%s1935_s1 + $0x10] sm:$0xff] }
   0x2   :  { %v33_v1 = vld [vmem:[%s1935_s1 + $0x80] sm:$0xff]  ;;  %v34_v5 = vld [vmem:[%s1935_s1 + $0x88] sm:$0xff]  ;;  %v35_v17 = vld [vmem:[%s1935_s1 + $0x90] sm:$0xff] }
   0x3   :  { %v1336_v4 = vcombine.high %v17_v0, %v33_v1  ;;  %v1335_v6 = vcombine.low %v17_v0, %v33_v1  ;;  %v49_v7 = vld [vmem:[%s1935_s1 + $0x100] sm:$0xff]  ;;  %v1338_v9 = vcombine.high %v18_v2, %v34_v5  ;;  %v1337_v10 = vcombine.low %v18_v2, %v34_v5  ;;  %v50_v12 = vld [vmem:[%s1935_s1 + $0x108] sm:$0xff]  ;;  %v20_v18 = vld [vmem:[%s1935_s1 + $0x18] sm:$0xff] }
   0x4   :  { %v65_v8 = vld [vmem:[%s1935_s1 + $0x180] sm:$0xff]  ;;  %v66_v13 = vld [vmem:[%s1935_s1 + $0x188] sm:$0xff]  ;;  %v36_v19 = vld [vmem:[%s1935_s1 + $0x98] sm:$0xff]  ;;  %v1340_v21 = vcombine.high %v19_v15, %v35_v17  ;;  %v1339_v28 = vcombine.low %v19_v15, %v35_v17 }
   0x5   :  { %v1368_v11 = vcombine.high %v49_v7, %v65_v8  ;;  %578 = vmatprep.subr.bf16.mxu0 %v1336_v4  ;;  %v1370_v14 = vcombine.high %v50_v12, %v66_v13  ;;  %621 = vmatprep.subr.bf16.mxu1 %v1338_v9  ;;  %v1367_v16 = vcombine.low %v49_v7, %v65_v8  ;;  %v51_v23 = vld [vmem:[%s1935_s1 + $0x110] sm:$0xff]  ;;  %v1485_v25 = vld [vmem:[%s1936_s0] sm:$0x1f]   ;;  %v52_v26 = vld [vmem:[%s1935_s1 + $0x118] sm:$0xff] }
   0x6   :  { %579 = vmatpush1.bf16.msra.mxu0 %v1335_v6  ;;  %622 = vmatpush1.bf16.msra.mxu1 %v1337_v10  ;;  %v1369_v20 = vcombine.low %v50_v12, %v66_v13  ;;  %v1342_v22 = vcombine.high %v20_v18, %v36_v19  ;;  %v67_v24 = vld [vmem:[%s1935_s1 + $0x190] sm:$0xff]  ;;  %v68_v27 = vld [vmem:[%s1935_s1 + $0x198] sm:$0xff]  ;;  %v1341_v29 = vcombine.low %v20_v18, %v36_v19  ;;  %v21_v32 = vld [vmem:[%s1935_s1 + $0x20] sm:$0xff] }
   0x7   :  { %580 = vmatprep.subr.bf16.mxu0 %v1368_v11  ;;  %623 = vmatprep.subr.bf16.mxu1 %v1370_v14  ;;  %v1372_v30 = vcombine.high %v51_v23, %v67_v24  ;;  %v1374_v31 = vcombine.high %v52_v26, %v68_v27  ;;  %v37_v33 = vld [vmem:[%s1935_s1 + $0xa0] sm:$0xff]  ;;  %v22_v34 = vld [vmem:[%s1935_s1 + $0x28] sm:$0xff]  ;;  %v1371_v36 = vcombine.low %v51_v23, %v67_v24  ;;  %v23_v48 = vld [vmem:[%s1935_s1 + $0x30] sm:$0xff] }
   0x8   :  { %v38_v35 = vld [vmem:[%s1935_s1 + $0xa8] sm:$0xff]  ;;  %v1373_v37 = vcombine.low %v52_v26, %v68_v27  ;;  %v1344_v38 = vcombine.high %v21_v32, %v37_v33  ;;  %v53_v40 = vld [vmem:[%s1935_s1 + $0x120] sm:$0xff]  ;;  %v1343_v44 = vcombine.low %v21_v32, %v37_v33  ;;  %v39_v49 = vld [vmem:[%s1935_s1 + $0xb0] sm:$0xff] }
   0x9   :  { %v1346_v39 = vcombine.high %v22_v34, %v38_v35  ;;  %v69_v41 = vld [vmem:[%s1935_s1 + $0x1a0] sm:$0xff]  ;;  %v54_v42 = vld [vmem:[%s1935_s1 + $0x128] sm:$0xff]  ;;  %v1345_v45 = vcombine.low %v22_v34, %v38_v35  ;;  %v24_v50 = vld [vmem:[%s1935_s1 + $0x38] sm:$0xff]  ;;  %v1348_v54 = vcombine.high %v23_v48, %v39_v49  ;;  %v1347_v60 = vcombine.low %v23_v48, %v39_v49 }
   0xa   :  { %581 = vmatpush1.bf16.msra.mxu0 %v1367_v16  ;;  %624 = vmatpush1.bf16.msra.mxu1 %v1369_v20  ;;  %v70_v43 = vld [vmem:[%s1935_s1 + $0x1a8] sm:$0xff]  ;;  %v1376_v46 = vcombine.high %v53_v40, %v69_v41  ;;  %v40_v51 = vld [vmem:[%s1935_s1 + $0xb8] sm:$0xff]  ;;  %v1375_v52 = vcombine.low %v53_v40, %v69_v41  ;;  %v55_v56 = vld [vmem:[%s1935_s1 + $0x130] sm:$0xff] }
   0xb   :  { %664 = vmatprep.subr.bf16.mxu0 %v1340_v21  ;;  %707 = vmatprep.subr.bf16.mxu1 %v1342_v22  ;;  %v1378_v47 = vcombine.high %v54_v42, %v70_v43  ;;  %v1377_v53 = vcombine.low %v54_v42, %v70_v43  ;;  %v1350_v55 = vcombine.high %v24_v50, %v40_v51  ;;  %v71_v57 = vld [vmem:[%s1935_s1 + $0x1b0] sm:$0xff]  ;;  %v56_v58 = vld [vmem:[%s1935_s1 + $0x138] sm:$0xff]  ;;  %v25_v0 = vld [vmem:[%s1935_s1 + $0x40] sm:$0xff] }
   0xc   :  { %v72_v59 = vld [vmem:[%s1935_s1 + $0x1b8] sm:$0xff]  ;;  %v1349_v61 = vcombine.low %v24_v50, %v40_v51  ;;  %v1380_v62 = vcombine.high %v55_v56, %v71_v57  ;;  %v41_v1 = vld [vmem:[%s1935_s1 + $0xc0] sm:$0xff]  ;;  %v26_v2 = vld [vmem:[%s1935_s1 + $0x48] sm:$0xff]  ;;  %v1379_v5 = vcombine.low %v55_v56, %v71_v57 }
   0xd   :  { %1399 = vmatmul.mubr.msk.bf16.vlgmr.msra.gmra.mrb[0].mxu0 %vm574_vm0, %v1485_v25  ;;  %1400 = vmatmul.mubr.msk.bf16.vlgmr.msra.gmra.mrb[0].mxu1 %vm574_vm0, %v1485_v25  ;;  %v1382_v63 = vcombine.high %v56_v58, %v72_v59  ;;  %v42_v4 = vld [vmem:[%s1935_s1 + $0xc8] sm:$0xff]  ;;  %v1381_v6 = vcombine.low %v56_v58, %v72_v59  ;;  %v1352_v7 = vcombine.high %v25_v0, %v41_v1  ;;  %v57_v9 = vld [vmem:[%s1935_s1 + $0x140] sm:$0xff]  ;;  %v27_v17 = vld [vmem:[%s1935_s1 + $0x50] sm:$0xff] }
   0xe   :  { %665 = vmatpush1.bf16.msra.mxu0 %v1339_v28  ;;  %708 = vmatpush1.bf16.msra.mxu1 %v1341_v29  ;;  %v1354_v8 = vcombine.high %v26_v2, %v42_v4  ;;  %v73_v10 = vld [vmem:[%s1935_s1 + $0x1c0] sm:$0xff]  ;;  %v58_v11 = vld [vmem:[%s1935_s1 + $0x148] sm:$0xff]  ;;  %v1351_v13 = vcombine.low %v25_v0, %v41_v1  ;;  %v1353_v14 = vcombine.low %v26_v2, %v42_v4  ;;  %v43_v18 = vld [vmem:[%s1935_s1 + $0xd0] sm:$0xff] }
   0xf   :  { %666 = vmatprep.subr.bf16.mxu0 %v1372_v30  ;;  %709 = vmatprep.subr.bf16.mxu1 %v1374_v31  ;;  %v74_v12 = vld [vmem:[%s1935_s1 + $0x1c8] sm:$0xff]  ;;  %v1384_v15 = vcombine.high %v57_v9, %v73_v10  ;;  %v28_v19 = vld [vmem:[%s1935_s1 + $0x58] sm:$0xff]  ;;  %v1383_v21 = vcombine.low %v57_v9, %v73_v10  ;;  %v1356_v23 = vcombine.high %v27_v17, %v43_v18  ;;  %v59_v26 = vld [vmem:[%s1935_s1 + $0x150] sm:$0xff] }
  0x10   :  { %696 = vmatprep.mubr.bf16.mxu0 %v1417_v3  ;;  %739 = vmatprep.mubr.bf16.mxu1 %v1417_v3  ;;  %v1386_v16 = vcombine.high %v58_v11, %v74_v12  ;;  %v44_v20 = vld [vmem:[%s1935_s1 + $0xd8] sm:$0xff]  ;;  %v1385_v22 = vcombine.low %v58_v11, %v74_v12  ;;  %v75_v27 = vld [vmem:[%s1935_s1 + $0x1d0] sm:$0xff]  ;;  %v1355_v30 = vcombine.low %v27_v17, %v43_v18  ;;  %v29_v34 = vld [vmem:[%s1935_s1 + $0x60] sm:$0xff] }
  0x11   :  { %v1358_v24 = vcombine.high %v28_v19, %v44_v20  ;;  %v60_v28 = vld [vmem:[%s1935_s1 + $0x158] sm:$0xff]  ;;  %v1357_v31 = vcombine.low %v28_v19, %v44_v20  ;;  %v1388_v32 = vcombine.high %v59_v26, %v75_v27  ;;  %v45_v35 = vld [vmem:[%s1935_s1 + $0xe0] sm:$0xff]  ;;  %v31_v50 = vld [vmem:[%s1935_s1 + $0x70] sm:$0xff] }
  0x12   :  { %667 = vmatpush1.bf16.msra.mxu0 %v1371_v36  ;;  %710 = vmatpush1.bf16.msra.mxu1 %v1373_v37  ;;  %v76_v29 = vld [vmem:[%s1935_s1 + $0x1d8] sm:$0xff]  ;;  %v30_v36 = vld [vmem:[%s1935_s1 + $0x68] sm:$0xff]  ;;  %v1360_v40 = vcombine.high %v29_v34, %v45_v35  ;;  %v61_v42 = vld [vmem:[%s1935_s1 + $0x160] sm:$0xff] }
  0x13   :  { %750 = vmatprep.subr.bf16.mxu0 %v1344_v38  ;;  %793 = vmatprep.subr.bf16.mxu1 %v1346_v39  ;;  %v1390_v33 = vcombine.high %v60_v28, %v76_v29  ;;  %v46_v37 = vld [vmem:[%s1935_s1 + $0xe8] sm:$0xff]  ;;  %v1387_v38 = vcombine.low %v59_v26, %v75_v27  ;;  %v1389_v39 = vcombine.low %v60_v28, %v76_v29  ;;  %v77_v43 = vld [vmem:[%s1935_s1 + $0x1e0] sm:$0xff]  ;;  %v47_v51 = vld [vmem:[%s1935_s1 + $0xf0] sm:$0xff] }
  0x14   :  { %v1362_v41 = vcombine.high %v30_v36, %v46_v37  ;;  %v1392_v48 = vcombine.high %v61_v42, %v77_v43  ;;  %v1364_v56 = vcombine.high %v31_v50, %v47_v51  ;;  %v63_v58 = vld [vmem:[%s1935_s1 + $0x170] sm:$0xff] }
  0x15   :  { %1401 = vmatmul.mubr.msk.bf16.vlgmr.msra.gmra.mrb[4].mxu0 %vm574_vm0, %v1485_v25  ;;  %1402 = vmatmul.mubr.msk.bf16.vlgmr.msra.gmra.mrb[4].mxu1 %vm574_vm0, %v1485_v25  ;;  %v79_v59 = vld [vmem:[%s1935_s1 + $0x1f0] sm:$0xff] }
  0x16   :  { %751 = vmatpush1.bf16.msra.mxu0 %v1343_v44  ;;  %794 = vmatpush1.bf16.msra.mxu1 %v1345_v45  ;;  %v62_v44 = vld [vmem:[%s1935_s1 + $0x168] sm:$0xff]  ;;  %v1396_v0 = vcombine.high %v63_v58, %v79_v59  ;;  %v1395_v2 = vcombine.low %v63_v58, %v79_v59 }
  0x17   :  { %752 = vmatprep.subr.bf16.mxu0 %v1376_v46  ;;  %795 = vmatprep.subr.bf16.mxu1 %v1378_v47  ;;  %v78_v45 = vld [vmem:[%s1935_s1 + $0x1e8] sm:$0xff]  ;;  %v1359_v46 = vcombine.low %v29_v34, %v45_v35  ;;  %v1361_v47 = vcombine.low %v30_v36, %v46_v37 }
  0x18   :  { %782 = vmatprep.mubr.bf16.mxu0 %v1417_v3  ;;  %825 = vmatprep.mubr.bf16.mxu1 %v1417_v3  ;;  %v1394_v49 = vcombine.high %v62_v44, %v78_v45 }
  0x1a   :  { %753 = vmatpush1.bf16.msra.mxu0 %v1375_v52  ;;  %796 = vmatpush1.bf16.msra.mxu1 %v1377_v53  ;;  %v32_v52 = vld [vmem:[%s1935_s1 + $0x78] sm:$0xff] }
  0x1b   :  { %836 = vmatprep.subr.bf16.mxu0 %v1348_v54  ;;  %879 = vmatprep.subr.bf16.mxu1 %v1350_v55  ;;  %v48_v53 = vld [vmem:[%s1935_s1 + $0xf8] sm:$0xff]  ;;  %v1391_v54 = vcombine.low %v61_v42, %v77_v43  ;;  %v1393_v55 = vcombine.low %v62_v44, %v78_v45 }
  0x1c   :  { %v1366_v57 = vcombine.high %v32_v52, %v48_v53 }
  0x1d   :  { %1403 = vmatmul.mubr.msk.bf16.vlgmr.msra.gmra.mrb[8].mxu0 %vm574_vm0, %v1485_v25  ;;  %1404 = vmatmul.mubr.msk.bf16.vlgmr.msra.gmra.mrb[8].mxu1 %vm574_vm0, %v1485_v25 }
  0x1e   :  { %837 = vmatpush1.bf16.msra.mxu0 %v1347_v60  ;;  %880 = vmatpush1.bf16.msra.mxu1 %v1349_v61  ;;  %v64_v60 = vld [vmem:[%s1935_s1 + $0x178] sm:$0xff] }
  0x1f   :  { %838 = vmatprep.subr.bf16.mxu0 %v1380_v62  ;;  %881 = vmatprep.subr.bf16.mxu1 %v1382_v63  ;;  %v80_v61 = vld [vmem:[%s1935_s1 + $0x1f8] sm:$0xff]  ;;  %v1363_v62 = vcombine.low %v31_v50, %v47_v51  ;;  %v1365_v63 = vcombine.low %v32_v52, %v48_v53 }
  0x20   :  { %868 = vmatprep.mubr.bf16.mxu0 %v1417_v3  ;;  %911 = vmatprep.mubr.bf16.mxu1 %v1417_v3  ;;  %v1398_v1 = vcombine.high %v64_v60, %v80_v61  ;;  %v1397_v4 = vcombine.low %v64_v60, %v80_v61 }
  0x22   :  { %839 = vmatpush1.bf16.msra.mxu0 %v1379_v5  ;;  %882 = vmatpush1.bf16.msra.mxu1 %v1381_v6  ;;  %v89_v5 = vlaneseq }
  0x23   :  { %922 = vmatprep.subr.bf16.mxu0 %v1352_v7  ;;  %965 = vmatprep.subr.bf16.mxu1 %v1354_v8  ;;  %v81_v8 = vld [vmem:[%s1937_s2] sm:$0xff] }
  0x24   :  { %v90_v6 = vshrl.u32 %v89_v5, 7 }
  0x25   :  { %1405 = vmatmul.mubr.msk.bf16.vlgmr.msra.gmra.mrb[12].mxu0 %vm574_vm0, %v1485_v25  ;;  %1406 = vmatmul.mubr.msk.bf16.vlgmr.msra.gmra.mrb[12].mxu1 %vm574_vm0, %v1485_v25 }
  0x26   :  { %923 = vmatpush1.bf16.msra.mxu0 %v1351_v13  ;;  %966 = vmatpush1.bf16.msra.mxu1 %v1353_v14  ;;  %v1683_v7 = vsub.s32 0, %v90_v6  ;;  %v1688_v9 = vsub.s32 2, %v90_v6  ;;  %v1690_v10 = vsub.s32 1, %v90_v6  ;;  %v1698_v18 = vsub.s32 4, %v90_v6 }
  0x27   :  { %924 = vmatprep.subr.bf16.mxu0 %v1384_v15  ;;  %967 = vmatprep.subr.bf16.mxu1 %v1386_v16 }
  0x28   :  { %954 = vmatprep.mubr.bf16.mxu0 %v1417_v3  ;;  %997 = vmatprep.mubr.bf16.mxu1 %v1417_v3  ;;  %v92_v11 = vrot.slane %v81_v8, %v1683_v7  ;;  %v100_v12 = vrot.slane %v81_v8, %v1688_v9  ;;  %v108_v35 = vrot.slane %v81_v8, %v1698_v18 }
  0x2a   :  { %925 = vmatpush1.bf16.msra.mxu0 %v1383_v21  ;;  %968 = vmatpush1.bf16.msra.mxu1 %v1385_v22 }
  0x2b   :  { %1008 = vmatprep.subr.bf16.mxu0 %v1356_v23  ;;  %1051 = vmatprep.subr.bf16.mxu1 %v1358_v24  ;;  %v1700_v23 = vsub.s32 6, %v90_v6  ;;  %v1702_v24 = vsub.s32 5, %v90_v6 }
  0x2d   :  { %1407 = vmatmul.mubr.msk.bf16.vlgmr.msra.gmra.mrb[16].mxu0 %vm574_vm0, %v1485_v25  ;;  %1408 = vmatmul.mubr.msk.bf16.vlgmr.msra.gmra.mrb[16].mxu1 %vm574_vm0, %v1485_v25  ;;  %v116_v36 = vrot.slane %v81_v8, %v1700_v23  ;;  %v112_v37 = vrot.slane %v81_v8, %v1702_v24 }
  0x2e   :  { %1009 = vmatpush1.bf16.msra.mxu0 %v1355_v30  ;;  %1052 = vmatpush1.bf16.msra.mxu1 %v1357_v31  ;;  %v1707_v30 = vsub.s32 7, %v90_v6 }
  0x2f   :  { %1010 = vmatprep.subr.bf16.mxu0 %v1388_v32  ;;  %1053 = vmatprep.subr.bf16.mxu1 %v1390_v33 }
  0x30   :  { %1040 = vmatprep.mubr.bf16.mxu0 %v1417_v3  ;;  %1083 = vmatprep.mubr.bf16.mxu1 %v1417_v3 }
  0x32   :  { %1011 = vmatpush1.bf16.msra.mxu0 %v1387_v38  ;;  %1054 = vmatpush1.bf16.msra.mxu1 %v1389_v39  ;;  %v120_v38 = vrot.slane %v81_v8, %v1707_v30 }
  0x33   :  { %1094 = vmatprep.subr.bf16.mxu0 %v1360_v40  ;;  %1137 = vmatprep.subr.bf16.mxu1 %v1362_v41 }
  0x35   :  { %1409 = vmatmul.mubr.msk.bf16.vlgmr.msra.gmra.mrb[20].mxu0 %vm574_vm0, %v1485_v25  ;;  %1410 = vmatmul.mubr.msk.bf16.vlgmr.msra.gmra.mrb[20].mxu1 %vm574_vm0, %v1485_v25 }
  0x36   :  { %1095 = vmatpush1.bf16.msra.mxu0 %v1359_v46  ;;  %1138 = vmatpush1.bf16.msra.mxu1 %v1361_v47  ;;  %v82_v47 = vld [vmem:[%s1937_s2 + $0x8] sm:$0xff] }
  0x37   :  { %1096 = vmatprep.subr.bf16.mxu0 %v1392_v48  ;;  %1139 = vmatprep.subr.bf16.mxu1 %v1394_v49  ;;  %v128_v58 = vrot.slane %v82_v47, %v1690_v10 }
  0x38   :  { %1126 = vmatprep.mubr.bf16.mxu0 %v1417_v3  ;;  %1169 = vmatprep.mubr.bf16.mxu1 %v1417_v3 }
  0x3a   :  { %1097 = vmatpush1.bf16.msra.mxu0 %v1391_v54  ;;  %1140 = vmatpush1.bf16.msra.mxu1 %v1393_v55 }
  0x3b   :  { %1180 = vmatprep.subr.bf16.mxu0 %v1364_v56  ;;  %1223 = vmatprep.subr.bf16.mxu1 %v1366_v57  ;;  %v124_v56 = vrot.slane %v82_v47, %v1683_v7  ;;  %v132_v57 = vrot.slane %v82_v47, %v1688_v9 }
  0x3d   :  { %1411 = vmatmul.mubr.msk.bf16.vlgmr.msra.gmra.mrb[24].mxu0 %vm574_vm0, %v1485_v25  ;;  %1412 = vmatmul.mubr.msk.bf16.vlgmr.msra.gmra.mrb[24].mxu1 %vm574_vm0, %v1485_v25 }
  0x3e   :  { %1181 = vmatpush1.bf16.msra.mxu0 %v1363_v62  ;;  %1224 = vmatpush1.bf16.msra.mxu1 %v1365_v63 }
  0x3f   :  { %1182 = vmatprep.subr.bf16.mxu0 %v1396_v0  ;;  %1225 = vmatprep.subr.bf16.mxu1 %v1398_v1 }
  0x40   :  { %1212 = vmatprep.mubr.bf16.mxu0 %v1417_v3  ;;  %1255 = vmatprep.mubr.bf16.mxu1 %v1417_v3  ;;  %v1692_v3 = vsub.s32 3, %v90_v6 }
  0x42   :  { %1183 = vmatpush1.bf16.msra.mxu0 %v1395_v2  ;;  %1226 = vmatpush1.bf16.msra.mxu1 %v1397_v4  ;;  %v104_v13 = vrot.slane %v81_v8, %v1692_v3  ;;  %v136_v59 = vrot.slane %v82_v47, %v1692_v3 }
  0x45   :  { %1413 = vmatmul.mubr.msk.bf16.vlgmr.msra.gmra.mrb[28].mxu0 %vm574_vm0, %v1485_v25  ;;  %1414 = vmatmul.mubr.msk.bf16.vlgmr.msra.gmra.mrb[28].mxu1 %vm574_vm0, %v1485_v25  ;;  %v96_v25 = vrot.slane %v81_v8, %v1690_v10 }
  0xe0   :  { %v612_v14 = vpop.f32.mrb[0].mxu0  ;;  %v655_v16 = vpop.f32.mrb[0].mxu1 }
  0xe1   :  { %v613_v15 = vadd.f32 %v612_v14, %v92_v11  ;;  %v614_v17 = vpop.f32.mrb[1].mxu0  ;;  %v656_v19 = vadd.f32 %v655_v16, %v100_v12  ;;  %v657_v21 = vpop.f32.mrb[1].mxu1  ;;  %v148_v16 = vrot.slane %v82_v47, %v1700_v23 }
  0xe2   :  { %v615_v20 = vadd.f32 %v614_v17, %v96_v25  ;;  %v616_v22 = vpop.f32.mrb[2].mxu0  ;;  %v658_v26 = vadd.f32 %v657_v21, %v104_v13  ;;  %v659_v28 = vpop.f32.mrb[2].mxu1  ;;  %v144_v17 = vrot.slane %v82_v47, %v1702_v24 }
  0xe3   :  { %1266 = vst [vmem:[%s1938_s3] sm:$0xff] %v613_v15  ;;  %v617_v27 = vadd.f32 %v616_v22, %v92_v11  ;;  %v618_v29 = vpop.f32.mrb[3].mxu0  ;;  %1268 = vst [vmem:[%s1938_s3 + $0x10] sm:$0xff] %v656_v19  ;;  %v660_v31 = vadd.f32 %v659_v28, %v100_v12  ;;  %v661_v33 = vpop.f32.mrb[3].mxu1  ;;  %v140_v15 = vrot.slane %v82_v47, %v1698_v18 }
  0xe4   :  { %1267 = vst [vmem:[%s1938_s3 + $0x8] sm:$0xff] %v615_v20  ;;  %v619_v32 = vadd.f32 %v618_v29, %v96_v25  ;;  %1269 = vst [vmem:[%s1938_s3 + $0x18] sm:$0xff] %v658_v26  ;;  %v662_v34 = vadd.f32 %v661_v33, %v104_v13  ;;  %v152_v19 = vrot.slane %v82_v47, %v1707_v30 }
  0xe5   :  { %1298 = vst [vmem:[%s1938_s3 + $0x100] sm:$0x1] %v617_v27  ;;  %1300 = vst [vmem:[%s1938_s3 + $0x110] sm:$0x1] %v660_v31 }
  0xe6   :  { %1299 = vst [vmem:[%s1938_s3 + $0x108] sm:$0x1] %v619_v32  ;;  %1301 = vst [vmem:[%s1938_s3 + $0x118] sm:$0x1] %v662_v34  ;;  %v83_v32 = vld [vmem:[%s1937_s2 + $0x10] sm:$0xff] }
  0xe8   :  { %v698_v39 = vpop.f32.mrb[4].mxu0  ;;  %v741_v41 = vpop.f32.mrb[4].mxu1 }
  0xe9   :  { %v699_v40 = vadd.f32 %v698_v39, %v108_v35  ;;  %v700_v42 = vpop.f32.mrb[5].mxu0  ;;  %v742_v43 = vadd.f32 %v741_v41, %v116_v36  ;;  %v743_v45 = vpop.f32.mrb[5].mxu1  ;;  %v156_v41 = vrot.slane %v83_v32, %v1683_v7 }
  0xea   :  { %v701_v44 = vadd.f32 %v700_v42, %v112_v37  ;;  %v702_v46 = vpop.f32.mrb[6].mxu0  ;;  %v744_v48 = vadd.f32 %v743_v45, %v120_v38  ;;  %v745_v50 = vpop.f32.mrb[6].mxu1  ;;  %v164_v42 = vrot.slane %v83_v32, %v1688_v9 }
  0xeb   :  { %1270 = vst [vmem:[%s1938_s3 + $0x20] sm:$0xff] %v699_v40  ;;  %v703_v49 = vadd.f32 %v702_v46, %v108_v35  ;;  %v704_v51 = vpop.f32.mrb[7].mxu0  ;;  %1272 = vst [vmem:[%s1938_s3 + $0x30] sm:$0xff] %v742_v43  ;;  %v746_v52 = vadd.f32 %v745_v50, %v116_v36  ;;  %v747_v54 = vpop.f32.mrb[7].mxu1  ;;  %v160_v43 = vrot.slane %v83_v32, %v1690_v10 }
  0xec   :  { %1271 = vst [vmem:[%s1938_s3 + $0x28] sm:$0xff] %v701_v44  ;;  %v705_v53 = vadd.f32 %v704_v51, %v112_v37  ;;  %1273 = vst [vmem:[%s1938_s3 + $0x38] sm:$0xff] %v744_v48  ;;  %v748_v55 = vadd.f32 %v747_v54, %v120_v38  ;;  %v168_v44 = vrot.slane %v83_v32, %v1692_v3 }
  0xed   :  { %1302 = vst [vmem:[%s1938_s3 + $0x120] sm:$0x1] %v703_v49  ;;  %1304 = vst [vmem:[%s1938_s3 + $0x130] sm:$0x1] %v746_v52 }
  0xee   :  { %1303 = vst [vmem:[%s1938_s3 + $0x128] sm:$0x1] %v705_v53  ;;  %1305 = vst [vmem:[%s1938_s3 + $0x138] sm:$0x1] %v748_v55 }
  0xf0   :  { %v784_v60 = vpop.f32.mrb[8].mxu0  ;;  %v827_v62 = vpop.f32.mrb[8].mxu1 }
  0xf1   :  { %v785_v61 = vadd.f32 %v784_v60, %v124_v56  ;;  %v786_v63 = vpop.f32.mrb[9].mxu0  ;;  %v828_v0 = vadd.f32 %v827_v62, %v132_v57  ;;  %v829_v2 = vpop.f32.mrb[9].mxu1  ;;  %v180_v62 = vrot.slane %v83_v32, %v1700_v23 }
  0xf2   :  { %v787_v1 = vadd.f32 %v786_v63, %v128_v58  ;;  %v788_v4 = vpop.f32.mrb[10].mxu0  ;;  %v830_v5 = vadd.f32 %v829_v2, %v136_v59  ;;  %v831_v8 = vpop.f32.mrb[10].mxu1  ;;  %v176_v63 = vrot.slane %v83_v32, %v1702_v24 }
  0xf3   :  { %1274 = vst [vmem:[%s1938_s3 + $0x40] sm:$0xff] %v785_v61  ;;  %v789_v6 = vadd.f32 %v788_v4, %v124_v56  ;;  %v790_v11 = vpop.f32.mrb[11].mxu0  ;;  %1276 = vst [vmem:[%s1938_s3 + $0x50] sm:$0xff] %v828_v0  ;;  %v832_v12 = vadd.f32 %v831_v8, %v132_v57  ;;  %v833_v13 = vpop.f32.mrb[11].mxu1  ;;  %v172_v61 = vrot.slane %v83_v32, %v1698_v18 }
  0xf4   :  { %1275 = vst [vmem:[%s1938_s3 + $0x48] sm:$0xff] %v787_v1  ;;  %v791_v25 = vadd.f32 %v790_v11, %v128_v58  ;;  %1277 = vst [vmem:[%s1938_s3 + $0x58] sm:$0xff] %v830_v5  ;;  %v834_v14 = vadd.f32 %v833_v13, %v136_v59  ;;  %v184_v0 = vrot.slane %v83_v32, %v1707_v30 }
  0xf5   :  { %1306 = vst [vmem:[%s1938_s3 + $0x140] sm:$0x1] %v789_v6  ;;  %1308 = vst [vmem:[%s1938_s3 + $0x150] sm:$0x1] %v832_v12 }
  0xf6   :  { %1307 = vst [vmem:[%s1938_s3 + $0x148] sm:$0x1] %v791_v25  ;;  %1309 = vst [vmem:[%s1938_s3 + $0x158] sm:$0x1] %v834_v14  ;;  %v84_v25 = vld [vmem:[%s1937_s2 + $0x18] sm:$0xff] }
  0xf8   :  { %v870_v20 = vpop.f32.mrb[12].mxu0  ;;  %v913_v22 = vpop.f32.mrb[12].mxu1 }
  0xf9   :  { %v871_v21 = vadd.f32 %v870_v20, %v140_v15  ;;  %v872_v26 = vpop.f32.mrb[13].mxu0  ;;  %v914_v27 = vadd.f32 %v913_v22, %v148_v16  ;;  %v915_v29 = vpop.f32.mrb[13].mxu1  ;;  %v188_v22 = vrot.slane %v84_v25, %v1683_v7 }
  0xfa   :  { %v873_v28 = vadd.f32 %v872_v26, %v144_v17  ;;  %v874_v31 = vpop.f32.mrb[14].mxu0  ;;  %v916_v33 = vadd.f32 %v915_v29, %v152_v19  ;;  %v917_v35 = vpop.f32.mrb[14].mxu1  ;;  %v196_v26 = vrot.slane %v84_v25, %v1688_v9 }
  0xfb   :  { %1278 = vst [vmem:[%s1938_s3 + $0x60] sm:$0xff] %v871_v21  ;;  %v875_v34 = vadd.f32 %v874_v31, %v140_v15  ;;  %v876_v36 = vpop.f32.mrb[15].mxu0  ;;  %1280 = vst [vmem:[%s1938_s3 + $0x70] sm:$0xff] %v914_v27  ;;  %v918_v37 = vadd.f32 %v917_v35, %v148_v16  ;;  %v919_v39 = vpop.f32.mrb[15].mxu1  ;;  %v192_v27 = vrot.slane %v84_v25, %v1690_v10 }
  0xfc   :  { %1279 = vst [vmem:[%s1938_s3 + $0x68] sm:$0xff] %v873_v28  ;;  %v877_v38 = vadd.f32 %v876_v36, %v144_v17  ;;  %1281 = vst [vmem:[%s1938_s3 + $0x78] sm:$0xff] %v916_v33  ;;  %v920_v40 = vadd.f32 %v919_v39, %v152_v19  ;;  %v200_v28 = vrot.slane %v84_v25, %v1692_v3 }
  0xfd   :  { %1310 = vst [vmem:[%s1938_s3 + $0x160] sm:$0x1] %v875_v34  ;;  %1312 = vst [vmem:[%s1938_s3 + $0x170] sm:$0x1] %v918_v37 }
  0xfe   :  { %1311 = vst [vmem:[%s1938_s3 + $0x168] sm:$0x1] %v877_v38  ;;  %1313 = vst [vmem:[%s1938_s3 + $0x178] sm:$0x1] %v920_v40 }
 0x100   :  { %v956_v45 = vpop.f32.mrb[16].mxu0  ;;  %v999_v47 = vpop.f32.mrb[16].mxu1 }
 0x101   :  { %v957_v46 = vadd.f32 %v956_v45, %v156_v41  ;;  %v958_v48 = vpop.f32.mrb[17].mxu0  ;;  %v1000_v49 = vadd.f32 %v999_v47, %v164_v42  ;;  %v1001_v51 = vpop.f32.mrb[17].mxu1  ;;  %v216_v45 = vrot.slane %v84_v25, %v1707_v30 }
 0x102   :  { %v959_v50 = vadd.f32 %v958_v48, %v160_v43  ;;  %v960_v52 = vpop.f32.mrb[18].mxu0  ;;  %v1002_v53 = vadd.f32 %v1001_v51, %v168_v44  ;;  %v1003_v55 = vpop.f32.mrb[18].mxu1 }
 0x103   :  { %1282 = vst [vmem:[%s1938_s3 + $0x80] sm:$0xff] %v957_v46  ;;  %v961_v54 = vadd.f32 %v960_v52, %v156_v41  ;;  %v962_v56 = vpop.f32.mrb[19].mxu0  ;;  %1284 = vst [vmem:[%s1938_s3 + $0x90] sm:$0xff] %v1000_v49  ;;  %v1004_v57 = vadd.f32 %v1003_v55, %v164_v42  ;;  %v1005_v59 = vpop.f32.mrb[19].mxu1  ;;  %v204_v42 = vrot.slane %v84_v25, %v1698_v18 }
 0x104   :  { %1283 = vst [vmem:[%s1938_s3 + $0x88] sm:$0xff] %v959_v50  ;;  %v963_v58 = vadd.f32 %v962_v56, %v160_v43  ;;  %1285 = vst [vmem:[%s1938_s3 + $0x98] sm:$0xff] %v1002_v53  ;;  %v1006_v60 = vadd.f32 %v1005_v59, %v168_v44  ;;  %v212_v43 = vrot.slane %v84_v25, %v1700_v23 }
 0x105   :  { %1314 = vst [vmem:[%s1938_s3 + $0x180] sm:$0x1] %v961_v54  ;;  %1316 = vst [vmem:[%s1938_s3 + $0x190] sm:$0x1] %v1004_v57  ;;  %v208_v44 = vrot.slane %v84_v25, %v1702_v24 }
 0x106   :  { %1315 = vst [vmem:[%s1938_s3 + $0x188] sm:$0x1] %v963_v58  ;;  %1317 = vst [vmem:[%s1938_s3 + $0x198] sm:$0x1] %v1006_v60 }
 0x108   :  { %v1042_v1 = vpop.f32.mrb[20].mxu0  ;;  %v1085_v4 = vpop.f32.mrb[20].mxu1 }
 0x109   :  { %v1043_v2 = vadd.f32 %v1042_v1, %v172_v61  ;;  %v1044_v5 = vpop.f32.mrb[21].mxu0  ;;  %v1086_v6 = vadd.f32 %v1085_v4, %v180_v62  ;;  %v1087_v11 = vpop.f32.mrb[21].mxu1 }
 0x10a   :  { %v1045_v8 = vadd.f32 %v1044_v5, %v176_v63  ;;  %v1046_v12 = vpop.f32.mrb[22].mxu0  ;;  %v1088_v13 = vadd.f32 %v1087_v11, %v184_v0  ;;  %v1089_v15 = vpop.f32.mrb[22].mxu1 }
 0x10b   :  { %1286 = vst [vmem:[%s1938_s3 + $0xa0] sm:$0xff] %v1043_v2  ;;  %v1047_v14 = vadd.f32 %v1046_v12, %v172_v61  ;;  %v1048_v16 = vpop.f32.mrb[23].mxu0  ;;  %1288 = vst [vmem:[%s1938_s3 + $0xb0] sm:$0xff] %v1086_v6  ;;  %v1090_v17 = vadd.f32 %v1089_v15, %v180_v62  ;;  %v1091_v20 = vpop.f32.mrb[23].mxu1 }
 0x10c   :  { %1287 = vst [vmem:[%s1938_s3 + $0xa8] sm:$0xff] %v1045_v8  ;;  %v1049_v19 = vadd.f32 %v1048_v16, %v176_v63  ;;  %1289 = vst [vmem:[%s1938_s3 + $0xb8] sm:$0xff] %v1088_v13  ;;  %v1092_v21 = vadd.f32 %v1091_v20, %v184_v0 }
 0x10d   :  { %1318 = vst [vmem:[%s1938_s3 + $0x1a0] sm:$0x1] %v1047_v14  ;;  %1320 = vst [vmem:[%s1938_s3 + $0x1b0] sm:$0x1] %v1090_v17 }
 0x10e   :  { %1319 = vst [vmem:[%s1938_s3 + $0x1a8] sm:$0x1] %v1049_v19  ;;  %1321 = vst [vmem:[%s1938_s3 + $0x1b8] sm:$0x1] %v1092_v21 }
 0x110   :  { %v1128_v29 = vpop.f32.mrb[24].mxu0  ;;  %v1171_v31 = vpop.f32.mrb[24].mxu1 }
 0x111   :  { %v1129_v7 = vadd.f32 %v1128_v29, %v188_v22  ;;  %v1130_v32 = vpop.f32.mrb[25].mxu0  ;;  %v1172_v33 = vadd.f32 %v1171_v31, %v196_v26  ;;  %v1173_v35 = vpop.f32.mrb[25].mxu1 }
 0x112   :  { %v1131_v34 = vadd.f32 %v1130_v32, %v192_v27  ;;  %v1132_v36 = vpop.f32.mrb[26].mxu0  ;;  %v1174_v9 = vadd.f32 %v1173_v35, %v200_v28  ;;  %v1175_v37 = vpop.f32.mrb[26].mxu1 }
 0x113   :  { %1290 = vst [vmem:[%s1938_s3 + $0xc0] sm:$0xff] %v1129_v7  ;;  %v1133_v10 = vadd.f32 %v1132_v36, %v188_v22  ;;  %v1134_v38 = vpop.f32.mrb[27].mxu0  ;;  %1292 = vst [vmem:[%s1938_s3 + $0xd0] sm:$0xff] %v1172_v33  ;;  %v1176_v3 = vadd.f32 %v1175_v37, %v196_v26  ;;  %v1177_v40 = vpop.f32.mrb[27].mxu1 }
 0x114   :  { %1291 = vst [vmem:[%s1938_s3 + $0xc8] sm:$0xff] %v1131_v34  ;;  %v1135_v39 = vadd.f32 %v1134_v38, %v192_v27  ;;  %1293 = vst [vmem:[%s1938_s3 + $0xd8] sm:$0xff] %v1174_v9  ;;  %v1178_v41 = vadd.f32 %v1177_v40, %v200_v28 }
 0x115   :  { %1322 = vst [vmem:[%s1938_s3 + $0x1c0] sm:$0x1] %v1133_v10  ;;  %1324 = vst [vmem:[%s1938_s3 + $0x1d0] sm:$0x1] %v1176_v3 }
 0x116   :  { %1323 = vst [vmem:[%s1938_s3 + $0x1c8] sm:$0x1] %v1135_v39  ;;  %1325 = vst [vmem:[%s1938_s3 + $0x1d8] sm:$0x1] %v1178_v41 }
 0x118   :  { %v1214_v46 = vpop.f32.mrb[28].mxu0  ;;  %v1257_v47 = vpop.f32.mrb[28].mxu1 }
 0x119   :  { %v1215_v18 = vadd.f32 %v1214_v46, %v204_v42  ;;  %v1216_v48 = vpop.f32.mrb[29].mxu0  ;;  %v1258_v49 = vadd.f32 %v1257_v47, %v212_v43  ;;  %v1259_v51 = vpop.f32.mrb[29].mxu1 }
 0x11a   :  { %v1217_v50 = vadd.f32 %v1216_v48, %v208_v44  ;;  %v1218_v52 = vpop.f32.mrb[30].mxu0  ;;  %v1260_v23 = vadd.f32 %v1259_v51, %v216_v45  ;;  %v1261_v53 = vpop.f32.mrb[30].mxu1 }
 0x11b   :  { %1294 = vst [vmem:[%s1938_s3 + $0xe0] sm:$0xff] %v1215_v18  ;;  %v1219_v24 = vadd.f32 %v1218_v52, %v204_v42  ;;  %v1220_v54 = vpop.f32.mrb[31].mxu0  ;;  %1296 = vst [vmem:[%s1938_s3 + $0xf0] sm:$0xff] %v1258_v49  ;;  %v1262_v30 = vadd.f32 %v1261_v53, %v212_v43  ;;  %v1263_v56 = vpop.f32.mrb[31].mxu1 }
 0x11c   :  { %1295 = vst [vmem:[%s1938_s3 + $0xe8] sm:$0xff] %v1217_v50  ;;  %v1221_v55 = vadd.f32 %v1220_v54, %v208_v44  ;;  %1297 = vst [vmem:[%s1938_s3 + $0xf8] sm:$0xff] %v1260_v23  ;;  %v1264_v57 = vadd.f32 %v1263_v56, %v216_v45 }
 0x11d   :  { %1326 = vst [vmem:[%s1938_s3 + $0x1e0] sm:$0x1] %v1219_v24  ;;  %1328 = vst [vmem:[%s1938_s3 + $0x1f0] sm:$0x1] %v1262_v30 }
 0x11e   :  { %1327 = vst [vmem:[%s1938_s3 + $0x1e8] sm:$0x1] %v1221_v55  ;;  %1329 = vst [vmem:[%s1938_s3 + $0x1f8] sm:$0x1] %v1264_v57 }

// kernel: dofa_wrapper_forward.11
= control target key start
LH: loop header
LB: loop body
LE: loop exit
PB: predicated region body
PF: predicated region fallthrough
CT: control target
= control target key end

     0   :  { %v101_v0 = vmov 0.0   ;;  %vm102_vm0 = vmmov 0   ;;  %vm33_vm1 = vcmask 261120   ;;  %vm77_vm2 = vcmask 516096   ;;  %s138_s1 = inlined_call_operand.vmem [shape: bf16[32,64], index: 1, kind: input, shape index: {}]   ;;  %s139_s0 = inlined_call_operand.vmem [shape: bf16[1,32], index: 0, kind: input, shape index: {}]   ;;  %s140_s2 = inlined_call_operand.vmem [shape: f32[1,64], index: 2, kind: input, shape index: {}]   ;;  %s141_s3 = inlined_call_operand.vmem [shape: f32[1,64], index: 3, kind: output, shape index: {}]  }
   0x1   :  { %89 = vmatprep.subr.bf16.mxu0 %v101_v0  ;;  %v99_v1 = vld [vmem:[%s138_s1] sm:$0xff]   ;;  %93 = vmatprep.mubr.msk.bf16.mxu0 %vm102_vm0, %v101_v0  ;;  %v100_v2 = vld [vmem:[%s138_s1 + $0x8] sm:$0xff]  }
   0x2   :  { %90 = vmatpush3.bf16.msra.mxu0 %v99_v1  ;;  %v15_v3 = vld [vmem:[%s139_s0] sm:$0x1] }
   0x3   :  { %91 = vmatprep.subr.bf16.mxu0 %v101_v0  ;;  %v20_v4 = vld [vmem:[%s140_s2] sm:$0x1] }
   0x6   :  { %92 = vmatpush3.bf16.msra.mxu0 %v100_v2 }
   0x9   :  { %94 = vmatmul.mubr.msk.bf16.vlgmr.msra.gmra.mrb[0].mxu0 %vm33_vm1, %v15_v3 }
  0xdc   :  { %v71_v5 = vpop.f32.mrb[0].mxu0 }
  0xdd   :  { %v72_v6 = vadd.f32 %v71_v5, %v20_v4  ;;  %v95_v7 = vpop.f32.mrb[1].mxu0 }
  0xde   :  { %v74_v8 = vpop.f32.mrb[2].mxu0 }
  0xdf   :  { %78 = vst.msk [vmem:[%s141_s3] sm:$0x1] %vm77_vm2, %v72_v6  ;;  %v96_v9 = vpop.f32.mrb[3].mxu0 }

// kernel: dofa_wrapper_forward.9
= control target key start
LH: loop header
LB: loop body
LE: loop exit
PB: predicated region body
PF: predicated region fallthrough
CT: control target
= control target key end

     0   :  { %v9000_v0 = vmov 0.0   ;;  %vm5509_vm0 = vmmov 0   ;;  %vm95_vm1 = vcmask 261120   ;;  %v9002_v30 = vmov 0   ;;  %s5511_s14 = smov 88   ;;  %s5512_s15 = smov 96   ;;  %s8986_s1 = inlined_call_operand.vmem [shape: bf16[32,96], index: 1, kind: input, shape index: {}]   ;;  %s8987_s0 = inlined_call_operand.vmem [shape: f32[138,32], index: 0, kind: input, shape index: {}]   ;;  %s8988_s2 = inlined_call_operand.vmem [shape: f32[1,96], index: 2, kind: input, shape index: {}]   ;;  %s8989_s3 = inlined_call_operand.vmem [shape: bf16[32,32], index: 3, kind: input, shape index: {}]   ;;  %s8990_s4 = inlined_call_operand.vmem [shape: f32[1,32], index: 4, kind: input, shape index: {}]   ;;  %s8991_s7 = inlined_call_operand.vmem [shape: bf16[32,128], index: 7, kind: input, shape index: {}]   ;;  %s8992_s9 = inlined_call_operand.vmem [shape: bf16[128,32], index: 9, kind: input, shape index: {}]   ;;  %s8993_s5 = inlined_call_operand.vmem [shape: f32[1,32], index: 5, kind: input, shape index: {}]   ;;  %s8994_s6 = inlined_call_operand.vmem [shape: f32[1,32], index: 6, kind: input, shape index: {}]   ;;  %s8995_s8 = inlined_call_operand.vmem [shape: f32[1,128], index: 8, kind: input, shape index: {}]   ;;  %s8996_s10 = inlined_call_operand.vmem [shape: f32[1,32], index: 10, kind: input, shape index: {}]   ;;  %s8997_s11 = inlined_call_operand.vmem [shape: f32[1,32], index: 11, kind: input, shape index: {}]   ;;  %s8998_s12 = inlined_call_operand.vmem [shape: f32[1,32], index: 12, kind: input, shape index: {}]   ;;  %s8999_s13 = inlined_call_operand.vmem [shape: f32[138,32], index: 13, kind: output, shape index: {}]  }
   0x1   :  { %4743 = vmatprep.subr.bf16.mxu0 %v9000_v0  ;;  %v4936_v1 = vld [vmem:[%s8986_s1] sm:$0xff]   ;;  %4747 = vmatprep.mubr.msk.bf16.mxu0 %vm5509_vm0, %v9000_v0  ;;  %v4937_v2 = vld [vmem:[%s8986_s1 + $0x8] sm:$0xff]   ;;  %v47_v6 = vld [vmem:[%s8987_s0 + $0x10] sm:$0xff]  ;;  %s5514_s16 = smov 120   ;;  %s5515_s1 = smov 112   ;;  %vm264_vm2 = vcmask 64512  }
   0x2   :  { %4744 = vmatpush3.bf16.msra.mxu0 %v4936_v1  ;;  %v45_v3 = vld [vmem:[%s8987_s0] sm:$0xff]  ;;  %v46_v4 = vld [vmem:[%s8987_s0 + $0x8] sm:$0xff]  ;;  %v48_v7 = vld [vmem:[%s8987_s0 + $0x18] sm:$0xff]  ;;  %319 = vmatprep.subr.bf16.mxu1 %v9002_v30  ;;  %s5516_s17 = smov 72   ;;  %s5517_s18 = smov 104   ;;  %vm860_vm3 = vcmask 1044480  }
   0x3   :  { %4745 = vmatprep.subr.bf16.mxu0 %v9000_v0  ;;  %v63_v5 = vpack.c.bf16 %v46_v4, %v45_v3  ;;  %v64_v8 = vpack.c.bf16 %v48_v7, %v47_v6  ;;  %v49_v9 = vld [vmem:[%s8987_s0 + $0x20] sm:$0xff]  ;;  %v50_v10 = vld [vmem:[%s8987_s0 + $0x28] sm:$0xff]  ;;  %v51_v12 = vld [vmem:[%s8987_s0 + $0x30] sm:$0xff]  ;;  %351 = vmatprep.mubr.bf16.mxu1 %v9002_v30  ;;  %s5518_s19 = smov 64   ;;  %s5519_s20 = smov 56   ;;  %vm478_vm4 = vcmask 80896  }
   0x4   :  { %v65_v11 = vpack.c.bf16 %v50_v10, %v49_v9  ;;  %v52_v13 = vld [vmem:[%s8987_s0 + $0x38] sm:$0xff]  ;;  %v53_v15 = vld [vmem:[%s8987_s0 + $0x40] sm:$0xff]  ;;  %v54_v16 = vld [vmem:[%s8987_s0 + $0x48] sm:$0xff]  ;;  %s5520_s21 = smov 48   ;;  %vm547_vm5 = vcmask 1041408   ;;  %vm549_vm6 = vcmask 74752  }
   0x5   :  { %v66_v14 = vpack.c.bf16 %v52_v13, %v51_v12  ;;  %v67_v17 = vpack.c.bf16 %v54_v16, %v53_v15  ;;  %v55_v18 = vld [vmem:[%s8987_s0 + $0x50] sm:$0xff]  ;;  %v56_v19 = vld [vmem:[%s8987_s0 + $0x58] sm:$0xff]  ;;  %v57_v21 = vld [vmem:[%s8987_s0 + $0x60] sm:$0xff]  ;;  %s5521_s22 = smov 40   ;;  %s5522_s23 = smov 8   ;;  %vm3321_vm7 = vcmask 130048  }
   0x6   :  { %4746 = vmatpush3.bf16.msra.mxu0 %v4937_v2  ;;  %v68_v20 = vpack.c.bf16 %v56_v19, %v55_v18  ;;  %v58_v22 = vld [vmem:[%s8987_s0 + $0x68] sm:$0xff]  ;;  %v59_v24 = vld [vmem:[%s8987_s0 + $0x70] sm:$0xff]  ;;  %v60_v25 = vld [vmem:[%s8987_s0 + $0x78] sm:$0xff]  ;;  %s5523_s24 = smov 16   ;;  %s5524_s29 = smov 24   ;;  %vm3340_vm8 = vcmask 195584  }
   0x7   :  { %v69_v23 = vpack.c.bf16 %v58_v22, %v57_v21  ;;  %v70_v26 = vpack.c.bf16 %v60_v25, %v59_v24  ;;  %v61_v27 = vld [vmem:[%s8987_s0 + $0x80] sm:$0xff]  ;;  %v62_v28 = vld [vmem:[%s8987_s0 + $0x88] sm:$0x3]  ;;  %864 = vmatprep.subr.bf16.mxu0 %v9002_v30  ;;  %vm3576_vm9 = vcmask 254976  }
   0x8   :  { %v71_v29 = vpack.c.bf16 %v62_v28, %v61_v27  ;;  %v5690_v31 = vld [vmem:[%s8988_s2] ss:$0 sm:$0xff]  ;;  %s5513_s2 = smov 80  }
   0x9   :  { %4748 = vmatmul.mubr.msk.bf16.vlgmr.msra.gmra.mrb[0].mxu0 %vm95_vm1, %v63_v5 }
   0xa   :  { %4751 = vmatprep.mubr.msk.bf16.mxu0 %vm5509_vm0, %v9000_v0 }
  0x11   :  { %4752 = vmatmul.mubr.msk.bf16.gmra.mrb[4].mxu0 %vm95_vm1, %v64_v8 }
  0x12   :  { %4755 = vmatprep.mubr.msk.bf16.mxu0 %vm5509_vm0, %v9000_v0 }
  0x19   :  { %4756 = vmatmul.mubr.msk.bf16.gmra.mrb[8].mxu0 %vm95_vm1, %v65_v11 }
  0x1a   :  { %4759 = vmatprep.mubr.msk.bf16.mxu0 %vm5509_vm0, %v9000_v0 }
  0x21   :  { %4760 = vmatmul.mubr.msk.bf16.gmra.mrb[12].mxu0 %vm95_vm1, %v66_v14 }
  0x22   :  { %4763 = vmatprep.mubr.msk.bf16.mxu0 %vm5509_vm0, %v9000_v0 }
  0x29   :  { %4764 = vmatmul.mubr.msk.bf16.gmra.mrb[16].mxu0 %vm95_vm1, %v67_v17 }
  0x2a   :  { %4767 = vmatprep.mubr.msk.bf16.mxu0 %vm5509_vm0, %v9000_v0 }
  0x31   :  { %4768 = vmatmul.mubr.msk.bf16.gmra.mrb[20].mxu0 %vm95_vm1, %v68_v20 }
  0x32   :  { %4771 = vmatprep.mubr.msk.bf16.mxu0 %vm5509_vm0, %v9000_v0 }
  0x39   :  { %4772 = vmatmul.mubr.msk.bf16.gmra.mrb[24].mxu0 %vm95_vm1, %v69_v23 }
  0x3a   :  { %4775 = vmatprep.mubr.msk.bf16.mxu0 %vm5509_vm0, %v9000_v0 }
  0x41   :  { %4776 = vmatmul.mubr.msk.bf16.gmra.mrb[28].mxu0 %vm95_vm1, %v70_v26 }
  0x42   :  { %4779 = vmatprep.mubr.msk.bf16.mxu0 %vm5509_vm0, %v9000_v0 }
  0x49   :  { %4780 = vmatmul.mubr.msk.bf16.gmra.mrb[32].mxu0 %vm95_vm1, %v71_v29 }
  0xdc   :  { %v157_v32 = vpop.f32.mrb[0].mxu0 }
  0xdd   :  { %v4749_v33 = vpop.f32.mrb[1].mxu0  ;;  %v158_v35 = vadd.f32 %v5690_v31, %v157_v32 }
  0xde   :  { %v160_v34 = vpop.f32.mrb[2].mxu0 }
  0xdf   :  { %v161_v36 = vadd.f32 %v5690_v31, %v160_v34  ;;  %v4750_v37 = vpop.f32.mrb[3].mxu0 }
  0xe1   :  { %v5694_v38 = vpack.c.bf16 %v161_v36, %v158_v35 }
  0xe3   :  { %9190 = vst [vmem:[#allocation2_spill] sm:$0xff] %v5694_v38  ;;  %996 = vrot.lane.b32.xlu1 %v5694_v38, %s5511_s14  ;;  %246 = vrot.lane.b32.xlu0 %v5694_v38, %s5512_s15 }
  0xe4   :  { %v165_v39 = vpop.f32.mrb[4].mxu0 }
  0xe5   :  { %v4753_v40 = vpop.f32.mrb[5].mxu0  ;;  %v166_v42 = vadd.f32 %v5690_v31, %v165_v39 }
  0xe6   :  { %v168_v41 = vpop.f32.mrb[6].mxu0 }
  0xe7   :  { %v169_v43 = vadd.f32 %v5690_v31, %v168_v41  ;;  %1741 = vrot.lane.b32.xlu1 %v5694_v38, %s5513_s2  ;;  %978 = vrot.lane.b32.xlu0 %v5694_v38, %s5514_s16  ;;  %v4754_v44 = vpop.f32.mrb[7].mxu0 }
  0xe9   :  { %v5706_v45 = vpack.c.bf16 %v169_v43, %v166_v42 }
  0xeb   :  { %9191 = vst [vmem:[#allocation3_spill] sm:$0xff] %v5706_v45  ;;  %248 = vrot.lane.b32.xlu0 %v5706_v45, %s5512_s15 }
  0xec   :  { %v173_v46 = vpop.f32.mrb[8].mxu0 }
  0xed   :  { %v4757_v47 = vpop.f32.mrb[9].mxu0  ;;  %v174_v49 = vadd.f32 %v5690_v31, %v173_v46 }
  0xee   :  { %v176_v48 = vpop.f32.mrb[10].mxu0 }
  0xef   :  { %v177_v50 = vadd.f32 %v5690_v31, %v176_v48  ;;  %998 = vrot.lane.b32.xlu0 %v5706_v45, %s5511_s14  ;;  %v4758_v51 = vpop.f32.mrb[11].mxu0 }
  0xf1   :  { %v5714_v52 = vpack.c.bf16 %v177_v50, %v174_v49 }
  0xf3   :  { %9192 = vst [vmem:[#allocation4_spill] sm:$0xff] %v5714_v52  ;;  %980 = vrot.lane.b32.xlu0 %v5706_v45, %s5514_s16  ;;  %250 = vrot.lane.b32.xlu1 %v5714_v52, %s5512_s15 }
  0xf4   :  { %v181_v53 = vpop.f32.mrb[12].mxu0 }
  0xf5   :  { %v4761_v54 = vpop.f32.mrb[13].mxu0  ;;  %v182_v56 = vadd.f32 %v5690_v31, %v181_v53 }
  0xf6   :  { %v184_v55 = vpop.f32.mrb[14].mxu0 }
  0xf7   :  { %v185_v57 = vadd.f32 %v5690_v31, %v184_v55  ;;  %982 = vrot.lane.b32.xlu0 %v5714_v52, %s5514_s16  ;;  %1000 = vrot.lane.b32.xlu1 %v5714_v52, %s5511_s14  ;;  %v4762_v58 = vpop.f32.mrb[15].mxu0 }
  0xf9   :  { %v5726_v59 = vpack.c.bf16 %v185_v57, %v182_v56 }
  0xfb   :  { %9193 = vst [vmem:[#allocation5_spill] sm:$0xff] %v5726_v59  ;;  %1002 = vrot.lane.b32.xlu0 %v5726_v59, %s5511_s14  ;;  %252 = vrot.lane.b32.xlu1 %v5726_v59, %s5512_s15 }
  0xfc   :  { %v189_v60 = vpop.f32.mrb[16].mxu0 }
  0xfd   :  { %v4765_v61 = vpop.f32.mrb[17].mxu0  ;;  %v190_v63 = vadd.f32 %v5690_v31, %v189_v60 }
  0xfe   :  { %v192_v62 = vpop.f32.mrb[18].mxu0 }
  0xff   :  { %v193_v1 = vadd.f32 %v5690_v31, %v192_v62  ;;  %984 = vrot.lane.b32.xlu0 %v5726_v59, %s5514_s16  ;;  %1743 = vrot.lane.b32.xlu1 %v5706_v45, %s5513_s2  ;;  %v4766_v2 = vpop.f32.mrb[19].mxu0 }
 0x101   :  { %v5738_v3 = vpack.c.bf16 %v193_v1, %v190_v63 }
 0x103   :  { %9194 = vst [vmem:[#allocation6_spill] sm:$0xff] %v5738_v3  ;;  %1745 = vrot.lane.b32.xlu1 %v5714_v52, %s5513_s2  ;;  %254 = vrot.lane.b32.xlu0 %v5738_v3, %s5512_s15 }
 0x104   :  { %v197_v4 = vpop.f32.mrb[20].mxu0 }
 0x105   :  { %v4769_v5 = vpop.f32.mrb[21].mxu0  ;;  %v198_v7 = vadd.f32 %v5690_v31, %v197_v4 }
 0x106   :  { %v200_v6 = vpop.f32.mrb[22].mxu0 }
 0x107   :  { %v201_v8 = vadd.f32 %v5690_v31, %v200_v6  ;;  %1004 = vrot.lane.b32.xlu1 %v5738_v3, %s5511_s14  ;;  %986 = vrot.lane.b32.xlu0 %v5738_v3, %s5514_s16  ;;  %v4770_v9 = vpop.f32.mrb[23].mxu0 }
 0x109   :  { %v5750_v10 = vpack.c.bf16 %v201_v8, %v198_v7 }
 0x10b   :  { %9195 = vst [vmem:[#allocation7_spill] sm:$0xff] %v5750_v10  ;;  %1006 = vrot.lane.b32.xlu0 %v5750_v10, %s5511_s14  ;;  %256 = vrot.lane.b32.xlu1 %v5750_v10, %s5512_s15 }
 0x10c   :  { %v205_v11 = vpop.f32.mrb[24].mxu0 }
 0x10d   :  { %v4773_v12 = vpop.f32.mrb[25].mxu0  ;;  %v206_v14 = vadd.f32 %v5690_v31, %v205_v11 }
 0x10e   :  { %v208_v13 = vpop.f32.mrb[26].mxu0 }
 0x10f   :  { %v209_v15 = vadd.f32 %v5690_v31, %v208_v13  ;;  %988 = vrot.lane.b32.xlu0 %v5750_v10, %s5514_s16  ;;  %1747 = vrot.lane.b32.xlu1 %v5726_v59, %s5513_s2  ;;  %v4774_v16 = vpop.f32.mrb[27].mxu0 }
 0x111   :  { %v5762_v17 = vpack.c.bf16 %v209_v15, %v206_v14 }
 0x113   :  { %9196 = vst [vmem:[#allocation8_spill] sm:$0xff] %v5762_v17  ;;  %1749 = vrot.lane.b32.xlu1 %v5738_v3, %s5513_s2  ;;  %258 = vrot.lane.b32.xlu0 %v5762_v17, %s5512_s15 }
 0x114   :  { %v213_v18 = vpop.f32.mrb[28].mxu0 }
 0x115   :  { %v214_v19 = vadd.f32 %v5690_v31, %v213_v18  ;;  %v4777_v20 = vpop.f32.mrb[29].mxu0 }
 0x116   :  { %v216_v21 = vpop.f32.mrb[30].mxu0 }
 0x117   :  { %v217_v22 = vadd.f32 %v5690_v31, %v216_v21  ;;  %1008 = vrot.lane.b32.xlu1 %v5762_v17, %s5511_s14  ;;  %990 = vrot.lane.b32.xlu0 %v5762_v17, %s5514_s16  ;;  %v4778_v23 = vpop.f32.mrb[31].mxu0 }
 0x119   :  { %v5774_v24 = vpack.c.bf16 %v217_v22, %v214_v19 }
 0x11b   :  { %9197 = vst [vmem:[#allocation9_spill] sm:$0xff] %v5774_v24  ;;  %1723 = vrot.lane.b32.xlu0 %v5694_v38, %s5515_s1  ;;  %260 = vrot.lane.b32.xlu1 %v5774_v24, %s5512_s15 }
 0x11c   :  { %v221_v25 = vpop.f32.mrb[32].mxu0 }
 0x11d   :  { %v222_v26 = vadd.f32 %v5690_v31, %v221_v25  ;;  %v4781_v27 = vpop.f32.mrb[33].mxu0 }
 0x11e   :  { %v224_v28 = vpop.f32.mrb[34].mxu0 }
 0x11f   :  { %1725 = vrot.lane.b32.xlu0 %v5706_v45, %s5515_s1  ;;  %1751 = vrot.lane.b32.xlu1 %v5750_v10, %s5513_s2  ;;  %v225_v29 = vadd.f32 %v5690_v31, %v224_v28  ;;  %v4782_v32 = vpop.f32.mrb[35].mxu0 }
 0x121   :  { %v5786_v33 = vpack.c.bf16 %v225_v29, %v222_v26 }
 0x123   :  { %9198 = vst [vmem:[#allocation10_spill] sm:$0xff] %v5786_v33  ;;  %1727 = vrot.lane.b32.xlu0 %v5714_v52, %s5515_s1  ;;  %1753 = vrot.lane.b32.xlu1 %v5762_v17, %s5513_s2 }
 0x127   :  { %1729 = vrot.lane.b32.xlu0 %v5726_v59, %s5515_s1  ;;  %2486 = vrot.lane.b32.xlu1 %v5694_v38, %s5516_s17 }
 0x12b   :  { %1731 = vrot.lane.b32.xlu0 %v5738_v3, %s5515_s1  ;;  %2488 = vrot.lane.b32.xlu1 %v5706_v45, %s5516_s17 }
 0x12f   :  { %1733 = vrot.lane.b32.xlu0 %v5750_v10, %s5515_s1  ;;  %2490 = vrot.lane.b32.xlu1 %v5714_v52, %s5516_s17 }
 0x133   :  { %1735 = vrot.lane.b32.xlu0 %v5762_v17, %s5515_s1  ;;  %2492 = vrot.lane.b32.xlu1 %v5726_v59, %s5516_s17 }
 0x137   :  { %1010 = vrot.lane.b32.xlu0 %v5774_v24, %s5511_s14  ;;  %2494 = vrot.lane.b32.xlu1 %v5738_v3, %s5516_s17 }
 0x13b   :  { %992 = vrot.lane.b32.xlu0 %v5774_v24, %s5514_s16  ;;  %2496 = vrot.lane.b32.xlu1 %v5750_v10, %s5516_s17 }
 0x13f   :  { %1737 = vrot.lane.b32.xlu0 %v5774_v24, %s5515_s1  ;;  %2498 = vrot.lane.b32.xlu1 %v5762_v17, %s5516_s17 }
 0x143   :  { %1755 = vrot.lane.b32.xlu1 %v5774_v24, %s5513_s2  ;;  %262 = vrot.lane.b32.xlu0 %v5786_v33, %s5512_s15 }
 0x147   :  { %2500 = vrot.lane.b32.xlu1 %v5774_v24, %s5516_s17  ;;  %2468 = vrot.lane.b32.xlu0 %v5694_v38, %s5517_s18 }
 0x14b   :  { %2470 = vrot.lane.b32.xlu1 %v5706_v45, %s5517_s18  ;;  %2472 = vrot.lane.b32.xlu0 %v5714_v52, %s5517_s18 }
 0x14f   :  { %2474 = vrot.lane.b32.xlu1 %v5726_v59, %s5517_s18  ;;  %2476 = vrot.lane.b32.xlu0 %v5738_v3, %s5517_s18 }
 0x153   :  { %2478 = vrot.lane.b32.xlu1 %v5750_v10, %s5517_s18  ;;  %2480 = vrot.lane.b32.xlu0 %v5762_v17, %s5517_s18 }
 0x155   :  { %v247_v31 = vpop.permute.xlu0 %246  ;;  %v5848_v36 = vpop.permute.xlu1 %996 }
 0x156   :  { %v293_v34 = vsel %vm264_vm2, %v247_v31, 0 }
 0x157   :  { %320 = vmatpush1.bf16.xpose.msra.mxu1 %v293_v34  ;;  %2482 = vrot.lane.b32.xlu1 %v5774_v24, %s5517_s18 }
 0x158   :  { %809 = vrot.lane.b32.xlu0 %v5706_v45, %s5518_s19  ;;  %321 = vmatprep.subr.bf16.mxu1 %v9002_v30 }
 0x159   :  { %v5846_v35 = vpop.permute.xlu0 %978  ;;  %v5860_v40 = vpop.permute.xlu1 %1741 }
 0x15b   :  { %807 = vrot.lane.b32.xlu1 %v5694_v38, %s5518_s19 }
 0x15c   :  { %815 = vrot.lane.b32.xlu0 %v5738_v3, %s5518_s19 }
 0x15d   :  { %v249_v37 = vpop.permute.xlu0 %248 }
 0x15e   :  { %v296_v39 = vsel %vm264_vm2, %v249_v37, 0 }
 0x15f   :  { %322 = vmatpush1.bf16.xpose.msra.mxu1 %v296_v39  ;;  %811 = vrot.lane.b32.xlu1 %v5714_v52, %s5518_s19 }
 0x160   :  { %819 = vrot.lane.b32.xlu0 %v5762_v17, %s5518_s19  ;;  %323 = vmatprep.subr.bf16.mxu1 %v9002_v30 }
 0x161   :  { %v5862_v41 = vpop.permute.xlu0 %998 }
 0x163   :  { %813 = vrot.lane.b32.xlu1 %v5726_v59, %s5518_s19 }
 0x164   :  { %1553 = vrot.lane.b32.xlu0 %v5694_v38, %s5519_s20 }
 0x165   :  { %v5868_v42 = vpop.permute.xlu0 %980  ;;  %v251_v43 = vpop.permute.xlu1 %250 }
 0x166   :  { %v299_v44 = vsel %vm264_vm2, %v251_v43, 0 }
 0x167   :  { %324 = vmatpush1.bf16.xpose.msra.mxu1 %v299_v44  ;;  %817 = vrot.lane.b32.xlu1 %v5750_v10, %s5518_s19 }
 0x168   :  { %1557 = vrot.lane.b32.xlu0 %v5714_v52, %s5519_s20  ;;  %325 = vmatprep.subr.bf16.mxu1 %v9002_v30 }
 0x169   :  { %v5876_v46 = vpop.permute.xlu0 %982  ;;  %v5878_v47 = vpop.permute.xlu1 %1000 }
 0x16b   :  { %1012 = vrot.lane.b32.xlu1 %v5786_v33, %s5511_s14 }
 0x16c   :  { %994 = vrot.lane.b32.xlu0 %v5786_v33, %s5514_s16 }
 0x16d   :  { %v5884_v48 = vpop.permute.xlu0 %1002  ;;  %v253_v49 = vpop.permute.xlu1 %252 }
 0x16e   :  { %v302_v50 = vsel %vm264_vm2, %v253_v49, 0 }
 0x16f   :  { %326 = vmatpush1.bf16.xpose.msra.mxu1 %v302_v50  ;;  %821 = vrot.lane.b32.xlu1 %v5774_v24, %s5518_s19 }
 0x170   :  { %1739 = vrot.lane.b32.xlu0 %v5786_v33, %s5515_s1  ;;  %327 = vmatprep.subr.bf16.mxu1 %v9002_v30 }
 0x171   :  { %v5892_v51 = vpop.permute.xlu0 %984  ;;  %v5894_v53 = vpop.permute.xlu1 %1743 }
 0x173   :  { %1555 = vrot.lane.b32.xlu1 %v5706_v45, %s5519_s20 }
 0x174   :  { %2484 = vrot.lane.b32.xlu0 %v5786_v33, %s5517_s18 }
 0x175   :  { %v5900_v54 = vpop.permute.xlu1 %1745  ;;  %v255_v55 = vpop.permute.xlu0 %254 }
 0x176   :  { %v305_v56 = vsel %vm264_vm2, %v255_v55, 0  ;;  %v1042_v55 = vsel %vm264_vm2, %v5848_v36, 0 }
 0x177   :  { %328 = vmatpush1.bf16.xpose.msra.mxu1 %v305_v56  ;;  %1559 = vrot.lane.b32.xlu1 %v5726_v59, %s5519_s20 }
 0x178   :  { %823 = vrot.lane.b32.xlu0 %v5786_v33, %s5518_s19  ;;  %329 = vmatprep.subr.bf16.mxu1 %v9002_v30 }
 0x179   :  { %v5908_v57 = vpop.permute.xlu1 %1004  ;;  %v5910_v58 = vpop.permute.xlu0 %986 }
 0x17b   :  { %1757 = vrot.lane.b32.xlu1 %v5786_v33, %s5513_s2 }
 0x17c   :  { %1561 = vrot.lane.b32.xlu0 %v5738_v3, %s5519_s20 }
 0x17d   :  { %v5916_v60 = vpop.permute.xlu0 %1006  ;;  %v257_v61 = vpop.permute.xlu1 %256 }
 0x17e   :  { %v308_v62 = vsel %vm264_vm2, %v257_v61, 0 }
 0x17f   :  { %330 = vmatpush1.bf16.xpose.msra.mxu1 %v308_v62  ;;  %2502 = vrot.lane.b32.xlu1 %v5786_v33, %s5516_s17 }
 0x180   :  { %1563 = vrot.lane.b32.xlu0 %v5750_v10, %s5519_s20  ;;  %331 = vmatprep.subr.bf16.mxu1 %v9002_v30 }
 0x181   :  { %v5924_v63 = vpop.permute.xlu0 %988  ;;  %v5926_v1 = vpop.permute.xlu1 %1747 }
 0x183   :  { %1565 = vrot.lane.b32.xlu1 %v5762_v17, %s5519_s20 }
 0x184   :  { %1567 = vrot.lane.b32.xlu0 %v5774_v24, %s5519_s20 }
 0x185   :  { %v5932_v2 = vpop.permute.xlu1 %1749  ;;  %v259_v4 = vpop.permute.xlu0 %258 }
 0x186   :  { %v311_v5 = vsel %vm264_vm2, %v259_v4, 0 }
 0x187   :  { %332 = vmatpush1.bf16.xpose.msra.mxu1 %v311_v5  ;;  %2298 = vrot.lane.b32.xlu1 %v5694_v38, %s5520_s21  ;;  %v1045_v5 = vsel %vm264_vm2, %v5862_v41, 0 }
 0x188   :  { %2300 = vrot.lane.b32.xlu0 %v5706_v45, %s5520_s21  ;;  %333 = vmatprep.subr.bf16.mxu1 %v9002_v30 }
 0x189   :  { %v5940_v6 = vpop.permute.xlu1 %1008  ;;  %v5942_v7 = vpop.permute.xlu0 %990 }
 0x18b   :  { %1569 = vrot.lane.b32.xlu1 %v5786_v33, %s5519_s20 }
 0x18c   :  { %2306 = vrot.lane.b32.xlu0 %v5738_v3, %s5520_s21 }
 0x18d   :  { %v5948_v8 = vpop.permute.xlu0 %1723  ;;  %v261_v9 = vpop.permute.xlu1 %260 }
 0x18e   :  { %v314_v11 = vsel %vm264_vm2, %v261_v9, 0 }
 0x18f   :  { %2302 = vrot.lane.b32.xlu1 %v5714_v52, %s5520_s21  ;;  %334 = vmatpush1.bf16.xpose.msra.mxu1 %v314_v11 }
 0x190   :  { %2310 = vrot.lane.b32.xlu0 %v5762_v17, %s5520_s21  ;;  %335 = vmatprep.subr.bf16.mxu1 %v9002_v30 }
 0x191   :  { %v5956_v12 = vpop.permute.xlu0 %1725  ;;  %v5958_v13 = vpop.permute.xlu1 %1751 }
 0x193   :  { %2304 = vrot.lane.b32.xlu1 %v5726_v59, %s5520_s21 }
 0x195   :  { %v5962_v14 = vpop.permute.xlu0 %1727  ;;  %v5964_v15 = vpop.permute.xlu1 %1753 }
 0x197   :  { %2308 = vrot.lane.b32.xlu1 %v5750_v10, %s5520_s21 }
 0x199   :  { %v5968_v16 = vpop.permute.xlu0 %1729  ;;  %v5970_v18 = vpop.permute.xlu1 %2486 }
 0x19b   :  { %2312 = vrot.lane.b32.xlu1 %v5774_v24, %s5520_s21 }
 0x19d   :  { %v5974_v19 = vpop.permute.xlu0 %1731  ;;  %v5976_v20 = vpop.permute.xlu1 %2488 }
 0x1a1   :  { %v5978_v21 = vpop.permute.xlu0 %1733  ;;  %v5980_v22 = vpop.permute.xlu1 %2490 }
 0x1a5   :  { %v5982_v23 = vpop.permute.xlu0 %1735  ;;  %v5984_v25 = vpop.permute.xlu1 %2492 }
 0x1a9   :  { %v5986_v26 = vpop.permute.xlu0 %1010  ;;  %v5988_v27 = vpop.permute.xlu1 %2494 }
 0x1ad   :  { %v5990_v28 = vpop.permute.xlu0 %992  ;;  %v5992_v29 = vpop.permute.xlu1 %2496 }
 0x1b1   :  { %v5994_v32 = vpop.permute.xlu0 %1737  ;;  %v5996_v31 = vpop.permute.xlu1 %2498 }
 0x1b5   :  { %v5998_v34 = vpop.permute.xlu1 %1755  ;;  %v263_v37 = vpop.permute.xlu0 %262 }
 0x1b6   :  { %v317_v39 = vsel %vm264_vm2, %v263_v37, 0  ;;  %v1048_v37 = vsel %vm264_vm2, %v5878_v47, 0  ;;  %v1051_v47 = vsel %vm264_vm2, %v5884_v48, 0 }
 0x1b7   :  { %336 = vmatpush1.bf16.xpose.msra.mxu1 %v317_v39 }
 0x1b8   :  { %1068 = vmatprep.subr.bf16.mxu1 %v9002_v30 }
 0x1b9   :  { %v6002_v43 = vpop.permute.xlu1 %2500  ;;  %v6004_v44 = vpop.permute.xlu0 %2468 }
 0x1bd   :  { %v6006_v49 = vpop.permute.xlu1 %2470  ;;  %v6008_v50 = vpop.permute.xlu0 %2472 }
 0x1be   :  { %4584 = vmatmul.mubr.msk.bf16.vlgmr.msra.gmra.mrb[0].mxu1 %vm264_vm2, %v5694_v38 }
 0x1bf   :  { %1069 = vmatpush1.bf16.xpose.msra.mxu1 %v1042_v55  ;;  %361 = vmatprep.mubr.bf16.mxu1 %v9002_v30 }
 0x1c0   :  { %1070 = vmatprep.subr.bf16.mxu1 %v9002_v30 }
 0x1c1   :  { %v6016_v56 = vpop.permute.xlu1 %2474  ;;  %v6018_v61 = vpop.permute.xlu0 %2476 }
 0x1c5   :  { %v6020_v62 = vpop.permute.xlu1 %2478  ;;  %v6022_v4 = vpop.permute.xlu0 %2480 }
 0x1c6   :  { %4585 = vmatmul.mubr.msk.bf16.gmra.mrb[4].mxu1 %vm264_vm2, %v5706_v45 }
 0x1c7   :  { %1071 = vmatpush1.bf16.xpose.msra.mxu1 %v1045_v5  ;;  %371 = vmatprep.mubr.bf16.mxu1 %v9002_v30 }
 0x1c8   :  { %1072 = vmatprep.subr.bf16.mxu1 %v9002_v30 }
 0x1c9   :  { %v6030_v36 = vpop.permute.xlu1 %2482 }
 0x1ca   :  { %v810_v9 = vpop.permute.xlu0 %809 }
 0x1cd   :  { %v808_v11 = vpop.permute.xlu1 %807 }
 0x1ce   :  { %v816_v39 = vpop.permute.xlu0 %815  ;;  %4586 = vmatmul.mubr.msk.bf16.gmra.mrb[8].mxu1 %vm264_vm2, %v5714_v52  ;;  %865 = vmatpush1.bf16.msra.mxu0 %v808_v11 }
 0x1cf   :  { %1073 = vmatpush1.bf16.xpose.msra.mxu1 %v1048_v37  ;;  %866 = vmatprep.subr.bf16.mxu0 %v9002_v30  ;;  %v1054_v37 = vsel %vm264_vm2, %v5908_v57, 0  ;;  %v1057_v57 = vsel %vm264_vm2, %v5916_v60, 0 }
 0x1d0   :  { %381 = vmatprep.mubr.bf16.mxu1 %v9002_v30  ;;  %1074 = vmatprep.subr.bf16.mxu1 %v9002_v30 }
 0x1d1   :  { %v812_v41 = vpop.permute.xlu1 %811 }
 0x1d2   :  { %v820_v55 = vpop.permute.xlu0 %819  ;;  %867 = vmatpush1.bf16.msra.mxu0 %v810_v9 }
 0x1d3   :  { %868 = vmatprep.subr.bf16.mxu0 %v9002_v30 }
 0x1d5   :  { %v814_v11 = vpop.permute.xlu1 %813 }
 0x1d6   :  { %v6042_v5 = vpop.permute.xlu0 %1553  ;;  %4587 = vmatmul.mubr.msk.bf16.gmra.mrb[12].mxu1 %vm264_vm2, %v5726_v59  ;;  %869 = vmatpush1.bf16.msra.mxu0 %v812_v41 }
 0x1d7   :  { %9199 = vst [vmem:[#allocation11_spill] sm:$0xff] %v6042_v5  ;;  %1075 = vmatpush1.bf16.xpose.msra.mxu1 %v1051_v47  ;;  %870 = vmatprep.subr.bf16.mxu0 %v9002_v30 }
 0x1d8   :  { %391 = vmatprep.mubr.bf16.mxu1 %v9002_v30  ;;  %1076 = vmatprep.subr.bf16.mxu1 %v9002_v30 }
 0x1d9   :  { %v818_v48 = vpop.permute.xlu1 %817 }
 0x1da   :  { %v6049_v9 = vpop.permute.xlu0 %1557  ;;  %871 = vmatpush1.bf16.msra.mxu0 %v814_v11 }
 0x1db   :  { %9200 = vst [vmem:[#allocation12_spill] sm:$0xff] %v6049_v9  ;;  %872 = vmatprep.subr.bf16.mxu0 %v9002_v30 }
 0x1dd   :  { %v1013_v47 = vpop.permute.xlu1 %1012 }
 0x1de   :  { %v6054_v0 = vpop.permute.xlu0 %994  ;;  %4588 = vmatmul.mubr.msk.bf16.gmra.mrb[16].mxu1 %vm264_vm2, %v5738_v3  ;;  %873 = vmatpush1.bf16.msra.mxu0 %v816_v39 }
 0x1df   :  { %1077 = vmatpush1.bf16.xpose.msra.mxu1 %v1054_v37  ;;  %874 = vmatprep.subr.bf16.mxu0 %v9002_v30  ;;  %v1060_v37 = vsel %vm264_vm2, %v5940_v6, 0  ;;  %v1066_v6 = vsel %vm264_vm2, %v1013_v47, 0  ;;  %v1790_v47 = vsel %vm264_vm2, %v5894_v53, 0 }
 0x1e0   :  { %401 = vmatprep.mubr.bf16.mxu1 %v9002_v30  ;;  %1078 = vmatprep.subr.bf16.mxu1 %v9002_v30 }
 0x1e1   :  { %v822_v39 = vpop.permute.xlu1 %821 }
 0x1e2   :  { %v6061_v41 = vpop.permute.xlu0 %1739  ;;  %875 = vmatpush1.bf16.msra.mxu0 %v818_v48 }
 0x1e3   :  { %876 = vmatprep.subr.bf16.mxu0 %v9002_v30 }
 0x1e5   :  { %v6133_v53 = vpop.permute.xlu1 %1555 }
 0x1e6   :  { %v6066_v11 = vpop.permute.xlu0 %2484  ;;  %4589 = vmatmul.mubr.msk.bf16.gmra.mrb[20].mxu1 %vm264_vm2, %v5750_v10  ;;  %877 = vmatpush1.bf16.msra.mxu0 %v820_v55  ;;  %v1063_v55 = vsel %vm264_vm2, %v5986_v26, 0  ;;  %v1787_v26 = vsel %vm264_vm2, %v5860_v40, 0  ;;  %v1793_v40 = vsel %vm264_vm2, %v5900_v54, 0  ;;  %9201 = vst [vmem:[#allocation13_spill] sm:$0xff] %v6133_v53 }
 0x1e7   :  { %1079 = vmatpush1.bf16.xpose.msra.mxu1 %v1057_v57  ;;  %878 = vmatprep.subr.bf16.mxu0 %v9002_v30 }
 0x1e8   :  { %411 = vmatprep.mubr.bf16.mxu1 %v9002_v30  ;;  %1080 = vmatprep.subr.bf16.mxu1 %v9002_v30 }
 0x1e9   :  { %v6137_v54 = vpop.permute.xlu1 %1559 }
 0x1ea   :  { %v824_v48 = vpop.permute.xlu0 %823  ;;  %879 = vmatpush1.bf16.msra.mxu0 %v822_v39  ;;  %9202 = vst [vmem:[#allocation14_spill] sm:$0xff] %v6137_v54 }
 0x1eb   :  { %880 = vmatprep.subr.bf16.mxu0 %v9002_v30  ;;  %v862_v60 = vsel %vm860_vm3, %v824_v48, 0 }
 0x1ee   :  { %4590 = vmatmul.mubr.msk.bf16.gmra.mrb[24].mxu1 %vm264_vm2, %v5762_v17  ;;  %881 = vmatpush1.bf16.msra.mxu0 %v862_v60 }
 0x1ef   :  { %1081 = vmatpush1.bf16.xpose.msra.mxu1 %v1060_v37  ;;  %421 = vmatprep.mubr.bf16.mxu1 %v9002_v30 }
 0x1f0   :  { %1082 = vmatprep.subr.bf16.mxu1 %v9002_v30  ;;  %1609 = vmatprep.subr.bf16.mxu0 %v9002_v30 }
 0x1f6   :  { %4591 = vmatmul.mubr.msk.bf16.gmra.mrb[28].mxu1 %vm264_vm2, %v5774_v24 }
 0x1f7   :  { %1083 = vmatpush1.bf16.xpose.msra.mxu1 %v1063_v55  ;;  %431 = vmatprep.mubr.bf16.mxu1 %v9002_v30 }
 0x1f8   :  { %1084 = vmatprep.subr.bf16.mxu1 %v9002_v30 }
 0x1fe   :  { %4592 = vmatmul.mubr.msk.bf16.gmra.mrb[32].mxu1 %vm264_vm2, %v5786_v33 }
 0x1ff   :  { %1085 = vmatpush1.bf16.xpose.msra.mxu1 %v1066_v6  ;;  %1100 = vmatprep.mubr.bf16.mxu1 %v9002_v30 }
 0x200   :  { %1813 = vmatprep.subr.bf16.mxu1 %v9002_v30 }
 0x206   :  { %4602 = vmatmul.mubr.msk.bf16.vlgmr.msra.gmra.mrb[36].mxu1 %vm264_vm2, %v5846_v35  ;;  %v1796_v35 = vsel %vm264_vm2, %v5926_v1, 0 }
 0x207   :  { %1814 = vmatpush1.bf16.xpose.msra.mxu1 %v1787_v26  ;;  %1110 = vmatprep.mubr.bf16.mxu1 %v9002_v30 }
 0x208   :  { %1815 = vmatprep.subr.bf16.mxu1 %v9002_v30 }
 0x20e   :  { %4603 = vmatmul.mubr.msk.bf16.gmra.mrb[40].mxu1 %vm264_vm2, %v5868_v42  ;;  %v1799_v42 = vsel %vm264_vm2, %v5932_v2, 0  ;;  %v2532_v2 = vsel %vm264_vm2, %v5970_v18, 0 }
 0x20f   :  { %1816 = vmatpush1.bf16.xpose.msra.mxu1 %v1790_v47  ;;  %1120 = vmatprep.mubr.bf16.mxu1 %v9002_v30 }
 0x210   :  { %1817 = vmatprep.subr.bf16.mxu1 %v9002_v30 }
 0x216   :  { %4604 = vmatmul.mubr.msk.bf16.gmra.mrb[44].mxu1 %vm264_vm2, %v5876_v46  ;;  %v1802_v46 = vsel %vm264_vm2, %v5958_v13, 0  ;;  %v2547_v13 = vsel %vm264_vm2, %v5992_v29, 0 }
 0x217   :  { %1818 = vmatpush1.bf16.xpose.msra.mxu1 %v1793_v40  ;;  %1130 = vmatprep.mubr.bf16.mxu1 %v9002_v30 }
 0x218   :  { %1819 = vmatprep.subr.bf16.mxu1 %v9002_v30 }
 0x21e   :  { %4605 = vmatmul.mubr.msk.bf16.gmra.mrb[48].mxu1 %vm264_vm2, %v5892_v51  ;;  %v1805_v51 = vsel %vm264_vm2, %v5964_v15, 0  ;;  %v2553_v15 = vsel %vm264_vm2, %v6002_v43, 0 }
 0x21f   :  { %1820 = vmatpush1.bf16.xpose.msra.mxu1 %v1796_v35  ;;  %1140 = vmatprep.mubr.bf16.mxu1 %v9002_v30 }
 0x220   :  { %1821 = vmatprep.subr.bf16.mxu1 %v9002_v30 }
 0x226   :  { %4606 = vmatmul.mubr.msk.bf16.gmra.mrb[52].mxu1 %vm264_vm2, %v5910_v58  ;;  %v1808_v58 = vsel %vm264_vm2, %v5998_v34, 0 }
 0x227   :  { %1822 = vmatpush1.bf16.xpose.msra.mxu1 %v1799_v42  ;;  %1150 = vmatprep.mubr.bf16.mxu1 %v9002_v30 }
 0x228   :  { %1823 = vmatprep.subr.bf16.mxu1 %v9002_v30 }
 0x22e   :  { %4607 = vmatmul.mubr.msk.bf16.gmra.mrb[56].mxu1 %vm264_vm2, %v5924_v63  ;;  %v1758_v63 = vpop.permute.xlu1 %1757 }
 0x22f   :  { %1824 = vmatpush1.bf16.xpose.msra.mxu1 %v1802_v46  ;;  %1160 = vmatprep.mubr.bf16.mxu1 %v9002_v30  ;;  %v1811_v1 = vsel %vm264_vm2, %v1758_v63, 0 }
 0x230   :  { %1825 = vmatprep.subr.bf16.mxu1 %v9002_v30 }
 0x236   :  { %4608 = vmatmul.mubr.msk.bf16.gmra.mrb[60].mxu1 %vm264_vm2, %v5942_v7  ;;  %v2535_v7 = vsel %vm264_vm2, %v5976_v20, 0 }
 0x237   :  { %1826 = vmatpush1.bf16.xpose.msra.mxu1 %v1805_v51  ;;  %1170 = vmatprep.mubr.bf16.mxu1 %v9002_v30 }
 0x238   :  { %1827 = vmatprep.subr.bf16.mxu1 %v9002_v30 }
 0x23e   :  { %4609 = vmatmul.mubr.msk.bf16.gmra.mrb[64].mxu1 %vm264_vm2, %v5990_v28 }
 0x23f   :  { %1828 = vmatpush1.bf16.xpose.msra.mxu1 %v1808_v58  ;;  %1180 = vmatprep.mubr.bf16.mxu1 %v9002_v30 }
 0x240   :  { %1829 = vmatprep.subr.bf16.mxu1 %v9002_v30 }
 0x246   :  { %4610 = vmatmul.mubr.msk.bf16.gmra.mrb[68].mxu1 %vm264_vm2, %v6054_v0  ;;  %v2538_v0 = vsel %vm264_vm2, %v5980_v22, 0 }
 0x247   :  { %1830 = vmatpush1.bf16.xpose.msra.mxu1 %v1811_v1  ;;  %1845 = vmatprep.mubr.bf16.mxu1 %v9002_v30 }
 0x248   :  { %2558 = vmatprep.subr.bf16.mxu1 %v9002_v30 }
 0x24e   :  { %4620 = vmatmul.mubr.msk.bf16.vlgmr.msra.gmra.mrb[72].mxu1 %vm264_vm2, %v5948_v8  ;;  %v2541_v8 = vsel %vm264_vm2, %v5984_v25, 0 }
 0x24f   :  { %2559 = vmatpush1.bf16.xpose.msra.mxu1 %v2532_v2  ;;  %1855 = vmatprep.mubr.bf16.mxu1 %v9002_v30 }
 0x250   :  { %2560 = vmatprep.subr.bf16.mxu1 %v9002_v30 }
 0x256   :  { %4621 = vmatmul.mubr.msk.bf16.gmra.mrb[76].mxu1 %vm264_vm2, %v5956_v12  ;;  %v2544_v12 = vsel %vm264_vm2, %v5988_v27, 0 }
 0x257   :  { %2561 = vmatpush1.bf16.xpose.msra.mxu1 %v2535_v7  ;;  %1865 = vmatprep.mubr.bf16.mxu1 %v9002_v30 }
 0x258   :  { %2562 = vmatprep.subr.bf16.mxu1 %v9002_v30 }
 0x25e   :  { %4622 = vmatmul.mubr.msk.bf16.gmra.mrb[80].mxu1 %vm264_vm2, %v5962_v14  ;;  %v2550_v14 = vsel %vm264_vm2, %v5996_v31, 0 }
 0x25f   :  { %2563 = vmatpush1.bf16.xpose.msra.mxu1 %v2538_v0  ;;  %1875 = vmatprep.mubr.bf16.mxu1 %v9002_v30 }
 0x260   :  { %2564 = vmatprep.subr.bf16.mxu1 %v9002_v30 }
 0x266   :  { %4623 = vmatmul.mubr.msk.bf16.gmra.mrb[84].mxu1 %vm264_vm2, %v5968_v16  ;;  %v2503_v16 = vpop.permute.xlu1 %2502 }
 0x267   :  { %2565 = vmatpush1.bf16.xpose.msra.mxu1 %v2541_v8  ;;  %1885 = vmatprep.mubr.bf16.mxu1 %v9002_v30  ;;  %v2556_v18 = vsel %vm264_vm2, %v2503_v16, 0 }
 0x268   :  { %2566 = vmatprep.subr.bf16.mxu1 %v9002_v30 }
 0x26e   :  { %4624 = vmatmul.mubr.msk.bf16.gmra.mrb[88].mxu1 %vm264_vm2, %v5974_v19  ;;  %v9203_v19 = vmov 0.0  }
 0x26f   :  { %2567 = vmatpush1.bf16.xpose.msra.mxu1 %v2544_v12  ;;  %1895 = vmatprep.mubr.bf16.mxu1 %v9002_v30 }
 0x270   :  { %2568 = vmatprep.subr.bf16.mxu1 %v9002_v30 }
 0x276   :  { %4625 = vmatmul.mubr.msk.bf16.gmra.mrb[92].mxu1 %vm264_vm2, %v5978_v21 }
 0x277   :  { %2569 = vmatpush1.bf16.xpose.msra.mxu1 %v2547_v13  ;;  %1905 = vmatprep.mubr.bf16.mxu1 %v9002_v30 }
 0x278   :  { %2570 = vmatprep.subr.bf16.mxu1 %v9002_v30 }
 0x27e   :  { %4626 = vmatmul.mubr.msk.bf16.gmra.mrb[96].mxu1 %vm264_vm2, %v5982_v23 }
 0x27f   :  { %2571 = vmatpush1.bf16.xpose.msra.mxu1 %v2550_v14  ;;  %1915 = vmatprep.mubr.bf16.mxu1 %v9002_v30 }
 0x280   :  { %2572 = vmatprep.subr.bf16.mxu1 %v9002_v30 }
 0x286   :  { %4627 = vmatmul.mubr.msk.bf16.gmra.mrb[100].mxu1 %vm264_vm2, %v5994_v32 }
 0x287   :  { %2573 = vmatpush1.bf16.xpose.msra.mxu1 %v2553_v15  ;;  %1925 = vmatprep.mubr.bf16.mxu1 %v9002_v30 }
 0x288   :  { %2574 = vmatprep.subr.bf16.mxu1 %v9002_v30 }
 0x28e   :  { %4628 = vmatmul.mubr.msk.bf16.gmra.mrb[104].mxu1 %vm264_vm2, %v6061_v41 }
 0x28f   :  { %2575 = vmatpush1.bf16.xpose.msra.mxu1 %v2556_v18  ;;  %2590 = vmatprep.mubr.bf16.mxu1 %v9002_v30 }
 0x290   :  { %4915 = vmatprep.subr.bf16.mxu1 %v9203_v19 }
 0x291   :  { %v353_v20 = vpop.f32.mrb[0].mxu1 }
 0x292   :  { %v355_v21 = vpop.f32.mrb[1].mxu1  ;;  %v6205_v25 = vmul.f32 0.35355338, %v353_v20 }
 0x293   :  { %v6203_v22 = vmul.f32 0.35355338, %v355_v21  ;;  %v357_v23 = vpop.f32.mrb[2].mxu1 }
 0x294   :  { %v359_v27 = vpop.f32.mrb[3].mxu1  ;;  %v6211_v32 = vmul.f32 0.35355338, %v357_v23 }
 0x295   :  { %v6207_v28 = vmul.f32 0.35355338, %v359_v27  ;;  %v479_v29 = vsel %vm478_vm4, %v6203_v22, -inf }
 0x296   :  { %4638 = vmatmul.mubr.msk.bf16.vlgmr.msra.gmra.mrb[108].mxu1 %vm264_vm2, %v6004_v44  ;;  %v480_v31 = vmax.f32 %v6205_v25, %v479_v29 }
 0x297   :  { %v483_v34 = vsel %vm478_vm4, %v6207_v28, -inf  ;;  %2600 = vmatprep.mubr.bf16.mxu1 %v9002_v30 }
 0x298   :  { %481 = vmax.xlane.f32.xlu0 %v480_v31  ;;  %v484_v43 = vmax.f32 %v6211_v32, %v483_v34 }
 0x299   :  { %v363_v41 = vpop.f32.mrb[4].mxu1 }
 0x29a   :  { %485 = vmax.xlane.f32.xlu1 %v484_v43  ;;  %v365_v57 = vpop.f32.mrb[5].mxu1  ;;  %v6222_v60 = vmul.f32 0.35355338, %v363_v41 }
 0x29b   :  { %v6220_v39 = vmul.f32 0.35355338, %v365_v57  ;;  %v367_v48 = vpop.f32.mrb[6].mxu1 }
 0x29c   :  { %v369_v37 = vpop.f32.mrb[7].mxu1  ;;  %v6234_v47 = vmul.f32 0.35355338, %v367_v48 }
 0x29d   :  { %v6224_v44 = vmul.f32 0.35355338, %v369_v37  ;;  %v487_v55 = vsel %vm478_vm4, %v6220_v39, -inf }
 0x29e   :  { %4639 = vmatmul.mubr.msk.bf16.gmra.mrb[112].mxu1 %vm264_vm2, %v6006_v49  ;;  %v488_v6 = vmax.f32 %v6222_v60, %v487_v55 }
 0x29f   :  { %v491_v26 = vsel %vm478_vm4, %v6224_v44, -inf  ;;  %2610 = vmatprep.mubr.bf16.mxu1 %v9002_v30 }
 0x2a0   :  { %489 = vmax.xlane.f32.xlu1 %v488_v6  ;;  %v492_v42 = vmax.f32 %v6234_v47, %v491_v26 }
 0x2a1   :  { %v373_v40 = vpop.f32.mrb[8].mxu1 }
 0x2a2   :  { %v375_v35 = vpop.f32.mrb[9].mxu1  ;;  %v6239_v58 = vmul.f32 0.35355338, %v373_v40 }
 0x2a3   :  { %v6237_v46 = vmul.f32 0.35355338, %v375_v35  ;;  %v377_v51 = vpop.f32.mrb[10].mxu1 }
 0x2a4   :  { %493 = vmax.xlane.f32.xlu1 %v492_v42  ;;  %v379_v49 = vpop.f32.mrb[11].mxu1  ;;  %v6251_v0 = vmul.f32 0.35355338, %v377_v51 }
 0x2a5   :  { %v6241_v63 = vmul.f32 0.35355338, %v379_v49  ;;  %v495_v1 = vsel %vm478_vm4, %v6237_v46, -inf }
 0x2a6   :  { %4640 = vmatmul.mubr.msk.bf16.gmra.mrb[116].mxu1 %vm264_vm2, %v6008_v50  ;;  %v496_v2 = vmax.f32 %v6239_v58, %v495_v1 }
 0x2a7   :  { %v499_v7 = vsel %vm478_vm4, %v6241_v63, -inf  ;;  %2620 = vmatprep.mubr.bf16.mxu1 %v9002_v30 }
 0x2a8   :  { %497 = vmax.xlane.f32.xlu1 %v496_v2  ;;  %v500_v12 = vmax.f32 %v6251_v0, %v499_v7 }
 0x2a9   :  { %v383_v8 = vpop.f32.mrb[12].mxu1 }
 0x2aa   :  { %v385_v13 = vpop.f32.mrb[13].mxu1  ;;  %v6256_v16 = vmul.f32 0.35355338, %v383_v8 }
 0x2ab   :  { %v6254_v14 = vmul.f32 0.35355338, %v385_v13  ;;  %v387_v15 = vpop.f32.mrb[14].mxu1 }
 0x2ac   :  { %501 = vmax.xlane.f32.xlu1 %v500_v12  ;;  %v389_v50 = vpop.f32.mrb[15].mxu1  ;;  %v6263_v23 = vmul.f32 0.35355338, %v387_v15 }
 0x2ad   :  { %v503_v18 = vsel %vm478_vm4, %v6254_v14, -inf  ;;  %v6260_v20 = vmul.f32 0.35355338, %v389_v50 }
 0x2ae   :  { %v504_v21 = vmax.f32 %v6256_v16, %v503_v18  ;;  %4641 = vmatmul.mubr.msk.bf16.gmra.mrb[120].mxu1 %vm264_vm2, %v6016_v56 }
 0x2af   :  { %v507_v27 = vsel %vm478_vm4, %v6260_v20, -inf  ;;  %2630 = vmatprep.mubr.bf16.mxu1 %v9002_v30 }
 0x2b0   :  { %505 = vmax.xlane.f32.xlu1 %v504_v21  ;;  %v508_v29 = vmax.f32 %v6263_v23, %v507_v27 }
 0x2b1   :  { %v393_v31 = vpop.f32.mrb[16].mxu1 }
 0x2b2   :  { %509 = vmax.xlane.f32.xlu0 %v508_v29  ;;  %v395_v34 = vpop.f32.mrb[17].mxu1  ;;  %v6273_v57 = vmul.f32 0.35355338, %v393_v31 }
 0x2b3   :  { %v6271_v43 = vmul.f32 0.35355338, %v395_v34  ;;  %v397_v41 = vpop.f32.mrb[18].mxu1 }
 0x2b4   :  { %v399_v48 = vpop.f32.mrb[19].mxu1  ;;  %v6285_v26 = vmul.f32 0.35355338, %v397_v41 }
 0x2b5   :  { %v511_v56 = vsel %vm478_vm4, %v6271_v43, -inf  ;;  %v6277_v37 = vmul.f32 0.35355338, %v399_v48 }
 0x2b6   :  { %v512_v55 = vmax.f32 %v6273_v57, %v511_v56  ;;  %4642 = vmatmul.mubr.msk.bf16.gmra.mrb[124].mxu1 %vm264_vm2, %v6018_v61 }
 0x2b7   :  { %v515_v6 = vsel %vm478_vm4, %v6277_v37, -inf  ;;  %2640 = vmatprep.mubr.bf16.mxu1 %v9002_v30 }
 0x2b8   :  { %513 = vmax.xlane.f32.xlu1 %v512_v55  ;;  %v516_v35 = vmax.f32 %v6285_v26, %v515_v6 }
 0x2b9   :  { %v403_v40 = vpop.f32.mrb[20].mxu1 }
 0x2ba   :  { %v405_v42 = vpop.f32.mrb[21].mxu1  ;;  %v6290_v1 = vmul.f32 0.35355338, %v403_v40 }
 0x2bb   :  { %v6288_v51 = vmul.f32 0.35355338, %v405_v42  ;;  %v407_v49 = vpop.f32.mrb[22].mxu1 }
 0x2bc   :  { %517 = vmax.xlane.f32.xlu1 %v516_v35  ;;  %v409_v2 = vpop.f32.mrb[23].mxu1  ;;  %v6302_v13 = vmul.f32 0.35355338, %v407_v49 }
 0x2bd   :  { %v519_v61 = vsel %vm478_vm4, %v6288_v51, -inf  ;;  %v6294_v7 = vmul.f32 0.35355338, %v409_v2 }
 0x2be   :  { %v520_v8 = vmax.f32 %v6290_v1, %v519_v61  ;;  %4643 = vmatmul.mubr.msk.bf16.gmra.mrb[128].mxu1 %vm264_vm2, %v6020_v62 }
 0x2bf   :  { %v523_v12 = vsel %vm478_vm4, %v6294_v7, -inf  ;;  %2650 = vmatprep.mubr.bf16.mxu1 %v9002_v30 }
 0x2c0   :  { %521 = vmax.xlane.f32.xlu1 %v520_v8  ;;  %v524_v50 = vmax.f32 %v6302_v13, %v523_v12 }
 0x2c1   :  { %v413_v15 = vpop.f32.mrb[24].mxu1 }
 0x2c2   :  { %v415_v18 = vpop.f32.mrb[25].mxu1  ;;  %v6307_v29 = vmul.f32 0.35355338, %v413_v15 }
 0x2c3   :  { %v6305_v21 = vmul.f32 0.35355338, %v415_v18  ;;  %v417_v27 = vpop.f32.mrb[26].mxu1 }
 0x2c4   :  { %525 = vmax.xlane.f32.xlu1 %v524_v50  ;;  %v419_v31 = vpop.f32.mrb[27].mxu1  ;;  %v6319_v56 = vmul.f32 0.35355338, %v417_v27 }
 0x2c5   :  { %v527_v62 = vsel %vm478_vm4, %v6305_v21, -inf  ;;  %v6311_v34 = vmul.f32 0.35355338, %v419_v31 }
 0x2c6   :  { %v528_v41 = vmax.f32 %v6307_v29, %v527_v62  ;;  %4644 = vmatmul.mubr.msk.bf16.gmra.mrb[132].mxu1 %vm264_vm2, %v6022_v4 }
 0x2c7   :  { %v531_v48 = vsel %vm478_vm4, %v6311_v34, -inf  ;;  %2660 = vmatprep.mubr.bf16.mxu1 %v9002_v30 }
 0x2c8   :  { %529 = vmax.xlane.f32.xlu1 %v528_v41  ;;  %v532_v6 = vmax.f32 %v6319_v56, %v531_v48 }
 0x2c9   :  { %v423_v55 = vpop.f32.mrb[28].mxu1 }
 0x2ca   :  { %v425_v40 = vpop.f32.mrb[29].mxu1  ;;  %v6324_v49 = vmul.f32 0.35355338, %v423_v55 }
 0x2cb   :  { %v6322_v35 = vmul.f32 0.35355338, %v425_v40  ;;  %v427_v42 = vpop.f32.mrb[30].mxu1 }
 0x2cc   :  { %533 = vmax.xlane.f32.xlu1 %v532_v6  ;;  %v429_v2 = vpop.f32.mrb[31].mxu1  ;;  %v6331_v12 = vmul.f32 0.35355338, %v427_v42 }
 0x2cd   :  { %v535_v4 = vsel %vm478_vm4, %v6322_v35, -inf  ;;  %v6328_v61 = vmul.f32 0.35355338, %v429_v2 }
 0x2ce   :  { %v536_v8 = vmax.f32 %v6324_v49, %v535_v4  ;;  %4645 = vmatmul.mubr.msk.bf16.gmra.mrb[136].mxu1 %vm264_vm2, %v6030_v36 }
 0x2cf   :  { %v539_v15 = vsel %vm478_vm4, %v6328_v61, -inf  ;;  %2670 = vmatprep.mubr.bf16.mxu1 %v9002_v30 }
 0x2d0   :  { %537 = vmax.xlane.f32.xlu1 %v536_v8  ;;  %v540_v50 = vmax.f32 %v6331_v12, %v539_v15 }
 0x2d1   :  { %v433_v18 = vpop.f32.mrb[32].mxu1 }
 0x2d2   :  { %541 = vmax.xlane.f32.xlu0 %v540_v50  ;;  %v435_v27 = vpop.f32.mrb[33].mxu1  ;;  %v6341_v41 = vmul.f32 0.35355338, %v433_v18 }
 0x2d3   :  { %v6339_v31 = vmul.f32 0.35355338, %v435_v27  ;;  %v437_v62 = vpop.f32.mrb[34].mxu1 }
 0x2d4   :  { %v6343_v48 = vmul.f32 0.35355338, %v437_v62  ;;  %v439_v36 = vpop.f32.mrb[35].mxu1 }
 0x2d5   :  { %v543_v55 = vsel %vm478_vm4, %v6339_v31, -inf  ;;  %v6347_v6 = vmul.f32 0.35355338, %v439_v36 }
 0x2d6   :  { %v544_v40 = vmax.f32 %v6341_v41, %v543_v55  ;;  %4646 = vmatmul.mubr.msk.bf16.gmra.mrb[140].mxu1 %vm264_vm2, %v6066_v11  ;;  %v548_v42 = vsel %vm547_vm5, %v6343_v48, -inf }
 0x2d7   :  { %v550_v2 = vsel %vm549_vm6, %v6347_v6, -inf  ;;  %4803 = vmatprep.mubr.msk.bf16.mxu1 %vm5509_vm0, %v9203_v19 }
 0x2d8   :  { %545 = vmax.xlane.f32.xlu1 %v544_v40  ;;  %v551_v4 = vmax.f32 %v548_v42, %v550_v2 }
 0x2d9   :  { %v1102_v8 = vpop.f32.mrb[36].mxu1 }
 0x2da   :  { %v1104_v15 = vpop.f32.mrb[37].mxu1  ;;  %552 = vmax.xlane.f32.xlu0 %v551_v4  ;;  %v6360_v27 = vmul.f32 0.35355338, %v1102_v8 }
 0x2db   :  { %v6358_v50 = vmul.f32 0.35355338, %v1104_v15  ;;  %v1106_v18 = vpop.f32.mrb[38].mxu1 }
 0x2dc   :  { %v1108_v11 = vpop.f32.mrb[39].mxu1  ;;  %v6367_v30 = vmul.f32 0.35355338, %v1106_v18 }
 0x2dd   :  { %v1227_v62 = vsel %vm478_vm4, %v6358_v50, -inf  ;;  %v6364_v36 = vmul.f32 0.35355338, %v1108_v11 }
 0x2de   :  { %v1228_v55 = vmax.f32 %v6360_v27, %v1227_v62 }
 0x2df   :  { %v1231_v40 = vsel %vm478_vm4, %v6364_v36, -inf }
 0x2e0   :  { %1229 = vmax.xlane.f32.xlu1 %v1228_v55  ;;  %v1232_v42 = vmax.f32 %v6367_v30, %v1231_v40 }
 0x2e1   :  { %v1112_v2 = vpop.f32.mrb[40].mxu1 }
 0x2e2   :  { %v1114_v4 = vpop.f32.mrb[41].mxu1  ;;  %1233 = vmax.xlane.f32.xlu0 %v1232_v42  ;;  %v6374_v19 = vmul.f32 0.35355338, %v1112_v2 }
 0x2e3   :  { %v6372_v8 = vmul.f32 0.35355338, %v1114_v4  ;;  %v1116_v15 = vpop.f32.mrb[42].mxu1 }
 0x2e4   :  { %v1118_v11 = vpop.f32.mrb[43].mxu1  ;;  %v6381_v24 = vmul.f32 0.35355338, %v1116_v15 }
 0x2e5   :  { %v1235_v62 = vsel %vm478_vm4, %v6372_v8, -inf  ;;  %v6378_v18 = vmul.f32 0.35355338, %v1118_v11 }
 0x2e6   :  { %v1236_v17 = vmax.f32 %v6374_v19, %v1235_v62 }
 0x2e7   :  { %v1239_v55 = vsel %vm478_vm4, %v6378_v18, -inf }
 0x2e8   :  { %v1240_v40 = vmax.f32 %v6381_v24, %v1239_v55  ;;  %1237 = vmax.xlane.f32.xlu1 %v1236_v17 }
 0x2e9   :  { %v1122_v42 = vpop.f32.mrb[44].mxu1 }
 0x2ea   :  { %v1124_v4 = vpop.f32.mrb[45].mxu1  ;;  %1241 = vmax.xlane.f32.xlu0 %v1240_v40  ;;  %v6388_v10 = vmul.f32 0.35355338, %v1122_v42 }
 0x2eb   :  { %v6386_v2 = vmul.f32 0.35355338, %v1124_v4  ;;  %v1126_v3 = vpop.f32.mrb[46].mxu1 }
 0x2ec   :  { %v1128_v11 = vpop.f32.mrb[47].mxu1  ;;  %v6397_v17 = vmul.f32 0.35355338, %v1126_v3 }
 0x2ed   :  { %v1243_v62 = vsel %vm478_vm4, %v6386_v2, -inf  ;;  %v6392_v15 = vmul.f32 0.35355338, %v1128_v11 }
 0x2ee   :  { %v1244_v52 = vmax.f32 %v6388_v10, %v1243_v62  ;;  %9205 = vst [vmem:[#allocation16_spill] sm:$0xff] %v6397_v17 }
 0x2ef   :  { %9204 = vst [vmem:[#allocation15_spill] sm:$0xff] %v6392_v15  ;;  %v1247_v55 = vsel %vm478_vm4, %v6392_v15, -inf }
 0x2f0   :  { %1245 = vmax.xlane.f32.xlu0 %v1244_v52  ;;  %v1248_v4 = vmax.f32 %v6397_v17, %v1247_v55 }
 0x2f1   :  { %v1132_v40 = vpop.f32.mrb[48].mxu1 }
 0x2f2   :  { %v1134_v59 = vpop.f32.mrb[49].mxu1  ;;  %v6402_v45 = vmul.f32 0.35355338, %v1132_v40 }
 0x2f3   :  { %v6400_v42 = vmul.f32 0.35355338, %v1134_v59  ;;  %v1136_v38 = vpop.f32.mrb[50].mxu1 }
 0x2f4   :  { %v1138_v33 = vpop.f32.mrb[51].mxu1  ;;  %1249 = vmax.xlane.f32.xlu0 %v1248_v4  ;;  %v6411_v54 = vmul.f32 0.35355338, %v1136_v38 }
 0x2f5   :  { %v1251_v11 = vsel %vm478_vm4, %v6400_v42, -inf  ;;  %v6406_v62 = vmul.f32 0.35355338, %v1138_v33 }
 0x2f6   :  { %v1252_v3 = vmax.f32 %v6402_v45, %v1251_v11  ;;  %9207 = vst [vmem:[#allocation18_spill] sm:$0xff] %v6411_v54 }
 0x2f7   :  { %9206 = vst [vmem:[#allocation17_spill] sm:$0xff] %v6406_v62  ;;  %v1255_v52 = vsel %vm478_vm4, %v6406_v62, -inf }
 0x2f8   :  { %1253 = vmax.xlane.f32.xlu0 %v1252_v3  ;;  %v1256_v55 = vmax.f32 %v6411_v54, %v1255_v52  ;;  %v6425_v3 = vpop.permute.xlu1 %1565  ;;  %v6430_v54 = vpop.permute.xlu0 %1561 }
 0x2f9   :  { %v1142_v59 = vpop.f32.mrb[52].mxu1  ;;  %9212 = vst [vmem:[#allocation23_spill] sm:$0xff] %v6425_v3  ;;  %9213 = vst [vmem:[#allocation24_spill] sm:$0xff] %v6430_v54 }
 0x2fa   :  { %v1144_v40 = vpop.f32.mrb[53].mxu1  ;;  %v6416_v53 = vmul.f32 0.35355338, %v1142_v59 }
 0x2fb   :  { %v6414_v9 = vmul.f32 0.35355338, %v1144_v40  ;;  %v1146_v4 = vpop.f32.mrb[54].mxu1 }
 0x2fc   :  { %9209 = vst [vmem:[#allocation20_spill] sm:$0xff] %v6416_v53  ;;  %v1148_v5 = vpop.f32.mrb[55].mxu1  ;;  %1257 = vmax.xlane.f32.xlu0 %v1256_v55  ;;  %v6423_v62 = vmul.f32 0.35355338, %v1146_v4 }
 0x2fd   :  { %9208 = vst [vmem:[#allocation19_spill] sm:$0xff] %v6414_v9  ;;  %v1259_v33 = vsel %vm478_vm4, %v6414_v9, -inf  ;;  %v6420_v11 = vmul.f32 0.35355338, %v1148_v5 }
 0x2fe   :  { %v1260_v38 = vmax.f32 %v6416_v53, %v1259_v33  ;;  %9211 = vst [vmem:[#allocation22_spill] sm:$0xff] %v6423_v62  ;;  %v6436_v33 = vpop.permute.xlu1 %2298 }
 0x2ff   :  { %9210 = vst [vmem:[#allocation21_spill] sm:$0xff] %v6420_v11  ;;  %v1263_v52 = vsel %vm478_vm4, %v6420_v11, -inf  ;;  %9216 = vst [vmem:[#allocation27_spill] sm:$0xff] %v6436_v33 }
 0x300   :  { %v1264_v40 = vmax.f32 %v6423_v62, %v1263_v52  ;;  %1261 = vmax.xlane.f32.xlu0 %v1260_v38 }
 0x301   :  { %v1152_v59 = vpop.f32.mrb[56].mxu1 }
 0x302   :  { %1265 = vmax.xlane.f32.xlu1 %v1264_v40  ;;  %v1154_v55 = vpop.f32.mrb[57].mxu1  ;;  %v6434_v17 = vmul.f32 0.35355338, %v1152_v59  ;;  %v6448_v59 = vpop.permute.xlu0 %1563 }
 0x303   :  { %v6432_v9 = vmul.f32 0.35355338, %v1154_v55  ;;  %v1156_v5 = vpop.f32.mrb[58].mxu1  ;;  %9219 = vst [vmem:[#allocation30_spill] sm:$0xff] %v6448_v59  ;;  %v6450_v62 = vpop.permute.xlu1 %1569 }
 0x304   :  { %9215 = vst [vmem:[#allocation26_spill] sm:$0xff] %v6434_v17  ;;  %v1158_v4 = vpop.f32.mrb[59].mxu1  ;;  %v6443_v52 = vmul.f32 0.35355338, %v1156_v5  ;;  %9220 = vst [vmem:[#allocation31_spill] sm:$0xff] %v6450_v62 }
 0x305   :  { %9214 = vst [vmem:[#allocation25_spill] sm:$0xff] %v6432_v9  ;;  %v1267_v3 = vsel %vm478_vm4, %v6432_v9, -inf  ;;  %v6440_v11 = vmul.f32 0.35355338, %v1158_v4 }
 0x306   :  { %v1268_v38 = vmax.f32 %v6434_v17, %v1267_v3  ;;  %9218 = vst [vmem:[#allocation29_spill] sm:$0xff] %v6443_v52  ;;  %v6463_v59 = vpop.permute.xlu0 %1567 }
 0x307   :  { %9217 = vst [vmem:[#allocation28_spill] sm:$0xff] %v6440_v11  ;;  %v1271_v40 = vsel %vm478_vm4, %v6440_v11, -inf  ;;  %9225 = vst [vmem:[#allocation36_spill] sm:$0xff] %v6463_v59 }
 0x308   :  { %v1272_v55 = vmax.f32 %v6443_v52, %v1271_v40  ;;  %1269 = vmax.xlane.f32.xlu0 %v1268_v38 }
 0x309   :  { %v1162_v54 = vpop.f32.mrb[60].mxu1 }
 0x30a   :  { %1273 = vmax.xlane.f32.xlu1 %v1272_v55  ;;  %v1164_v33 = vpop.f32.mrb[61].mxu1  ;;  %v6454_v53 = vmul.f32 0.35355338, %v1162_v54  ;;  %v6468_v54 = vpop.permute.xlu1 %2302 }
 0x30b   :  { %v6452_v9 = vmul.f32 0.35355338, %v1164_v33  ;;  %v1166_v4 = vpop.f32.mrb[62].mxu1  ;;  %9226 = vst [vmem:[#allocation37_spill] sm:$0xff] %v6468_v54 }
 0x30c   :  { %9222 = vst [vmem:[#allocation33_spill] sm:$0xff] %v6454_v53  ;;  %v1168_v3 = vpop.f32.mrb[63].mxu1  ;;  %v6461_v40 = vmul.f32 0.35355338, %v1166_v4 }
 0x30d   :  { %9221 = vst [vmem:[#allocation32_spill] sm:$0xff] %v6452_v9  ;;  %v1275_v5 = vsel %vm478_vm4, %v6452_v9, -inf  ;;  %v6458_v11 = vmul.f32 0.35355338, %v1168_v3 }
 0x30e   :  { %v1276_v38 = vmax.f32 %v6454_v53, %v1275_v5  ;;  %9224 = vst [vmem:[#allocation35_spill] sm:$0xff] %v6461_v40  ;;  %v6474_v5 = vpop.permute.xlu0 %2300 }
 0x30f   :  { %9223 = vst [vmem:[#allocation34_spill] sm:$0xff] %v6458_v11  ;;  %v1279_v55 = vsel %vm478_vm4, %v6458_v11, -inf  ;;  %9229 = vst [vmem:[#allocation40_spill] sm:$0xff] %v6474_v5 }
 0x310   :  { %v1280_v33 = vmax.f32 %v6461_v40, %v1279_v55  ;;  %1277 = vmax.xlane.f32.xlu0 %v1276_v38  ;;  %v6481_v55 = vpop.permute.xlu1 %2304 }
 0x311   :  { %v1172_v62 = vpop.f32.mrb[64].mxu1  ;;  %9231 = vst [vmem:[#allocation42_spill] sm:$0xff] %v6481_v55 }
 0x312   :  { %1281 = vmax.xlane.f32.xlu1 %v1280_v33  ;;  %v1174_v52 = vpop.f32.mrb[65].mxu1  ;;  %v6472_v9 = vmul.f32 0.35355338, %v1172_v62  ;;  %v6488_v5 = vpop.permute.xlu0 %2306 }
 0x313   :  { %v6470_v17 = vmul.f32 0.35355338, %v1174_v52  ;;  %v1176_v3 = vpop.f32.mrb[66].mxu1  ;;  %9233 = vst [vmem:[#allocation44_spill] sm:$0xff] %v6488_v5 }
 0x314   :  { %9228 = vst [vmem:[#allocation39_spill] sm:$0xff] %v6472_v9  ;;  %v1178_v4 = vpop.f32.mrb[67].mxu1  ;;  %v6485_v52 = vmul.f32 0.35355338, %v1176_v3 }
 0x315   :  { %9227 = vst [vmem:[#allocation38_spill] sm:$0xff] %v6470_v17  ;;  %v1283_v59 = vsel %vm478_vm4, %v6470_v17, -inf  ;;  %v6478_v11 = vmul.f32 0.35355338, %v1178_v4 }
 0x316   :  { %v1284_v38 = vmax.f32 %v6472_v9, %v1283_v59  ;;  %9232 = vst [vmem:[#allocation43_spill] sm:$0xff] %v6485_v52  ;;  %v6496_v9 = vpop.permute.xlu1 %2308 }
 0x317   :  { %9230 = vst [vmem:[#allocation41_spill] sm:$0xff] %v6478_v11  ;;  %v1287_v33 = vsel %vm478_vm4, %v6478_v11, -inf  ;;  %9237 = vst [vmem:[#allocation48_spill] sm:$0xff] %v6496_v9 }
 0x318   :  { %1285 = vmax.xlane.f32.xlu1 %v1284_v38  ;;  %v1288_v54 = vmax.f32 %v6485_v52, %v1287_v33 }
 0x319   :  { %v1182_v62 = vpop.f32.mrb[68].mxu1 }
 0x31a   :  { %v1184_v40 = vpop.f32.mrb[69].mxu1  ;;  %v6492_v17 = vmul.f32 0.35355338, %v1182_v62  ;;  %v6509_v9 = vpop.permute.xlu1 %2312 }
 0x31b   :  { %v6490_v53 = vmul.f32 0.35355338, %v1184_v40  ;;  %v1186_v4 = vpop.f32.mrb[70].mxu1  ;;  %9240 = vst [vmem:[#allocation51_spill] sm:$0xff] %v6509_v9 }
 0x31c   :  { %9235 = vst [vmem:[#allocation46_spill] sm:$0xff] %v6492_v17  ;;  %v6494_v59 = vmul.f32 0.35355338, %v1186_v4  ;;  %1289 = vmax.xlane.f32.xlu1 %v1288_v54  ;;  %v1188_v55 = vpop.f32.mrb[71].mxu1  ;;  %v6507_v4 = vpop.permute.xlu0 %2310 }
 0x31d   :  { %9234 = vst [vmem:[#allocation45_spill] sm:$0xff] %v6490_v53  ;;  %v1291_v3 = vsel %vm478_vm4, %v6490_v53, -inf  ;;  %v6500_v38 = vmul.f32 0.35355338, %v1188_v55  ;;  %9239 = vst [vmem:[#allocation50_spill] sm:$0xff] %v6507_v4 }
 0x31e   :  { %9236 = vst [vmem:[#allocation47_spill] sm:$0xff] %v6494_v59  ;;  %v1292_v33 = vmax.f32 %v6492_v17, %v1291_v3  ;;  %v1295_v40 = vsel %vm547_vm5, %v6494_v59, -inf }
 0x31f   :  { %9238 = vst [vmem:[#allocation49_spill] sm:$0xff] %v6500_v38  ;;  %v1296_v62 = vsel %vm549_vm6, %v6500_v38, -inf }
 0x320   :  { %v1297_v5 = vmax.f32 %v1295_v40, %v1296_v62  ;;  %1293 = vmax.xlane.f32.xlu0 %v1292_v33 }
 0x321   :  { %v1847_v54 = vpop.f32.mrb[72].mxu1 }
 0x322   :  { %v1849_v11 = vpop.f32.mrb[73].mxu1  ;;  %1298 = vmax.xlane.f32.xlu1 %v1297_v5  ;;  %v6513_v52 = vmul.f32 0.35355338, %v1847_v54 }
 0x323   :  { %v6511_v53 = vmul.f32 0.35355338, %v1849_v11  ;;  %v1851_v55 = vpop.f32.mrb[74].mxu1 }
 0x324   :  { %9242 = vst [vmem:[#allocation53_spill] sm:$0xff] %v6513_v52  ;;  %v1853_v3 = vpop.f32.mrb[75].mxu1  ;;  %v6520_v62 = vmul.f32 0.35355338, %v1851_v55 }
 0x325   :  { %9241 = vst [vmem:[#allocation52_spill] sm:$0xff] %v6511_v53  ;;  %v1972_v59 = vsel %vm478_vm4, %v6511_v53, -inf  ;;  %v6517_v17 = vmul.f32 0.35355338, %v1853_v3  ;;  %v482_v40 = vpop.xlane.xlu0 %481 }
 0x326   :  { %v1973_v33 = vmax.f32 %v6513_v52, %v1972_v59  ;;  %v554_v5 = vsub.f32 %v6205_v25, %v482_v40  ;;  %v555_v9 = vsub.f32 %v6203_v22, %v482_v40 }
 0x327   :  { %9243 = vst [vmem:[#allocation54_spill] sm:$0xff] %v6517_v17  ;;  %v1976_v11 = vsel %vm478_vm4, %v6517_v17, -inf  ;;  %v486_v54 = vpop.xlane.xlu1 %485 }
 0x328   :  { %v1977_v4 = vmax.f32 %v6520_v62, %v1976_v11  ;;  %v590_v38 = vmul.f32 1.442695, %v554_v5  ;;  %v592_v15 = vmul.f32 1.442695, %v555_v9  ;;  %v556_v3 = vsub.f32 %v6211_v32, %v486_v54  ;;  %1974 = vmax.xlane.f32.xlu0 %v1973_v33 }
 0x329   :  { %v557_v53 = vsub.f32 %v6207_v28, %v486_v54  ;;  %v1857_v59 = vpop.f32.mrb[76].mxu1 }
 0x32a   :  { %4950 = vpow2.f32 %v590_v38  ;;  %v594_v55 = vmul.f32 1.442695, %v556_v3  ;;  %v1859_v52 = vpop.f32.mrb[77].mxu1  ;;  %1978 = vmax.xlane.f32.xlu1 %v1977_v4  ;;  %v6531_v17 = vmul.f32 0.35355338, %v1857_v59 }
 0x32b   :  { %4952 = vpow2.f32 %v592_v15  ;;  %v596_v22 = vmul.f32 1.442695, %v557_v53  ;;  %v6529_v25 = vmul.f32 0.35355338, %v1859_v52  ;;  %v1861_v40 = vpop.f32.mrb[78].mxu1 }
 0x32c   :  { %4954 = vpow2.f32 %v594_v55  ;;  %v1863_v5 = vpop.f32.mrb[79].mxu1  ;;  %v6538_v33 = vmul.f32 0.35355338, %v1861_v40 }
 0x32d   :  { %9244 = vst [vmem:[#allocation55_spill] sm:$0xff] %v6529_v25  ;;  %4956 = vpow2.f32 %v596_v22  ;;  %v1980_v9 = vsel %vm478_vm4, %v6529_v25, -inf  ;;  %v6535_v32 = vmul.f32 0.35355338, %v1863_v5  ;;  %v490_v28 = vpop.xlane.xlu1 %489 }
 0x32e   :  { %v1981_v38 = vmax.f32 %v6531_v17, %v1980_v9  ;;  %9246 = vst [vmem:[#allocation57_spill] sm:$0xff] %v6538_v33  ;;  %v558_v53 = vsub.f32 %v6222_v60, %v490_v28  ;;  %v559_v15 = vsub.f32 %v6220_v39, %v490_v28 }
 0x32f   :  { %9245 = vst [vmem:[#allocation56_spill] sm:$0xff] %v6535_v32  ;;  %v1984_v52 = vsel %vm478_vm4, %v6535_v32, -inf }
 0x330   :  { %v1985_v4 = vmax.f32 %v6538_v33, %v1984_v52  ;;  %v598_v11 = vmul.f32 1.442695, %v558_v53  ;;  %v600_v54 = vmul.f32 1.442695, %v559_v15  ;;  %1982 = vmax.xlane.f32.xlu0 %v1981_v38 }
 0x331   :  { %v494_v3 = vpop.xlane.xlu1 %493  ;;  %v1867_v59 = vpop.f32.mrb[80].mxu1 }
 0x332   :  { %v560_v55 = vsub.f32 %v6234_v47, %v494_v3  ;;  %v561_v22 = vsub.f32 %v6224_v44, %v494_v3  ;;  %v1869_v40 = vpop.f32.mrb[81].mxu1  ;;  %1986 = vmax.xlane.f32.xlu1 %v1985_v4  ;;  %4958 = vpow2.f32 %v600_v54  ;;  %v6569_v25 = vmul.f32 0.35355338, %v1867_v59 }
 0x333   :  { %v6547_v60 = vmul.f32 0.35355338, %v1869_v40  ;;  %v1871_v39 = vpop.f32.mrb[82].mxu1  ;;  %4960 = vpow2.f32 %v598_v11 }
 0x334   :  { %v6549_v5 = vpop.eup %4950  ;;  %v604_v9 = vmul.f32 1.442695, %v561_v22  ;;  %v602_v53 = vmul.f32 1.442695, %v560_v55  ;;  %v1873_v38 = vpop.f32.mrb[83].mxu1 }
 0x335   :  { %9247 = vst [vmem:[#allocation58_spill] sm:$0xff] %v6547_v60  ;;  %9248 = vst [vmem:[#allocation59_spill] sm:$0xff] %v6549_v5  ;;  %v6551_v28 = vpop.eup %4952  ;;  %v498_v15 = vpop.xlane.xlu1 %497  ;;  %v1988_v4 = vsel %vm478_vm4, %v6547_v60, -inf  ;;  %v6566_v40 = vmul.f32 0.35355338, %v1873_v38 }
 0x336   :  { %9249 = vst [vmem:[#allocation60_spill] sm:$0xff] %v6551_v28  ;;  %v6553_v52 = vpop.eup %4954  ;;  %v562_v47 = vsub.f32 %v6239_v58, %v498_v15  ;;  %v563_v54 = vsub.f32 %v6237_v46, %v498_v15  ;;  %v662_v11 = vsel %vm478_vm4, %v6551_v28, 0.0  ;;  %4962 = vpow2.f32 %v604_v9 }
 0x337   :  { %9250 = vst [vmem:[#allocation61_spill] sm:$0xff] %v6553_v52  ;;  %v6556_v44 = vpop.eup %4956  ;;  %v663_v55 = vadd.f32 %v6549_v5, %v662_v11  ;;  %4964 = vpow2.f32 %v602_v53  ;;  %v1989_v15 = vmax.f32 %v6569_v25, %v1988_v4  ;;  %v1992_v38 = vsel %vm478_vm4, %v6566_v40, -inf }
 0x338   :  { %9251 = vst [vmem:[#allocation62_spill] sm:$0xff] %v6556_v44  ;;  %v606_v3 = vmul.f32 1.442695, %v562_v47  ;;  %v666_v22 = vsel %vm478_vm4, %v6556_v44, 0.0  ;;  %v608_v58 = vmul.f32 1.442695, %v563_v54 }
 0x339   :  { %v502_v32 = vpop.xlane.xlu1 %501  ;;  %v1877_v33 = vpop.f32.mrb[84].mxu1  ;;  %v667_v60 = vadd.f32 %v6553_v52, %v666_v22  ;;  %664 = vadd.xlane.f32.xlu1 %v663_v55 }
 0x33a   :  { %4966 = vpow2.f32 %v606_v3  ;;  %v1879_v46 = vpop.f32.mrb[85].mxu1  ;;  %v565_v47 = vsub.f32 %v6241_v63, %v502_v32  ;;  %v6581_v3 = vmul.f32 0.35355338, %v1871_v39  ;;  %v564_v4 = vsub.f32 %v6251_v0, %v502_v32 }
 0x33b   :  { %4968 = vpow2.f32 %v608_v58  ;;  %668 = vadd.xlane.f32.xlu0 %v667_v60  ;;  %v1881_v9 = vpop.f32.mrb[86].mxu1  ;;  %v6577_v54 = vmul.f32 0.35355338, %v1879_v46 }
 0x33c   :  { %v6573_v53 = vpop.eup %4958  ;;  %v1883_v11 = vpop.f32.mrb[87].mxu1  ;;  %v1993_v58 = vmax.f32 %v6581_v3, %v1992_v38  ;;  %v612_v46 = vmul.f32 1.442695, %v565_v47 }
 0x33d   :  { %9252 = vst [vmem:[#allocation63_spill] sm:$0xff] %v6573_v53  ;;  %9253 = vst [vmem:[#allocation64_spill] sm:$0xff] %v6577_v54  ;;  %v506_v59 = vpop.xlane.xlu1 %505  ;;  %v6579_v22 = vpop.eup %4960  ;;  %1990 = vmax.xlane.f32.xlu1 %v1989_v15  ;;  %v670_v55 = vsel %vm478_vm4, %v6573_v53, 0.0  ;;  %v1996_v28 = vsel %vm478_vm4, %v6577_v54, -inf }
 0x33e   :  { %9254 = vst [vmem:[#allocation65_spill] sm:$0xff] %v6579_v22  ;;  %v566_v60 = vsub.f32 %v6256_v16, %v506_v59  ;;  %v567_v63 = vsub.f32 %v6254_v14, %v506_v59  ;;  %v671_v39 = vadd.f32 %v6579_v22, %v670_v55  ;;  %v6594_v16 = vmul.f32 0.35355338, %v1877_v33 }
 0x33f   :  { %v610_v14 = vmul.f32 1.442695, %v564_v4  ;;  %v510_v59 = vpop.xlane.xlu0 %509  ;;  %v6605_v33 = vmul.f32 0.35355338, %v1883_v11 }
 0x340   :  { %v614_v44 = vmul.f32 1.442695, %v566_v60  ;;  %v616_v52 = vmul.f32 1.442695, %v567_v63  ;;  %v6592_v5 = vpop.eup %4962  ;;  %672 = vadd.xlane.f32.xlu0 %v671_v39  ;;  %v1997_v38 = vmax.f32 %v6594_v16, %v1996_v28  ;;  %v568_v39 = vsub.f32 %v6263_v23, %v510_v59 }
 0x341   :  { %v1887_v15 = vpop.f32.mrb[88].mxu1  ;;  %9255 = vst [vmem:[#allocation66_spill] sm:$0xff] %v6592_v5  ;;  %1994 = vmax.xlane.f32.xlu1 %v1993_v58  ;;  %v6596_v0 = vpop.eup %4964  ;;  %9259 = vst [vmem:[#allocation70_spill] sm:$0xff] %v6605_v33  ;;  %v674_v4 = vsel %vm478_vm4, %v6592_v5, 0.0  ;;  %v2000_v11 = vsel %vm478_vm4, %v6605_v33, -inf }
 0x342   :  { %4970 = vpow2.f32 %v614_v44  ;;  %9256 = vst [vmem:[#allocation67_spill] sm:$0xff] %v6596_v0  ;;  %v1889_v32 = vpop.f32.mrb[89].mxu1 }
 0x343   :  { %4972 = vpow2.f32 %v616_v52  ;;  %v6601_v60 = vpop.f32.mrb[90].mxu1  ;;  %v569_v52 = vsub.f32 %v6260_v20, %v510_v59  ;;  %v6617_v22 = vmul.f32 0.35355338, %v1889_v32  ;;  %v618_v32 = vmul.f32 1.442695, %v568_v39 }
 0x344   :  { %v6598_v47 = vpop.eup %4966  ;;  %4974 = vpow2.f32 %v612_v46  ;;  %v1893_v44 = vpop.f32.mrb[91].mxu1  ;;  %v675_v46 = vadd.f32 %v6596_v0, %v674_v4 }
 0x345   :  { %9257 = vst [vmem:[#allocation68_spill] sm:$0xff] %v6598_v47  ;;  %v6603_v63 = vpop.eup %4968  ;;  %v514_v55 = vpop.xlane.xlu1 %513  ;;  %1998 = vmax.xlane.f32.xlu1 %v1997_v38  ;;  %4976 = vpow2.f32 %v610_v14  ;;  %9260 = vst [vmem:[#allocation71_spill] sm:$0xff] %v6617_v22  ;;  %v6623_v14 = vmul.f32 0.35355338, %v1881_v9  ;;  %v2004_v59 = vsel %vm478_vm4, %v6617_v22, -inf }
 0x346   :  { %9258 = vst [vmem:[#allocation69_spill] sm:$0xff] %v6603_v63  ;;  %v678_v58 = vsel %vm478_vm4, %v6603_v63, 0.0  ;;  %v571_v20 = vsub.f32 %v6271_v43, %v514_v55  ;;  %v6635_v43 = vmul.f32 0.35355338, %v1887_v15  ;;  %v6645_v54 = vmul.f32 0.35355338, %v1893_v44 }
 0x347   :  { %v679_v28 = vadd.f32 %v6598_v47, %v678_v58  ;;  %9261 = vst [vmem:[#allocation72_spill] sm:$0xff] %v6623_v14  ;;  %v620_v47 = vmul.f32 1.442695, %v569_v52  ;;  %v2001_v0 = vmax.f32 %v6623_v14, %v2000_v11  ;;  %v570_v11 = vsub.f32 %v6273_v57, %v514_v55 }
 0x348   :  { %v2005_v14 = vmax.f32 %v6635_v43, %v2004_v59 }
 0x349   :  { %v6619_v53 = vpop.xlane.xlu1 %517  ;;  %v6621_v38 = vpop.f32.mrb[92].mxu1  ;;  %680 = vadd.xlane.f32.xlu0 %v679_v28  ;;  %676 = vadd.xlane.f32.xlu1 %v675_v46  ;;  %v624_v28 = vmul.f32 1.442695, %v571_v20  ;;  %4978 = vpow2.f32 %v620_v47 }
 0x34a   :  { %v1899_v58 = vpop.f32.mrb[93].mxu1  ;;  %4980 = vpow2.f32 %v618_v32  ;;  %v573_v32 = vsub.f32 %v6277_v37, %v6619_v53 }
 0x34b   :  { %v1901_v4 = vpop.f32.mrb[94].mxu1  ;;  %4982 = vpow2.f32 %v624_v28  ;;  %v6664_v28 = vmul.f32 0.35355338, %v1899_v58 }
 0x34c   :  { %v6626_v63 = vpop.eup %4970  ;;  %v1903_v5 = vpop.f32.mrb[95].mxu1  ;;  %v6656_v55 = vmul.f32 0.35355338, %v1901_v4 }
 0x34d   :  { %9262 = vst [vmem:[#allocation73_spill] sm:$0xff] %v6626_v63  ;;  %v6629_v23 = vpop.eup %4972  ;;  %v522_v9 = vpop.xlane.xlu1 %521  ;;  %v6637_v46 = vmul.f32 0.35355338, %v1903_v5  ;;  %2002 = vmax.xlane.f32.xlu1 %v2001_v0  ;;  %9264 = vst [vmem:[#allocation75_spill] sm:$0xff] %v6664_v28 }
 0x34e   :  { %9263 = vst [vmem:[#allocation74_spill] sm:$0xff] %v6629_v23  ;;  %v6633_v33 = vpop.eup %4974  ;;  %v574_v52 = vsub.f32 %v6290_v1, %v522_v9  ;;  %v575_v39 = vsub.f32 %v6288_v51, %v522_v9  ;;  %v686_v22 = vsel %vm478_vm4, %v6629_v23, 0.0 }
 0x34f   :  { %v687_v20 = vadd.f32 %v6626_v63, %v686_v22  ;;  %v6648_v5 = vpop.eup %4976  ;;  %v2016_v1 = vsel %vm478_vm4, %v6637_v46, -inf  ;;  %v682_v51 = vsel %vm478_vm4, %v6633_v33, 0.0  ;;  %v622_v22 = vmul.f32 1.442695, %v570_v11 }
 0x350   :  { %v630_v15 = vmul.f32 1.442695, %v574_v52  ;;  %v632_v0 = vmul.f32 1.442695, %v575_v39  ;;  %v2017_v9 = vmax.f32 %v6656_v55, %v2016_v1  ;;  %v683_v52 = vadd.f32 %v6648_v5, %v682_v51 }
 0x351   :  { %v526_v57 = vpop.xlane.xlu1 %525  ;;  %v6652_v47 = vpop.f32.mrb[96].mxu1  ;;  %688 = vadd.xlane.f32.xlu0 %v687_v20  ;;  %2006 = vmax.xlane.f32.xlu1 %v2005_v14  ;;  %v2008_v39 = vsel %vm478_vm4, %v6645_v54, -inf  ;;  %v6667_v14 = vmul.f32 0.35355338, %v6601_v60  ;;  %v572_v11 = vsub.f32 %v6285_v26, %v6619_v53  ;;  %v628_v51 = vmul.f32 1.442695, %v573_v32 }
 0x352   :  { %v1909_v44 = vpop.f32.mrb[97].mxu1  ;;  %4984 = vpow2.f32 %v632_v0  ;;  %v2012_v53 = vsel %vm478_vm4, %v6664_v28, -inf  ;;  %v576_v32 = vsub.f32 %v6302_v13, %v526_v57 }
 0x353   :  { %v1911_v59 = vpop.f32.mrb[98].mxu1  ;;  %4986 = vpow2.f32 %v630_v15  ;;  %v577_v15 = vsub.f32 %v6294_v7, %v526_v57  ;;  %v2009_v0 = vmax.f32 %v6667_v14, %v2008_v39  ;;  %v6681_v26 = vpop.eup %4978 }
 0x354   :  { %v1913_v4 = vpop.f32.mrb[99].mxu1  ;;  %4988 = vpow2.f32 %v622_v22  ;;  %v6674_v1 = vmul.f32 0.35355338, %v1911_v59  ;;  %v690_v13 = vsel %vm478_vm4, %v6681_v26, 0.0 }
 0x355   :  { %v530_v20 = vpop.xlane.xlu1 %529  ;;  %2018 = vmax.xlane.f32.xlu0 %v2017_v9  ;;  %v6671_v37 = vmul.f32 0.35355338, %v1913_v4  ;;  %684 = vadd.xlane.f32.xlu1 %v683_v52  ;;  %v626_v52 = vmul.f32 1.442695, %v572_v11  ;;  %v6690_v4 = vpop.eup %4980  ;;  %4990 = vpow2.f32 %v628_v51 }
 0x356   :  { %v579_v58 = vsub.f32 %v6305_v21, %v530_v20  ;;  %v578_v63 = vsub.f32 %v6307_v29, %v530_v20  ;;  %v6687_v21 = vmul.f32 0.35355338, %v6621_v38  ;;  %v636_v29 = vmul.f32 1.442695, %v577_v15  ;;  %v6692_v23 = vpop.eup %4982 }
 0x357   :  { %v2024_v60 = vsel %vm478_vm4, %v6671_v37, -inf  ;;  %v634_v15 = vmul.f32 1.442695, %v576_v32 }
 0x358   :  { %v2025_v22 = vmax.f32 %v6674_v1, %v2024_v60  ;;  %v640_v7 = vmul.f32 1.442695, %v579_v58  ;;  %9265 = vst [vmem:[#allocation76_spill] sm:$0xff] %v6687_v21  ;;  %v2013_v58 = vmax.f32 %v6687_v21, %v2012_v53  ;;  %v638_v60 = vmul.f32 1.442695, %v578_v63 }
 0x359   :  { %v534_v59 = vpop.xlane.xlu1 %533  ;;  %v1917_v9 = vpop.f32.mrb[100].mxu1  ;;  %2010 = vmax.xlane.f32.xlu1 %v2009_v0 }
 0x35a   :  { %v1919_v39 = vpop.f32.mrb[101].mxu1  ;;  %2026 = vmax.xlane.f32.xlu0 %v2025_v22  ;;  %4992 = vpow2.f32 %v640_v7  ;;  %v581_v51 = vsub.f32 %v6311_v34, %v534_v59  ;;  %v691_v7 = vadd.f32 %v6690_v4, %v690_v13  ;;  %v694_v34 = vsel %vm478_vm4, %v6692_v23, 0.0 }
 0x35b   :  { %v1921_v20 = vpop.f32.mrb[102].mxu1  ;;  %4994 = vpow2.f32 %v626_v52  ;;  %v6701_v0 = vmul.f32 0.35355338, %v1919_v39  ;;  %v6711_v52 = vmul.f32 0.35355338, %v1909_v44 }
 0x35c   :  { %v6695_v28 = vpop.eup %4984  ;;  %v1923_v38 = vpop.f32.mrb[103].mxu1  ;;  %4996 = vpow2.f32 %v636_v29  ;;  %v6723_v44 = vmul.f32 0.35355338, %v1917_v9 }
 0x35d   :  { %9266 = vst [vmem:[#allocation77_spill] sm:$0xff] %v6695_v28  ;;  %v538_v11 = vpop.xlane.xlu1 %537  ;;  %v6699_v57 = vpop.eup %4986  ;;  %9268 = vst [vmem:[#allocation79_spill] sm:$0xff] %v6701_v0  ;;  %2014 = vmax.xlane.f32.xlu1 %v2013_v58  ;;  %v702_v53 = vsel %vm478_vm4, %v6695_v28, 0.0  ;;  %4998 = vpow2.f32 %v638_v60  ;;  %v6720_v58 = vmul.f32 0.35355338, %v1923_v38  ;;  %v2020_v28 = vsel %vm478_vm4, %v6711_v52, -inf }
 0x35e   :  { %9267 = vst [vmem:[#allocation78_spill] sm:$0xff] %v6699_v57  ;;  %v583_v63 = vsub.f32 %v6322_v35, %v538_v11  ;;  %v582_v22 = vsub.f32 %v6324_v49, %v538_v11  ;;  %v6709_v21 = vpop.eup %4988  ;;  %9270 = vst [vmem:[#allocation81_spill] sm:$0xff] %v6711_v52  ;;  %v703_v39 = vadd.f32 %v6699_v57, %v702_v53  ;;  %v2028_v35 = vsel %vm478_vm4, %v6701_v0, -inf }
 0x35f   :  { %9269 = vst [vmem:[#allocation80_spill] sm:$0xff] %v6709_v21  ;;  %5000 = vpow2.f32 %v634_v15  ;;  %v580_v49 = vsub.f32 %v6319_v56, %v534_v59  ;;  %v644_v60 = vmul.f32 1.442695, %v581_v51  ;;  %9271 = vst [vmem:[#allocation82_spill] sm:$0xff] %v6723_v44  ;;  %v695_v57 = vadd.f32 %v6709_v21, %v694_v34  ;;  %v6729_v0 = vpop.eup %4990 }
 0x360   :  { %v648_v32 = vmul.f32 1.442695, %v583_v63  ;;  %704 = vadd.xlane.f32.xlu0 %v703_v39  ;;  %v646_v13 = vmul.f32 1.442695, %v582_v22  ;;  %v542_v63 = vpop.xlane.xlu0 %541  ;;  %v2029_v38 = vmax.f32 %v6723_v44, %v2028_v35  ;;  %9272 = vst [vmem:[#allocation83_spill] sm:$0xff] %v6729_v0  ;;  %v2032_v59 = vsel %vm478_vm4, %v6720_v58, -inf }
 0x361   :  { %v6714_v29 = vpop.f32.mrb[104].mxu1  ;;  %692 = vadd.xlane.f32.xlu1 %v691_v7  ;;  %v6732_v56 = vmul.f32 0.35355338, %v6652_v47  ;;  %v642_v22 = vmul.f32 1.442695, %v580_v49 }
 0x362   :  { %v1929_v11 = vpop.f32.mrb[105].mxu1  ;;  %5002 = vpow2.f32 %v648_v32  ;;  %v6739_v39 = vmul.f32 0.35355338, %v1921_v20  ;;  %v585_v32 = vsub.f32 %v6328_v61, %v542_v63  ;;  %v698_v20 = vsel %vm478_vm4, %v6729_v0, 0.0 }
 0x363   :  { %v1931_v53 = vpop.f32.mrb[106].mxu1  ;;  %9273 = vst [vmem:[#allocation84_spill] sm:$0xff] %v6732_v56  ;;  %5004 = vpow2.f32 %v644_v60  ;;  %v2021_v47 = vmax.f32 %v6732_v56, %v2020_v28 }
 0x364   :  { %v1933_v7 = vpop.f32.mrb[107].mxu1  ;;  %v6737_v51 = vpop.eup %4992  ;;  %2030 = vmax.xlane.f32.xlu0 %v2029_v38  ;;  %5006 = vpow2.f32 %v646_v13  ;;  %v6755_v61 = vmul.f32 0.35355338, %v1931_v53  ;;  %v584_v13 = vsub.f32 %v6331_v12, %v542_v63  ;;  %v652_v38 = vmul.f32 1.442695, %v585_v32 }
 0x365   :  { %v546_v15 = vpop.xlane.xlu1 %545  ;;  %696 = vadd.xlane.f32.xlu1 %v695_v57  ;;  %9274 = vst [vmem:[#allocation85_spill] sm:$0xff] %v6737_v51  ;;  %v6742_v34 = vpop.eup %4994  ;;  %v6757_v60 = vmul.f32 0.35355338, %v1933_v7  ;;  %5008 = vpow2.f32 %v642_v22  ;;  %v6765_v7 = vmul.f32 0.35355338, %v1929_v11 }
 0x366   :  { %v587_v9 = vsub.f32 %v6339_v31, %v546_v15  ;;  %v586_v35 = vsub.f32 %v6341_v41, %v546_v15  ;;  %v6746_v44 = vpop.eup %4996  ;;  %v2033_v31 = vmax.f32 %v6739_v39, %v2032_v59  ;;  %v710_v41 = vsel %vm478_vm4, %v6737_v51, 0.0 }
 0x367   :  { %v6753_v49 = vpop.eup %4998  ;;  %v553_v15 = vpop.xlane.xlu0 %552  ;;  %v699_v21 = vadd.f32 %v6742_v34, %v698_v20  ;;  %9276 = vst [vmem:[#allocation87_spill] sm:$0xff] %v6765_v7  ;;  %v706_v22 = vsel %vm478_vm4, %v6746_v44, 0.0  ;;  %v2040_v12 = vsel %vm547_vm5, %v6755_v61, -inf  ;;  %v2041_v63 = vsel %vm549_vm6, %v6757_v60, -inf }
 0x368   :  { %v656_v57 = vmul.f32 1.442695, %v587_v9  ;;  %9275 = vst [vmem:[#allocation86_spill] sm:$0xff] %v6753_v49  ;;  %2034 = vmax.xlane.f32.xlu0 %v2033_v31  ;;  %v654_v9 = vmul.f32 1.442695, %v586_v35  ;;  %v588_v32 = vsub.f32 %v6343_v48, %v553_v15  ;;  %v2036_v48 = vsel %vm478_vm4, %v6765_v7, -inf }
 0x369   :  { %v6749_v52 = vpop.f32.mrb[108].mxu1  ;;  %2022 = vmax.xlane.f32.xlu1 %v2021_v47  ;;  %v6763_v53 = vpop.eup %5000  ;;  %v711_v47 = vadd.f32 %v6753_v49, %v710_v41  ;;  %v650_v31 = vmul.f32 1.442695, %v584_v13  ;;  %v6784_v51 = vmul.f32 0.35355338, %v6714_v29 }
 0x36a   :  { %v2594_v28 = vpop.f32.mrb[109].mxu1  ;;  %5010 = vpow2.f32 %v656_v57  ;;  %v589_v57 = vsub.f32 %v6347_v6, %v553_v15  ;;  %v707_v41 = vadd.f32 %v6763_v53, %v706_v22  ;;  %v658_v15 = vmul.f32 1.442695, %v588_v32 }
 0x36b   :  { %v2596_v59 = vpop.f32.mrb[110].mxu1  ;;  %5012 = vpow2.f32 %v652_v38  ;;  %v2037_v22 = vmax.f32 %v6784_v51, %v2036_v48  ;;  %v6800_v32 = vmul.f32 0.35355338, %v2594_v28 }
 0x36c   :  { %v2598_v56 = vpop.f32.mrb[111].mxu1  ;;  %v6776_v11 = vpop.eup %5002  ;;  %712 = vadd.xlane.f32.xlu0 %v711_v47  ;;  %5014 = vpow2.f32 %v654_v9  ;;  %v660_v29 = vmul.f32 1.442695, %v589_v57 }
 0x36d   :  { %v1230_v0 = vpop.xlane.xlu1 %1229  ;;  %700 = vadd.xlane.f32.xlu1 %v699_v21  ;;  %v6781_v49 = vpop.eup %5004  ;;  %v6792_v9 = vmul.f32 0.35355338, %v2598_v56  ;;  %5016 = vpow2.f32 %v650_v31  ;;  %9279 = vst [vmem:[#allocation90_spill] sm:$0xff] %v6800_v32 }
 0x36e   :  { %v1301_v35 = vsub.f32 %v6358_v50, %v1230_v0  ;;  %v1300_v20 = vsub.f32 %v6360_v27, %v1230_v0  ;;  %v2042_v50 = vmax.f32 %v2040_v12, %v2041_v63  ;;  %v6790_v6 = vpop.eup %5006  ;;  %v718_v0 = vsel %vm478_vm4, %v6776_v11, 0.0 }
 0x36f   :  { %v1234_v13 = vpop.xlane.xlu0 %1233  ;;  %9277 = vst [vmem:[#allocation88_spill] sm:$0xff] %v6790_v6  ;;  %9278 = vst [vmem:[#allocation89_spill] sm:$0xff] %v6792_v9  ;;  %v6798_v7 = vpop.eup %5008  ;;  %v719_v56 = vadd.f32 %v6790_v6, %v718_v0  ;;  %v2721_v31 = vsel %vm478_vm4, %v6792_v9, -inf }
 0x370   :  { %v1338_v21 = vmul.f32 1.442695, %v1301_v35  ;;  %2043 = vmax.xlane.f32.xlu0 %v2042_v50  ;;  %v1336_v12 = vmul.f32 1.442695, %v1300_v20  ;;  %v1303_v63 = vsub.f32 %v6364_v36, %v1234_v13  ;;  %v6809_v36 = vmul.f32 0.35355338, %v2596_v59 }
 0x371   :  { %v6788_v38 = vpop.f32.mrb[112].mxu1  ;;  %708 = vadd.xlane.f32.xlu1 %v707_v41  ;;  %v714_v41 = vsel %vm478_vm4, %v6781_v49, 0.0  ;;  %v1302_v28 = vsub.f32 %v6367_v30, %v1234_v13  ;;  %v6825_v13 = vmul.f32 0.35355338, %v6749_v52 }
 0x372   :  { %v2604_v27 = vpop.f32.mrb[113].mxu1  ;;  %5018 = vpow2.f32 %v1338_v21  ;;  %9281 = vst [vmem:[#allocation92_spill] sm:$0xff] %v6809_v36  ;;  %v1342_v50 = vmul.f32 1.442695, %v1303_v63  ;;  %v715_v21 = vadd.f32 %v6798_v7, %v714_v41 }
 0x373   :  { %v2606_v47 = vpop.f32.mrb[114].mxu1  ;;  %5020 = vpow2.f32 %v658_v15  ;;  %v2717_v15 = vsel %vm478_vm4, %v6800_v32, -inf  ;;  %9284 = vst [vmem:[#allocation95_spill] sm:$0xff] %v6825_v13  ;;  %v6838_v6 = vmul.f32 0.35355338, %v2604_v27 }
 0x374   :  { %v2608_v35 = vpop.f32.mrb[115].mxu1  ;;  %v6807_v20 = vpop.eup %5010  ;;  %5022 = vpow2.f32 %v660_v29  ;;  %720 = vadd.xlane.f32.xlu0 %v719_v56 }
 0x375   :  { %2038 = vmax.xlane.f32.xlu1 %v2037_v22  ;;  %v1238_v57 = vpop.xlane.xlu1 %1237  ;;  %9280 = vst [vmem:[#allocation91_spill] sm:$0xff] %v6807_v20  ;;  %5024 = vpow2.f32 %v1336_v12  ;;  %v6813_v0 = vpop.eup %5012  ;;  %v2722_v22 = vmax.f32 %v6809_v36, %v2721_v31  ;;  %v6827_v12 = vmul.f32 0.35355338, %v2608_v35  ;;  %v726_v41 = vsel %vm478_vm4, %v6807_v20, 0.0  ;;  %9287 = vst [vmem:[#allocation98_spill] sm:$0xff] %v6838_v6 }
 0x376   :  { %9282 = vst [vmem:[#allocation93_spill] sm:$0xff] %v6813_v0  ;;  %v1305_v9 = vsub.f32 %v6372_v8, %v1238_v57  ;;  %v6822_v30 = vpop.eup %5014  ;;  %v1304_v63 = vsub.f32 %v6374_v19, %v1238_v57  ;;  %v1340_v31 = vmul.f32 1.442695, %v1302_v28  ;;  %v2718_v36 = vmax.f32 %v6825_v13, %v2717_v15 }
 0x377   :  { %v1242_v48 = vpop.xlane.xlu0 %1241  ;;  %9283 = vst [vmem:[#allocation94_spill] sm:$0xff] %v6822_v30  ;;  %9285 = vst [vmem:[#allocation96_spill] sm:$0xff] %v6827_v12  ;;  %5026 = vpow2.f32 %v1342_v50  ;;  %v6836_v35 = vpop.eup %5016  ;;  %v727_v57 = vadd.f32 %v6822_v30, %v726_v41  ;;  %v722_v28 = vsel %vm478_vm4, %v6813_v0, 0.0 }
 0x378   :  { %v1307_v59 = vsub.f32 %v6378_v18, %v1242_v48  ;;  %v1306_v8 = vsub.f32 %v6381_v24, %v1242_v48  ;;  %2723 = vmax.xlane.f32.xlu0 %v2722_v22  ;;  %9286 = vst [vmem:[#allocation97_spill] sm:$0xff] %v6836_v35  ;;  %v1346_v19 = vmul.f32 1.442695, %v1305_v9  ;;  %v2729_v24 = vsel %vm478_vm4, %v6827_v12, -inf }
 0x379   :  { %v6820_v29 = vpop.f32.mrb[116].mxu1  ;;  %716 = vadd.xlane.f32.xlu1 %v715_v21  ;;  %v1344_v48 = vmul.f32 1.442695, %v1304_v63  ;;  %5028 = vpow2.f32 %v1340_v31  ;;  %v6848_v22 = vmul.f32 0.35355338, %v2606_v47  ;;  %v723_v13 = vadd.f32 %v6836_v35, %v722_v28 }
 0x37a   :  { %v2614_v56 = vpop.f32.mrb[117].mxu1  ;;  %v1350_v52 = vmul.f32 1.442695, %v1307_v59  ;;  %v1348_v27 = vmul.f32 1.442695, %v1306_v8 }
 0x37b   :  { %v6833_v18 = vpop.f32.mrb[118].mxu1  ;;  %9289 = vst [vmem:[#allocation100_spill] sm:$0xff] %v6848_v22  ;;  %v6866_v8 = vmul.f32 0.35355338, %v2614_v56 }
 0x37c   :  { %v2618_v32 = vpop.f32.mrb[119].mxu1  ;;  %v6846_v15 = vpop.eup %5018  ;;  %728 = vadd.xlane.f32.xlu0 %v727_v57  ;;  %5030 = vpow2.f32 %v1350_v52 }
 0x37d   :  { %v1246_v21 = vpop.xlane.xlu0 %1245  ;;  %2719 = vmax.xlane.f32.xlu1 %v2718_v36  ;;  %9288 = vst [vmem:[#allocation99_spill] sm:$0xff] %v6846_v15  ;;  %v6851_v59 = vpop.eup %5020  ;;  %v2730_v36 = vmax.f32 %v6848_v22, %v2729_v24  ;;  %5032 = vpow2.f32 %v1346_v19  ;;  %9294 = vst [vmem:[#allocation105_spill] sm:$0xff] %v6866_v8  ;;  %v1408_v57 = vsel %vm478_vm4, %v6846_v15, 0.0 }
 0x37e   :  { %v1309_v50 = vsub.f32 %v6386_v2, %v1246_v21  ;;  %v1308_v9 = vsub.f32 %v6388_v10, %v1246_v21  ;;  %9290 = vst [vmem:[#allocation101_spill] sm:$0xff] %v6851_v59  ;;  %v6854_v12 = vpop.eup %5022  ;;  %v2725_v2 = vsel %vm478_vm4, %v6838_v6, -inf  ;;  %v6864_v10 = vmul.f32 0.35355338, %v6788_v38 }
 0x37f   :  { %9291 = vst [vmem:[#allocation102_spill] sm:$0xff] %v6854_v12  ;;  %v6861_v31 = vpop.eup %5024  ;;  %5034 = vpow2.f32 %v1344_v48  ;;  %v730_v56 = vsel %vm547_vm5, %v6851_v59, 0.0  ;;  %v9333_v59 = vld [vmem:[#allocation28_spill] sm:$0xff] }
 0x380   :  { %v1354_v41 = vmul.f32 1.442695, %v1309_v50  ;;  %9292 = vst [vmem:[#allocation103_spill] sm:$0xff] %v6861_v31  ;;  %9293 = vst [vmem:[#allocation104_spill] sm:$0xff] %v6864_v10  ;;  %5036 = vpow2.f32 %v1348_v27  ;;  %v1352_v21 = vmul.f32 1.442695, %v1308_v9  ;;  %2731 = vmax.xlane.f32.xlu0 %v2730_v36  ;;  %v2726_v28 = vmax.f32 %v6864_v10, %v2725_v2 }
 0x381   :  { %v6859_v47 = vpop.f32.mrb[120].mxu1  ;;  %v1250_v63 = vpop.xlane.xlu0 %1249  ;;  %724 = vadd.xlane.f32.xlu1 %v723_v13  ;;  %v1409_v38 = vadd.f32 %v6861_v31, %v1408_v57  ;;  %v731_v13 = vsel %vm549_vm6, %v6854_v12, 0.0  ;;  %v2733_v27 = vsel %vm478_vm4, %v6866_v8, -inf  ;;  %v6882_v9 = vmul.f32 0.35355338, %v2618_v32  ;;  %v9298_v57 = vld [vmem:[#allocation15_spill] sm:$0xff] }
 0x382   :  { %v2624_v52 = vpop.f32.mrb[121].mxu1  ;;  %5038 = vpow2.f32 %v1354_v41  ;;  %v6878_v48 = vpop.eup %5026  ;;  %v6885_v41 = vmul.f32 0.35355338, %v6820_v29  ;;  %v1311_v22 = vsub.f32 %v9298_v57, %v1250_v63  ;;  %v732_v10 = vadd.f32 %v731_v13, %v730_v56 }
 0x383   :  { %v6870_v19 = vpop.f32.mrb[122].mxu1  ;;  %9295 = vst [vmem:[#allocation106_spill] sm:$0xff] %v6878_v48  ;;  %9296 = vst [vmem:[#allocation107_spill] sm:$0xff] %v6882_v9  ;;  %5040 = vpow2.f32 %v1352_v21  ;;  %v6890_v6 = vpop.eup %5028  ;;  %v1412_v29 = vsel %vm478_vm4, %v6878_v48, 0.0 }
 0x384   :  { %v2628_v24 = vpop.f32.mrb[123].mxu1  ;;  %9297 = vst [vmem:[#allocation108_spill] sm:$0xff] %v6885_v41  ;;  %1410 = vadd.xlane.f32.xlu0 %v1409_v38  ;;  %9299 = vst [vmem:[#allocation15_spill] sm:$0xff] %v6890_v6  ;;  %v2734_v31 = vmax.f32 %v6885_v41, %v2733_v27  ;;  %v6904_v38 = vmul.f32 0.35355338, %v6833_v18  ;;  %v1413_v15 = vadd.f32 %v6890_v6, %v1412_v29 }
 0x385   :  { %v1254_v50 = vpop.xlane.xlu0 %1253  ;;  %2727 = vmax.xlane.f32.xlu1 %v2726_v28  ;;  %v1358_v57 = vmul.f32 1.442695, %v1311_v22 }
 0x386   :  { %v1312_v2 = vsub.f32 %v6402_v45, %v1254_v50  ;;  %v1313_v36 = vsub.f32 %v6400_v42, %v1254_v50  ;;  %v6897_v28 = vpop.eup %5030  ;;  %v2737_v45 = vsel %vm478_vm4, %v6882_v9, -inf  ;;  %9302 = vst [vmem:[#allocation111_spill] sm:$0xff] %v6904_v38  ;;  %v9303_v50 = vld [vmem:[#allocation16_spill] sm:$0xff] }
 0x387   :  { %9300 = vst [vmem:[#allocation109_spill] sm:$0xff] %v6897_v28  ;;  %v6901_v21 = vpop.eup %5032  ;;  %v1310_v56 = vsub.f32 %v9303_v50, %v1250_v63  ;;  %v1420_v18 = vsel %vm478_vm4, %v6897_v28, 0.0  ;;  %v6917_v63 = vmul.f32 0.35355338, %v2624_v52 }
 0x388   :  { %v1362_v8 = vmul.f32 1.442695, %v1313_v36  ;;  %9301 = vst [vmem:[#allocation110_spill] sm:$0xff] %v6901_v21  ;;  %v1360_v13 = vmul.f32 1.442695, %v1312_v2  ;;  %2735 = vmax.xlane.f32.xlu0 %v2734_v31  ;;  %v1416_v22 = vsel %vm478_vm4, %v6901_v21, 0.0 }
 0x389   :  { %v6893_v32 = vpop.f32.mrb[124].mxu1  ;;  %733 = vadd.xlane.f32.xlu1 %v732_v10  ;;  %v6907_v36 = vpop.eup %5034  ;;  %v2738_v10 = vmax.f32 %v6904_v38, %v2737_v45  ;;  %9307 = vst [vmem:[#allocation114_spill] sm:$0xff] %v6917_v63  ;;  %v1356_v31 = vmul.f32 1.442695, %v1310_v56  ;;  %v9310_v45 = vld [vmem:[#allocation17_spill] sm:$0xff] }
 0x38a   :  { %v2634_v42 = vpop.f32.mrb[125].mxu1  ;;  %9304 = vst [vmem:[#allocation16_spill] sm:$0xff] %v6907_v36  ;;  %5042 = vpow2.f32 %v1362_v8  ;;  %v1258_v41 = vpop.xlane.xlu0 %1257  ;;  %v6921_v8 = vmul.f32 0.35355338, %v2628_v24  ;;  %v1417_v52 = vadd.f32 %v6907_v36, %v1416_v22  ;;  %v9314_v22 = vld [vmem:[#allocation18_spill] sm:$0xff] }
 0x38b   :  { %v2636_v27 = vpop.f32.mrb[126].mxu1  ;;  %v6910_v9 = vpop.eup %5036  ;;  %5044 = vpow2.f32 %v1360_v13  ;;  %v1315_v50 = vsub.f32 %v9310_v45, %v1258_v41  ;;  %v2741_v13 = vsel %vm478_vm4, %v6917_v63, -inf  ;;  %v1314_v45 = vsub.f32 %v9314_v22, %v1258_v41 }
 0x38c   :  { %9305 = vst [vmem:[#allocation112_spill] sm:$0xff] %v6910_v9  ;;  %v2638_v30 = vpop.f32.mrb[127].mxu1  ;;  %v6915_v48 = vpop.eup %5038  ;;  %2739 = vmax.xlane.f32.xlu0 %v2738_v10  ;;  %5046 = vpow2.f32 %v1358_v57  ;;  %9308 = vst [vmem:[#allocation115_spill] sm:$0xff] %v6921_v8  ;;  %v1421_v2 = vadd.f32 %v6910_v9, %v1420_v18  ;;  %v6937_v57 = vmul.f32 0.35355338, %v6859_v47  ;;  %v2745_v18 = vsel %vm478_vm4, %v6921_v8, -inf }
 0x38d   :  { %9306 = vst [vmem:[#allocation113_spill] sm:$0xff] %v6915_v48  ;;  %1414 = vadd.xlane.f32.xlu1 %v1413_v15  ;;  %v6924_v29 = vpop.eup %5040  ;;  %v6927_v38 = vmul.f32 0.35355338, %v2638_v30  ;;  %v1424_v56 = vsel %vm478_vm4, %v6915_v48, 0.0  ;;  %5048 = vpow2.f32 %v1356_v31  ;;  %v6940_v10 = vmul.f32 0.35355338, %v6870_v19 }
 0x38e   :  { %9309 = vst [vmem:[#allocation116_spill] sm:$0xff] %v6924_v29  ;;  %v1262_v24 = vpop.xlane.xlu0 %1261  ;;  %9312 = vst [vmem:[#allocation117_spill] sm:$0xff] %v6937_v57  ;;  %v6945_v48 = vmul.f32 0.35355338, %v2634_v42  ;;  %v1425_v63 = vadd.f32 %v6924_v29, %v1424_v56  ;;  %v1366_v47 = vmul.f32 1.442695, %v1315_v50 }
 0x38f   :  { %9311 = vst [vmem:[#allocation17_spill] sm:$0xff] %v6927_v38  ;;  %9313 = vst [vmem:[#allocation118_spill] sm:$0xff] %v6940_v10  ;;  %v2753_v31 = vsel %vm478_vm4, %v6927_v38, -inf  ;;  %v9316_v19 = vld [vmem:[#allocation19_spill] sm:$0xff]  ;;  %v6954_v8 = vmul.f32 0.35355338, %v2636_v27  ;;  %v2746_v41 = vmax.f32 %v6940_v10, %v2745_v18 }
 0x390   :  { %1418 = vadd.xlane.f32.xlu0 %v1417_v52  ;;  %9315 = vst [vmem:[#allocation18_spill] sm:$0xff] %v6945_v48  ;;  %v1317_v36 = vsub.f32 %v9316_v19, %v1262_v24  ;;  %v1266_v52 = vpop.xlane.xlu1 %1265  ;;  %v9319_v42 = vld [vmem:[#allocation20_spill] sm:$0xff]  ;;  %v1364_v56 = vmul.f32 1.442695, %v1314_v45  ;;  %v2749_v50 = vsel %vm478_vm4, %v6945_v48, -inf  ;;  %v9320_v38 = vld [vmem:[#allocation21_spill] sm:$0xff]  ;;  %5050 = vpow2.f32 %v1366_v47 }
 0x391   :  { %v6930_v15 = vpop.f32.mrb[128].mxu1  ;;  %1422 = vadd.xlane.f32.xlu1 %v1421_v2  ;;  %v2742_v2 = vmax.f32 %v6937_v57, %v2741_v13  ;;  %9318 = vst [vmem:[#allocation119_spill] sm:$0xff] %v6954_v8  ;;  %v1316_v22 = vsub.f32 %v9319_v42, %v1262_v24  ;;  %v2754_v13 = vmax.f32 %v6954_v8, %v2753_v31  ;;  %v6973_v45 = vmul.f32 0.35355338, %v6893_v32  ;;  %v9325_v31 = vld [vmem:[#allocation22_spill] sm:$0xff] }
 0x392   :  { %v2644_v30 = vpop.f32.mrb[129].mxu1  ;;  %v1319_v19 = vsub.f32 %v9320_v38, %v1266_v52  ;;  %v1370_v29 = vmul.f32 1.442695, %v1317_v36  ;;  %v1318_v47 = vsub.f32 %v9325_v31, %v1266_v52  ;;  %5052 = vpow2.f32 %v1364_v56 }
 0x393   :  { %v2646_v9 = vpop.f32.mrb[130].mxu1  ;;  %9324 = vst [vmem:[#allocation121_spill] sm:$0xff] %v6973_v45  ;;  %v1368_v38 = vmul.f32 1.442695, %v1316_v22  ;;  %v2750_v36 = vmax.f32 %v6973_v45, %v2749_v50  ;;  %v9327_v22 = vld [vmem:[#allocation25_spill] sm:$0xff]  ;;  %v9331_v45 = vld [vmem:[#allocation32_spill] sm:$0xff] }
 0x394   :  { %v2648_v28 = vpop.f32.mrb[131].mxu1  ;;  %v6952_v21 = vpop.eup %5042  ;;  %2743 = vmax.xlane.f32.xlu0 %v2742_v2  ;;  %v1374_v42 = vmul.f32 1.442695, %v1319_v19  ;;  %5054 = vpow2.f32 %v1370_v29  ;;  %v6991_v31 = vmul.f32 0.35355338, %v2644_v30  ;;  %v9330_v19 = vld [vmem:[#allocation33_spill] sm:$0xff] }
 0x395   :  { %9317 = vst [vmem:[#allocation19_spill] sm:$0xff] %v6952_v21  ;;  %1426 = vadd.xlane.f32.xlu1 %v1425_v63  ;;  %v6962_v57 = vpop.eup %5044  ;;  %v6964_v27 = vmul.f32 0.35355338, %v2648_v28  ;;  %v1270_v63 = vpop.xlane.xlu0 %1269  ;;  %v1432_v24 = vsel %vm478_vm4, %v6952_v21, 0.0  ;;  %v6993_v50 = vmul.f32 0.35355338, %v2646_v9  ;;  %5056 = vpow2.f32 %v1368_v38 }
 0x396   :  { %9321 = vst [vmem:[#allocation20_spill] sm:$0xff] %v6962_v57  ;;  %v6970_v18 = vpop.eup %5046  ;;  %v1433_v8 = vadd.f32 %v6962_v57, %v1432_v24  ;;  %9328 = vst [vmem:[#allocation25_spill] sm:$0xff] %v6991_v31  ;;  %v1372_v29 = vmul.f32 1.442695, %v1318_v47  ;;  %v9332_v21 = vld [vmem:[#allocation26_spill] sm:$0xff]  ;;  %5058 = vpow2.f32 %v1374_v42  ;;  %v9336_v38 = vld [vmem:[#allocation29_spill] sm:$0xff] }
 0x397   :  { %9322 = vst [vmem:[#allocation21_spill] sm:$0xff] %v6964_v27  ;;  %9323 = vst [vmem:[#allocation120_spill] sm:$0xff] %v6970_v18  ;;  %v6984_v48 = vpop.eup %5048  ;;  %v2761_v32 = vsel %vm478_vm4, %v6964_v27, -inf  ;;  %v1274_v52 = vpop.xlane.xlu1 %1273  ;;  %v1428_v56 = vsel %vm478_vm4, %v6970_v18, 0.0  ;;  %v1320_v27 = vsub.f32 %v9332_v21, %v1270_v63 }
 0x398   :  { %2747 = vmax.xlane.f32.xlu0 %v2746_v41  ;;  %9326 = vst [vmem:[#allocation22_spill] sm:$0xff] %v6984_v48  ;;  %9329 = vst [vmem:[#allocation122_spill] sm:$0xff] %v6993_v50  ;;  %v1323_v12 = vsub.f32 %v9333_v59, %v1274_v52  ;;  %v7010_v59 = vmul.f32 0.35355338, %v6930_v15  ;;  %v1322_v47 = vsub.f32 %v9336_v38, %v1274_v52  ;;  %v9339_v15 = vld [vmem:[#allocation39_spill] sm:$0xff] }
 0x399   :  { %v6966_v6 = vpop.f32.mrb[132].mxu1  ;;  %2755 = vmax.xlane.f32.xlu1 %v2754_v13  ;;  %v1321_v13 = vsub.f32 %v9327_v22, %v1270_v63  ;;  %v2762_v22 = vmax.f32 %v6993_v50, %v2761_v32 }
 0x39a   :  { %v6975_v2 = vpop.f32.mrb[133].mxu1  ;;  %v7007_v63 = vpop.eup %5050  ;;  %9335 = vst [vmem:[#allocation32_spill] sm:$0xff] %v7010_v59  ;;  %v1382_v42 = vmul.f32 1.442695, %v1323_v12  ;;  %v1380_v12 = vmul.f32 1.442695, %v1322_v47 }
 0x39b   :  { %v6978_v28 = vpop.f32.mrb[134].mxu1  ;;  %v1378_v30 = vmul.f32 1.442695, %v1321_v13  ;;  %9334 = vst [vmem:[#allocation33_spill] sm:$0xff] %v7007_v63  ;;  %v9337_v13 = vld [vmem:[#allocation34_spill] sm:$0xff] }
 0x39c   :  { %v6981_v10 = vpop.f32.mrb[135].mxu1  ;;  %2751 = vmax.xlane.f32.xlu0 %v2750_v36 }
 0x39d   :  { %v1278_v41 = vpop.xlane.xlu0 %1277  ;;  %1434 = vadd.xlane.f32.xlu1 %v1433_v8  ;;  %v1429_v8 = vadd.f32 %v6984_v48, %v1428_v56 }
 0x39e   :  { %v1324_v24 = vsub.f32 %v9330_v19, %v1278_v41  ;;  %v1325_v57 = vsub.f32 %v9331_v45, %v1278_v41  ;;  %v2757_v45 = vsel %vm478_vm4, %v6991_v31, -inf  ;;  %v7019_v19 = vpop.eup %5052  ;;  %v9346_v31 = vld [vmem:[#allocation41_spill] sm:$0xff] }
 0x39f   :  { %v1282_v9 = vpop.xlane.xlu1 %1281  ;;  %9338 = vst [vmem:[#allocation26_spill] sm:$0xff] %v7019_v19 }
 0x3a0   :  { %v1384_v20 = vmul.f32 1.442695, %v1324_v24  ;;  %v1386_v18 = vmul.f32 1.442695, %v1325_v57  ;;  %v1376_v57 = vmul.f32 1.442695, %v1320_v27  ;;  %1430 = vadd.xlane.f32.xlu0 %v1429_v8  ;;  %v1327_v41 = vsub.f32 %v9337_v13, %v1282_v9 }
 0x3a1   :  { %v7001_v35 = vpop.f32.mrb[136].mxu1  ;;  %2763 = vmax.xlane.f32.xlu1 %v2762_v22  ;;  %v9340_v24 = vld [vmem:[#allocation38_spill] sm:$0xff]  ;;  %v7025_v22 = vpop.eup %5054 }
 0x3a2   :  { %5060 = vpow2.f32 %v1384_v20  ;;  %v7005_v21 = vpop.f32.mrb[137].mxu1  ;;  %v2758_v20 = vmax.f32 %v7010_v59, %v2757_v45  ;;  %9341 = vst [vmem:[#allocation28_spill] sm:$0xff] %v7025_v22  ;;  %v7028_v38 = vpop.eup %5056  ;;  %v1390_v13 = vmul.f32 1.442695, %v1327_v41 }
 0x3a3   :  { %5062 = vpow2.f32 %v1386_v18  ;;  %v7013_v36 = vpop.f32.mrb[138].mxu1  ;;  %v1436_v18 = vsel %vm478_vm4, %v7007_v63, 0.0  ;;  %9343 = vst [vmem:[#allocation29_spill] sm:$0xff] %v7028_v38  ;;  %v9353_v63 = vld [vmem:[#allocation49_spill] sm:$0xff] }
 0x3a4   :  { %5064 = vpow2.f32 %v1372_v29  ;;  %v7015_v32 = vpop.f32.mrb[139].mxu1  ;;  %2759 = vmax.xlane.f32.xlu0 %v2758_v20  ;;  %v9342_v29 = vld [vmem:[#allocation35_spill] sm:$0xff] }
 0x3a5   :  { %5066 = vpow2.f32 %v1378_v30  ;;  %v1286_v56 = vpop.xlane.xlu1 %1285  ;;  %v1326_v30 = vsub.f32 %v9342_v29, %v1282_v9  ;;  %v1440_v9 = vsel %vm478_vm4, %v7025_v22, 0.0  ;;  %v9351_v22 = vld [vmem:[#allocation45_spill] sm:$0xff] }
 0x3a6   :  { %v1328_v27 = vsub.f32 %v9339_v15, %v1286_v56  ;;  %v1329_v52 = vsub.f32 %v9340_v24, %v1286_v56  ;;  %5068 = vpow2.f32 %v1376_v57  ;;  %v1437_v15 = vadd.f32 %v7019_v19, %v1436_v18  ;;  %v9345_v24 = vld [vmem:[#allocation43_spill] sm:$0xff] }
 0x3a7   :  { %5070 = vpow2.f32 %v1382_v42  ;;  %v7039_v42 = vpop.eup %5058 }
 0x3a8   :  { %v1392_v8 = vmul.f32 1.442695, %v1328_v27  ;;  %v1394_v45 = vmul.f32 1.442695, %v1329_v52  ;;  %9347 = vst [vmem:[#allocation39_spill] sm:$0xff] %v7039_v42  ;;  %1438 = vadd.xlane.f32.xlu0 %v1437_v15 }
 0x3a9   :  { %v1290_v50 = vpop.xlane.xlu1 %1289  ;;  %v7031_v56 = vpop.f32.mrb[140].mxu1  ;;  %v1388_v27 = vmul.f32 1.442695, %v1326_v30 }
 0x3aa   :  { %9344 = vst [vmem:[#allocation34_spill] sm:$0xff] %v7031_v56  ;;  %5072 = vpow2.f32 %v1392_v8  ;;  %v1330_v59 = vsub.f32 %v9345_v24, %v1290_v50  ;;  %v1331_v57 = vsub.f32 %v9346_v31, %v1290_v50  ;;  %v7035_v47 = vpop.f32.mrb[141].mxu1  ;;  %v1441_v50 = vadd.f32 %v7028_v38, %v1440_v9  ;;  %v9352_v9 = vld [vmem:[#allocation47_spill] sm:$0xff] }
 0x3ab   :  { %5074 = vpow2.f32 %v1394_v45  ;;  %v7041_v20 = vpop.f32.mrb[142].mxu1  ;;  %v1444_v45 = vsel %vm478_vm4, %v7039_v42, 0.0 }
 0x3ac   :  { %v7043_v41 = vpop.eup %5060  ;;  %5076 = vpow2.f32 %v1380_v12  ;;  %v1398_v18 = vmul.f32 1.442695, %v1331_v57  ;;  %v7047_v31 = vpop.f32.mrb[143].mxu1  ;;  %v1396_v24 = vmul.f32 1.442695, %v1330_v59  ;;  %1442 = vadd.xlane.f32.xlu0 %v1441_v50  ;;  %v9350_v12 = vld [vmem:[#allocation46_spill] sm:$0xff] }
 0x3ad   :  { %9348 = vst [vmem:[#allocation38_spill] sm:$0xff] %v7043_v41  ;;  %v7045_v52 = vpop.eup %5062  ;;  %5078 = vpow2.f32 %v1390_v13  ;;  %v1294_v29 = vpop.xlane.xlu0 %1293 }
 0x3ae   :  { %9349 = vst [vmem:[#allocation35_spill] sm:$0xff] %v7045_v52  ;;  %v7050_v8 = vpop.eup %5064  ;;  %v1332_v30 = vsub.f32 %v9350_v12, %v1294_v29  ;;  %v1333_v19 = vsub.f32 %v9351_v22, %v1294_v29  ;;  %v1456_v57 = vsel %vm478_vm4, %v7045_v52, 0.0  ;;  %5080 = vpow2.f32 %v1388_v27 }
 0x3af   :  { %v7054_v15 = vpop.eup %5066  ;;  %v1299_v13 = vpop.xlane.xlu1 %1298  ;;  %v1457_v59 = vadd.f32 %v7043_v41, %v1456_v57  ;;  %5082 = vpow2.f32 %v1398_v18  ;;  %v1445_v12 = vadd.f32 %v7050_v8, %v1444_v45  ;;  %v9359_v41 = vld [vmem:[#allocation54_spill] sm:$0xff] }
 0x3b0   :  { %v1334_v38 = vsub.f32 %v9352_v9, %v1299_v13  ;;  %v1335_v48 = vsub.f32 %v9353_v63, %v1299_v13  ;;  %v7063_v56 = vpop.eup %5068  ;;  %v1400_v42 = vmul.f32 1.442695, %v1332_v30  ;;  %v1402_v50 = vmul.f32 1.442695, %v1333_v19  ;;  %v9358_v30 = vld [vmem:[#allocation52_spill] sm:$0xff] }
 0x3b1   :  { %9354 = vst [vmem:[#allocation43_spill] sm:$0xff] %v7063_v56  ;;  %v7066_v0 = vpop.eup %5070  ;;  %5084 = vpow2.f32 %v1396_v24  ;;  %1458 = vadd.xlane.f32.xlu1 %v1457_v59  ;;  %v1448_v27 = vsel %vm478_vm4, %v7054_v15, 0.0  ;;  %1446 = vadd.xlane.f32.xlu0 %v1445_v12 }
 0x3b2   :  { %v1404_v22 = vmul.f32 1.442695, %v1334_v38  ;;  %v1406_v29 = vmul.f32 1.442695, %v1335_v48  ;;  %5086 = vpow2.f32 %v1400_v42  ;;  %v1449_v19 = vadd.f32 %v7063_v56, %v1448_v27  ;;  %v9357_v48 = vld [vmem:[#allocation53_spill] sm:$0xff] }
 0x3b3   :  { %5088 = vpow2.f32 %v1402_v50  ;;  %v1452_v24 = vsel %vm478_vm4, %v7066_v0, 0.0 }
 0x3b4   :  { %v7070_v63 = vpop.eup %5072  ;;  %5090 = vpow2.f32 %v1404_v22 }
 0x3b5   :  { %9355 = vst [vmem:[#allocation41_spill] sm:$0xff] %v7070_v63  ;;  %v7072_v13 = vpop.eup %5074  ;;  %v1975_v18 = vpop.xlane.xlu0 %1974  ;;  %5092 = vpow2.f32 %v1406_v29  ;;  %1450 = vadd.xlane.f32.xlu0 %v1449_v19 }
 0x3b6   :  { %9356 = vst [vmem:[#allocation46_spill] sm:$0xff] %v7072_v13  ;;  %v7077_v38 = vpop.eup %5076  ;;  %v2045_v45 = vsub.f32 %v9357_v48, %v1975_v18  ;;  %v2046_v42 = vsub.f32 %v9358_v30, %v1975_v18  ;;  %v1464_v57 = vsel %vm478_vm4, %v7072_v13, 0.0 }
 0x3b7   :  { %v7083_v9 = vpop.eup %5078  ;;  %v1979_v59 = vpop.xlane.xlu1 %1978  ;;  %v1465_v50 = vadd.f32 %v7070_v63, %v1464_v57  ;;  %v1453_v29 = vadd.f32 %v7077_v38, %v1452_v24  ;;  %v9364_v57 = vld [vmem:[#allocation55_spill] sm:$0xff] }
 0x3b8   :  { %v2081_v12 = vmul.f32 1.442695, %v2045_v45  ;;  %v2083_v22 = vmul.f32 1.442695, %v2046_v42  ;;  %v2047_v27 = vsub.f32 %v6520_v62, %v1979_v59  ;;  %v2048_v52 = vsub.f32 %v9359_v41, %v1979_v59  ;;  %v7089_v48 = vpop.eup %5080 }
 0x3b9   :  { %1466 = vadd.xlane.f32.xlu1 %v1465_v50  ;;  %9360 = vst [vmem:[#allocation45_spill] sm:$0xff] %v7089_v48  ;;  %v1460_v19 = vsel %vm478_vm4, %v7083_v9, 0.0  ;;  %v7093_v13 = vpop.eup %5082  ;;  %1454 = vadd.xlane.f32.xlu0 %v1453_v29 }
 0x3ba   :  { %5094 = vpow2.f32 %v2081_v12  ;;  %v2085_v18 = vmul.f32 1.442695, %v2047_v27  ;;  %v2087_v30 = vmul.f32 1.442695, %v2048_v52  ;;  %9361 = vst [vmem:[#allocation47_spill] sm:$0xff] %v7093_v13  ;;  %v1461_v41 = vadd.f32 %v7089_v48, %v1460_v19  ;;  %v9366_v19 = vld [vmem:[#allocation57_spill] sm:$0xff] }
 0x3bb   :  { %5096 = vpow2.f32 %v2083_v22  ;;  %v7095_v45 = vpop.eup %5084  ;;  %v1468_v50 = vsel %vm478_vm4, %v7093_v13, 0.0  ;;  %v9367_v48 = vld [vmem:[#allocation56_spill] sm:$0xff] }
 0x3bc   :  { %5098 = vpow2.f32 %v2085_v18  ;;  %v7097_v62 = vpop.eup %5086 }
 0x3bd   :  { %9362 = vst [vmem:[#allocation49_spill] sm:$0xff] %v7097_v62  ;;  %5100 = vpow2.f32 %v2087_v30  ;;  %v1983_v24 = vpop.xlane.xlu0 %1982  ;;  %v7100_v42 = vpop.eup %5088  ;;  %1462 = vadd.xlane.f32.xlu0 %v1461_v41 }
 0x3be   :  { %9363 = vst [vmem:[#allocation53_spill] sm:$0xff] %v7100_v42  ;;  %v2049_v52 = vsub.f32 %v6531_v17, %v1983_v24  ;;  %v2050_v59 = vsub.f32 %v9364_v57, %v1983_v24  ;;  %v7106_v12 = vpop.eup %5090  ;;  %v1472_v27 = vsel %vm478_vm4, %v7100_v42, 0.0  ;;  %v1469_v24 = vadd.f32 %v7095_v45, %v1468_v50 }
 0x3bf   :  { %9365 = vst [vmem:[#allocation52_spill] sm:$0xff] %v7106_v12  ;;  %v1987_v22 = vpop.xlane.xlu1 %1986  ;;  %v7110_v29 = vpop.eup %5092  ;;  %v1473_v57 = vadd.f32 %v7097_v62, %v1472_v27  ;;  %v1476_v13 = vsel %vm547_vm5, %v7106_v12, 0.0 }
 0x3c0   :  { %v2089_v18 = vmul.f32 1.442695, %v2049_v52  ;;  %v2091_v30 = vmul.f32 1.442695, %v2050_v59  ;;  %v2051_v63 = vsub.f32 %v9366_v19, %v1987_v22  ;;  %v2052_v17 = vsub.f32 %v9367_v48, %v1987_v22 }
 0x3c1   :  { %v1477_v42 = vsel %vm549_vm6, %v7110_v29, 0.0  ;;  %1470 = vadd.xlane.f32.xlu0 %v1469_v24  ;;  %1474 = vadd.xlane.f32.xlu1 %v1473_v57  ;;  %v9373_v24 = vld [vmem:[#allocation58_spill] sm:$0xff] }
 0x3c2   :  { %5102 = vpow2.f32 %v2089_v18  ;;  %v2093_v41 = vmul.f32 1.442695, %v2051_v63  ;;  %v2095_v56 = vmul.f32 1.442695, %v2052_v17  ;;  %v1478_v59 = vadd.f32 %v1477_v42, %v1476_v13 }
 0x3c3   :  { %5104 = vpow2.f32 %v2091_v30 }
 0x3c4   :  { %v7120_v52 = vpop.eup %5094  ;;  %5106 = vpow2.f32 %v2093_v41 }
 0x3c5   :  { %9368 = vst [vmem:[#allocation54_spill] sm:$0xff] %v7120_v52  ;;  %v7122_v48 = vpop.eup %5096  ;;  %5108 = vpow2.f32 %v2095_v56  ;;  %1479 = vadd.xlane.f32.xlu0 %v1478_v59 }
 0x3c6   :  { %9369 = vst [vmem:[#allocation55_spill] sm:$0xff] %v7122_v48  ;;  %v7124_v50 = vpop.eup %5098  ;;  %v2153_v22 = vsel %vm478_vm4, %v7122_v48, 0.0  ;;  %v665_v27 = vpop.xlane.xlu1 %664  ;;  %v9377_v48 = vld [vmem:[#allocation59_spill] sm:$0xff] }
 0x3c7   :  { %9370 = vst [vmem:[#allocation57_spill] sm:$0xff] %v7124_v50  ;;  %v7128_v63 = vpop.eup %5100  ;;  %v2154_v18 = vadd.f32 %v7120_v52, %v2153_v22  ;;  %5110 = vrcp.f32 %v665_v27 }
 0x3c8   :  { %9371 = vst [vmem:[#allocation56_spill] sm:$0xff] %v7128_v63  ;;  %v669_v30 = vpop.xlane.xlu0 %668  ;;  %v2157_v19 = vsel %vm478_vm4, %v7128_v63, 0.0 }
 0x3c9   :  { %5112 = vrcp.f32 %v669_v30  ;;  %2155 = vadd.xlane.f32.xlu1 %v2154_v18  ;;  %v2158_v56 = vadd.f32 %v7124_v50, %v2157_v19 }
 0x3ca   :  { %v1991_v13 = vpop.xlane.xlu1 %1990 }
 0x3cb   :  { %2159 = vadd.xlane.f32.xlu0 %v2158_v56  ;;  %v2053_v17 = vsub.f32 %v6569_v25, %v1991_v13  ;;  %v2054_v57 = vsub.f32 %v9373_v24, %v1991_v13 }
 0x3cc   :  { %v7134_v42 = vpop.eup %5102 }
 0x3cd   :  { %9372 = vst [vmem:[#allocation123_spill] sm:$0xff] %v7134_v42  ;;  %v7138_v41 = vpop.eup %5104  ;;  %v2097_v22 = vmul.f32 1.442695, %v2053_v17  ;;  %v2099_v27 = vmul.f32 1.442695, %v2054_v57 }
 0x3ce   :  { %9374 = vst [vmem:[#allocation58_spill] sm:$0xff] %v7138_v41  ;;  %v7140_v59 = vpop.eup %5106  ;;  %v2161_v30 = vsel %vm478_vm4, %v7138_v41, 0.0  ;;  %v1995_v19 = vpop.xlane.xlu1 %1994 }
 0x3cf   :  { %9375 = vst [vmem:[#allocation124_spill] sm:$0xff] %v7140_v59  ;;  %v7144_v18 = vpop.eup %5108  ;;  %v2162_v56 = vadd.f32 %v7134_v42, %v2161_v30  ;;  %5114 = vpow2.f32 %v2097_v22  ;;  %v2055_v52 = vsub.f32 %v6581_v3, %v1995_v19  ;;  %v2056_v25 = vsub.f32 %v6566_v40, %v1995_v19  ;;  %v9378_v22 = vld [vmem:[#allocation61_spill] sm:$0xff]  ;;  %v673_v3 = vpop.xlane.xlu0 %672  ;;  %v9379_v19 = vld [vmem:[#allocation64_spill] sm:$0xff] }
 0x3d0   :  { %9376 = vst [vmem:[#allocation125_spill] sm:$0xff] %v7144_v18  ;;  %v2165_v13 = vsel %vm478_vm4, %v7144_v18, 0.0  ;;  %5116 = vpow2.f32 %v2099_v27  ;;  %v9380_v27 = vld [vmem:[#allocation60_spill] sm:$0xff] }
 0x3d1   :  { %2163 = vadd.xlane.f32.xlu0 %v2162_v56  ;;  %v2166_v17 = vadd.f32 %v7140_v59, %v2165_v13  ;;  %v5111_v24 = vpop.eup %5110  ;;  %v2101_v57 = vmul.f32 1.442695, %v2055_v52  ;;  %v2103_v41 = vmul.f32 1.442695, %v2056_v25  ;;  %v9381_v13 = vld [vmem:[#allocation62_spill] sm:$0xff] }
 0x3d2   :  { %v753_v62 = vmul.f32 %v5111_v24, %v9377_v48  ;;  %v1999_v63 = vpop.xlane.xlu1 %1998  ;;  %v754_v56 = vmul.f32 %v5111_v24, %v9380_v27 }
 0x3d3   :  { %v5113_v50 = vpop.eup %5112  ;;  %2167 = vadd.xlane.f32.xlu1 %v2166_v17  ;;  %5118 = vpow2.f32 %v2101_v57  ;;  %v2057_v40 = vsub.f32 %v6594_v16, %v1999_v63  ;;  %v2058_v42 = vsub.f32 %v9379_v19, %v1999_v63  ;;  %v9384_v63 = vld [vmem:[#allocation11_spill] sm:$0xff]  ;;  %v9387_v57 = vmov 0   ;;  %v9389_v19 = vld [vmem:[#allocation13_spill] sm:$0xff] }
 0x3d4   :  { %v755_v30 = vmul.f32 %v5113_v50, %v9378_v22  ;;  %5120 = vpow2.f32 %v2103_v41  ;;  %v756_v59 = vmul.f32 %v5113_v50, %v9381_v13  ;;  %v9385_v50 = vld [vmem:[#allocation72_spill] sm:$0xff]  ;;  %v9390_v13 = vld [vmem:[#allocation71_spill] sm:$0xff] }
 0x3d5   :  { %v2105_v52 = vmul.f32 1.442695, %v2057_v40  ;;  %v2107_v25 = vmul.f32 1.442695, %v2058_v42  ;;  %5122 = vrcp.f32 %v673_v3  ;;  %v9386_v42 = vld [vmem:[#allocation70_spill] sm:$0xff] }
 0x3d6   :  { %v789_v18 = vpack.c.bf16 %v755_v30, %v753_v62  ;;  %v677_v48 = vpop.xlane.xlu1 %676  ;;  %v790_v12 = vpack.c.bf16 %v756_v59, %v754_v56  ;;  %v681_v30 = vpop.xlane.xlu0 %680 }
 0x3d7   :  { %5124 = vpow2.f32 %v2105_v52 }
 0x3d8   :  { %5126 = vpow2.f32 %v2107_v25  ;;  %4593 = vmatprep.mubr.msk.bf16.mxu0 %vm478_vm4, %v790_v12 }
 0x3d9   :  { %v7159_v17 = vpop.eup %5114  ;;  %5128 = vrcp.f32 %v677_v48  ;;  %897 = vmatmul.mubr.bf16.vlgmr.msra.gmra.mrb[36].mxu0 %v789_v18 }
 0x3da   :  { %9382 = vst [vmem:[#allocation59_spill] sm:$0xff] %v7159_v17  ;;  %v7161_v16 = vpop.eup %5116  ;;  %1610 = vmatpush1.bf16.msra.mxu0 %v9384_v63  ;;  %v2003_v41 = vpop.xlane.xlu1 %2002 }
 0x3db   :  { %9383 = vst [vmem:[#allocation61_spill] sm:$0xff] %v7161_v16  ;;  %v2059_v24 = vsub.f32 %v9385_v50, %v2003_v41  ;;  %v2060_v62 = vsub.f32 %v9386_v42, %v2003_v41  ;;  %1611 = vmatprep.subr.bf16.mxu0 %v9387_v57  ;;  %v2169_v59 = vsel %vm478_vm4, %v7161_v16, 0.0 }
 0x3dc   :  { %v2170_v12 = vadd.f32 %v7159_v17, %v2169_v59 }
 0x3dd   :  { %v7170_v22 = vpop.eup %5118  ;;  %v2109_v18 = vmul.f32 1.442695, %v2059_v24  ;;  %v2111_v3 = vmul.f32 1.442695, %v2060_v62 }
 0x3de   :  { %9388 = vst [vmem:[#allocation64_spill] sm:$0xff] %v7170_v22  ;;  %v7172_v40 = vpop.eup %5120  ;;  %2171 = vadd.xlane.f32.xlu0 %v2170_v12  ;;  %1612 = vmatpush1.bf16.msra.mxu0 %v9389_v19  ;;  %v2007_v27 = vpop.xlane.xlu1 %2006 }
 0x3df   :  { %5130 = vpow2.f32 %v2109_v18  ;;  %v2061_v56 = vsub.f32 %v6635_v43, %v2007_v27  ;;  %v2062_v52 = vsub.f32 %v9390_v13, %v2007_v27  ;;  %1613 = vmatprep.subr.bf16.mxu0 %v9387_v57  ;;  %v2173_v25 = vsel %vm478_vm4, %v7172_v40, 0.0  ;;  %v5123_v48 = vpop.eup %5122  ;;  %v689_v24 = vpop.xlane.xlu0 %688  ;;  %v9392_v43 = vld [vmem:[#allocation12_spill] sm:$0xff]  ;;  %v9394_v27 = vld [vmem:[#allocation65_spill] sm:$0xff] }
 0x3e0   :  { %5132 = vpow2.f32 %v2111_v3  ;;  %v2174_v63 = vadd.f32 %v7170_v22, %v2173_v25  ;;  %v9393_v3 = vld [vmem:[#allocation63_spill] sm:$0xff]  ;;  %v757_v13 = vmul.f32 %v5123_v48, %v9394_v27  ;;  %v9395_v25 = vld [vmem:[#allocation66_spill] sm:$0xff] }
 0x3e1   :  { %v7181_v41 = vpop.eup %5124  ;;  %v2115_v50 = vmul.f32 1.442695, %v2062_v52  ;;  %5134 = vrcp.f32 %v681_v30  ;;  %v2113_v12 = vmul.f32 1.442695, %v2061_v56  ;;  %v758_v19 = vmul.f32 %v5123_v48, %v9393_v3 }
 0x3e2   :  { %v7183_v42 = vpop.eup %5126  ;;  %2175 = vadd.xlane.f32.xlu1 %v2174_v63  ;;  %1614 = vmatpush1.bf16.msra.mxu0 %v9392_v43  ;;  %v685_v62 = vpop.xlane.xlu1 %684  ;;  %v9396_v63 = vld [vmem:[#allocation67_spill] sm:$0xff]  ;;  %v9397_v43 = vld [vmem:[#allocation14_spill] sm:$0xff] }
 0x3e3   :  { %9391 = vst [vmem:[#allocation60_spill] sm:$0xff] %v7183_v42  ;;  %v5129_v59 = vpop.eup %5128  ;;  %1615 = vmatprep.subr.bf16.mxu0 %v9387_v57  ;;  %v2177_v18 = vsel %vm478_vm4, %v7183_v42, 0.0  ;;  %5136 = vpow2.f32 %v2115_v50  ;;  %v2019_v42 = vpop.xlane.xlu0 %2018  ;;  %v7199_v50 = vmul.f32 0.35355338, %v6981_v10 }
 0x3e4   :  { %v2178_v52 = vadd.f32 %v7181_v41, %v2177_v18  ;;  %v760_v30 = vmul.f32 %v5129_v59, %v9395_v25  ;;  %v759_v17 = vmul.f32 %v5129_v59, %v9396_v63  ;;  %5138 = vrcp.f32 %v685_v62 }
 0x3e5   :  { %5140 = vpow2.f32 %v2113_v12  ;;  %9398 = vst [vmem:[#allocation62_spill] sm:$0xff] %v7199_v50  ;;  %v2769_v27 = vsel %vm478_vm4, %v7199_v50, -inf }
 0x3e6   :  { %2179 = vadd.xlane.f32.xlu0 %v2178_v52  ;;  %1616 = vmatpush1.bf16.msra.mxu0 %v9397_v43  ;;  %v2011_v56 = vpop.xlane.xlu1 %2010  ;;  %v792_v22 = vpack.c.bf16 %v760_v30, %v758_v19  ;;  %v791_v16 = vpack.c.bf16 %v759_v17, %v757_v13  ;;  %v9399_v17 = vld [vmem:[#allocation24_spill] sm:$0xff]  ;;  %v7217_v13 = vmul.f32 0.35355338, %v6978_v28  ;;  %v2067_v43 = vsub.f32 %v6656_v55, %v2019_v42  ;;  %v9404_v55 = vld [vmem:[#allocation23_spill] sm:$0xff] }
 0x3e7   :  { %v2063_v3 = vsub.f32 %v6667_v14, %v2011_v56  ;;  %v2064_v48 = vsub.f32 %v6645_v54, %v2011_v56  ;;  %1617 = vmatprep.subr.bf16.mxu0 %v9387_v57  ;;  %v2068_v54 = vsub.f32 %v6637_v46, %v2019_v42  ;;  %v2027_v14 = vpop.xlane.xlu0 %2026  ;;  %v9401_v46 = vld [vmem:[#allocation30_spill] sm:$0xff] }
 0x3e8   :  { %4594 = vmatprep.mubr.msk.bf16.mxu0 %vm478_vm4, %v792_v22  ;;  %9400 = vst [vmem:[#allocation11_spill] sm:$0xff] %v7217_v13  ;;  %v2770_v63 = vmax.f32 %v7217_v13, %v2769_v27 }
 0x3e9   :  { %v7202_v62 = vpop.eup %5130  ;;  %v2117_v59 = vmul.f32 1.442695, %v2063_v3  ;;  %v2119_v18 = vmul.f32 1.442695, %v2064_v48  ;;  %905 = vmatmul.mubr.bf16.gmra.mrb[40].mxu0 %v791_v16  ;;  %v2127_v56 = vmul.f32 1.442695, %v2068_v54 }
 0x3ea   :  { %v7204_v19 = vpop.eup %5132  ;;  %1618 = vmatpush1.bf16.msra.mxu0 %v9399_v17  ;;  %v7207_v12 = vpop.xlane.xlu1 %2014  ;;  %v9402_v48 = vld [vmem:[#allocation69_spill] sm:$0xff] }
 0x3eb   :  { %5142 = vpow2.f32 %v2117_v59  ;;  %1619 = vmatprep.subr.bf16.mxu0 %v9387_v57  ;;  %v2181_v10 = vsel %vm478_vm4, %v7204_v19, 0.0  ;;  %v5135_v22 = vpop.eup %5134 }
 0x3ec   :  { %5144 = vpow2.f32 %v2119_v18  ;;  %v2182_v16 = vadd.f32 %v7202_v62, %v2181_v10  ;;  %v762_v59 = vmul.f32 %v5135_v22, %v9402_v48  ;;  %v9403_v18 = vld [vmem:[#allocation68_spill] sm:$0xff] }
 0x3ed   :  { %v7219_v52 = vpop.eup %5136  ;;  %5146 = vrcp.f32 %v689_v24  ;;  %v705_v3 = vpop.xlane.xlu0 %704  ;;  %v761_v17 = vmul.f32 %v5135_v22, %v9403_v18  ;;  %v2072_v22 = vsub.f32 %v6671_v37, %v2027_v14 }
 0x3ee   :  { %2183 = vadd.xlane.f32.xlu1 %v2182_v16  ;;  %1620 = vmatpush1.bf16.msra.mxu0 %v9401_v46  ;;  %v693_v25 = vpop.xlane.xlu1 %692  ;;  %v5139_v30 = vpop.eup %5138  ;;  %v2185_v27 = vsel %vm478_vm4, %v7219_v52, 0.0  ;;  %v7235_v46 = vmul.f32 0.35355338, %v7005_v21  ;;  %v9406_v21 = vld [vmem:[#allocation36_spill] sm:$0xff] }
 0x3ef   :  { %1621 = vmatprep.subr.bf16.mxu0 %v9387_v57  ;;  %v764_v28 = vmul.f32 %v5139_v30, %v6633_v33  ;;  %v763_v24 = vmul.f32 %v5139_v30, %v6648_v5  ;;  %v7229_v10 = vpop.eup %5140  ;;  %5148 = vrcp.f32 %v693_v25  ;;  %v2125_v33 = vmul.f32 1.442695, %v2067_v43 }
 0x3f0   :  { %9405 = vst [vmem:[#allocation72_spill] sm:$0xff] %v7235_v46  ;;  %5150 = vpow2.f32 %v2127_v56  ;;  %v2071_v5 = vsub.f32 %v6674_v1, %v2027_v14  ;;  %v2186_v25 = vadd.f32 %v7229_v10, %v2185_v27  ;;  %v2773_v43 = vsel %vm478_vm4, %v7235_v46, -inf  ;;  %v9408_v27 = vld [vmem:[#allocation31_spill] sm:$0xff] }
 0x3f1   :  { %v794_v54 = vpack.c.bf16 %v764_v28, %v762_v59  ;;  %v793_v16 = vpack.c.bf16 %v763_v24, %v761_v17  ;;  %v7238_v48 = vpop.xlane.xlu0 %2030  ;;  %5152 = vpow2.f32 %v2125_v33  ;;  %v2135_v56 = vmul.f32 1.442695, %v2072_v22 }
 0x3f2   :  { %2771 = vmax.xlane.f32.xlu1 %v2770_v63  ;;  %1622 = vmatpush1.bf16.msra.mxu0 %v9404_v55  ;;  %v697_v42 = vpop.xlane.xlu1 %696  ;;  %v7257_v28 = vmul.f32 0.35355338, %v7001_v35  ;;  %v2133_v18 = vmul.f32 1.442695, %v2071_v5  ;;  %v1607_v55 = vsel %vm860_vm3, %v9408_v27, 0 }
 0x3f3   :  { %1623 = vmatprep.subr.bf16.mxu0 %v9387_v57  ;;  %4595 = vmatprep.mubr.msk.bf16.mxu0 %vm478_vm4, %v794_v54  ;;  %v7264_v54 = vmul.f32 0.35355338, %v7015_v32  ;;  %5154 = vpow2.f32 %v2135_v56  ;;  %v9412_v32 = vld [vmem:[#allocation10_spill] sm:$0xff] }
 0x3f4   :  { %913 = vmatmul.mubr.bf16.gmra.mrb[44].mxu0 %v793_v16  ;;  %9407 = vst [vmem:[#allocation70_spill] sm:$0xff] %v7257_v28  ;;  %v2774_v16 = vmax.f32 %v7257_v28, %v2773_v43  ;;  %5156 = vpow2.f32 %v2133_v18  ;;  %v9420_v28 = vld [vmem:[#allocation81_spill] sm:$0xff] }
 0x3f5   :  { %v7244_v30 = vpop.eup %5142  ;;  %v2035_v1 = vpop.xlane.xlu0 %2034  ;;  %9409 = vst [vmem:[#allocation13_spill] sm:$0xff] %v7264_v54  ;;  %v2777_v56 = vsel %vm478_vm4, %v7264_v54, -inf  ;;  %5158 = vrcp.f32 %v697_v42 }
 0x3f6   :  { %v7246_v63 = vpop.eup %5144  ;;  %2187 = vadd.xlane.f32.xlu1 %v2186_v25  ;;  %1624 = vmatpush1.bf16.msra.mxu0 %v9406_v21  ;;  %v7249_v37 = vpop.xlane.xlu1 %2022  ;;  %v2076_v17 = vsub.f32 %v6720_v58, %v2035_v1  ;;  %v2075_v35 = vsub.f32 %v6739_v39, %v2035_v1  ;;  %v9410_v25 = vld [vmem:[#allocation74_spill] sm:$0xff]  ;;  %v9411_v21 = vld [vmem:[#allocation73_spill] sm:$0xff]  ;;  %v7280_v1 = vmul.f32 0.35355338, %v7013_v36  ;;  %5160 = vrcp.f32 %v705_v3 }
 0x3f7   :  { %1625 = vmatprep.subr.bf16.mxu0 %v9387_v57  ;;  %v2189_v14 = vsel %vm478_vm4, %v7246_v63, 0.0  ;;  %v5147_v59 = vpop.eup %5146  ;;  %v7289_v36 = vmul.f32 0.35355338, %v7041_v20  ;;  %v7292_v3 = vmul.f32 0.35355338, %v7047_v31  ;;  %v2070_v46 = vsub.f32 %v9420_v28, %v7249_v37 }
 0x3f8   :  { %v2190_v24 = vadd.f32 %v7244_v30, %v2189_v14  ;;  %v766_v58 = vmul.f32 %v5147_v59, %v9410_v25  ;;  %v765_v14 = vmul.f32 %v5147_v59, %v9411_v21  ;;  %v2143_v27 = vmul.f32 1.442695, %v2076_v17  ;;  %9413 = vst [vmem:[#allocation71_spill] sm:$0xff] %v7280_v1 }
 0x3f9   :  { %v5149_v22 = vpop.eup %5148  ;;  %v713_v5 = vpop.xlane.xlu0 %712  ;;  %9414 = vst [vmem:[#allocation12_spill] sm:$0xff] %v7289_v36  ;;  %9415 = vst [vmem:[#allocation63_spill] sm:$0xff] %v7292_v3  ;;  %v2785_v31 = vsel %vm547_vm5, %v7289_v36, -inf  ;;  %v2786_v21 = vsel %vm549_vm6, %v7292_v3, -inf  ;;  %v9421_v3 = vld [vmem:[#allocation77_spill] sm:$0xff] }
 0x3fa   :  { %2191 = vadd.xlane.f32.xlu1 %v2190_v24  ;;  %1626 = vmatpush1.bf16.msra.mxu0 %v1607_v55  ;;  %v701_v33 = vpop.xlane.xlu1 %700  ;;  %v768_v43 = vmul.f32 %v5149_v22, %v6681_v26  ;;  %v767_v24 = vmul.f32 %v5149_v22, %v6690_v4  ;;  %v7277_v39 = vpop.eup %5150  ;;  %v2141_v55 = vmul.f32 1.442695, %v2075_v35  ;;  %v2778_v26 = vmax.f32 %v7280_v1, %v2777_v56 }
 0x3fb   :  { %2354 = vmatprep.subr.bf16.mxu0 %v9387_v57  ;;  %5162 = vrcp.f32 %v701_v33  ;;  %v7286_v22 = vpop.eup %5152 }
 0x3fc   :  { %2314 = vrot.lane.b32.xlu0 %v9412_v32, %s5520_s21  ;;  %v796_v18 = vpack.c.bf16 %v768_v43, %v766_v58  ;;  %v795_v17 = vpack.c.bf16 %v767_v24, %v765_v14  ;;  %5164 = vpow2.f32 %v2143_v27  ;;  %v9416_v14 = vld [vmem:[#allocation75_spill] sm:$0xff] }
 0x3fd   :  { %v2044_v25 = vpop.xlane.xlu0 %2043  ;;  %v7299_v20 = vpop.eup %5154  ;;  %v2066_v27 = vsub.f32 %v9416_v14, %v7207_v12 }
 0x3fe   :  { %2775 = vmax.xlane.f32.xlu1 %v2774_v16  ;;  %v709_v59 = vpop.xlane.xlu1 %708  ;;  %4596 = vmatprep.mubr.msk.bf16.mxu0 %vm478_vm4, %v796_v18  ;;  %v2079_v4 = vsub.f32 %v6755_v61, %v2044_v25  ;;  %v2080_v42 = vsub.f32 %v6757_v60, %v2044_v25  ;;  %v2197_v16 = vsel %vm478_vm4, %v7277_v39, 0.0  ;;  %v7307_v43 = vpop.eup %5156  ;;  %v2787_v25 = vmax.f32 %v2785_v31, %v2786_v21 }
 0x3ff   :  { %5166 = vrcp.f32 %v709_v59  ;;  %921 = vmatmul.mubr.bf16.gmra.mrb[48].mxu0 %v795_v17  ;;  %v2198_v60 = vadd.f32 %v7286_v22, %v2197_v16  ;;  %v5159_v56 = vpop.eup %5158  ;;  %v9417_v59 = vld [vmem:[#allocation76_spill] sm:$0xff] }
 0x400   :  { %v2149_v33 = vmul.f32 1.442695, %v2079_v4  ;;  %v2151_v35 = vmul.f32 1.442695, %v2080_v42  ;;  %5168 = vpow2.f32 %v2141_v55  ;;  %v2065_v18 = vsub.f32 %v9417_v59, %v7207_v12  ;;  %v5161_v55 = vpop.eup %5160 }
 0x401   :  { %v721_v61 = vpop.xlane.xlu0 %720  ;;  %v2123_v42 = vmul.f32 1.442695, %v2066_v27  ;;  %v774_v36 = vmul.f32 %v5161_v55, %v9421_v3 }
 0x402   :  { %2779 = vmax.xlane.f32.xlu1 %v2778_v26  ;;  %v7296_v58 = vpop.xlane.xlu1 %2038  ;;  %5170 = vpow2.f32 %v2149_v33  ;;  %v2205_v26 = vsel %vm478_vm4, %v7299_v20, 0.0  ;;  %v2121_v21 = vmul.f32 1.442695, %v2065_v18  ;;  %v9422_v18 = vld [vmem:[#allocation79_spill] sm:$0xff] }
 0x403   :  { %5172 = vpow2.f32 %v2151_v35  ;;  %v770_v35 = vmul.f32 %v5159_v56, %v6692_v23  ;;  %v2074_v28 = vsub.f32 %v9422_v18, %v7238_v48 }
 0x404   :  { %5174 = vrcp.f32 %v713_v5  ;;  %v9419_v5 = vld [vmem:[#allocation80_spill] sm:$0xff] }
 0x405   :  { %v7311_v17 = vpop.xlane.xlu0 %2723  ;;  %v5163_v4 = vpop.eup %5162  ;;  %v769_v14 = vmul.f32 %v5159_v56, %v9419_v5 }
 0x406   :  { %2199 = vadd.xlane.f32.xlu1 %v2198_v60  ;;  %v717_v24 = vpop.xlane.xlu1 %716  ;;  %v7315_v16 = vpop.eup %5164  ;;  %v9418_v60 = vld [vmem:[#allocation83_spill] sm:$0xff]  ;;  %v771_v59 = vmul.f32 %v5163_v4, %v6742_v34 }
 0x407   :  { %5176 = vrcp.f32 %v717_v24  ;;  %v772_v12 = vmul.f32 %v5163_v4, %v9418_v60  ;;  %v2206_v24 = vadd.f32 %v7307_v43, %v2205_v26  ;;  %v2213_v34 = vsel %vm478_vm4, %v7315_v16, 0.0 }
 0x408   :  { %5178 = vpow2.f32 %v2123_v42  ;;  %v2131_v60 = vmul.f32 1.442695, %v2070_v46 }
 0x409   :  { %v5167_v31 = vpop.eup %5166  ;;  %v729_v27 = vpop.xlane.xlu0 %728  ;;  %v798_v32 = vpack.c.bf16 %v772_v12, %v770_v35  ;;  %5180 = vrcp.f32 %v721_v61  ;;  %v7351_v61 = vmul.f32 0.35355338, %v6975_v2 }
 0x40a   :  { %2788 = vmax.xlane.f32.xlu1 %v2787_v25  ;;  %v7317_v33 = vpop.xlane.xlu1 %2719  ;;  %v797_v25 = vpack.c.bf16 %v771_v59, %v769_v14  ;;  %v776_v23 = vmul.f32 %v5167_v31, %v6746_v44  ;;  %v7328_v1 = vpop.eup %5168  ;;  %v9423_v44 = vld [vmem:[#allocation84_spill] sm:$0xff]  ;;  %5182 = vpow2.f32 %v2121_v21  ;;  %v2139_v14 = vmul.f32 1.442695, %v2074_v28  ;;  %v9425_v21 = vld [vmem:[#allocation82_spill] sm:$0xff] }
 0x40b   :  { %4597 = vmatprep.mubr.msk.bf16.mxu0 %vm478_vm4, %v798_v32  ;;  %v2069_v3 = vsub.f32 %v9423_v44, %v7249_v37  ;;  %v2214_v12 = vadd.f32 %v7328_v1, %v2213_v34  ;;  %v775_v32 = vmul.f32 %v5167_v31, %v6763_v53  ;;  %9424 = vst [vmem:[#allocation65_spill] sm:$0xff] %v7351_v61  ;;  %v9426_v53 = vld [vmem:[#allocation78_spill] sm:$0xff]  ;;  %v9427_v34 = vld [vmem:[#allocation87_spill] sm:$0xff] }
 0x40c   :  { %v7332_v56 = vpop.eup %5170  ;;  %v800_v4 = vpack.c.bf16 %v776_v23, %v774_v36  ;;  %929 = vmatmul.mubr.bf16.gmra.mrb[52].mxu0 %v797_v25  ;;  %v773_v31 = vmul.f32 %v5161_v55, %v9426_v53  ;;  %v2078_v18 = vsub.f32 %v9427_v34, %v7296_v58  ;;  %v7367_v55 = vmul.f32 0.35355338, %v6966_v6 }
 0x40d   :  { %v7337_v35 = vpop.eup %5172  ;;  %v7341_v42 = vpop.xlane.xlu0 %2731  ;;  %v2221_v36 = vsel %vm547_vm5, %v7332_v56, 0.0  ;;  %v2129_v25 = vmul.f32 1.442695, %v2069_v3 }
 0x40e   :  { %2207 = vadd.xlane.f32.xlu1 %v2206_v24  ;;  %v725_v26 = vpop.xlane.xlu1 %724  ;;  %4598 = vmatprep.mubr.msk.bf16.mxu0 %vm478_vm4, %v800_v4  ;;  %v5175_v5 = vpop.eup %5174  ;;  %v2222_v37 = vsel %vm549_vm6, %v7337_v35, 0.0  ;;  %v2073_v24 = vsub.f32 %v9425_v21, %v7238_v48  ;;  %v9428_v4 = vld [vmem:[#allocation85_spill] sm:$0xff]  ;;  %v799_v28 = vpack.c.bf16 %v775_v32, %v773_v31  ;;  %9429 = vst [vmem:[#allocation66_spill] sm:$0xff] %v7367_v55 }
 0x40f   :  { %5184 = vrcp.f32 %v725_v26  ;;  %v2223_v26 = vadd.f32 %v2222_v37, %v2221_v36  ;;  %v778_v44 = vmul.f32 %v5175_v5, %v9428_v4 }
 0x410   :  { %5186 = vpow2.f32 %v2131_v60  ;;  %v2137_v53 = vmul.f32 1.442695, %v2073_v24  ;;  %v2147_v60 = vmul.f32 1.442695, %v2078_v18 }
 0x411   :  { %v5177_v59 = vpop.eup %5176  ;;  %v1411_v23 = vpop.xlane.xlu0 %1410  ;;  %5188 = vpow2.f32 %v2139_v14 }
 0x412   :  { %2215 = vadd.xlane.f32.xlu1 %v2214_v12  ;;  %v7353_v46 = vpop.xlane.xlu1 %2727  ;;  %v780_v2 = vmul.f32 %v5177_v59, %v6781_v49  ;;  %v2765_v12 = vsel %vm478_vm4, %v7351_v61, -inf  ;;  %v7364_v21 = vpop.eup %5178  ;;  %5190 = vrcp.f32 %v729_v27  ;;  %v2077_v49 = vsub.f32 %v6784_v51, %v7296_v58  ;;  %v9431_v58 = vld [vmem:[#allocation86_spill] sm:$0xff]  ;;  %v9472_v61 = vld [vmem:[#allocation48_spill] sm:$0xff] }
 0x413   :  { %5192 = vpow2.f32 %v2129_v25  ;;  %v5181_v32 = vpop.eup %5180  ;;  %v2766_v37 = vmax.f32 %v7367_v55, %v2765_v12  ;;  %v779_v14 = vmul.f32 %v5177_v59, %v6798_v7  ;;  %v7379_v27 = vmul.f32 0.35355338, %v7035_v47  ;;  %v9432_v59 = vld [vmem:[#allocation93_spill] sm:$0xff]  ;;  %v9433_v12 = vld [vmem:[#allocation34_spill] sm:$0xff] }
 0x414   :  { %v802_v3 = vpack.c.bf16 %v780_v2, %v778_v44  ;;  %937 = vmatmul.mubr.bf16.gmra.mrb[56].mxu0 %v799_v28  ;;  %v7376_v6 = vpop.eup %5182  ;;  %v2193_v25 = vsel %vm478_vm4, %v7364_v21, 0.0  ;;  %v777_v34 = vmul.f32 %v5175_v5, %v9431_v58  ;;  %v2145_v18 = vmul.f32 1.442695, %v2077_v49  ;;  %v9436_v58 = vld [vmem:[#allocation88_spill] sm:$0xff] }
 0x415   :  { %v7369_v36 = vpop.xlane.xlu0 %2735  ;;  %9430 = vst [vmem:[#allocation67_spill] sm:$0xff] %v7379_v27  ;;  %v782_v7 = vmul.f32 %v5181_v32, %v6776_v11  ;;  %v2194_v4 = vadd.f32 %v7376_v6, %v2193_v25  ;;  %v2781_v44 = vsel %vm478_vm4, %v7379_v27, -inf }
 0x416   :  { %2224 = vadd.xlane.f32.xlu1 %v2223_v26  ;;  %v734_v48 = vpop.xlane.xlu1 %733  ;;  %4599 = vmatprep.mubr.msk.bf16.mxu0 %vm478_vm4, %v802_v3  ;;  %v801_v47 = vpack.c.bf16 %v779_v14, %v777_v34  ;;  %v781_v34 = vmul.f32 %v5181_v32, %v9436_v58 }
 0x417   :  { %5194 = vrcp.f32 %v734_v48  ;;  %v7394_v48 = vmul.f32 0.35355338, %v9433_v12 }
 0x418   :  { %5196 = vpow2.f32 %v2137_v53 }
 0x419   :  { %v5185_v31 = vpop.eup %5184  ;;  %v7383_v51 = vpop.xlane.xlu0 %2739  ;;  %5198 = vpow2.f32 %v2147_v60  ;;  %9434 = vst [vmem:[#allocation14_spill] sm:$0xff] %v7394_v48  ;;  %v2782_v53 = vmax.f32 %v7394_v48, %v2781_v44  ;;  %v9435_v60 = vld [vmem:[#allocation97_spill] sm:$0xff] }
 0x41a   :  { %v1415_v24 = vpop.xlane.xlu1 %1414  ;;  %v784_v26 = vmul.f32 %v5185_v31, %v9432_v59  ;;  %v7391_v28 = vpop.eup %5186  ;;  %v9438_v59 = vld [vmem:[#allocation102_spill] sm:$0xff] }
 0x41b   :  { %2767 = vmax.xlane.f32.xlu0 %v2766_v37  ;;  %5200 = vrcp.f32 %v1415_v24  ;;  %v7396_v11 = vpop.eup %5188  ;;  %v783_v37 = vmul.f32 %v5185_v31, %v9435_v60  ;;  %v2201_v24 = vsel %vm478_vm4, %v7391_v28, 0.0 }
 0x41c   :  { %v804_v2 = vpack.c.bf16 %v784_v26, %v782_v7  ;;  %5202 = vrcp.f32 %v1411_v23  ;;  %945 = vmatmul.mubr.bf16.gmra.mrb[60].mxu0 %v801_v47  ;;  %v5191_v3 = vpop.eup %5190  ;;  %v2209_v12 = vsel %vm478_vm4, %v7396_v11, 0.0 }
 0x41d   :  { %v1419_v5 = vpop.xlane.xlu0 %1418  ;;  %5204 = vpow2.f32 %v2145_v18  ;;  %v7401_v14 = vpop.eup %5192  ;;  %v9437_v18 = vld [vmem:[#allocation91_spill] sm:$0xff]  ;;  %v803_v31 = vpack.c.bf16 %v783_v37, %v781_v34 }
 0x41e   :  { %4600 = vmatprep.mubr.msk.bf16.mxu0 %vm478_vm4, %v804_v2  ;;  %v1423_v49 = vpop.xlane.xlu1 %1422  ;;  %v786_v7 = vmul.f32 %v5191_v3, %v9437_v18  ;;  %v9442_v18 = vld [vmem:[#allocation106_spill] sm:$0xff] }
 0x41f   :  { %2195 = vadd.xlane.f32.xlu0 %v2194_v4  ;;  %5206 = vrcp.f32 %v1423_v49  ;;  %v2202_v4 = vadd.f32 %v7401_v14, %v2201_v24  ;;  %v9440_v49 = vld [vmem:[#allocation3_spill] sm:$0xff]  ;;  %v9441_v24 = vld [vmem:[#allocation101_spill] sm:$0xff] }
 0x420   :  { %5208 = vrcp.f32 %v1419_v5 }
 0x421   :  { %v5195_v23 = vpop.eup %5194  ;;  %v7405_v25 = vpop.xlane.xlu0 %2743 }
 0x422   :  { %v788_v26 = vmul.f32 %v5195_v23, %v9438_v59  ;;  %v7410_v47 = vpop.eup %5196  ;;  %v1427_v60 = vpop.xlane.xlu1 %1426  ;;  %v787_v58 = vmul.f32 %v5195_v23, %v9441_v24 }
 0x423   :  { %2783 = vmax.xlane.f32.xlu0 %v2782_v53  ;;  %v7413_v44 = vpop.eup %5198  ;;  %v2210_v37 = vadd.f32 %v7410_v47, %v2209_v12  ;;  %5210 = vrcp.f32 %v1427_v60 }
 0x424   :  { %v806_v2 = vpack.c.bf16 %v788_v26, %v786_v7  ;;  %953 = vmatmul.mubr.bf16.gmra.mrb[64].mxu0 %v803_v31  ;;  %v2217_v59 = vsel %vm478_vm4, %v7413_v44, 0.0  ;;  %v9443_v31 = vld [vmem:[#allocation94_spill] sm:$0xff] }
 0x425   :  { %v5201_v53 = vpop.eup %5200  ;;  %v7417_v32 = vpop.xlane.xlu0 %2747 }
 0x426   :  { %9439 = vst [vmem:[#allocation24_spill] sm:$0xff] %v7417_v32  ;;  %4601 = vmatprep.mubr.msk.bf16.mxu0 %vm478_vm4, %v806_v2  ;;  %v5203_v5 = vpop.eup %5202  ;;  %v1502_v7 = vmul.f32 %v5201_v53, %v9442_v18  ;;  %v7434_v24 = vpop.xlane.xlu1 %2755 }
 0x427   :  { %2203 = vadd.xlane.f32.xlu0 %v2202_v4  ;;  %3045 = vrot.lane.b32.xlu1 %v9440_v49, %s5521_s22  ;;  %v7424_v34 = vpop.eup %5204  ;;  %v785_v4 = vmul.f32 %v5191_v3, %v9443_v31  ;;  %v9444_v49 = vld [vmem:[#allocation99_spill] sm:$0xff] }
 0x428   :  { %v1500_v2 = vmul.f32 %v5203_v5, %v9444_v49  ;;  %v2218_v27 = vadd.f32 %v7424_v34, %v2217_v59  ;;  %v9446_v3 = vld [vmem:[#allocation15_spill] sm:$0xff]  ;;  %v9448_v59 = vld [vmem:[#allocation109_spill] sm:$0xff] }
 0x429   :  { %v7429_v26 = vpop.xlane.xlu0 %2751  ;;  %v805_v48 = vpack.c.bf16 %v787_v58, %v785_v4  ;;  %v5207_v12 = vpop.eup %5206  ;;  %v1501_v31 = vmul.f32 %v5201_v53, %v9446_v3  ;;  %v9447_v58 = vld [vmem:[#allocation110_spill] sm:$0xff]  ;;  %v9451_v53 = vld [vmem:[#allocation27_spill] sm:$0xff] }
 0x42a   :  { %v1536_v54 = vpack.c.bf16 %v1502_v7, %v1500_v2  ;;  %v5209_v23 = vpop.eup %5208  ;;  %v1506_v49 = vmul.f32 %v5207_v12, %v9448_v59  ;;  %v9449_v7 = vld [vmem:[#allocation103_spill] sm:$0xff]  ;;  %v1435_v32 = vpop.xlane.xlu1 %1434 }
 0x42b   :  { %2211 = vadd.xlane.f32.xlu0 %v2210_v37  ;;  %v9445_v37 = vld [vmem:[#allocation90_spill] sm:$0xff]  ;;  %v1504_v4 = vmul.f32 %v5209_v23, %v9447_v58  ;;  %v1499_v2 = vmul.f32 %v5203_v5, %v9449_v7  ;;  %v9452_v5 = vld [vmem:[#allocation16_spill] sm:$0xff] }
 0x42c   :  { %961 = vmatmul.mubr.bf16.gmra.mrb[68].mxu0 %v805_v48  ;;  %v2791_v13 = vsub.f32 %v9445_v37, %v7317_v33  ;;  %v1503_v3 = vmul.f32 %v5209_v23, %v9452_v5  ;;  %v9453_v58 = vld [vmem:[#allocation112_spill] sm:$0xff] }
 0x42d   :  { %v1431_v18 = vpop.xlane.xlu0 %1430  ;;  %4611 = vmatprep.mubr.msk.bf16.mxu0 %vm478_vm4, %v1536_v54  ;;  %v1535_v54 = vpack.c.bf16 %v1501_v31, %v1499_v2  ;;  %v1538_v55 = vpack.c.bf16 %v1506_v49, %v1504_v4  ;;  %v1505_v59 = vmul.f32 %v5207_v12, %v9453_v58  ;;  %v9454_v4 = vld [vmem:[#allocation40_spill] sm:$0xff]  ;;  %v9455_v49 = vld [vmem:[#allocation113_spill] sm:$0xff]  ;;  %v9458_v12 = vld [vmem:[#allocation22_spill] sm:$0xff] }
 0x42e   :  { %5212 = vrcp.f32 %v1431_v18  ;;  %v2828_v60 = vmul.f32 1.442695, %v2791_v13  ;;  %v9456_v7 = vld [vmem:[#allocation120_spill] sm:$0xff]  ;;  %v9461_v58 = vld [vmem:[#allocation42_spill] sm:$0xff] }
 0x42f   :  { %2219 = vadd.xlane.f32.xlu0 %v2218_v27  ;;  %v9450_v27 = vld [vmem:[#allocation95_spill] sm:$0xff]  ;;  %5214 = vrcp.f32 %v1435_v32  ;;  %v1537_v32 = vpack.c.bf16 %v1505_v59, %v1503_v3 }
 0x430   :  { %v2790_v48 = vsub.f32 %v9450_v27, %v7317_v33  ;;  %5216 = vpow2.f32 %v2828_v60  ;;  %v5211_v33 = vpop.eup %5210 }
 0x431   :  { %v7443_v50 = vpop.xlane.xlu0 %2759 }
 0x432   :  { %v2826_v18 = vmul.f32 1.442695, %v2790_v48  ;;  %v9457_v48 = vld [vmem:[#allocation37_spill] sm:$0xff] }
 0x434   :  { %1642 = vmatmul.mubr.bf16.vlgmr.msra.gmra.mrb[72].mxu0 %v1535_v54 }
 0x435   :  { %v1439_v37 = vpop.xlane.xlu0 %1438  ;;  %2355 = vmatpush1.bf16.msra.mxu0 %v9451_v53  ;;  %4612 = vmatprep.mubr.msk.bf16.mxu0 %vm478_vm4, %v1538_v55  ;;  %v1508_v55 = vmul.f32 %v5211_v33, %v9455_v49  ;;  %v9464_v49 = vld [vmem:[#allocation33_spill] sm:$0xff] }
 0x436   :  { %2356 = vmatprep.subr.bf16.mxu0 %v9387_v57  ;;  %5218 = vrcp.f32 %v1439_v37 }
 0x437   :  { %5220 = vpow2.f32 %v2826_v18  ;;  %v9460_v18 = vld [vmem:[#allocation116_spill] sm:$0xff] }
 0x438   :  { %v5213_v31 = vpop.eup %5212  ;;  %v1507_v5 = vmul.f32 %v5211_v33, %v9460_v18  ;;  %v9467_v18 = vld [vmem:[#allocation89_spill] sm:$0xff] }
 0x439   :  { %v1443_v13 = vpop.xlane.xlu0 %1442  ;;  %2357 = vmatpush1.bf16.msra.mxu0 %v9454_v4  ;;  %v1510_v2 = vmul.f32 %v5213_v31, %v9456_v7  ;;  %v1509_v60 = vmul.f32 %v5213_v31, %v9458_v12  ;;  %v5215_v54 = vpop.eup %5214  ;;  %v9463_v4 = vld [vmem:[#allocation19_spill] sm:$0xff]  ;;  %v9466_v12 = vld [vmem:[#allocation26_spill] sm:$0xff] }
 0x43a   :  { %2358 = vmatprep.subr.bf16.mxu0 %v9387_v57  ;;  %5222 = vrcp.f32 %v1443_v13  ;;  %v7460_v37 = vpop.eup %5216  ;;  %v9462_v13 = vld [vmem:[#allocation2_spill] sm:$0xff] }
 0x43b   :  { %v1540_v27 = vpack.c.bf16 %v1510_v2, %v1508_v55  ;;  %9459 = vst [vmem:[#allocation30_spill] sm:$0xff] %v7460_v37  ;;  %v1539_v59 = vpack.c.bf16 %v1509_v60, %v1507_v5  ;;  %v2898_v33 = vsel %vm478_vm4, %v7460_v37, 0.0  ;;  %v2793_v5 = vsub.f32 %v9467_v18, %v7311_v17 }
 0x43c   :  { %1650 = vmatmul.mubr.bf16.gmra.mrb[76].mxu0 %v1537_v32  ;;  %v1512_v32 = vmul.f32 %v5215_v54, %v9463_v4 }
 0x43d   :  { %2359 = vmatpush1.bf16.msra.mxu0 %v9457_v48  ;;  %4613 = vmatprep.mubr.msk.bf16.mxu0 %vm478_vm4, %v1540_v27  ;;  %v9465_v48 = vld [vmem:[#allocation44_spill] sm:$0xff] }
 0x43e   :  { %v1447_v23 = vpop.xlane.xlu0 %1446  ;;  %2360 = vmatprep.subr.bf16.mxu0 %v9387_v57 }
 0x43f   :  { %5224 = vrcp.f32 %v1447_v23  ;;  %v7473_v23 = vpop.xlane.xlu1 %2763 }
 0x440   :  { %v5219_v3 = vpop.eup %5218 }
 0x441   :  { %2361 = vmatpush1.bf16.msra.mxu0 %v9461_v58  ;;  %v1514_v55 = vmul.f32 %v5219_v3, %v9464_v49  ;;  %v7469_v31 = vpop.eup %5220  ;;  %v1513_v60 = vmul.f32 %v5219_v3, %v9466_v12 }
 0x442   :  { %v1451_v53 = vpop.xlane.xlu0 %1450  ;;  %2362 = vmatprep.subr.bf16.mxu0 %v9387_v57  ;;  %v2899_v58 = vadd.f32 %v7469_v31, %v2898_v33  ;;  %v2832_v33 = vmul.f32 1.442695, %v2793_v5 }
 0x443   :  { %5226 = vrcp.f32 %v1451_v53  ;;  %v1542_v7 = vpack.c.bf16 %v1514_v55, %v1512_v32  ;;  %v9469_v32 = vld [vmem:[#allocation28_spill] sm:$0xff]  ;;  %v9470_v55 = vld [vmem:[#allocation39_spill] sm:$0xff]  ;;  %v1459_v37 = vpop.xlane.xlu1 %1458 }
 0x444   :  { %1658 = vmatmul.mubr.bf16.gmra.mrb[80].mxu0 %v1539_v59  ;;  %v5223_v27 = vpop.eup %5222 }
 0x445   :  { %3043 = vrot.lane.b32.xlu0 %v9462_v13, %s5521_s22  ;;  %2363 = vmatpush1.bf16.msra.mxu0 %v9465_v48  ;;  %v9468_v13 = vld [vmem:[#allocation20_spill] sm:$0xff]  ;;  %v1516_v49 = vmul.f32 %v5223_v27, %v9469_v32  ;;  %v9474_v32 = vld [vmem:[#allocation29_spill] sm:$0xff] }
 0x446   :  { %v1455_v2 = vpop.xlane.xlu0 %1454  ;;  %4614 = vmatprep.mubr.msk.bf16.mxu0 %vm478_vm4, %v1542_v7  ;;  %2364 = vmatprep.subr.bf16.mxu0 %v9387_v57  ;;  %v1511_v4 = vmul.f32 %v5215_v54, %v9468_v13  ;;  %v9473_v13 = vld [vmem:[#allocation50_spill] sm:$0xff] }
 0x447   :  { %5228 = vrcp.f32 %v1455_v2  ;;  %v9471_v2 = vld [vmem:[#allocation92_spill] sm:$0xff]  ;;  %v1467_v5 = vpop.xlane.xlu1 %1466 }
 0x448   :  { %v2792_v7 = vsub.f32 %v9471_v2, %v7311_v17  ;;  %v1541_v3 = vpack.c.bf16 %v1513_v60, %v1511_v4  ;;  %v9475_v4 = vld [vmem:[#allocation51_spill] sm:$0xff] }
 0x449   :  { %v5225_v53 = vpop.eup %5224  ;;  %2365 = vmatpush1.bf16.msra.mxu0 %v9472_v61 }
 0x44a   :  { %v1463_v59 = vpop.xlane.xlu0 %1462  ;;  %v1518_v48 = vmul.f32 %v5225_v53, %v9470_v55  ;;  %2366 = vmatprep.subr.bf16.mxu0 %v9387_v57  ;;  %v2830_v18 = vmul.f32 1.442695, %v2792_v7  ;;  %v1517_v17 = vmul.f32 %v5225_v53, %v7050_v8  ;;  %v9476_v53 = vld [vmem:[#allocation43_spill] sm:$0xff] }
 0x44b   :  { %2900 = vadd.xlane.f32.xlu1 %v2899_v58  ;;  %5230 = vrcp.f32 %v1463_v59  ;;  %v1515_v59 = vmul.f32 %v5223_v27, %v9474_v32 }
 0x44c   :  { %v1544_v12 = vpack.c.bf16 %v1518_v48, %v1516_v49  ;;  %5232 = vrcp.f32 %v1459_v37  ;;  %1666 = vmatmul.mubr.bf16.gmra.mrb[84].mxu0 %v1541_v3 }
 0x44d   :  { %v5227_v54 = vpop.eup %5226  ;;  %2367 = vmatpush1.bf16.msra.mxu0 %v9473_v13  ;;  %5234 = vpow2.f32 %v2832_v33  ;;  %v1543_v49 = vpack.c.bf16 %v1517_v17, %v1515_v59 }
 0x44e   :  { %4615 = vmatprep.mubr.msk.bf16.mxu0 %vm478_vm4, %v1544_v12  ;;  %2368 = vmatprep.subr.bf16.mxu0 %v9387_v57  ;;  %v1471_v58 = vpop.xlane.xlu0 %1470  ;;  %v1520_v60 = vmul.f32 %v5227_v54, %v7054_v15  ;;  %5236 = vpow2.f32 %v2830_v18  ;;  %v1519_v2 = vmul.f32 %v5227_v54, %v9476_v53  ;;  %v1475_v3 = vpop.xlane.xlu1 %1474  ;;  %v9477_v12 = vld [vmem:[#allocation35_spill] sm:$0xff]  ;;  %v9478_v18 = vld [vmem:[#allocation5_spill] sm:$0xff]  ;;  %v9483_v53 = vld [vmem:[#allocation98_spill] sm:$0xff] }
 0x44f   :  { %5238 = vrcp.f32 %v1471_v58  ;;  %v9479_v54 = vld [vmem:[#allocation45_spill] sm:$0xff] }
 0x450   :  { %5240 = vrcp.f32 %v1467_v5 }
 0x451   :  { %v5229_v61 = vpop.eup %5228  ;;  %2369 = vmatpush1.bf16.msra.mxu0 %v9475_v4  ;;  %v9481_v4 = vld [vmem:[#allocation38_spill] sm:$0xff] }
 0x452   :  { %v1522_v37 = vmul.f32 %v5229_v61, %v7066_v0  ;;  %2370 = vmatprep.subr.bf16.mxu0 %v9387_v57  ;;  %v1521_v27 = vmul.f32 %v5229_v61, %v7077_v38  ;;  %v1480_v15 = vpop.xlane.xlu0 %1479 }
 0x453   :  { %5242 = vrcp.f32 %v1480_v15 }
 0x454   :  { %v1546_v55 = vpack.c.bf16 %v1522_v37, %v1520_v60  ;;  %1674 = vmatmul.mubr.bf16.gmra.mrb[88].mxu0 %v1543_v49  ;;  %v1545_v13 = vpack.c.bf16 %v1521_v27, %v1519_v2  ;;  %5244 = vrcp.f32 %v1475_v3  ;;  %v9480_v37 = vld [vmem:[#allocation47_spill] sm:$0xff]  ;;  %v9482_v27 = vld [vmem:[#allocation46_spill] sm:$0xff]  ;;  %v2795_v2 = vsub.f32 %v9483_v53, %v7353_v46  ;;  %v9489_v53 = vld [vmem:[#allocation49_spill] sm:$0xff] }
 0x455   :  { %v5231_v48 = vpop.eup %5230 }
 0x456   :  { %4616 = vmatprep.mubr.msk.bf16.mxu0 %vm478_vm4, %v1546_v55  ;;  %v5233_v8 = vpop.eup %5232  ;;  %v1526_v0 = vmul.f32 %v5231_v48, %v7083_v9  ;;  %v1525_v61 = vmul.f32 %v5231_v48, %v9479_v54  ;;  %v2156_v55 = vpop.xlane.xlu1 %2155 }
 0x457   :  { %v7502_v7 = vpop.eup %5234  ;;  %v1524_v33 = vmul.f32 %v5233_v8, %v9477_v12  ;;  %v1523_v49 = vmul.f32 %v5233_v8, %v9481_v4  ;;  %v9484_v8 = vld [vmem:[#allocation104_spill] sm:$0xff] }
 0x458   :  { %v7507_v17 = vpop.eup %5236  ;;  %v2902_v38 = vsel %vm478_vm4, %v7502_v7, 0.0  ;;  %v2160_v59 = vpop.xlane.xlu0 %2159 }
 0x459   :  { %v1548_v58 = vpack.c.bf16 %v1526_v0, %v1524_v33  ;;  %v5239_v32 = vpop.eup %5238  ;;  %v2903_v60 = vadd.f32 %v7507_v17, %v2902_v38  ;;  %5246 = vrcp.f32 %v2160_v59  ;;  %v1547_v0 = vpack.c.bf16 %v1525_v61, %v1523_v49  ;;  %v9485_v61 = vld [vmem:[#allocation41_spill] sm:$0xff] }
 0x45a   :  { %v5241_v9 = vpop.eup %5240  ;;  %v1530_v5 = vmul.f32 %v5239_v32, %v9480_v37  ;;  %5248 = vrcp.f32 %v2156_v55  ;;  %v1529_v33 = vmul.f32 %v5239_v32, %v7095_v45  ;;  %v9487_v32 = vld [vmem:[#allocation52_spill] sm:$0xff] }
 0x45b   :  { %v1528_v15 = vmul.f32 %v5241_v9, %v9482_v27  ;;  %v1527_v59 = vmul.f32 %v5241_v9, %v9485_v61  ;;  %v9491_v61 = vld [vmem:[#allocation57_spill] sm:$0xff] }
 0x45c   :  { %3049 = vrot.lane.b32.xlu1 %v9478_v18, %s5521_s22  ;;  %1682 = vmatmul.mubr.bf16.gmra.mrb[92].mxu0 %v1545_v13  ;;  %v2794_v18 = vsub.f32 %v9484_v8, %v7353_v46  ;;  %v2836_v13 = vmul.f32 1.442695, %v2795_v2 }
 0x45d   :  { %4617 = vmatprep.mubr.msk.bf16.mxu0 %vm478_vm4, %v1548_v58  ;;  %v1550_v3 = vpack.c.bf16 %v1530_v5, %v1528_v15  ;;  %v5243_v12 = vpop.eup %5242  ;;  %v1549_v5 = vpack.c.bf16 %v1529_v33, %v1527_v59  ;;  %v9488_v15 = vld [vmem:[#allocation56_spill] sm:$0xff] }
 0x45e   :  { %v5245_v48 = vpop.eup %5244  ;;  %v1534_v38 = vmul.f32 %v5243_v12, %v7110_v29  ;;  %v2164_v54 = vpop.xlane.xlu0 %2163  ;;  %v2834_v4 = vmul.f32 1.442695, %v2794_v18  ;;  %v1533_v27 = vmul.f32 %v5243_v12, %v9487_v32  ;;  %v9495_v32 = vld [vmem:[#allocation58_spill] sm:$0xff] }
 0x45f   :  { %v1531_v2 = vmul.f32 %v5245_v48, %v9489_v53  ;;  %v9496_v53 = vld [vmem:[#allocation96_spill] sm:$0xff] }
 0x460   :  { %v2168_v58 = vpop.xlane.xlu1 %2167 }
 0x461   :  { %5250 = vrcp.f32 %v2168_v58  ;;  %v1551_v8 = vpack.c.bf16 %v1533_v27, %v1531_v2  ;;  %v2797_v2 = vsub.f32 %v9496_v53, %v7341_v42  ;;  %v9503_v53 = vld [vmem:[#allocation60_spill] sm:$0xff] }
 0x462   :  { %5252 = vpow2.f32 %v2836_v13 }
 0x463   :  { %v5247_v55 = vpop.eup %5246  ;;  %5254 = vrcp.f32 %v2164_v54 }
 0x464   :  { %2904 = vadd.xlane.f32.xlu0 %v2903_v60  ;;  %1690 = vmatmul.mubr.bf16.gmra.mrb[96].mxu0 %v1547_v0  ;;  %v9486_v60 = vld [vmem:[#allocation53_spill] sm:$0xff]  ;;  %v5249_v46 = vpop.eup %5248  ;;  %5256 = vpow2.f32 %v2834_v4  ;;  %v2247_v9 = vmul.f32 %v5247_v55, %v9488_v15  ;;  %v2246_v59 = vmul.f32 %v5247_v55, %v9491_v61 }
 0x465   :  { %4618 = vmatprep.mubr.msk.bf16.mxu0 %vm478_vm4, %v1550_v3  ;;  %v1532_v37 = vmul.f32 %v5245_v48, %v9486_v60  ;;  %v9490_v3 = vld [vmem:[#allocation55_spill] sm:$0xff]  ;;  %v9492_v48 = vld [vmem:[#allocation4_spill] sm:$0xff]  ;;  %v9493_v60 = vld [vmem:[#allocation125_spill] sm:$0xff] }
 0x466   :  { %v2245_v33 = vmul.f32 %v5249_v46, %v9490_v3 }
 0x467   :  { %v1552_v49 = vpack.c.bf16 %v1534_v38, %v1532_v37 }
 0x468   :  { %v2281_v18 = vpack.c.bf16 %v2247_v9, %v2245_v33 }
 0x46b   :  { %v2172_v45 = vpop.xlane.xlu0 %2171  ;;  %v5251_v13 = vpop.eup %5250 }
 0x46c   :  { %1698 = vmatmul.mubr.bf16.gmra.mrb[100].mxu0 %v1549_v5  ;;  %v7531_v38 = vpop.eup %5252  ;;  %v2251_v37 = vmul.f32 %v5251_v13, %v9493_v60  ;;  %v9494_v5 = vld [vmem:[#allocation54_spill] sm:$0xff]  ;;  %v9499_v60 = vld [vmem:[#allocation123_spill] sm:$0xff] }
 0x46d   :  { %4619 = vmatprep.mubr.msk.bf16.mxu0 %vm478_vm4, %v1552_v49  ;;  %v5255_v54 = vpop.eup %5254  ;;  %v2244_v4 = vmul.f32 %v5249_v46, %v9494_v5 }
 0x46e   :  { %v2249_v27 = vmul.f32 %v5255_v54, %v9495_v32 }
 0x46f   :  { %v2176_v29 = vpop.xlane.xlu1 %2175  ;;  %v2280_v55 = vpack.c.bf16 %v2246_v59, %v2244_v4  ;;  %v2840_v59 = vmul.f32 1.442695, %v2797_v2 }
 0x470   :  { %5258 = vrcp.f32 %v2176_v29  ;;  %v2906_v29 = vsel %vm478_vm4, %v7531_v38, 0.0  ;;  %v2283_v15 = vpack.c.bf16 %v2251_v37, %v2249_v27  ;;  %v9500_v37 = vld [vmem:[#allocation61_spill] sm:$0xff] }
 0x471   :  { %5260 = vrcp.f32 %v2172_v45  ;;  %v7541_v45 = vpop.eup %5256 }
 0x472   :  { %v2907_v46 = vadd.f32 %v7541_v45, %v2906_v29 }
 0x473   :  { %v2180_v0 = vpop.xlane.xlu0 %2179 }
 0x474   :  { %1706 = vmatmul.mubr.bf16.gmra.mrb[104].mxu0 %v1551_v8  ;;  %v9497_v8 = vld [vmem:[#allocation124_spill] sm:$0xff] }
 0x475   :  { %4629 = vmatprep.mubr.msk.bf16.mxu0 %vm478_vm4, %v2281_v18  ;;  %v2250_v18 = vmul.f32 %v5251_v13, %v9497_v8  ;;  %v9501_v13 = vld [vmem:[#allocation64_spill] sm:$0xff] }
 0x477   :  { %v2315_v58 = vpop.permute.xlu0 %2314 }
 0x478   :  { %v2352_v12 = vsel %vm860_vm3, %v2315_v58, 0  ;;  %v9498_v58 = vld [vmem:[#allocation100_spill] sm:$0xff] }
 0x479   :  { %2371 = vmatpush1.bf16.msra.mxu0 %v2352_v12  ;;  %v2796_v12 = vsub.f32 %v9498_v58, %v7341_v42 }
 0x47a   :  { %3047 = vrot.lane.b32.xlu0 %v9492_v48, %s5521_s22  ;;  %3099 = vmatprep.subr.bf16.mxu0 %v9387_v57  ;;  %v5259_v9 = vpop.eup %5258 }
 0x47b   :  { %v2184_v49 = vpop.xlane.xlu1 %2183  ;;  %v5261_v33 = vpop.eup %5260  ;;  %v2255_v61 = vmul.f32 %v5259_v9, %v7172_v40  ;;  %v2254_v40 = vmul.f32 %v5259_v9, %v9501_v13  ;;  %v9504_v9 = vld [vmem:[#allocation7_spill] sm:$0xff] }
 0x47c   :  { %5262 = vrcp.f32 %v2184_v49  ;;  %2387 = vmatmul.mubr.bf16.vlgmr.msra.gmra.mrb[108].mxu0 %v2280_v55  ;;  %v2253_v5 = vmul.f32 %v5261_v33, %v9500_v37  ;;  %v2838_v49 = vmul.f32 1.442695, %v2796_v12 }
 0x47d   :  { %5264 = vrcp.f32 %v2180_v0  ;;  %4630 = vmatprep.mubr.msk.bf16.mxu0 %vm478_vm4, %v2283_v15  ;;  %v2248_v0 = vmul.f32 %v5255_v54, %v9499_v60  ;;  %v9502_v54 = vld [vmem:[#allocation59_spill] sm:$0xff] }
 0x47e   :  { %v2285_v32 = vpack.c.bf16 %v2255_v61, %v2253_v5  ;;  %v2252_v15 = vmul.f32 %v5261_v33, %v9502_v54 }
 0x47f   :  { %v7548_v3 = vpop.xlane.xlu1 %2771  ;;  %v2282_v4 = vpack.c.bf16 %v2250_v18, %v2248_v0 }
 0x480   :  { %2908 = vadd.xlane.f32.xlu1 %v2907_v46  ;;  %v2284_v46 = vpack.c.bf16 %v2254_v40, %v2252_v15 }
 0x483   :  { %v2188_v48 = vpop.xlane.xlu1 %2187 }
 0x484   :  { %5266 = vrcp.f32 %v2188_v48  ;;  %2395 = vmatmul.mubr.bf16.gmra.mrb[112].mxu0 %v2282_v4  ;;  %v9505_v4 = vld [vmem:[#allocation105_spill] sm:$0xff] }
 0x485   :  { %5268 = vpow2.f32 %v2840_v59  ;;  %4631 = vmatprep.mubr.msk.bf16.mxu0 %vm478_vm4, %v2285_v32 }
 0x486   :  { %v5263_v27 = vpop.eup %5262 }
 0x487   :  { %v2192_v29 = vpop.xlane.xlu1 %2191  ;;  %v5265_v42 = vpop.eup %5264  ;;  %v2259_v55 = vmul.f32 %v5263_v27, %v7204_v19  ;;  %v2258_v12 = vmul.f32 %v5263_v27, %v7202_v62  ;;  %v9506_v27 = vld [vmem:[#allocation108_spill] sm:$0xff] }
 0x488   :  { %5270 = vrcp.f32 %v2192_v29  ;;  %v2257_v2 = vmul.f32 %v5265_v42, %v9503_v53  ;;  %v2256_v19 = vmul.f32 %v5265_v42, %v7181_v41  ;;  %v2798_v29 = vsub.f32 %v9506_v27, %v7369_v36 }
 0x489   :  { %5272 = vpow2.f32 %v2838_v49  ;;  %v2799_v49 = vsub.f32 %v9505_v4, %v7369_v36  ;;  %v9509_v36 = vld [vmem:[#allocation6_spill] sm:$0xff] }
 0x48a   :  { %v2287_v8 = vpack.c.bf16 %v2259_v55, %v2257_v2  ;;  %v2286_v37 = vpack.c.bf16 %v2258_v12, %v2256_v19  ;;  %v2842_v40 = vmul.f32 1.442695, %v2798_v29 }
 0x48b   :  { %v7576_v0 = vpop.xlane.xlu1 %2775  ;;  %v2844_v42 = vmul.f32 1.442695, %v2799_v49 }
 0x48c   :  { %2403 = vmatmul.mubr.bf16.gmra.mrb[116].mxu0 %v2284_v46 }
 0x48d   :  { %4632 = vmatprep.mubr.msk.bf16.mxu0 %vm478_vm4, %v2287_v8  ;;  %5274 = vpow2.f32 %v2844_v42 }
 0x48e   :  { %v5267_v18 = vpop.eup %5266  ;;  %5276 = vpow2.f32 %v2842_v40 }
 0x48f   :  { %v7564_v58 = vpop.eup %5268  ;;  %v2261_v33 = vmul.f32 %v5267_v18, %v7219_v52  ;;  %v7581_v52 = vpop.xlane.xlu1 %2779 }
 0x490   :  { %v2910_v60 = vsel %vm478_vm4, %v7564_v58, 0.0 }
 0x491   :  { %3053 = vrot.lane.b32.xlu1 %v9504_v9, %s5521_s22 }
 0x492   :  { %v5271_v61 = vpop.eup %5270 }
 0x493   :  { %v2263_v59 = vmul.f32 %v5271_v61, %v7246_v63  ;;  %v7572_v48 = vpop.eup %5272  ;;  %v2262_v41 = vmul.f32 %v5271_v61, %v7244_v30  ;;  %v2260_v63 = vmul.f32 %v5267_v18, %v7229_v10  ;;  %v2200_v13 = vpop.xlane.xlu1 %2199 }
 0x494   :  { %2411 = vmatmul.mubr.bf16.gmra.mrb[120].mxu0 %v2286_v37  ;;  %v2911_v62 = vadd.f32 %v7572_v48, %v2910_v60  ;;  %5278 = vrcp.f32 %v2200_v13 }
 0x495   :  { %v2289_v5 = vpack.c.bf16 %v2263_v59, %v2261_v33  ;;  %v2288_v32 = vpack.c.bf16 %v2262_v41, %v2260_v63  ;;  %v9510_v33 = vld [vmem:[#allocation107_spill] sm:$0xff] }
 0x496   :  { %v2801_v59 = vsub.f32 %v9510_v33, %v7383_v51 }
 0x497   :  { %4633 = vmatprep.mubr.msk.bf16.mxu0 %vm478_vm4, %v2289_v5  ;;  %v7588_v55 = vpop.xlane.xlu1 %2788  ;;  %v7594_v2 = vpop.eup %5274  ;;  %v9511_v5 = vld [vmem:[#allocation111_spill] sm:$0xff] }
 0x498   :  { %v7604_v61 = vpop.eup %5276  ;;  %v2914_v9 = vsel %vm478_vm4, %v7594_v2, 0.0  ;;  %v2848_v63 = vmul.f32 1.442695, %v2801_v59 }
 0x499   :  { %2912 = vadd.xlane.f32.xlu0 %v2911_v62  ;;  %v2915_v37 = vadd.f32 %v7604_v61, %v2914_v9  ;;  %v2800_v62 = vsub.f32 %v9511_v5, %v7383_v51 }
 0x49b   :  { %v2208_v10 = vpop.xlane.xlu1 %2207 }
 0x49c   :  { %2419 = vmatmul.mubr.bf16.gmra.mrb[124].mxu0 %v2288_v32  ;;  %v2846_v32 = vmul.f32 1.442695, %v2800_v62 }
 0x49e   :  { %v5279_v41 = vpop.eup %5278 }
 0x49f   :  { %v2216_v19 = vpop.xlane.xlu1 %2215  ;;  %v2267_v29 = vmul.f32 %v5279_v41, %v7277_v39  ;;  %v2266_v13 = vmul.f32 %v5279_v41, %v7286_v22 }
 0x4a3   :  { %v2225_v40 = vpop.xlane.xlu1 %2224 }
 0x4a7   :  { %v3046_v62 = vpop.permute.xlu1 %3045 }
 0x4a8   :  { %v7590_v30 = vpop.xlane.xlu0 %2767 }
 0x4ac   :  { %v2196_v54 = vpop.xlane.xlu0 %2195  ;;  %v7592_v15 = vpop.f32.mrb[36].mxu0 }
 0x4ad   :  { %9507 = vst [vmem:[#allocation69_spill] sm:$0xff] %v7592_v15  ;;  %v900_v53 = vpop.f32.mrb[37].mxu0  ;;  %5280 = vrcp.f32 %v2196_v54 }
 0x4ae   :  { %v7596_v46 = vpop.f32.mrb[38].mxu0  ;;  %5282 = vrcp.f32 %v2208_v10 }
 0x4af   :  { %9508 = vst [vmem:[#allocation68_spill] sm:$0xff] %v7596_v46  ;;  %3051 = vrot.lane.b32.xlu0 %v9509_v36, %s5521_s22  ;;  %v903_v18 = vpop.f32.mrb[39].mxu0  ;;  %5284 = vrcp.f32 %v2216_v19 }
 0x4b0   :  { %v7602_v12 = vpop.xlane.xlu0 %2783 }
 0x4b4   :  { %v2204_v60 = vpop.xlane.xlu0 %2203 }
 0x4b5   :  { %2916 = vadd.xlane.f32.xlu1 %v2915_v37  ;;  %5286 = vrcp.f32 %v2204_v60 }
 0x4b7   :  { %v5281_v49 = vpop.eup %5280 }
 0x4b8   :  { %v2212_v4 = vpop.xlane.xlu0 %2211  ;;  %v2265_v27 = vmul.f32 %v5281_v49, %v7364_v21  ;;  %v2264_v42 = vmul.f32 %v5281_v49, %v7376_v6  ;;  %v5283_v21 = vpop.eup %5282 }
 0x4b9   :  { %5288 = vrcp.f32 %v2212_v4  ;;  %v5285_v6 = vpop.eup %5284  ;;  %v2271_v59 = vmul.f32 %v5283_v21, %v7299_v20  ;;  %v2270_v37 = vmul.f32 %v5283_v21, %v7307_v43  ;;  %v9514_v43 = vld [vmem:[#allocation9_spill] sm:$0xff] }
 0x4ba   :  { %5290 = vpow2.f32 %v2848_v63  ;;  %v2291_v54 = vpack.c.bf16 %v2267_v29, %v2265_v27  ;;  %v2290_v53 = vpack.c.bf16 %v2266_v13, %v2264_v42  ;;  %v2275_v49 = vmul.f32 %v5285_v6, %v7315_v16 }
 0x4bc   :  { %v7617_v51 = vpop.f32.mrb[40].mxu0  ;;  %v2220_v10 = vpop.xlane.xlu0 %2219  ;;  %4634 = vmatprep.mubr.msk.bf16.mxu0 %vm478_vm4, %v2291_v54 }
 0x4bd   :  { %9512 = vst [vmem:[#allocation23_spill] sm:$0xff] %v7617_v51  ;;  %5292 = vrcp.f32 %v2220_v10  ;;  %v908_v36 = vpop.f32.mrb[41].mxu0  ;;  %2427 = vmatmul.mubr.bf16.gmra.mrb[128].mxu0 %v2290_v53  ;;  %v2274_v53 = vmul.f32 %v5285_v6, %v7328_v1 }
 0x4be   :  { %5294 = vpow2.f32 %v2846_v32  ;;  %v7620_v18 = vpop.f32.mrb[42].mxu0 }
 0x4bf   :  { %9513 = vst [vmem:[#allocation36_spill] sm:$0xff] %v7620_v18  ;;  %5296 = vrcp.f32 %v2225_v40  ;;  %v911_v22 = vpop.f32.mrb[43].mxu0  ;;  %v5287_v19 = vpop.eup %5286 }
 0x4c0   :  { %v3044_v9 = vpop.permute.xlu0 %3043  ;;  %v2269_v33 = vmul.f32 %v5287_v19, %v7391_v28  ;;  %v2268_v60 = vmul.f32 %v5287_v19, %v7401_v14 }
 0x4c1   :  { %3100 = vmatpush1.bf16.msra.mxu0 %v3044_v9  ;;  %v9517_v9 = vld [vmem:[#allocation114_spill] sm:$0xff] }
 0x4c2   :  { %3101 = vmatprep.subr.bf16.mxu0 %v9387_v57  ;;  %v2293_v41 = vpack.c.bf16 %v2271_v59, %v2269_v33  ;;  %v2292_v63 = vpack.c.bf16 %v2270_v37, %v2268_v60  ;;  %v2803_v19 = vsub.f32 %v9517_v9, %v7405_v25  ;;  %v9518_v59 = vld [vmem:[#allocation117_spill] sm:$0xff] }
 0x4c3   :  { %v5289_v5 = vpop.eup %5288  ;;  %v2802_v1 = vsub.f32 %v9518_v59, %v7405_v25  ;;  %v9523_v25 = vld [vmem:[#allocation17_spill] sm:$0xff] }
 0x4c4   :  { %v2273_v4 = vmul.f32 %v5289_v5, %v7396_v11  ;;  %v7631_v32 = vpop.eup %5290  ;;  %4635 = vmatprep.mubr.msk.bf16.mxu0 %vm478_vm4, %v2293_v41  ;;  %v2272_v29 = vmul.f32 %v5289_v5, %v7410_v47  ;;  %v2852_v60 = vmul.f32 1.442695, %v2803_v19  ;;  %v9530_v59 = vld [vmem:[#allocation65_spill] sm:$0xff] }
 0x4c5   :  { %3102 = vmatpush1.bf16.msra.mxu0 %v3046_v62  ;;  %v2918_v42 = vsel %vm478_vm4, %v7631_v32, 0.0 }
 0x4c6   :  { %v2295_v20 = vpack.c.bf16 %v2275_v49, %v2273_v4  ;;  %3103 = vmatprep.subr.bf16.mxu0 %v9387_v57  ;;  %2435 = vmatmul.mubr.bf16.gmra.mrb[132].mxu0 %v2292_v63  ;;  %v2294_v22 = vpack.c.bf16 %v2274_v53, %v2272_v29  ;;  %v2850_v4 = vmul.f32 1.442695, %v2802_v1  ;;  %5298 = vpow2.f32 %v2852_v60  ;;  %v9526_v53 = vld [vmem:[#allocation32_spill] sm:$0xff] }
 0x4c7   :  { %v5293_v28 = vpop.eup %5292  ;;  %3057 = vrot.lane.b32.xlu1 %v9514_v43, %s5521_s22  ;;  %v7639_v27 = vpop.f32.mrb[44].mxu0  ;;  %v9524_v43 = vld [vmem:[#allocation119_spill] sm:$0xff]  ;;  %v2815_v1 = vsub.f32 %v9530_v59, %v7590_v30 }
 0x4c8   :  { %v7637_v14 = vpop.eup %5294  ;;  %9515 = vst [vmem:[#allocation31_spill] sm:$0xff] %v7639_v27  ;;  %4636 = vmatprep.mubr.msk.bf16.mxu0 %vm478_vm4, %v2295_v20  ;;  %v916_v11 = vpop.f32.mrb[45].mxu0  ;;  %v2277_v40 = vmul.f32 %v5293_v28, %v7413_v44  ;;  %v2276_v44 = vmul.f32 %v5293_v28, %v7424_v34  ;;  %v2809_v20 = vsub.f32 %v9523_v25, %v7434_v24  ;;  %5300 = vpow2.f32 %v2850_v4  ;;  %v9534_v25 = vld [vmem:[#allocation24_spill] sm:$0xff] }
 0x4c9   :  { %v5297_v16 = vpop.eup %5296  ;;  %v7645_v13 = vpop.f32.mrb[46].mxu0  ;;  %v2919_v36 = vadd.f32 %v7637_v14, %v2918_v42  ;;  %v9525_v42 = vld [vmem:[#allocation25_spill] sm:$0xff] }
 0x4ca   :  { %9516 = vst [vmem:[#allocation74_spill] sm:$0xff] %v7645_v13  ;;  %v919_v10 = vpop.f32.mrb[47].mxu0  ;;  %v2279_v21 = vmul.f32 %v5297_v16, %v7337_v35  ;;  %v2278_v33 = vmul.f32 %v5297_v16, %v7332_v56  ;;  %v9520_v35 = vld [vmem:[#allocation18_spill] sm:$0xff]  ;;  %v9522_v56 = vld [vmem:[#allocation121_spill] sm:$0xff]  ;;  %v2808_v16 = vsub.f32 %v9524_v43, %v7434_v24  ;;  %v2864_v29 = vmul.f32 1.442695, %v2809_v20 }
 0x4cb   :  { %v2807_v37 = vsub.f32 %v9520_v35, %v7429_v26  ;;  %v2806_v49 = vsub.f32 %v9522_v56, %v7429_v26  ;;  %v2810_v26 = vsub.f32 %v9526_v53, %v7443_v50  ;;  %v9529_v24 = vld [vmem:[#allocation122_spill] sm:$0xff]  ;;  %v9535_v20 = vld [vmem:[#allocation115_spill] sm:$0xff]  ;;  %v2876_v43 = vmul.f32 1.442695, %v2815_v1  ;;  %v9541_v1 = vld [vmem:[#allocation13_spill] sm:$0xff] }
 0x4cc   :  { %v2297_v47 = vpack.c.bf16 %v2279_v21, %v2277_v40  ;;  %v2296_v62 = vpack.c.bf16 %v2278_v33, %v2276_v44  ;;  %v2811_v40 = vsub.f32 %v9525_v42, %v7443_v50  ;;  %v2862_v10 = vmul.f32 1.442695, %v2808_v16  ;;  %v9532_v50 = vld [vmem:[#allocation8_spill] sm:$0xff]  ;;  %v9536_v16 = vld [vmem:[#allocation62_spill] sm:$0xff] }
 0x4cd   :  { %v2860_v28 = vmul.f32 1.442695, %v2807_v37  ;;  %v2858_v11 = vmul.f32 1.442695, %v2806_v49  ;;  %v2812_v19 = vsub.f32 %v9529_v24, %v7473_v23  ;;  %v2866_v33 = vmul.f32 1.442695, %v2810_v26 }
 0x4ce   :  { %2920 = vadd.xlane.f32.xlu0 %v2919_v36  ;;  %2443 = vmatmul.mubr.bf16.gmra.mrb[136].mxu0 %v2294_v22  ;;  %v9527_v36 = vld [vmem:[#allocation21_spill] sm:$0xff]  ;;  %v2868_v22 = vmul.f32 1.442695, %v2811_v40  ;;  %v9538_v26 = vld [vmem:[#allocation118_spill] sm:$0xff]  ;;  %v9539_v24 = vld [vmem:[#allocation11_spill] sm:$0xff] }
 0x4cf   :  { %4637 = vmatprep.mubr.msk.bf16.mxu0 %vm478_vm4, %v2297_v47  ;;  %5302 = vpow2.f32 %v2860_v28  ;;  %v2813_v21 = vsub.f32 %v9527_v36, %v7473_v23  ;;  %v9533_v23 = vld [vmem:[#allocation66_spill] sm:$0xff]  ;;  %v2870_v49 = vmul.f32 1.442695, %v2812_v19  ;;  %v2805_v28 = vsub.f32 %v9535_v20, %v9534_v25  ;;  %v9542_v20 = vld [vmem:[#allocation71_spill] sm:$0xff] }
 0x4d0   :  { %5304 = vpow2.f32 %v2858_v11  ;;  %v7682_v9 = vpop.eup %5298  ;;  %v2817_v11 = vsub.f32 %v9536_v16, %v7548_v3  ;;  %v2804_v36 = vsub.f32 %v9538_v26, %v9534_v25  ;;  %v2816_v19 = vsub.f32 %v9539_v24, %v7548_v3  ;;  %v9543_v16 = vld [vmem:[#allocation67_spill] sm:$0xff]  ;;  %v9544_v26 = vld [vmem:[#allocation12_spill] sm:$0xff] }
 0x4d1   :  { %5306 = vpow2.f32 %v2864_v29  ;;  %v2872_v35 = vmul.f32 1.442695, %v2813_v21  ;;  %v2922_v4 = vsel %vm478_vm4, %v7682_v9, 0.0  ;;  %v9546_v24 = vld [vmem:[#allocation63_spill] sm:$0xff] }
 0x4d2   :  { %v7660_v6 = vpop.f32.mrb[48].mxu0  ;;  %5308 = vpow2.f32 %v2862_v10  ;;  %v2880_v59 = vmul.f32 1.442695, %v2817_v11  ;;  %v2878_v25 = vmul.f32 1.442695, %v2816_v19  ;;  %v2823_v11 = vsub.f32 %v9543_v16, %v7602_v12 }
 0x4d3   :  { %9519 = vst [vmem:[#allocation73_spill] sm:$0xff] %v7660_v6  ;;  %v924_v5 = vpop.f32.mrb[49].mxu0  ;;  %5310 = vpow2.f32 %v2868_v22  ;;  %v2856_v22 = vmul.f32 1.442695, %v2805_v28  ;;  %v2820_v28 = vsub.f32 %v9542_v20, %v7581_v52  ;;  %v2825_v19 = vsub.f32 %v9546_v24, %v7588_v55 }
 0x4d4   :  { %v7664_v41 = vpop.f32.mrb[50].mxu0  ;;  %5312 = vpow2.f32 %v2866_v33 }
 0x4d5   :  { %9521 = vst [vmem:[#allocation75_spill] sm:$0xff] %v7664_v41  ;;  %v927_v34 = vpop.f32.mrb[51].mxu0  ;;  %5314 = vpow2.f32 %v2872_v35 }
 0x4d6   :  { %2451 = vmatmul.mubr.bf16.gmra.mrb[140].mxu0 %v2296_v62  ;;  %v7694_v62 = vpop.eup %5300  ;;  %v2814_v34 = vsub.f32 %v9533_v23, %v7590_v30  ;;  %5316 = vpow2.f32 %v2870_v49  ;;  %v2854_v49 = vmul.f32 1.442695, %v2804_v36  ;;  %v2824_v36 = vsub.f32 %v9544_v26, %v7588_v55 }
 0x4d7   :  { %v2923_v29 = vadd.f32 %v7694_v62, %v2922_v4  ;;  %5318 = vpow2.f32 %v2876_v43 }
 0x4d8   :  { %v2874_v30 = vmul.f32 1.442695, %v2814_v34 }
 0x4d9   :  { %v7700_v56 = vpop.eup %5302 }
 0x4da   :  { %v7707_v42 = vpop.eup %5304  ;;  %v2930_v10 = vsel %vm478_vm4, %v7700_v56, 0.0  ;;  %5320 = vpow2.f32 %v2874_v30 }
 0x4db   :  { %v7713_v53 = vpop.eup %5306  ;;  %v2931_v23 = vadd.f32 %v7707_v42, %v2930_v10 }
 0x4dc   :  { %v7726_v34 = vpop.eup %5308  ;;  %v2934_v3 = vsel %vm478_vm4, %v7713_v53, 0.0 }
 0x4dd   :  { %v7730_v4 = vpop.eup %5310  ;;  %v2935_v30 = vadd.f32 %v7726_v34, %v2934_v3  ;;  %v2892_v3 = vmul.f32 1.442695, %v2823_v11 }
 0x4de   :  { %v7737_v10 = vpop.eup %5312 }
 0x4df   :  { %v7680_v47 = vpop.f32.mrb[52].mxu0 }
 0x4e0   :  { %9528 = vst [vmem:[#allocation76_spill] sm:$0xff] %v7680_v47  ;;  %v932_v44 = vpop.f32.mrb[53].mxu0 }
 0x4e1   :  { %v7688_v60 = vpop.f32.mrb[54].mxu0  ;;  %v2901_v44 = vpop.xlane.xlu1 %2900 }
 0x4e2   :  { %9531 = vst [vmem:[#allocation83_spill] sm:$0xff] %v7688_v60  ;;  %v935_v5 = vpop.f32.mrb[55].mxu0  ;;  %5322 = vrcp.f32 %v2901_v44 }
 0x4e3   :  { %5324 = vpow2.f32 %v2856_v22  ;;  %v2938_v22 = vsel %vm478_vm4, %v7730_v4, 0.0 }
 0x4e4   :  { %3055 = vrot.lane.b32.xlu0 %v9532_v50, %s5521_s22  ;;  %v2821_v50 = vsub.f32 %v9541_v1, %v7581_v52  ;;  %5326 = vpow2.f32 %v2880_v59  ;;  %v7745_v52 = vpop.eup %5314  ;;  %v2886_v59 = vmul.f32 1.442695, %v2820_v28  ;;  %v9547_v1 = vld [vmem:[#allocation14_spill] sm:$0xff]  ;;  %v2939_v55 = vadd.f32 %v7737_v10, %v2938_v22 }
 0x4e5   :  { %v2896_v28 = vmul.f32 1.442695, %v2825_v19  ;;  %v3050_v26 = vpop.permute.xlu1 %3049 }
 0x4e6   :  { %v2888_v43 = vmul.f32 1.442695, %v2821_v50  ;;  %v2822_v50 = vsub.f32 %v9547_v1, %v7602_v12  ;;  %v2942_v12 = vsel %vm478_vm4, %v7745_v52, 0.0 }
 0x4e7   :  { %v7709_v40 = vpop.f32.mrb[56].mxu0 }
 0x4e8   :  { %9537 = vst [vmem:[#allocation80_spill] sm:$0xff] %v7709_v40  ;;  %v940_v21 = vpop.f32.mrb[57].mxu0  ;;  %v2890_v11 = vmul.f32 1.442695, %v2822_v50 }
 0x4e9   :  { %v7719_v33 = vpop.f32.mrb[58].mxu0 }
 0x4ea   :  { %9540 = vst [vmem:[#allocation81_spill] sm:$0xff] %v7719_v33  ;;  %v943_v5 = vpop.f32.mrb[59].mxu0 }
 0x4eb   :  { %2924 = vadd.xlane.f32.xlu1 %v2923_v29 }
 0x4ef   :  { %2932 = vadd.xlane.f32.xlu1 %v2931_v23  ;;  %v7741_v21 = vpop.f32.mrb[60].mxu0  ;;  %v7753_v23 = vpop.eup %5316 }
 0x4f0   :  { %9545 = vst [vmem:[#allocation77_spill] sm:$0xff] %v7741_v21  ;;  %v948_v44 = vpop.f32.mrb[61].mxu0  ;;  %v2943_v22 = vadd.f32 %v7753_v23, %v2942_v12 }
 0x4f1   :  { %v2905_v29 = vpop.xlane.xlu0 %2904  ;;  %v7751_v5 = vpop.f32.mrb[62].mxu0 }
 0x4f2   :  { %5328 = vrcp.f32 %v2905_v29  ;;  %9548 = vst [vmem:[#allocation79_spill] sm:$0xff] %v7751_v5  ;;  %v7758_v29 = vpop.eup %5318 }
 0x4f3   :  { %5330 = vpow2.f32 %v2854_v49  ;;  %2936 = vadd.xlane.f32.xlu1 %v2935_v30  ;;  %v951_v49 = vpop.f32.mrb[63].mxu0 }
 0x4f4   :  { %5332 = vpow2.f32 %v2878_v25  ;;  %v2894_v25 = vmul.f32 1.442695, %v2824_v36  ;;  %v2946_v36 = vsel %vm478_vm4, %v7758_v29, 0.0 }
 0x4f5   :  { %5334 = vpow2.f32 %v2888_v43  ;;  %v3048_v16 = vpop.permute.xlu0 %3047  ;;  %v7763_v43 = vpop.eup %5320 }
 0x4f6   :  { %3104 = vmatpush1.bf16.msra.mxu0 %v3048_v16  ;;  %5336 = vpow2.f32 %v2886_v59  ;;  %v5323_v30 = vpop.eup %5322  ;;  %v2947_v49 = vadd.f32 %v7763_v43, %v2946_v36 }
 0x4f7   :  { %2940 = vadd.xlane.f32.xlu1 %v2939_v55  ;;  %3105 = vmatprep.subr.bf16.mxu0 %v9387_v57  ;;  %5338 = vpow2.f32 %v2892_v3  ;;  %v7768_v24 = vpop.eup %5324  ;;  %v7770_v44 = vpop.f32.mrb[64].mxu0  ;;  %v7776_v50 = vmul.f32 %v5323_v30, %v7469_v31 }
 0x4f8   :  { %5340 = vpow2.f32 %v2894_v25  ;;  %9549 = vst [vmem:[#allocation84_spill] sm:$0xff] %v7770_v44  ;;  %v7772_v19 = vpop.eup %5326  ;;  %v956_v1 = vpop.f32.mrb[65].mxu0  ;;  %v2926_v36 = vsel %vm478_vm4, %v7768_v24, 0.0 }
 0x4f9   :  { %5342 = vpow2.f32 %v2896_v28  ;;  %v7778_v3 = vpop.f32.mrb[66].mxu0  ;;  %v9551_v28 = vld [vmem:[#allocation30_spill] sm:$0xff]  ;;  %v2950_v31 = vsel %vm478_vm4, %v7772_v19, 0.0 }
 0x4fa   :  { %3106 = vmatpush1.bf16.msra.mxu0 %v3050_v26  ;;  %5344 = vpow2.f32 %v2890_v11  ;;  %9550 = vst [vmem:[#allocation82_spill] sm:$0xff] %v7778_v3  ;;  %v959_v12 = vpop.f32.mrb[67].mxu0  ;;  %v2990_v26 = vmul.f32 %v5323_v30, %v9551_v28 }
 0x4fb   :  { %2944 = vadd.xlane.f32.xlu1 %v2943_v22  ;;  %3107 = vmatprep.subr.bf16.mxu0 %v9387_v57 }
 0x4fc   :  { %v5329_v59 = vpop.eup %5328 }
 0x4fd   :  { %v7781_v16 = vpop.eup %5330  ;;  %v7784_v55 = vmul.f32 %v5329_v59, %v7507_v17  ;;  %v2992_v11 = vmul.f32 %v5329_v59, %v7502_v7 }
 0x4fe   :  { %v7790_v22 = vpop.eup %5332  ;;  %v2927_v7 = vadd.f32 %v7781_v16, %v2926_v36 }
 0x4ff   :  { %v7796_v1 = vpop.eup %5334  ;;  %2948 = vadd.xlane.f32.xlu1 %v2947_v49  ;;  %v3026_v17 = vpack.c.bf16 %v2992_v11, %v2990_v26  ;;  %v2951_v30 = vadd.f32 %v7790_v22, %v2950_v31  ;;  %v7805_v12 = vpop.f32.mrb[68].mxu0 }
 0x500   :  { %v7803_v59 = vpop.eup %5336  ;;  %9552 = vst [vmem:[#allocation78_spill] sm:$0xff] %v7805_v12  ;;  %v2958_v28 = vsel %vm478_vm4, %v7796_v1, 0.0  ;;  %v964_v49 = vpop.f32.mrb[69].mxu0 }
 0x501   :  { %4647 = vmatprep.mubr.msk.bf16.mxu0 %vm478_vm4, %v3026_v17  ;;  %v7809_v20 = vpop.eup %5338  ;;  %v7813_v11 = vpop.f32.mrb[70].mxu0  ;;  %v2959_v35 = vadd.f32 %v7803_v59, %v2958_v28 }
 0x502   :  { %v7811_v26 = vpop.eup %5340  ;;  %9553 = vst [vmem:[#allocation87_spill] sm:$0xff] %v7813_v11  ;;  %v967_v36 = vpop.f32.mrb[71].mxu0  ;;  %v2962_v63 = vsel %vm478_vm4, %v7809_v20, 0.0 }
 0x503   :  { %2952 = vadd.xlane.f32.xlu1 %v2951_v30  ;;  %2928 = vadd.xlane.f32.xlu0 %v2927_v7  ;;  %v7815_v17 = vpop.eup %5342  ;;  %v2966_v49 = vsel %vm547_vm5, %v7811_v26, 0.0 }
 0x504   :  { %v7820_v37 = vpop.eup %5344  ;;  %v2967_v54 = vsel %vm549_vm6, %v7815_v17, 0.0 }
 0x505   :  { %v2963_v30 = vadd.f32 %v7820_v37, %v2962_v63  ;;  %v2968_v8 = vadd.f32 %v2967_v54, %v2966_v49  ;;  %v9554_v63 = vld [vmem:[#allocation10_spill] sm:$0xff]  ;;  %v9555_v54 = vld [vmem:[#allocation72_spill] sm:$0xff] }
 0x507   :  { %2960 = vadd.xlane.f32.xlu1 %v2959_v35  ;;  %v1643_v7 = vpop.f32.mrb[72].mxu0 }
 0x508   :  { %v1645_v39 = vpop.f32.mrb[73].mxu0 }
 0x509   :  { %v1646_v36 = vpop.f32.mrb[74].mxu0 }
 0x50a   :  { %v1714_v31 = vpack.c.bf16 %v1646_v36, %v1643_v7  ;;  %v1648_v28 = vpop.f32.mrb[75].mxu0 }
 0x50b   :  { %2964 = vadd.xlane.f32.xlu1 %v2963_v30 }
 0x50f   :  { %2969 = vadd.xlane.f32.xlu1 %v2968_v8  ;;  %v1651_v25 = vpop.f32.mrb[76].mxu0  ;;  %v2819_v8 = vsub.f32 %v9555_v54, %v7576_v0 }
 0x510   :  { %v1653_v12 = vpop.f32.mrb[77].mxu0 }
 0x511   :  { %v1654_v11 = vpop.f32.mrb[78].mxu0  ;;  %v2884_v12 = vmul.f32 1.442695, %v2819_v8 }
 0x512   :  { %v1715_v35 = vpack.c.bf16 %v1654_v11, %v1651_v25  ;;  %v1656_v44 = vpop.f32.mrb[79].mxu0 }
 0x513   :  { %v9556_v44 = vld [vmem:[#allocation70_spill] sm:$0xff]  ;;  %5346 = vpow2.f32 %v2884_v12 }
 0x514   :  { %v2818_v25 = vsub.f32 %v9556_v44, %v7576_v0 }
 0x516   :  { %v2882_v49 = vmul.f32 1.442695, %v2818_v25 }
 0x517   :  { %v7831_v3 = vpop.f32.mrb[80].mxu0 }
 0x518   :  { %v1661_v21 = vpop.f32.mrb[81].mxu0  ;;  %5348 = vpow2.f32 %v2882_v49 }
 0x519   :  { %3059 = vrot.lane.b32.xlu0 %v9554_v63, %s5521_s22  ;;  %v7833_v5 = vpop.f32.mrb[82].mxu0 }
 0x51a   :  { %v1664_v30 = vpop.f32.mrb[83].mxu0 }
 0x51d   :  { %v7860_v12 = vpop.eup %5346 }
 0x51f   :  { %v7842_v11 = vpop.f32.mrb[84].mxu0 }
 0x520   :  { %3222 = vrot.lane.b32.xlu1 %v1714_v31, %s5522_s23  ;;  %v1669_v7 = vpop.f32.mrb[85].mxu0  ;;  %v7851_v31 = vpop.xlane.xlu1 %2908 }
 0x521   :  { %v7844_v21 = vpop.f32.mrb[86].mxu0 }
 0x522   :  { %v1672_v28 = vpop.f32.mrb[87].mxu0  ;;  %v7865_v49 = vpop.eup %5348 }
 0x524   :  { %3224 = vrot.lane.b32.xlu1 %v1715_v35, %s5522_s23  ;;  %v3054_v25 = vpop.permute.xlu1 %3053 }
 0x526   :  { %v7849_v63 = vpop.xlane.xlu0 %2912 }
 0x527   :  { %v7853_v0 = vpop.f32.mrb[88].mxu0  ;;  %5350 = vrcp.f32 %v7849_v63 }
 0x528   :  { %v1677_v54 = vpop.f32.mrb[89].mxu0  ;;  %5352 = vrcp.f32 %v7851_v31 }
 0x529   :  { %v7855_v8 = vpop.f32.mrb[90].mxu0 }
 0x52a   :  { %v3052_v30 = vpop.permute.xlu0 %3051  ;;  %v1680_v44 = vpop.f32.mrb[91].mxu0 }
 0x52b   :  { %3108 = vmatpush1.bf16.msra.mxu0 %v3052_v30  ;;  %v2954_v30 = vsel %vm478_vm4, %v7860_v12, 0.0 }
 0x52c   :  { %3109 = vmatprep.subr.bf16.mxu0 %v9387_v57 }
 0x52f   :  { %3110 = vmatpush1.bf16.msra.mxu0 %v3054_v25  ;;  %v7863_v7 = vpop.f32.mrb[92].mxu0  ;;  %v2955_v25 = vadd.f32 %v7865_v49, %v2954_v30 }
 0x530   :  { %3111 = vmatprep.subr.bf16.mxu0 %v9387_v57  ;;  %9557 = vst [vmem:[#allocation85_spill] sm:$0xff] %v7863_v7  ;;  %v1685_v28 = vpop.f32.mrb[93].mxu0 }
 0x531   :  { %v7869_v54 = vpop.f32.mrb[94].mxu0 }
 0x532   :  { %9558 = vst [vmem:[#allocation86_spill] sm:$0xff] %v7869_v54  ;;  %v1688_v44 = vpop.f32.mrb[95].mxu0 }
 0x537   :  { %v7874_v36 = vpop.f32.mrb[96].mxu0 }
 0x538   :  { %2956 = vadd.xlane.f32.xlu0 %v2955_v25  ;;  %9559 = vst [vmem:[#allocation93_spill] sm:$0xff] %v7874_v36  ;;  %v1693_v39 = vpop.f32.mrb[97].mxu0  ;;  %v5351_v36 = vpop.eup %5350 }
 0x539   :  { %v7876_v40 = vpop.f32.mrb[98].mxu0  ;;  %v2996_v54 = vmul.f32 %v5351_v36, %v7564_v58 }
 0x53a   :  { %9560 = vst [vmem:[#allocation34_spill] sm:$0xff] %v7876_v40  ;;  %v1696_v33 = vpop.f32.mrb[99].mxu0 }
 0x53f   :  { %v7880_v47 = vpop.f32.mrb[100].mxu0 }
 0x540   :  { %9561 = vst [vmem:[#allocation97_spill] sm:$0xff] %v7880_v47  ;;  %v1701_v60 = vpop.f32.mrb[101].mxu0 }
 0x541   :  { %v7882_v6 = vpop.f32.mrb[102].mxu0 }
 0x542   :  { %9562 = vst [vmem:[#allocation88_spill] sm:$0xff] %v7882_v6  ;;  %v1704_v35 = vpop.f32.mrb[103].mxu0 }
 0x547   :  { %v7886_v30 = vpop.f32.mrb[104].mxu0 }
 0x548   :  { %9563 = vst [vmem:[#allocation91_spill] sm:$0xff] %v7886_v30  ;;  %v1709_v25 = vpop.f32.mrb[105].mxu0 }
 0x549   :  { %v7888_v41 = vpop.f32.mrb[106].mxu0  ;;  %v2917_v25 = vpop.xlane.xlu1 %2916 }
 0x54a   :  { %9564 = vst [vmem:[#allocation102_spill] sm:$0xff] %v7888_v41  ;;  %v1712_v27 = vpop.f32.mrb[107].mxu0 }
 0x54f   :  { %v2388_v28 = vpop.f32.mrb[108].mxu0 }
 0x550   :  { %v2390_v33 = vpop.f32.mrb[109].mxu0 }
 0x551   :  { %v2391_v13 = vpop.f32.mrb[110].mxu0 }
 0x552   :  { %v2459_v51 = vpack.c.bf16 %v2391_v13, %v2388_v28  ;;  %v2393_v60 = vpop.f32.mrb[111].mxu0  ;;  %v3058_v28 = vpop.permute.xlu1 %3057 }
 0x554   :  { %3249 = vrot.lane.b32.xlu0 %v2459_v51, %s5523_s24 }
 0x557   :  { %v7893_v18 = vpop.f32.mrb[112].mxu0 }
 0x558   :  { %v2398_v35 = vpop.f32.mrb[113].mxu0 }
 0x559   :  { %v7895_v15 = vpop.f32.mrb[114].mxu0 }
 0x55a   :  { %v2401_v39 = vpop.f32.mrb[115].mxu0 }
 0x55b   :  { %v2921_v44 = vpop.xlane.xlu0 %2920 }
 0x55c   :  { %5354 = vrcp.f32 %v2921_v44 }
 0x55d   :  { %5356 = vrcp.f32 %v2917_v25  ;;  %v9568_v25 = vmov 0.0  }
 0x55f   :  { %v3056_v27 = vpop.permute.xlu0 %3055  ;;  %v7900_v13 = vpop.f32.mrb[116].mxu0 }
 0x560   :  { %3112 = vmatpush1.bf16.msra.mxu0 %v3056_v27  ;;  %v2406_v33 = vpop.f32.mrb[117].mxu0 }
 0x561   :  { %3113 = vmatprep.subr.bf16.mxu0 %v9387_v57  ;;  %v7902_v51 = vpop.f32.mrb[118].mxu0 }
 0x562   :  { %v2409_v35 = vpop.f32.mrb[119].mxu0 }
 0x564   :  { %3114 = vmatpush1.bf16.msra.mxu0 %v3058_v28 }
 0x565   :  { %3115 = vmatprep.subr.bf16.mxu0 %v9387_v57 }
 0x567   :  { %v7907_v30 = vpop.f32.mrb[120].mxu0 }
 0x568   :  { %v2414_v39 = vpop.f32.mrb[121].mxu0 }
 0x569   :  { %v7909_v46 = vpop.f32.mrb[122].mxu0 }
 0x56a   :  { %v2417_v41 = vpop.f32.mrb[123].mxu0 }
 0x56f   :  { %v7913_v47 = vpop.f32.mrb[124].mxu0 }
 0x570   :  { %9565 = vst [vmem:[#allocation3_spill] sm:$0xff] %v7913_v47  ;;  %v2422_v33 = vpop.f32.mrb[125].mxu0 }
 0x571   :  { %v7915_v6 = vpop.f32.mrb[126].mxu0  ;;  %v5353_v33 = vpop.eup %5352 }
 0x572   :  { %9566 = vst [vmem:[#allocation101_spill] sm:$0xff] %v7915_v6  ;;  %v2425_v35 = vpop.f32.mrb[127].mxu0  ;;  %v2994_v44 = vmul.f32 %v5353_v33, %v7531_v38  ;;  %v5355_v47 = vpop.eup %5354  ;;  %v2995_v38 = vmul.f32 %v5351_v36, %v7572_v48 }
 0x573   :  { %v9569_v35 = vpack.c.bf16 %v7784_v55, %v7776_v50  ;;  %v5357_v58 = vpop.eup %5356 }
 0x574   :  { %v2998_v50 = vmul.f32 %v5357_v58, %v7594_v2 }
 0x578   :  { %v2925_v57 = vpop.xlane.xlu1 %2924 }
 0x57c   :  { %v2933_v39 = vpop.xlane.xlu1 %2932 }
 0x580   :  { %v2937_v40 = vpop.xlane.xlu1 %2936 }
 0x590   :  { %v2929_v60 = vpop.xlane.xlu0 %2928  ;;  %v7921_v41 = vpop.f32.mrb[128].mxu0 }
 0x591   :  { %9567 = vst [vmem:[#allocation106_spill] sm:$0xff] %v7921_v41  ;;  %v2430_v27 = vpop.f32.mrb[129].mxu0  ;;  %5358 = vrcp.f32 %v2929_v60 }
 0x592   :  { %v7923_v7 = vpop.f32.mrb[130].mxu0  ;;  %v3028_v27 = vpack.c.bf16 %v2996_v54, %v2994_v44  ;;  %5360 = vrcp.f32 %v2925_v57  ;;  %v3000_v57 = vmul.f32 %v5355_v47, %v7631_v32  ;;  %v2999_v32 = vmul.f32 %v5355_v47, %v7637_v14 }
 0x593   :  { %v2433_v28 = vpop.f32.mrb[131].mxu0  ;;  %5362 = vrcp.f32 %v2937_v40 }
 0x594   :  { %v3060_v63 = vpop.permute.xlu0 %3059  ;;  %v2941_v28 = vpop.xlane.xlu1 %2940  ;;  %5364 = vrcp.f32 %v2933_v39 }
 0x595   :  { %v3097_v31 = vsel %vm860_vm3, %v3060_v63, 0 }
 0x596   :  { %3116 = vmatpush1.bf16.msra.mxu0 %v3097_v31  ;;  %v2993_v31 = vmul.f32 %v5353_v33, %v7541_v45  ;;  %v2997_v33 = vmul.f32 %v5357_v58, %v7604_v61 }
 0x597   :  { %4783 = vmatprep.subr.bf16.mxu0 %v9568_v25 }
 0x598   :  { %v3027_v55 = vpack.c.bf16 %v2995_v38, %v2993_v31 }
 0x599   :  { %v7931_v6 = vpop.f32.mrb[132].mxu0  ;;  %3132 = vmatmul.mubr.bf16.vlgmr.msra.gmra.mrb[144].mxu0 %v9569_v35  ;;  %v3030_v35 = vpack.c.bf16 %v3000_v57, %v2998_v50  ;;  %v3029_v57 = vpack.c.bf16 %v2999_v32, %v2997_v33 }
 0x59a   :  { %v2438_v41 = vpop.f32.mrb[133].mxu0  ;;  %4648 = vmatprep.mubr.msk.bf16.mxu0 %vm478_vm4, %v3028_v27 }
 0x59b   :  { %v7937_v63 = vpop.f32.mrb[134].mxu0  ;;  %v2945_v41 = vpop.xlane.xlu1 %2944 }
 0x59c   :  { %v2465_v54 = vpack.c.bf16 %v7937_v63, %v7931_v6  ;;  %v2441_v60 = vpop.f32.mrb[135].mxu0  ;;  %v5359_v44 = vpop.eup %5358  ;;  %5366 = vrcp.f32 %v2945_v41  ;;  %v9590_v6 = vld [vmem:[#allocation102_spill] sm:$0xff]  ;;  %v9591_v63 = vld [vmem:[#allocation91_spill] sm:$0xff] }
 0x59d   :  { %v5361_v36 = vpop.eup %5360  ;;  %v3004_v40 = vmul.f32 %v5359_v44, %v7768_v24  ;;  %5368 = vrcp.f32 %v2941_v28  ;;  %v3003_v24 = vmul.f32 %v5359_v44, %v7781_v16 }
 0x59e   :  { %v3002_v38 = vmul.f32 %v5361_v36, %v7682_v9  ;;  %v5363_v50 = vpop.eup %5362  ;;  %v3001_v28 = vmul.f32 %v5361_v36, %v7694_v62 }
 0x59f   :  { %v2949_v39 = vpop.xlane.xlu1 %2948  ;;  %v5365_v47 = vpop.eup %5364  ;;  %v3008_v41 = vmul.f32 %v5363_v50, %v7713_v53  ;;  %v3007_v44 = vmul.f32 %v5363_v50, %v7726_v34 }
 0x5a0   :  { %v3032_v31 = vpack.c.bf16 %v3004_v40, %v3002_v38  ;;  %v3031_v32 = vpack.c.bf16 %v3003_v24, %v3001_v28  ;;  %v3005_v53 = vmul.f32 %v5365_v47, %v7707_v42 }
 0x5a1   :  { %v7945_v27 = vpop.f32.mrb[136].mxu0  ;;  %3140 = vmatmul.mubr.bf16.gmra.mrb[148].mxu0 %v3027_v55 }
 0x5a2   :  { %v2446_v48 = vpop.f32.mrb[137].mxu0  ;;  %4649 = vmatprep.mubr.msk.bf16.mxu0 %vm478_vm4, %v3030_v35  ;;  %v3033_v36 = vpack.c.bf16 %v3007_v44, %v3005_v53 }
 0x5a3   :  { %v7948_v60 = vpop.f32.mrb[138].mxu0  ;;  %v2953_v61 = vpop.xlane.xlu1 %2952  ;;  %v3006_v48 = vmul.f32 %v5365_v47, %v7700_v56 }
 0x5a4   :  { %v2466_v45 = vpack.c.bf16 %v7948_v60, %v7945_v27  ;;  %v2449_v2 = vpop.f32.mrb[139].mxu0  ;;  %5370 = vrcp.f32 %v2953_v61 }
 0x5a5   :  { %v3034_v2 = vpack.c.bf16 %v3008_v41, %v3006_v48  ;;  %5372 = vrcp.f32 %v2949_v39 }
 0x5a6   :  { %v5367_v40 = vpop.eup %5366 }
 0x5a7   :  { %v5369_v16 = vpop.eup %5368  ;;  %v2961_v33 = vpop.xlane.xlu1 %2960  ;;  %v3012_v38 = vmul.f32 %v5367_v40, %v7745_v52 }
 0x5a8   :  { %v3010_v62 = vmul.f32 %v5369_v16, %v7730_v4  ;;  %v3009_v34 = vmul.f32 %v5369_v16, %v7737_v10  ;;  %5374 = vrcp.f32 %v2961_v33 }
 0x5a9   :  { %v7956_v55 = vpop.f32.mrb[140].mxu0  ;;  %3148 = vmatmul.mubr.bf16.gmra.mrb[152].mxu0 %v3029_v57 }
 0x5aa   :  { %v2454_v14 = vpop.f32.mrb[141].mxu0  ;;  %4650 = vmatprep.mubr.msk.bf16.mxu0 %vm478_vm4, %v3032_v31  ;;  %v3036_v56 = vpack.c.bf16 %v3012_v38, %v3010_v62  ;;  %v9570_v62 = vpack.c.bf16 %v7895_v15, %v7893_v18  ;;  %v9572_v15 = vpack.c.bf16 %v7902_v51, %v7900_v13  ;;  %v9575_v13 = vpack.c.bf16 %v7855_v8, %v7853_v0  ;;  %v9582_v8 = vld [vmem:[#allocation106_spill] sm:$0xff] }
 0x5ab   :  { %v7959_v35 = vpop.f32.mrb[142].mxu0  ;;  %v2965_v31 = vpop.xlane.xlu1 %2964  ;;  %v3011_v14 = vmul.f32 %v5367_v40, %v7753_v23 }
 0x5ac   :  { %v2467_v9 = vpack.c.bf16 %v7959_v35, %v7956_v55  ;;  %v2457_v58 = vpop.f32.mrb[143].mxu0 }
 0x5ad   :  { %v3035_v50 = vpack.c.bf16 %v3011_v14, %v3009_v34  ;;  %v9571_v14 = vpack.c.bf16 %v7833_v5, %v7831_v3  ;;  %v9574_v5 = vpack.c.bf16 %v7909_v46, %v7907_v30 }
 0x5ae   :  { %v5371_v57 = vpop.eup %5370 }
 0x5af   :  { %v5373_v39 = vpop.eup %5372  ;;  %v3016_v24 = vmul.f32 %v5371_v57, %v7772_v19  ;;  %v2970_v42 = vpop.xlane.xlu1 %2969  ;;  %v3015_v4 = vmul.f32 %v5371_v57, %v7790_v22 }
 0x5b0   :  { %v3014_v52 = vmul.f32 %v5373_v39, %v7758_v29  ;;  %5376 = vrcp.f32 %v2970_v42  ;;  %v3013_v23 = vmul.f32 %v5373_v39, %v7763_v43  ;;  %v9573_v42 = vpack.c.bf16 %v7844_v21, %v7842_v11  ;;  %v9576_v11 = vld [vmem:[#allocation101_spill] sm:$0xff]  ;;  %v9577_v21 = vld [vmem:[#allocation3_spill] sm:$0xff] }
 0x5b1   :  { %3156 = vmatmul.mubr.bf16.gmra.mrb[156].mxu0 %v3031_v32  ;;  %5378 = vrcp.f32 %v2965_v31 }
 0x5b2   :  { %4651 = vmatprep.mubr.msk.bf16.mxu0 %vm478_vm4, %v3034_v2  ;;  %v3038_v47 = vpack.c.bf16 %v3016_v24, %v3014_v52  ;;  %v3037_v19 = vpack.c.bf16 %v3015_v4, %v3013_v23  ;;  %v5375_v10 = vpop.eup %5374  ;;  %v9578_v23 = vpack.c.bf16 %v9576_v11, %v9577_v21 }
 0x5b3   :  { %v3020_v28 = vmul.f32 %v5375_v10, %v7796_v1  ;;  %v3019_v2 = vmul.f32 %v5375_v10, %v7803_v59  ;;  %v4938_v59 = vld [vmem:[%s8989_s3] sm:$0xff]  }
 0x5b4   :  { %4784 = vmatpush3.bf16.msra.mxu0 %v4938_v59  ;;  %4917 = vmatpush3.bf16.msra.mxu1 %v4938_v59  ;;  %v9587_v59 = vld [vmem:[#allocation88_spill] sm:$0xff] }
 0x5b5   :  { %4785 = vmatprep.subr.bf16.mxu0 %v9568_v25  ;;  %4916 = vmatprep.subr.bf16.mxu1 %v9568_v25 }
 0x5b9   :  { %3164 = vmatmul.mubr.bf16.gmra.mrb[160].mxu0 %v3033_v36 }
 0x5ba   :  { %4652 = vmatprep.mubr.msk.bf16.mxu0 %vm478_vm4, %v3036_v56  ;;  %v5377_v58 = vpop.eup %5376 }
 0x5bb   :  { %v5379_v29 = vpop.eup %5378  ;;  %v3024_v22 = vmul.f32 %v5377_v58, %v7815_v17  ;;  %v3023_v1 = vmul.f32 %v5377_v58, %v7811_v26  ;;  %v9579_v58 = vld [vmem:[#allocation86_spill] sm:$0xff] }
 0x5bc   :  { %v3022_v43 = vmul.f32 %v5379_v29, %v7809_v20  ;;  %v4939_v20 = vld [vmem:[%s8989_s3 + $0x8] sm:$0xff]  }
 0x5bd   :  { %4786 = vmatpush3.bf16.msra.mxu0 %v4939_v20  ;;  %4918 = vmatpush3.bf16.msra.mxu1 %v4939_v20  ;;  %v9588_v20 = vld [vmem:[#allocation97_spill] sm:$0xff] }
 0x5be   :  { %v3042_v44 = vpack.c.bf16 %v3024_v22, %v3022_v43  ;;  %4823 = vmatprep.subr.bf16.mxu0 %v9568_v25  ;;  %4863 = vmatprep.subr.bf16.mxu1 %v9568_v25 }
 0x5c1   :  { %3172 = vmatmul.mubr.bf16.gmra.mrb[164].mxu0 %v3035_v50 }
 0x5c2   :  { %4653 = vmatprep.mubr.msk.bf16.mxu0 %vm478_vm4, %v3038_v47 }
 0x5c5   :  { %v2957_v61 = vpop.xlane.xlu0 %2956 }
 0x5c6   :  { %5380 = vrcp.f32 %v2957_v61 }
 0x5c9   :  { %3180 = vmatmul.mubr.bf16.gmra.mrb[168].mxu0 %v3037_v19 }
 0x5d0   :  { %v5381_v41 = vpop.eup %5380 }
 0x5d1   :  { %v3018_v48 = vmul.f32 %v5381_v41, %v7860_v12  ;;  %v3017_v32 = vmul.f32 %v5381_v41, %v7865_v49  ;;  %v3021_v12 = vmul.f32 %v5379_v29, %v7820_v37  ;;  %v9580_v29 = vld [vmem:[#allocation85_spill] sm:$0xff] }
 0x5d2   :  { %v9581_v41 = vpack.c.bf16 %v9579_v58, %v9580_v29  ;;  %v9603_v58 = vld [vmem:[#allocation73_spill] sm:$0xff] }
 0x5d3   :  { %v3040_v40 = vpack.c.bf16 %v3020_v28, %v3018_v48  ;;  %v3039_v16 = vpack.c.bf16 %v3019_v2, %v3017_v32  ;;  %v3041_v33 = vpack.c.bf16 %v3023_v1, %v3021_v12  ;;  %v9583_v28 = vpack.c.bf16 %v7923_v7, %v9582_v8 }
 0x5d5   :  { %4654 = vmatprep.mubr.msk.bf16.mxu0 %vm478_vm4, %v3040_v40  ;;  %v9584_v40 = vld [vmem:[#allocation34_spill] sm:$0xff] }
 0x5d6   :  { %3188 = vmatmul.mubr.bf16.gmra.mrb[172].mxu0 %v3039_v16  ;;  %v9585_v16 = vld [vmem:[#allocation93_spill] sm:$0xff] }
 0x5d7   :  { %4655 = vmatprep.mubr.msk.bf16.mxu0 %vm478_vm4, %v3042_v44  ;;  %v9586_v43 = vpack.c.bf16 %v9584_v40, %v9585_v16  ;;  %v9606_v40 = vld [vmem:[#allocation76_spill] sm:$0xff] }
 0x5de   :  { %3196 = vmatmul.mubr.bf16.gmra.mrb[176].mxu0 %v3041_v33 }
 0x5df   :  { %4787 = vmatprep.mubr.msk.bf16.mxu0 %vm5509_vm0, %v9568_v25 }
 0x66c   :  { %v3133_v37 = vpop.f32.mrb[144].mxu0 }
 0x66d   :  { %v3135_v26 = vpop.f32.mrb[145].mxu0 }
 0x66e   :  { %v3136_v17 = vpop.f32.mrb[146].mxu0 }
 0x66f   :  { %v3204_v49 = vpack.c.bf16 %v3136_v17, %v3133_v37  ;;  %v3138_v38 = vpop.f32.mrb[147].mxu0  ;;  %v9589_v37 = vpack.c.bf16 %v9587_v59, %v9588_v20  ;;  %v9608_v59 = vld [vmem:[#allocation81_spill] sm:$0xff]  ;;  %v9609_v20 = vld [vmem:[#allocation80_spill] sm:$0xff] }
 0x671   :  { %3276 = vrot.lane.b32.xlu1 %v3204_v49, %s5524_s29 }
 0x674   :  { %v3141_v53 = vpop.f32.mrb[148].mxu0 }
 0x675   :  { %3251 = vrot.lane.b32.xlu1 %v9570_v62, %s5523_s24  ;;  %v3143_v36 = vpop.f32.mrb[149].mxu0 }
 0x676   :  { %v3144_v56 = vpop.f32.mrb[150].mxu0 }
 0x677   :  { %v3205_v57 = vpack.c.bf16 %v3144_v56, %v3141_v53  ;;  %v3146_v31 = vpop.f32.mrb[151].mxu0  ;;  %v3223_v56 = vpop.permute.xlu1 %3222 }
 0x678   :  { %v3250_v31 = vpop.permute.xlu0 %3249 }
 0x679   :  { %3278 = vrot.lane.b32.xlu1 %v3205_v57, %s5524_s29 }
 0x67b   :  { %v3225_v57 = vpop.permute.xlu1 %3224 }
 0x67c   :  { %v3149_v39 = vpop.f32.mrb[152].mxu0 }
 0x67d   :  { %3226 = vrot.lane.b32.xlu1 %v9571_v14, %s5522_s23  ;;  %v3151_v24 = vpop.f32.mrb[153].mxu0  ;;  %v9594_v14 = vld [vmem:[#allocation69_spill] sm:$0xff] }
 0x67e   :  { %v3152_v34 = vpop.f32.mrb[154].mxu0 }
 0x67f   :  { %v3206_v52 = vpack.c.bf16 %v3152_v34, %v3149_v39  ;;  %v3154_v50 = vpop.f32.mrb[155].mxu0  ;;  %v9593_v39 = vld [vmem:[#allocation68_spill] sm:$0xff] }
 0x680   :  { %v9595_v24 = vpack.c.bf16 %v9593_v39, %v9594_v14  ;;  %v9596_v50 = vld [vmem:[#allocation36_spill] sm:$0xff] }
 0x681   :  { %3253 = vrot.lane.b32.xlu1 %v9572_v15, %s5523_s24  ;;  %3280 = vrot.lane.b32.xlu0 %v3206_v52, %s5524_s29  ;;  %v9597_v15 = vld [vmem:[#allocation23_spill] sm:$0xff]  ;;  %v9615_v39 = vld [vmem:[#allocation84_spill] sm:$0xff] }
 0x682   :  { %v3296_v34 = vsel %vm264_vm2, %v9595_v24, %v3223_v56 }
 0x683   :  { %v3323_v52 = vsel %vm3321_vm7, %v3296_v34, %v3250_v31  ;;  %v9614_v31 = vld [vmem:[#allocation82_spill] sm:$0xff] }
 0x684   :  { %v3157_v18 = vpop.f32.mrb[156].mxu0  ;;  %v9616_v14 = vpack.c.bf16 %v9614_v31, %v9615_v39 }
 0x685   :  { %3228 = vrot.lane.b32.xlu1 %v9573_v42, %s5522_s23  ;;  %3255 = vrot.lane.b32.xlu0 %v9574_v5, %s5523_s24  ;;  %v3159_v3 = vpop.f32.mrb[157].mxu0 }
 0x686   :  { %v3160_v47 = vpop.f32.mrb[158].mxu0 }
 0x687   :  { %v3207_v4 = vpack.c.bf16 %v3160_v47, %v3157_v18  ;;  %v3162_v61 = vpop.f32.mrb[159].mxu0  ;;  %v9598_v18 = vpack.c.bf16 %v9596_v50, %v9597_v15  ;;  %v9617_v50 = vld [vmem:[#allocation87_spill] sm:$0xff]  ;;  %v9618_v15 = vld [vmem:[#allocation78_spill] sm:$0xff] }
 0x688   :  { %v9599_v61 = vld [vmem:[#allocation74_spill] sm:$0xff] }
 0x689   :  { %3230 = vrot.lane.b32.xlu0 %v9575_v13, %s5522_s23  ;;  %3282 = vrot.lane.b32.xlu1 %v3207_v4, %s5524_s29  ;;  %v3299_v42 = vsel %vm264_vm2, %v9598_v18, %v3225_v57  ;;  %v9600_v13 = vld [vmem:[#allocation31_spill] sm:$0xff]  ;;  %v9619_v18 = vpack.c.bf16 %v9617_v50, %v9618_v15 }
 0x68a   :  { %v5499_v15 = vld [vmem:[%s8987_s0 + $0x48] sm:$0xff] }
 0x68c   :  { %v3165_v51 = vpop.f32.mrb[160].mxu0 }
 0x68d   :  { %3257 = vrot.lane.b32.xlu1 %v9578_v23, %s5523_s24  ;;  %v3167_v19 = vpop.f32.mrb[161].mxu0 }
 0x68e   :  { %v3168_v46 = vpop.f32.mrb[162].mxu0 }
 0x68f   :  { %v3208_v30 = vpack.c.bf16 %v3168_v46, %v3165_v51  ;;  %v3170_v10 = vpop.f32.mrb[163].mxu0  ;;  %v9601_v51 = vpack.c.bf16 %v9599_v61, %v9600_v13 }
 0x690   :  { %v9602_v10 = vld [vmem:[#allocation75_spill] sm:$0xff] }
 0x691   :  { %3232 = vrot.lane.b32.xlu1 %v9581_v41, %s5522_s23  ;;  %3284 = vrot.lane.b32.xlu0 %v3208_v30, %s5524_s29  ;;  %v9604_v29 = vpack.c.bf16 %v9602_v10, %v9603_v58 }
 0x694   :  { %v3173_v0 = vpop.f32.mrb[164].mxu0 }
 0x695   :  { %3259 = vrot.lane.b32.xlu0 %v9583_v28, %s5523_s24  ;;  %v3175_v48 = vpop.f32.mrb[165].mxu0 }
 0x696   :  { %v3176_v32 = vpop.f32.mrb[166].mxu0 }
 0x697   :  { %v3209_v2 = vpack.c.bf16 %v3176_v32, %v3173_v0  ;;  %v3178_v22 = vpop.f32.mrb[167].mxu0 }
 0x698   :  { %v9605_v22 = vld [vmem:[#allocation83_spill] sm:$0xff] }
 0x699   :  { %3234 = vrot.lane.b32.xlu0 %v9586_v43, %s5522_s23  ;;  %3286 = vrot.lane.b32.xlu1 %v3209_v2, %s5524_s29  ;;  %v9607_v16 = vpack.c.bf16 %v9605_v22, %v9606_v40  ;;  %v5493_v40 = vld [vmem:[%s8987_s0 + $0x18] sm:$0xff] }
 0x69c   :  { %v3181_v44 = vpop.f32.mrb[168].mxu0 }
 0x69d   :  { %3261 = vrot.lane.b32.xlu1 %v2465_v54, %s5523_s24  ;;  %v3183_v1 = vpop.f32.mrb[169].mxu0  ;;  %v9592_v54 = vpack.c.bf16 %v9590_v6, %v9591_v63 }
 0x69e   :  { %v3184_v7 = vpop.f32.mrb[170].mxu0 }
 0x69f   :  { %v3210_v12 = vpack.c.bf16 %v3184_v7, %v3181_v44  ;;  %v3186_v33 = vpop.f32.mrb[171].mxu0 }
 0x6a1   :  { %3236 = vrot.lane.b32.xlu1 %v9589_v37, %s5522_s23  ;;  %3288 = vrot.lane.b32.xlu0 %v3210_v12, %s5524_s29  ;;  %v9610_v37 = vpack.c.bf16 %v9608_v59, %v9609_v20  ;;  %v5494_v59 = vld [vmem:[%s8987_s0 + $0x20] sm:$0xff] }
 0x6a5   :  { %3263 = vrot.lane.b32.xlu0 %v2466_v45, %s5523_s24 }
 0x6a9   :  { %v3189_v26 = vpop.f32.mrb[172].mxu0  ;;  %3238 = vrot.lane.b32.xlu0 %v9592_v54, %s5522_s23 }
 0x6aa   :  { %v3191_v17 = vpop.f32.mrb[173].mxu0 }
 0x6ab   :  { %v3192_v49 = vpop.f32.mrb[174].mxu0 }
 0x6ac   :  { %v3211_v38 = vpack.c.bf16 %v3192_v49, %v3189_v26  ;;  %v3194_v53 = vpop.f32.mrb[175].mxu0 }
 0x6ad   :  { %v9612_v53 = vld [vmem:[#allocation77_spill] sm:$0xff] }
 0x6ae   :  { %3290 = vrot.lane.b32.xlu1 %v3211_v38, %s5524_s29  ;;  %v9611_v38 = vld [vmem:[#allocation79_spill] sm:$0xff] }
 0x6b1   :  { %v3197_v62 = vpop.f32.mrb[176].mxu0 }
 0x6b2   :  { %3265 = vrot.lane.b32.xlu1 %v2467_v9, %s5523_s24  ;;  %v3199_v27 = vpop.f32.mrb[177].mxu0 }
 0x6b3   :  { %v3200_v60 = vpop.f32.mrb[178].mxu0 }
 0x6b4   :  { %v3212_v45 = vpack.c.bf16 %v3200_v60, %v3197_v62  ;;  %v3202_v36 = vpop.f32.mrb[179].mxu0  ;;  %v9613_v62 = vpack.c.bf16 %v9611_v38, %v9612_v53 }
 0x6b6   :  { %3292 = vrot.lane.b32.xlu0 %v3212_v45, %s5524_s29 }
 0x6e3   :  { %v3277_v55 = vpop.permute.xlu1 %3276 }
 0x6e4   :  { %v3342_v35 = vsel %vm3340_vm8, %v3323_v52, %v3277_v55 }
 0x6e5   :  { %4788 = vmatmul.mubr.msk.bf16.vlgmr.msra.gmra.mrb[180].mxu0 %vm95_vm1, %v3342_v35 }
 0x6e6   :  { %4791 = vmatprep.mubr.msk.bf16.mxu0 %vm5509_vm0, %v9568_v25 }
 0x6e7   :  { %v3252_v9 = vpop.permute.xlu1 %3251 }
 0x6e8   :  { %v3325_v5 = vsel %vm3321_vm7, %v3299_v42, %v3252_v9 }
 0x6eb   :  { %v3279_v3 = vpop.permute.xlu1 %3278 }
 0x6ec   :  { %v3344_v47 = vsel %vm3340_vm8, %v3325_v5, %v3279_v3 }
 0x6ed   :  { %4792 = vmatmul.mubr.msk.bf16.gmra.mrb[184].mxu0 %vm95_vm1, %v3344_v47 }
 0x6ee   :  { %4795 = vmatprep.mubr.msk.bf16.mxu0 %vm5509_vm0, %v9568_v25 }
 0x6ef   :  { %v3227_v4 = vpop.permute.xlu1 %3226 }
 0x6f0   :  { %v3302_v11 = vsel %vm264_vm2, %v9601_v51, %v3227_v4  ;;  %v8155_v4 = vld [vmem:[%s8990_s4] ss:$0 sm:$0xff] }
 0x6f3   :  { %v3254_v21 = vpop.permute.xlu1 %3253  ;;  %v3281_v23 = vpop.permute.xlu0 %3280 }
 0x6f4   :  { %v3327_v19 = vsel %vm3321_vm7, %v3302_v11, %v3254_v21  ;;  %v5490_v21 = vld [vmem:[%s8987_s0] sm:$0xff] }
 0x6f5   :  { %v3346_v46 = vsel %vm3340_vm8, %v3327_v19, %v3281_v23 }
 0x6f6   :  { %4796 = vmatmul.mubr.msk.bf16.gmra.mrb[188].mxu0 %vm95_vm1, %v3346_v46 }
 0x6f7   :  { %v3229_v30 = vpop.permute.xlu1 %3228  ;;  %4799 = vmatprep.mubr.msk.bf16.mxu0 %vm5509_vm0, %v9568_v25  ;;  %v3256_v0 = vpop.permute.xlu0 %3255 }
 0x6f8   :  { %v3305_v41 = vsel %vm264_vm2, %v9604_v29, %v3229_v30  ;;  %v5491_v30 = vld [vmem:[%s8987_s0 + $0x8] sm:$0xff] }
 0x6f9   :  { %v3329_v8 = vsel %vm3321_vm7, %v3305_v41, %v3256_v0 }
 0x6fb   :  { %v3283_v28 = vpop.permute.xlu1 %3282  ;;  %v3231_v32 = vpop.permute.xlu0 %3230 }
 0x6fc   :  { %v3348_v48 = vsel %vm3340_vm8, %v3329_v8, %v3283_v28  ;;  %v3308_v43 = vsel %vm264_vm2, %v9607_v16, %v3231_v32 }
 0x6fe   :  { %4800 = vmatmul.mubr.msk.bf16.gmra.mrb[192].mxu0 %vm95_vm1, %v3348_v48  ;;  %v5492_v48 = vld [vmem:[%s8987_s0 + $0x10] sm:$0xff] }
 0x6ff   :  { %4827 = vmatprep.mubr.msk.bf16.mxu0 %vm5509_vm0, %v9568_v25  ;;  %v3258_v2 = vpop.permute.xlu1 %3257 }
 0x700   :  { %v3331_v44 = vsel %vm3321_vm7, %v3308_v43, %v3258_v2 }
 0x703   :  { %v3285_v1 = vpop.permute.xlu0 %3284  ;;  %v3233_v12 = vpop.permute.xlu1 %3232 }
 0x704   :  { %v3350_v7 = vsel %vm3340_vm8, %v3331_v44, %v3285_v1  ;;  %v3311_v26 = vsel %vm264_vm2, %v9610_v37, %v3233_v12 }
 0x705   :  { %4804 = vmatmul.mubr.msk.bf16.vlgmr.msra.gmra.mrb[144].mxu1 %vm95_vm1, %v3350_v7 }
 0x706   :  { %4807 = vmatprep.mubr.msk.bf16.mxu1 %vm5509_vm0, %v9568_v25 }
 0x707   :  { %v3260_v33 = vpop.permute.xlu0 %3259 }
 0x708   :  { %v3333_v6 = vsel %vm3321_vm7, %v3311_v26, %v3260_v33 }
 0x70b   :  { %v3287_v63 = vpop.permute.xlu1 %3286  ;;  %v3235_v17 = vpop.permute.xlu0 %3234 }
 0x70c   :  { %v3352_v54 = vsel %vm3340_vm8, %v3333_v6, %v3287_v63  ;;  %v3314_v27 = vsel %vm264_vm2, %v9613_v62, %v3235_v17  ;;  %v5495_v6 = vld [vmem:[%s8987_s0 + $0x28] sm:$0xff] }
 0x70d   :  { %4808 = vmatmul.mubr.msk.bf16.gmra.mrb[148].mxu1 %vm95_vm1, %v3352_v54 }
 0x70e   :  { %4811 = vmatprep.mubr.msk.bf16.mxu1 %vm5509_vm0, %v9568_v25 }
 0x70f   :  { %v3262_v49 = vpop.permute.xlu1 %3261 }
 0x710   :  { %v3335_v60 = vsel %vm3321_vm7, %v3314_v27, %v3262_v49  ;;  %v5496_v27 = vld [vmem:[%s8987_s0 + $0x30] sm:$0xff] }
 0x713   :  { %v3289_v45 = vpop.permute.xlu0 %3288  ;;  %v3237_v56 = vpop.permute.xlu1 %3236 }
 0x714   :  { %v3354_v36 = vsel %vm3340_vm8, %v3335_v60, %v3289_v45  ;;  %v3317_v24 = vsel %vm264_vm2, %v9616_v14, %v3237_v56  ;;  %v5497_v56 = vld [vmem:[%s8987_s0 + $0x38] sm:$0xff] }
 0x715   :  { %4812 = vmatmul.mubr.msk.bf16.gmra.mrb[152].mxu1 %vm95_vm1, %v3354_v36 }
 0x716   :  { %4815 = vmatprep.mubr.msk.bf16.mxu1 %vm5509_vm0, %v9568_v25 }
 0x717   :  { %v3264_v57 = vpop.permute.xlu0 %3263 }
 0x718   :  { %v3337_v34 = vsel %vm3321_vm7, %v3317_v24, %v3264_v57 }
 0x71b   :  { %v3239_v35 = vpop.permute.xlu0 %3238 }
 0x71c   :  { %v3320_v42 = vsel %vm264_vm2, %v9619_v18, %v3239_v35 }
 0x720   :  { %v3291_v52 = vpop.permute.xlu1 %3290 }
 0x721   :  { %v3356_v55 = vsel %vm3340_vm8, %v3337_v34, %v3291_v52 }
 0x722   :  { %4816 = vmatmul.mubr.msk.bf16.gmra.mrb[156].mxu1 %vm95_vm1, %v3356_v55  ;;  %v5498_v55 = vld [vmem:[%s8987_s0 + $0x40] sm:$0xff] }
 0x723   :  { %4819 = vmatprep.mubr.msk.bf16.mxu1 %vm5509_vm0, %v9568_v25 }
 0x724   :  { %v3266_v9 = vpop.permute.xlu1 %3265 }
 0x725   :  { %v3339_v5 = vsel %vm3321_vm7, %v3320_v42, %v3266_v9 }
 0x728   :  { %v3293_v3 = vpop.permute.xlu0 %3292 }
 0x729   :  { %v3358_v47 = vsel %vm3340_vm8, %v3339_v5, %v3293_v3 }
 0x72a   :  { %4820 = vmatmul.mubr.msk.bf16.gmra.mrb[160].mxu1 %vm95_vm1, %v3358_v47 }
 0x72b   :  { %4879 = vmatprep.mubr.msk.bf16.mxu1 %vm5509_vm0, %v9568_v25 }
 0x7b8   :  { %v3434_v61 = vpop.f32.mrb[180].mxu0 }
 0x7b9   :  { %v3435_v13 = vadd.f32 %v8155_v4, %v3434_v61  ;;  %v4789_v51 = vpop.f32.mrb[181].mxu0 }
 0x7ba   :  { %v3437_v11 = vpop.f32.mrb[182].mxu0  ;;  %v5500_v51 = vld [vmem:[%s8987_s0 + $0x50] sm:$0xff] }
 0x7bb   :  { %v8161_v23 = vadd.f32 %v5490_v21, %v3435_v13  ;;  %v3438_v19 = vadd.f32 %v8155_v4, %v3437_v11  ;;  %v4790_v46 = vpop.f32.mrb[183].mxu0 }
 0x7bc   :  { %v5501_v46 = vld [vmem:[%s8987_s0 + $0x58] sm:$0xff] }
 0x7bd   :  { %v8167_v10 = vadd.f32 %v5491_v30, %v3438_v19  ;;  %v3525_v58 = vsel %vm95_vm1, %v8161_v23, 0.0 }
 0x7be   :  { %3526 = vadd.xlane.f32.xlu1 %v3525_v58 }
 0x7bf   :  { %v3528_v29 = vsel %vm95_vm1, %v8167_v10, 0.0 }
 0x7c0   :  { %3529 = vadd.xlane.f32.xlu0 %v3528_v29  ;;  %v3442_v41 = vpop.f32.mrb[184].mxu0 }
 0x7c1   :  { %v3443_v0 = vadd.f32 %v8155_v4, %v3442_v41  ;;  %v4793_v8 = vpop.f32.mrb[185].mxu0 }
 0x7c2   :  { %v3445_v28 = vpop.f32.mrb[186].mxu0 }
 0x7c3   :  { %v8177_v32 = vadd.f32 %v5492_v48, %v3443_v0  ;;  %v3446_v2 = vadd.f32 %v8155_v4, %v3445_v28  ;;  %v4794_v22 = vpop.f32.mrb[187].mxu0  ;;  %v5502_v48 = vld [vmem:[%s8987_s0 + $0x60] sm:$0xff] }
 0x7c5   :  { %v8183_v16 = vadd.f32 %v5493_v40, %v3446_v2  ;;  %v3531_v43 = vsel %vm95_vm1, %v8177_v32, 0.0 }
 0x7c6   :  { %3532 = vadd.xlane.f32.xlu0 %v3531_v43  ;;  %v5503_v43 = vld [vmem:[%s8987_s0 + $0x68] sm:$0xff] }
 0x7c7   :  { %v3534_v44 = vsel %vm95_vm1, %v8183_v16, 0.0 }
 0x7c8   :  { %3535 = vadd.xlane.f32.xlu1 %v3534_v44 }
 0x7c9   :  { %v3450_v1 = vpop.f32.mrb[188].mxu0 }
 0x7ca   :  { %v3451_v7 = vadd.f32 %v8155_v4, %v3450_v1  ;;  %v4797_v12 = vpop.f32.mrb[189].mxu0 }
 0x7cb   :  { %v3453_v33 = vpop.f32.mrb[190].mxu0 }
 0x7cc   :  { %v8193_v20 = vadd.f32 %v5494_v59, %v3451_v7  ;;  %v3454_v37 = vadd.f32 %v8155_v4, %v3453_v33  ;;  %v4798_v26 = vpop.f32.mrb[191].mxu0 }
 0x7cd   :  { %v5504_v26 = vld [vmem:[%s8987_s0 + $0x70] sm:$0xff] }
 0x7ce   :  { %v8199_v63 = vadd.f32 %v5495_v6, %v3454_v37  ;;  %v3537_v54 = vsel %vm95_vm1, %v8193_v20, 0.0 }
 0x7cf   :  { %3538 = vadd.xlane.f32.xlu0 %v3537_v54 }
 0x7d0   :  { %v3540_v17 = vsel %vm95_vm1, %v8199_v63, 0.0 }
 0x7d1   :  { %3541 = vadd.xlane.f32.xlu1 %v3540_v17  ;;  %v3458_v49 = vpop.f32.mrb[192].mxu0 }
 0x7d2   :  { %v3459_v38 = vadd.f32 %v8155_v4, %v3458_v49  ;;  %v4801_v53 = vpop.f32.mrb[193].mxu0  ;;  %v5505_v49 = vld [vmem:[%s8987_s0 + $0x78] sm:$0xff] }
 0x7d3   :  { %v3461_v62 = vpop.f32.mrb[194].mxu0 }
 0x7d4   :  { %v8209_v60 = vadd.f32 %v5496_v27, %v3459_v38  ;;  %v3462_v45 = vadd.f32 %v8155_v4, %v3461_v62  ;;  %v4802_v36 = vpop.f32.mrb[195].mxu0 }
 0x7d6   :  { %v8215_v57 = vadd.f32 %v5497_v56, %v3462_v45  ;;  %v3543_v31 = vsel %vm95_vm1, %v8209_v60, 0.0 }
 0x7d7   :  { %3544 = vadd.xlane.f32.xlu0 %v3543_v31  ;;  %v5506_v31 = vld [vmem:[%s8987_s0 + $0x80] sm:$0xff] }
 0x7d8   :  { %v3466_v39 = vpop.f32.mrb[144].mxu1  ;;  %v3546_v14 = vsel %vm95_vm1, %v8215_v57, 0.0 }
 0x7d9   :  { %v3467_v24 = vadd.f32 %v8155_v4, %v3466_v39  ;;  %v4805_v34 = vpop.f32.mrb[145].mxu1  ;;  %3547 = vadd.xlane.f32.xlu1 %v3546_v14 }
 0x7da   :  { %v3469_v52 = vpop.f32.mrb[146].mxu1  ;;  %v5507_v34 = vld [vmem:[%s8987_s0 + $0x88] sm:$0x3] }
 0x7db   :  { %v8225_v35 = vadd.f32 %v5498_v55, %v3467_v24  ;;  %v3470_v9 = vadd.f32 %v8155_v4, %v3469_v52  ;;  %v4806_v50 = vpop.f32.mrb[147].mxu1 }
 0x7dd   :  { %v8231_v18 = vadd.f32 %v5499_v15, %v3470_v9  ;;  %v3549_v42 = vsel %vm95_vm1, %v8225_v35, 0.0 }
 0x7de   :  { %3550 = vadd.xlane.f32.xlu0 %v3549_v42 }
 0x7df   :  { %v3552_v5 = vsel %vm95_vm1, %v8231_v18, 0.0 }
 0x7e0   :  { %v3474_v3 = vpop.f32.mrb[148].mxu1  ;;  %3553 = vadd.xlane.f32.xlu1 %v3552_v5 }
 0x7e1   :  { %v3475_v47 = vadd.f32 %v8155_v4, %v3474_v3  ;;  %v4809_v61 = vpop.f32.mrb[149].mxu1 }
 0x7e2   :  { %v3477_v13 = vpop.f32.mrb[150].mxu1 }
 0x7e3   :  { %v8241_v11 = vadd.f32 %v5500_v51, %v3475_v47  ;;  %v3478_v21 = vadd.f32 %v8155_v4, %v3477_v13  ;;  %v4810_v19 = vpop.f32.mrb[151].mxu1 }
 0x7e5   :  { %v8247_v30 = vadd.f32 %v5501_v46, %v3478_v21  ;;  %v3555_v58 = vsel %vm95_vm1, %v8241_v11, 0.0 }
 0x7e6   :  { %3556 = vadd.xlane.f32.xlu0 %v3555_v58 }
 0x7e7   :  { %v3558_v29 = vsel %vm95_vm1, %v8247_v30, 0.0 }
 0x7e8   :  { %v3482_v41 = vpop.f32.mrb[152].mxu1  ;;  %3559 = vadd.xlane.f32.xlu1 %v3558_v29 }
 0x7e9   :  { %v3483_v0 = vadd.f32 %v8155_v4, %v3482_v41  ;;  %v4813_v8 = vpop.f32.mrb[153].mxu1 }
 0x7ea   :  { %v3485_v28 = vpop.f32.mrb[154].mxu1 }
 0x7eb   :  { %v8257_v2 = vadd.f32 %v5502_v48, %v3483_v0  ;;  %v3486_v22 = vadd.f32 %v8155_v4, %v3485_v28  ;;  %v4814_v40 = vpop.f32.mrb[155].mxu1 }
 0x7ed   :  { %v8263_v44 = vadd.f32 %v5503_v43, %v3486_v22  ;;  %v3561_v1 = vsel %vm95_vm1, %v8257_v2, 0.0 }
 0x7ee   :  { %3562 = vadd.xlane.f32.xlu0 %v3561_v1 }
 0x7ef   :  { %v3564_v7 = vsel %vm95_vm1, %v8263_v44, 0.0 }
 0x7f0   :  { %3565 = vadd.xlane.f32.xlu1 %v3564_v7 }
 0x7f5   :  { %v3490_v12 = vpop.f32.mrb[156].mxu1 }
 0x7f6   :  { %v3491_v33 = vadd.f32 %v8155_v4, %v3490_v12  ;;  %v4817_v59 = vpop.f32.mrb[157].mxu1 }
 0x7f7   :  { %v3493_v37 = vpop.f32.mrb[158].mxu1 }
 0x7f8   :  { %v8273_v6 = vadd.f32 %v5504_v26, %v3491_v33  ;;  %v3494_v54 = vadd.f32 %v8155_v4, %v3493_v37  ;;  %v4818_v17 = vpop.f32.mrb[159].mxu1 }
 0x7fa   :  { %v8279_v38 = vadd.f32 %v5505_v49, %v3494_v54  ;;  %v3567_v53 = vsel %vm95_vm1, %v8273_v6, 0.0 }
 0x7fb   :  { %3568 = vadd.xlane.f32.xlu0 %v3567_v53 }
 0x7fc   :  { %v3570_v62 = vsel %vm95_vm1, %v8279_v38, 0.0 }
 0x7fd   :  { %v3498_v27 = vpop.f32.mrb[160].mxu1  ;;  %3571 = vadd.xlane.f32.xlu1 %v3570_v62 }
 0x7fe   :  { %v3499_v45 = vadd.f32 %v8155_v4, %v3498_v27  ;;  %v4821_v36 = vpop.f32.mrb[161].mxu1 }
 0x7ff   :  { %v3501_v56 = vpop.f32.mrb[162].mxu1 }
 0x800   :  { %v8289_v39 = vadd.f32 %v5506_v31, %v3499_v45  ;;  %v3502_v14 = vadd.f32 %v8155_v4, %v3501_v56  ;;  %v4822_v24 = vpop.f32.mrb[163].mxu1  ;;  %v4940_v4 = vld [vmem:[%s8991_s7] sm:$0xff]  }
 0x801   :  { %4824 = vmatpush3.bf16.msra.mxu0 %v4940_v4 }
 0x802   :  { %v8295_v52 = vadd.f32 %v5507_v34, %v3502_v14  ;;  %v3573_v55 = vsel %vm95_vm1, %v8289_v39, 0.0  ;;  %4825 = vmatprep.subr.bf16.mxu0 %v9568_v25 }
 0x803   :  { %3574 = vadd.xlane.f32.xlu0 %v3573_v55 }
 0x804   :  { %v3577_v9 = vsel %vm3576_vm9, %v8295_v52, 0.0 }
 0x805   :  { %3578 = vadd.xlane.f32.xlu1 %v3577_v9 }
 0x84b   :  { %v3527_v50 = vpop.xlane.xlu1 %3526 }
 0x84c   :  { %v3581_v15 = vmul.f32 0.03125, %v3527_v50 }
 0x84d   :  { %v3530_v42 = vpop.xlane.xlu0 %3529 }
 0x84e   :  { %v8306_v5 = vsub.f32 %v8161_v23, %v3581_v15  ;;  %v3582_v3 = vmul.f32 0.03125, %v3530_v42 }
 0x850   :  { %v8309_v47 = vsub.f32 %v8167_v10, %v3582_v3  ;;  %v3617_v61 = vmul.f32 %v8306_v5, %v8306_v5 }
 0x852   :  { %v3635_v13 = vsel %vm95_vm1, %v3617_v61, 0.0  ;;  %v3618_v51 = vmul.f32 %v8309_v47, %v8309_v47  ;;  %v4941_v61 = vld [vmem:[%s8991_s7 + $0x8] sm:$0xff]  }
 0x853   :  { %v3533_v21 = vpop.xlane.xlu0 %3532  ;;  %3636 = vadd.xlane.f32.xlu0 %v3635_v13  ;;  %4826 = vmatpush3.bf16.msra.mxu0 %v4941_v61 }
 0x854   :  { %v3583_v19 = vmul.f32 0.03125, %v3533_v21  ;;  %v3638_v46 = vsel %vm95_vm1, %v3618_v51, 0.0 }
 0x855   :  { %v3536_v58 = vpop.xlane.xlu1 %3535  ;;  %3639 = vadd.xlane.f32.xlu1 %v3638_v46 }
 0x856   :  { %v8318_v23 = vsub.f32 %v8177_v32, %v3583_v19  ;;  %v3584_v10 = vmul.f32 0.03125, %v3536_v58 }
 0x858   :  { %v8321_v29 = vsub.f32 %v8183_v16, %v3584_v10  ;;  %v3619_v41 = vmul.f32 %v8318_v23, %v8318_v23 }
 0x85a   :  { %v3641_v0 = vsel %vm95_vm1, %v3619_v41, 0.0  ;;  %v3620_v8 = vmul.f32 %v8321_v29, %v8321_v29 }
 0x85b   :  { %3642 = vadd.xlane.f32.xlu0 %v3641_v0 }
 0x85c   :  { %v3539_v28 = vpop.xlane.xlu0 %3538  ;;  %v3644_v48 = vsel %vm95_vm1, %v3620_v8, 0.0 }
 0x85d   :  { %v3585_v22 = vmul.f32 0.03125, %v3539_v28  ;;  %3645 = vadd.xlane.f32.xlu1 %v3644_v48 }
 0x85e   :  { %v3542_v32 = vpop.xlane.xlu1 %3541 }
 0x85f   :  { %v8330_v40 = vsub.f32 %v8193_v20, %v3585_v22  ;;  %v3586_v16 = vmul.f32 0.03125, %v3542_v32 }
 0x861   :  { %v8333_v43 = vsub.f32 %v8199_v63, %v3586_v16  ;;  %v3621_v1 = vmul.f32 %v8330_v40, %v8330_v40 }
 0x863   :  { %v3647_v7 = vsel %vm95_vm1, %v3621_v1, 0.0  ;;  %v3622_v12 = vmul.f32 %v8333_v43, %v8333_v43 }
 0x864   :  { %3648 = vadd.xlane.f32.xlu0 %v3647_v7  ;;  %v3545_v33 = vpop.xlane.xlu0 %3544 }
 0x865   :  { %v3587_v59 = vmul.f32 0.03125, %v3545_v33  ;;  %v3650_v37 = vsel %vm95_vm1, %v3622_v12, 0.0 }
 0x866   :  { %3651 = vadd.xlane.f32.xlu1 %v3650_v37  ;;  %v3548_v20 = vpop.xlane.xlu1 %3547 }
 0x867   :  { %v8342_v26 = vsub.f32 %v8209_v60, %v3587_v59  ;;  %v3588_v63 = vmul.f32 0.03125, %v3548_v20 }
 0x869   :  { %v8345_v54 = vsub.f32 %v8215_v57, %v3588_v63  ;;  %v3623_v17 = vmul.f32 %v8342_v26, %v8342_v26 }
 0x86b   :  { %v3551_v49 = vpop.xlane.xlu0 %3550  ;;  %v3653_v53 = vsel %vm95_vm1, %v3623_v17, 0.0  ;;  %v3624_v62 = vmul.f32 %v8345_v54, %v8345_v54 }
 0x86c   :  { %v3589_v27 = vmul.f32 0.03125, %v3551_v49  ;;  %3654 = vadd.xlane.f32.xlu0 %v3653_v53 }
 0x86d   :  { %v3554_v45 = vpop.xlane.xlu1 %3553  ;;  %v3656_v36 = vsel %vm95_vm1, %v3624_v62, 0.0 }
 0x86e   :  { %v8354_v60 = vsub.f32 %v8225_v35, %v3589_v27  ;;  %v3590_v56 = vmul.f32 0.03125, %v3554_v45  ;;  %3657 = vadd.xlane.f32.xlu1 %v3656_v36 }
 0x870   :  { %v8357_v57 = vsub.f32 %v8231_v18, %v3590_v56  ;;  %v3625_v31 = vmul.f32 %v8354_v60, %v8354_v60 }
 0x872   :  { %v3659_v14 = vsel %vm95_vm1, %v3625_v31, 0.0  ;;  %v3626_v24 = vmul.f32 %v8357_v57, %v8357_v57 }
 0x873   :  { %3660 = vadd.xlane.f32.xlu0 %v3659_v14  ;;  %v3557_v34 = vpop.xlane.xlu0 %3556 }
 0x874   :  { %v3591_v55 = vmul.f32 0.03125, %v3557_v34  ;;  %v3662_v9 = vsel %vm95_vm1, %v3626_v24, 0.0 }
 0x875   :  { %3663 = vadd.xlane.f32.xlu1 %v3662_v9  ;;  %v3560_v35 = vpop.xlane.xlu1 %3559 }
 0x876   :  { %v8366_v4 = vsub.f32 %v8241_v11, %v3591_v55  ;;  %v3592_v18 = vmul.f32 0.03125, %v3560_v35 }
 0x878   :  { %v8369_v50 = vsub.f32 %v8247_v30, %v3592_v18  ;;  %v3627_v15 = vmul.f32 %v8366_v4, %v8366_v4  ;;  %v8427_v18 = vld [vmem:[%s8993_s5] ss:$0 sm:$0xff] }
 0x87a   :  { %v3665_v42 = vsel %vm95_vm1, %v3627_v15, 0.0  ;;  %v3628_v3 = vmul.f32 %v8369_v50, %v8369_v50 }
 0x87b   :  { %3666 = vadd.xlane.f32.xlu0 %v3665_v42  ;;  %v3563_v13 = vpop.xlane.xlu0 %3562 }
 0x87c   :  { %v3593_v11 = vmul.f32 0.03125, %v3563_v13  ;;  %v3668_v51 = vsel %vm95_vm1, %v3628_v3, 0.0 }
 0x87d   :  { %3669 = vadd.xlane.f32.xlu1 %v3668_v51  ;;  %v3566_v30 = vpop.xlane.xlu1 %3565  ;;  %v8435_v51 = vld [vmem:[%s8994_s6] ss:$0 sm:$0xff] }
 0x87e   :  { %v8381_v21 = vsub.f32 %v8257_v2, %v3593_v11  ;;  %v3594_v19 = vmul.f32 0.03125, %v3566_v30 }
 0x880   :  { %v8384_v46 = vsub.f32 %v8263_v44, %v3594_v19  ;;  %v3629_v58 = vmul.f32 %v8381_v21, %v8381_v21 }
 0x882   :  { %v3671_v10 = vsel %vm95_vm1, %v3629_v58, 0.0  ;;  %v3630_v41 = vmul.f32 %v8384_v46, %v8384_v46 }
 0x883   :  { %3672 = vadd.xlane.f32.xlu0 %v3671_v10 }
 0x884   :  { %v3674_v0 = vsel %vm95_vm1, %v3630_v41, 0.0 }
 0x885   :  { %3675 = vadd.xlane.f32.xlu1 %v3674_v0 }
 0x888   :  { %v3569_v8 = vpop.xlane.xlu0 %3568 }
 0x889   :  { %v3595_v28 = vmul.f32 0.03125, %v3569_v8 }
 0x88a   :  { %v3572_v2 = vpop.xlane.xlu1 %3571 }
 0x88b   :  { %v8393_v48 = vsub.f32 %v8273_v6, %v3595_v28  ;;  %v3596_v44 = vmul.f32 0.03125, %v3572_v2 }
 0x88d   :  { %v8396_v22 = vsub.f32 %v8279_v38, %v3596_v44  ;;  %v3631_v32 = vmul.f32 %v8393_v48, %v8393_v48 }
 0x88f   :  { %v3677_v16 = vsel %vm95_vm1, %v3631_v32, 0.0  ;;  %v3632_v1 = vmul.f32 %v8396_v22, %v8396_v22 }
 0x890   :  { %3678 = vadd.xlane.f32.xlu0 %v3677_v16  ;;  %v3575_v7 = vpop.xlane.xlu0 %3574 }
 0x891   :  { %v3597_v12 = vmul.f32 0.03125, %v3575_v7  ;;  %v3680_v33 = vsel %vm95_vm1, %v3632_v1, 0.0 }
 0x892   :  { %3681 = vadd.xlane.f32.xlu1 %v3680_v33  ;;  %v3579_v6 = vpop.xlane.xlu1 %3578 }
 0x893   :  { %v8405_v59 = vsub.f32 %v8289_v39, %v3597_v12  ;;  %v3598_v38 = vmul.f32 0.03125, %v3579_v6  ;;  %v4942_v39 = vld [vmem:[%s8992_s9] sm:$0xff]  }
 0x894   :  { %4864 = vmatpush3.bf16.msra.mxu1 %v4942_v39 }
 0x895   :  { %v8408_v37 = vsub.f32 %v8295_v52, %v3598_v38  ;;  %v3633_v20 = vmul.f32 %v8405_v59, %v8405_v59  ;;  %v4943_v52 = vld [vmem:[%s8992_s9 + $0x8] sm:$0xff]   ;;  %4865 = vmatprep.subr.bf16.mxu1 %v9568_v25 }
 0x897   :  { %v3683_v63 = vsel %vm95_vm1, %v3633_v20, 0.0  ;;  %v3634_v17 = vmul.f32 %v8408_v37, %v8408_v37 }
 0x898   :  { %3684 = vadd.xlane.f32.xlu0 %v3683_v63  ;;  %4866 = vmatpush3.bf16.msra.mxu1 %v4943_v52 }
 0x899   :  { %v3686_v49 = vsel %vm3576_vm9, %v3634_v17, 0.0  ;;  %4867 = vmatprep.subr.bf16.mxu1 %v9568_v25 }
 0x89a   :  { %3687 = vadd.xlane.f32.xlu1 %v3686_v49 }
 0x8e0   :  { %v3637_v53 = vpop.xlane.xlu0 %3636 }
 0x8e1   :  { %v3689_v62 = vmul.f32 0.03125, %v3637_v53 }
 0x8e2   :  { %v3640_v27 = vpop.xlane.xlu1 %3639 }
 0x8e3   :  { %v3707_v45 = vadd.f32 1e-05, %v3689_v62  ;;  %v3690_v36 = vmul.f32 0.03125, %v3640_v27 }
 0x8e5   :  { %5382 = vrsqrt.f32 %v3707_v45  ;;  %v3708_v56 = vadd.f32 1e-05, %v3690_v36 }
 0x8e7   :  { %5384 = vrsqrt.f32 %v3708_v56 }
 0x8e8   :  { %v3643_v31 = vpop.xlane.xlu0 %3642 }
 0x8e9   :  { %v3691_v14 = vmul.f32 0.03125, %v3643_v31 }
 0x8ea   :  { %v3646_v24 = vpop.xlane.xlu1 %3645 }
 0x8eb   :  { %v3709_v34 = vadd.f32 1e-05, %v3691_v14  ;;  %v3692_v55 = vmul.f32 0.03125, %v3646_v24 }
 0x8ed   :  { %5386 = vrsqrt.f32 %v3709_v34  ;;  %v3710_v9 = vadd.f32 1e-05, %v3692_v55 }
 0x8ef   :  { %v5383_v35 = vpop.eup %5382  ;;  %5388 = vrsqrt.f32 %v3710_v9 }
 0x8f0   :  { %v3743_v15 = vmul.f32 %v5383_v35, %v8306_v5 }
 0x8f1   :  { %v5385_v42 = vpop.eup %5384  ;;  %v3649_v3 = vpop.xlane.xlu0 %3648 }
 0x8f2   :  { %v3767_v61 = vmul.f32 %v8427_v18, %v3743_v15  ;;  %v3744_v13 = vmul.f32 %v5385_v42, %v8309_v47  ;;  %v3693_v11 = vmul.f32 0.03125, %v3649_v3 }
 0x8f3   :  { %v3652_v30 = vpop.xlane.xlu1 %3651 }
 0x8f4   :  { %v3768_v19 = vmul.f32 %v8427_v18, %v3744_v13  ;;  %v3711_v58 = vadd.f32 1e-05, %v3693_v11  ;;  %v3694_v10 = vmul.f32 0.03125, %v3652_v30  ;;  %v8439_v41 = vadd.f32 %v8435_v51, %v3767_v61 }
 0x8f6   :  { %v8442_v5 = vadd.f32 %v8435_v51, %v3768_v19  ;;  %5390 = vrsqrt.f32 %v3711_v58  ;;  %v3712_v0 = vadd.f32 1e-05, %v3694_v10 }
 0x8f7   :  { %v5387_v47 = vpop.eup %5386 }
 0x8f8   :  { %v3745_v8 = vmul.f32 %v5387_v47, %v8318_v23  ;;  %5392 = vrsqrt.f32 %v3712_v0  ;;  %v3809_v28 = vpack.c.bf16 %v8442_v5, %v8439_v41 }
 0x8f9   :  { %v5389_v2 = vpop.eup %5388  ;;  %v3655_v44 = vpop.xlane.xlu0 %3654 }
 0x8fa   :  { %v3746_v32 = vmul.f32 %v5389_v2, %v8321_v29  ;;  %v3695_v16 = vmul.f32 0.03125, %v3655_v44  ;;  %4828 = vmatmul.mubr.msk.bf16.vlgmr.msra.gmra.mrb[196].mxu0 %vm95_vm1, %v3809_v28  ;;  %v3769_v1 = vmul.f32 %v8427_v18, %v3745_v8 }
 0x8fb   :  { %v3658_v7 = vpop.xlane.xlu1 %3657  ;;  %4831 = vmatprep.mubr.msk.bf16.mxu0 %vm5509_vm0, %v9568_v25 }
 0x8fc   :  { %v3713_v12 = vadd.f32 1e-05, %v3695_v16  ;;  %v3696_v33 = vmul.f32 0.03125, %v3658_v7  ;;  %v3770_v23 = vmul.f32 %v8427_v18, %v3746_v32  ;;  %v8454_v38 = vadd.f32 %v8435_v51, %v3769_v1 }
 0x8fe   :  { %5394 = vrsqrt.f32 %v3713_v12  ;;  %v3714_v6 = vadd.f32 1e-05, %v3696_v33  ;;  %v8457_v29 = vadd.f32 %v8435_v51, %v3770_v23 }
 0x900   :  { %v5391_v20 = vpop.eup %5390  ;;  %5396 = vrsqrt.f32 %v3714_v6  ;;  %v3661_v63 = vpop.xlane.xlu0 %3660  ;;  %v3810_v17 = vpack.c.bf16 %v8457_v29, %v8454_v38 }
 0x901   :  { %v3747_v49 = vmul.f32 %v5391_v20, %v8330_v40  ;;  %v3697_v39 = vmul.f32 0.03125, %v3661_v63 }
 0x902   :  { %v5393_v52 = vpop.eup %5392  ;;  %4832 = vmatmul.mubr.msk.bf16.gmra.mrb[200].mxu0 %vm95_vm1, %v3810_v17  ;;  %v3664_v53 = vpop.xlane.xlu1 %3663 }
 0x903   :  { %v3748_v62 = vmul.f32 %v5393_v52, %v8333_v43  ;;  %v3715_v27 = vadd.f32 1e-05, %v3697_v39  ;;  %v3698_v45 = vmul.f32 0.03125, %v3664_v53  ;;  %4835 = vmatprep.mubr.msk.bf16.mxu0 %vm5509_vm0, %v9568_v25  ;;  %v3771_v36 = vmul.f32 %v8427_v18, %v3747_v49 }
 0x905   :  { %5398 = vrsqrt.f32 %v3715_v27  ;;  %v3716_v56 = vadd.f32 1e-05, %v3698_v45  ;;  %v3772_v31 = vmul.f32 %v8427_v18, %v3748_v62  ;;  %v8469_v40 = vadd.f32 %v8435_v51, %v3771_v36 }
 0x907   :  { %5400 = vrsqrt.f32 %v3716_v56  ;;  %v8472_v14 = vadd.f32 %v8435_v51, %v3772_v31 }
 0x908   :  { %v5395_v24 = vpop.eup %5394  ;;  %v3667_v43 = vpop.xlane.xlu0 %3666 }
 0x909   :  { %v3749_v34 = vmul.f32 %v5395_v24, %v8342_v26  ;;  %v3699_v55 = vmul.f32 0.03125, %v3667_v43  ;;  %v3811_v9 = vpack.c.bf16 %v8472_v14, %v8469_v40 }
 0x90a   :  { %v5397_v35 = vpop.eup %5396  ;;  %v3670_v15 = vpop.xlane.xlu1 %3669 }
 0x90b   :  { %v3750_v42 = vmul.f32 %v5397_v35, %v8345_v54  ;;  %v3717_v3 = vadd.f32 1e-05, %v3699_v55  ;;  %v3700_v61 = vmul.f32 0.03125, %v3670_v15  ;;  %4836 = vmatmul.mubr.msk.bf16.gmra.mrb[204].mxu0 %vm95_vm1, %v3811_v9  ;;  %v3773_v13 = vmul.f32 %v8427_v18, %v3749_v34 }
 0x90c   :  { %4839 = vmatprep.mubr.msk.bf16.mxu0 %vm5509_vm0, %v9568_v25 }
 0x90d   :  { %5402 = vrsqrt.f32 %v3717_v3  ;;  %v3718_v11 = vadd.f32 1e-05, %v3700_v61  ;;  %v3774_v26 = vmul.f32 %v8427_v18, %v3750_v42  ;;  %v8484_v19 = vadd.f32 %v8435_v51, %v3773_v13 }
 0x90f   :  { %v5399_v30 = vpop.eup %5398  ;;  %5404 = vrsqrt.f32 %v3718_v11  ;;  %v8487_v54 = vadd.f32 %v8435_v51, %v3774_v26 }
 0x910   :  { %v3751_v58 = vmul.f32 %v5399_v30, %v8354_v60  ;;  %v3673_v10 = vpop.xlane.xlu0 %3672 }
 0x911   :  { %v5401_v0 = vpop.eup %5400  ;;  %v3701_v47 = vmul.f32 0.03125, %v3673_v10  ;;  %v3812_v8 = vpack.c.bf16 %v8487_v54, %v8484_v19 }
 0x912   :  { %v3752_v28 = vmul.f32 %v5401_v0, %v8357_v57  ;;  %v3676_v2 = vpop.xlane.xlu1 %3675  ;;  %v3775_v44 = vmul.f32 %v8427_v18, %v3751_v58 }
 0x913   :  { %v3719_v32 = vadd.f32 1e-05, %v3701_v47  ;;  %v3702_v16 = vmul.f32 0.03125, %v3676_v2  ;;  %4840 = vmatmul.mubr.msk.bf16.gmra.mrb[208].mxu0 %vm95_vm1, %v3812_v8 }
 0x914   :  { %4843 = vmatprep.mubr.msk.bf16.mxu0 %vm5509_vm0, %v9568_v25  ;;  %v3776_v60 = vmul.f32 %v8427_v18, %v3752_v28  ;;  %v8499_v7 = vadd.f32 %v8435_v51, %v3775_v44 }
 0x915   :  { %5406 = vrsqrt.f32 %v3719_v32  ;;  %v3720_v1 = vadd.f32 1e-05, %v3702_v16 }
 0x916   :  { %v8502_v12 = vadd.f32 %v8435_v51, %v3776_v60 }
 0x917   :  { %v5403_v57 = vpop.eup %5402  ;;  %5408 = vrsqrt.f32 %v3720_v1  ;;  %v4947_v1 = vld [vmem:[%s8992_s9 + $0x28] sm:$0xff]  }
 0x918   :  { %v3753_v33 = vmul.f32 %v5403_v57, %v8366_v4  ;;  %v3813_v23 = vpack.c.bf16 %v8502_v12, %v8499_v7  ;;  %v4948_v57 = vld [vmem:[%s8992_s9 + $0x30] sm:$0xff]  }
 0x919   :  { %v5405_v6 = vpop.eup %5404 }
 0x91a   :  { %v3754_v20 = vmul.f32 %v5405_v6, %v8369_v50  ;;  %v3777_v63 = vmul.f32 %v8427_v18, %v3753_v33  ;;  %v4949_v33 = vld [vmem:[%s8992_s9 + $0x38] sm:$0xff]  }
 0x91b   :  { %4844 = vmatmul.mubr.msk.bf16.gmra.mrb[212].mxu0 %vm95_vm1, %v3813_v23  ;;  %v8593_v23 = vld [vmem:[%s8995_s8] ss:$0 sm:$0xff] }
 0x91c   :  { %4847 = vmatprep.mubr.msk.bf16.mxu0 %vm5509_vm0, %v9568_v25  ;;  %v3778_v49 = vmul.f32 %v8427_v18, %v3754_v20  ;;  %v8514_v4 = vadd.f32 %v8435_v51, %v3777_v63 }
 0x91d   :  { %v3679_v17 = vpop.xlane.xlu0 %3678 }
 0x91e   :  { %v3703_v39 = vmul.f32 0.03125, %v3679_v17  ;;  %v8517_v53 = vadd.f32 %v8435_v51, %v3778_v49 }
 0x91f   :  { %v3682_v52 = vpop.xlane.xlu1 %3681  ;;  %v5407_v62 = vpop.eup %5406 }
 0x920   :  { %v3721_v50 = vadd.f32 1e-05, %v3703_v39  ;;  %v3704_v27 = vmul.f32 0.03125, %v3682_v52  ;;  %v3755_v45 = vmul.f32 %v5407_v62, %v8381_v21  ;;  %v3814_v36 = vpack.c.bf16 %v8517_v53, %v8514_v4 }
 0x921   :  { %v5409_v56 = vpop.eup %5408 }
 0x922   :  { %5410 = vrsqrt.f32 %v3721_v50  ;;  %v3722_v31 = vadd.f32 1e-05, %v3704_v27  ;;  %v3756_v24 = vmul.f32 %v5409_v56, %v8384_v46  ;;  %v3779_v43 = vmul.f32 %v8427_v18, %v3755_v45 }
 0x923   :  { %4848 = vmatmul.mubr.msk.bf16.gmra.mrb[216].mxu0 %vm95_vm1, %v3814_v36 }
 0x924   :  { %5412 = vrsqrt.f32 %v3722_v31  ;;  %4851 = vmatprep.mubr.msk.bf16.mxu0 %vm5509_vm0, %v9568_v25  ;;  %v3780_v55 = vmul.f32 %v8427_v18, %v3756_v24  ;;  %v8529_v35 = vadd.f32 %v8435_v51, %v3779_v43 }
 0x925   :  { %v3685_v34 = vpop.xlane.xlu0 %3684 }
 0x926   :  { %v3705_v21 = vmul.f32 0.03125, %v3685_v34  ;;  %v8532_v15 = vadd.f32 %v8435_v51, %v3780_v55 }
 0x927   :  { %v3688_v9 = vpop.xlane.xlu1 %3687 }
 0x928   :  { %v3723_v46 = vadd.f32 1e-05, %v3705_v21  ;;  %v3706_v42 = vmul.f32 0.03125, %v3688_v9  ;;  %v3815_v3 = vpack.c.bf16 %v8532_v15, %v8529_v35 }
 0x92a   :  { %5414 = vrsqrt.f32 %v3723_v46  ;;  %v3724_v61 = vadd.f32 1e-05, %v3706_v42 }
 0x92b   :  { %4852 = vmatmul.mubr.msk.bf16.gmra.mrb[220].mxu0 %vm95_vm1, %v3815_v3 }
 0x92c   :  { %v5411_v13 = vpop.eup %5410  ;;  %5416 = vrsqrt.f32 %v3724_v61  ;;  %4855 = vmatprep.mubr.msk.bf16.mxu0 %vm5509_vm0, %v9568_v25 }
 0x92d   :  { %v3757_v11 = vmul.f32 %v5411_v13, %v8393_v48 }
 0x92e   :  { %v5413_v26 = vpop.eup %5412 }
 0x92f   :  { %v3758_v30 = vmul.f32 %v5413_v26, %v8396_v22  ;;  %v3781_v58 = vmul.f32 %v8427_v18, %v3757_v11 }
 0x931   :  { %v3782_v10 = vmul.f32 %v8427_v18, %v3758_v30  ;;  %v8544_v0 = vadd.f32 %v8435_v51, %v3781_v58 }
 0x933   :  { %v8547_v47 = vadd.f32 %v8435_v51, %v3782_v10 }
 0x934   :  { %v5415_v8 = vpop.eup %5414 }
 0x935   :  { %v3759_v28 = vmul.f32 %v5415_v8, %v8405_v59  ;;  %v3816_v48 = vpack.c.bf16 %v8547_v47, %v8544_v0 }
 0x936   :  { %v5417_v2 = vpop.eup %5416 }
 0x937   :  { %v3760_v44 = vmul.f32 %v5417_v2, %v8408_v37  ;;  %4856 = vmatmul.mubr.msk.bf16.gmra.mrb[224].mxu0 %vm95_vm1, %v3816_v48  ;;  %v3783_v22 = vmul.f32 %v8427_v18, %v3759_v28  ;;  %v4944_v37 = vld [vmem:[%s8992_s9 + $0x10] sm:$0xff]  }
 0x938   :  { %4859 = vmatprep.mubr.msk.bf16.mxu0 %vm5509_vm0, %v9568_v25  ;;  %4868 = vmatpush3.bf16.msra.mxu1 %v4944_v37 }
 0x939   :  { %v3784_v32 = vmul.f32 %v8427_v18, %v3760_v44  ;;  %v8559_v16 = vadd.f32 %v8435_v51, %v3783_v22  ;;  %4869 = vmatprep.subr.bf16.mxu1 %v9568_v25  ;;  %v4945_v18 = vld [vmem:[%s8992_s9 + $0x18] sm:$0xff]  }
 0x93b   :  { %v8562_v59 = vadd.f32 %v8435_v51, %v3784_v32  ;;  %v4946_v51 = vld [vmem:[%s8992_s9 + $0x20] sm:$0xff]  }
 0x93c   :  { %4870 = vmatpush3.bf16.msra.mxu1 %v4945_v18 }
 0x93d   :  { %v3817_v60 = vpack.c.bf16 %v8562_v59, %v8559_v16  ;;  %4871 = vmatprep.subr.bf16.mxu1 %v9568_v25 }
 0x93f   :  { %4860 = vmatmul.mubr.msk.bf16.gmra.mrb[228].mxu0 %vm95_vm1, %v3817_v60 }
 0x940   :  { %4872 = vmatpush3.bf16.msra.mxu1 %v4946_v51 }
 0x941   :  { %4873 = vmatprep.subr.bf16.mxu1 %v9568_v25 }
 0x944   :  { %4874 = vmatpush3.bf16.msra.mxu1 %v4947_v1 }
 0x945   :  { %4875 = vmatprep.subr.bf16.mxu1 %v9568_v25 }
 0x948   :  { %4876 = vmatpush3.bf16.msra.mxu1 %v4948_v57 }
 0x949   :  { %4877 = vmatprep.subr.bf16.mxu1 %v9568_v25 }
 0x94c   :  { %4878 = vmatpush3.bf16.msra.mxu1 %v4949_v33 }
 0x9cd   :  { %v3902_v6 = vpop.f32.mrb[196].mxu0 }
 0x9ce   :  { %v3903_v20 = vadd.f32 %v8593_v23, %v3902_v6  ;;  %v4829_v63 = vpop.f32.mrb[197].mxu0 }
 0x9cf   :  { %v3905_v17 = vpop.f32.mrb[198].mxu0 }
 0x9d0   :  { %v3991_v49 = vmul.f32 0.70710677, %v3903_v20  ;;  %v3906_v39 = vadd.f32 %v8593_v23, %v3905_v17  ;;  %v4830_v52 = vpop.f32.mrb[199].mxu0  ;;  %v3973_v46 = vmul.f32 0.5, %v3903_v20 }
 0x9d2   :  { %5418 = verf.f32 %v3991_v49  ;;  %v3992_v62 = vmul.f32 0.70710677, %v3906_v39  ;;  %v3974_v42 = vmul.f32 0.5, %v3906_v39 }
 0x9d4   :  { %5420 = verf.f32 %v3992_v62 }
 0x9d5   :  { %v3910_v50 = vpop.f32.mrb[200].mxu0 }
 0x9d6   :  { %v3911_v27 = vadd.f32 %v8593_v23, %v3910_v50  ;;  %v4833_v45 = vpop.f32.mrb[201].mxu0 }
 0x9d7   :  { %v3913_v36 = vpop.f32.mrb[202].mxu0 }
 0x9d8   :  { %v3993_v56 = vmul.f32 0.70710677, %v3911_v27  ;;  %v3914_v31 = vadd.f32 %v8593_v23, %v3913_v36  ;;  %v4834_v24 = vpop.f32.mrb[203].mxu0  ;;  %v3975_v60 = vmul.f32 0.5, %v3911_v27 }
 0x9da   :  { %5422 = verf.f32 %v3993_v56  ;;  %v3994_v43 = vmul.f32 0.70710677, %v3914_v31  ;;  %v3976_v37 = vmul.f32 0.5, %v3914_v31 }
 0x9dc   :  { %v5419_v34 = vpop.eup %5418  ;;  %5424 = verf.f32 %v3994_v43 }
 0x9dd   :  { %v4027_v55 = vadd.f32 1.0, %v5419_v34 }
 0x9de   :  { %v5421_v21 = vpop.eup %5420  ;;  %v3918_v9 = vpop.f32.mrb[204].mxu0 }
 0x9df   :  { %v4028_v3 = vadd.f32 1.0, %v5421_v21  ;;  %v3919_v61 = vadd.f32 %v8593_v23, %v3918_v9  ;;  %v4837_v13 = vpop.f32.mrb[205].mxu0  ;;  %v4045_v26 = vmul.f32 %v4027_v55, %v3973_v46 }
 0x9e0   :  { %v3921_v11 = vpop.f32.mrb[206].mxu0 }
 0x9e1   :  { %v4046_v30 = vmul.f32 %v4028_v3, %v3974_v42  ;;  %v3995_v58 = vmul.f32 0.70710677, %v3919_v61  ;;  %v3922_v10 = vadd.f32 %v8593_v23, %v3921_v11  ;;  %v4838_v8 = vpop.f32.mrb[207].mxu0  ;;  %v3977_v56 = vmul.f32 0.5, %v3919_v61 }
 0x9e3   :  { %v4063_v28 = vpack.c.bf16 %v4046_v30, %v4045_v26  ;;  %5426 = verf.f32 %v3995_v58  ;;  %v3996_v48 = vmul.f32 0.70710677, %v3922_v10  ;;  %v3978_v31 = vmul.f32 0.5, %v3922_v10 }
 0x9e4   :  { %v5423_v2 = vpop.eup %5422 }
 0x9e5   :  { %v4029_v44 = vadd.f32 1.0, %v5423_v2  ;;  %5428 = verf.f32 %v3996_v48  ;;  %4880 = vmatmul.mubr.bf16.vlgmr.msra.gmra.mrb[164].mxu1 %v4063_v28 }
 0x9e6   :  { %v5425_v22 = vpop.eup %5424  ;;  %v3926_v32 = vpop.f32.mrb[208].mxu0  ;;  %4883 = vmatprep.mubr.msk.bf16.mxu1 %vm5509_vm0, %v9568_v25 }
 0x9e7   :  { %v4030_v18 = vadd.f32 1.0, %v5425_v22  ;;  %v3927_v51 = vadd.f32 %v8593_v23, %v3926_v32  ;;  %v4841_v1 = vpop.f32.mrb[209].mxu0  ;;  %v4047_v33 = vmul.f32 %v4029_v44, %v3975_v60 }
 0x9e8   :  { %v3929_v57 = vpop.f32.mrb[210].mxu0 }
 0x9e9   :  { %v4048_v6 = vmul.f32 %v4030_v18, %v3976_v37  ;;  %v3997_v20 = vmul.f32 0.70710677, %v3927_v51  ;;  %v3930_v63 = vadd.f32 %v8593_v23, %v3929_v57  ;;  %v4842_v17 = vpop.f32.mrb[211].mxu0  ;;  %v3979_v10 = vmul.f32 0.5, %v3927_v51 }
 0x9eb   :  { %5430 = verf.f32 %v3997_v20  ;;  %v3998_v49 = vmul.f32 0.70710677, %v3930_v63  ;;  %v4064_v39 = vpack.c.bf16 %v4048_v6, %v4047_v33  ;;  %v3980_v8 = vmul.f32 0.5, %v3930_v63 }
 0x9ed   :  { %v5427_v52 = vpop.eup %5426  ;;  %5432 = verf.f32 %v3998_v49  ;;  %4884 = vmatmul.mubr.bf16.gmra.mrb[168].mxu1 %v4064_v39 }
 0x9ee   :  { %v4031_v62 = vadd.f32 1.0, %v5427_v52  ;;  %v3934_v50 = vpop.f32.mrb[212].mxu0  ;;  %4887 = vmatprep.mubr.msk.bf16.mxu1 %vm5509_vm0, %v9568_v25 }
 0x9ef   :  { %v5429_v27 = vpop.eup %5428  ;;  %v3935_v45 = vadd.f32 %v8593_v23, %v3934_v50  ;;  %v4845_v36 = vpop.f32.mrb[213].mxu0 }
 0x9f0   :  { %v4032_v24 = vadd.f32 1.0, %v5429_v27  ;;  %v3937_v43 = vpop.f32.mrb[214].mxu0  ;;  %v4049_v9 = vmul.f32 %v4031_v62, %v3977_v56 }
 0x9f1   :  { %v3999_v34 = vmul.f32 0.70710677, %v3935_v45  ;;  %v3938_v55 = vadd.f32 %v8593_v23, %v3937_v43  ;;  %v4846_v21 = vpop.f32.mrb[215].mxu0  ;;  %v3981_v63 = vmul.f32 0.5, %v3935_v45 }
 0x9f2   :  { %v4050_v46 = vmul.f32 %v4032_v24, %v3978_v31 }
 0x9f3   :  { %5434 = verf.f32 %v3999_v34  ;;  %v4000_v42 = vmul.f32 0.70710677, %v3938_v55  ;;  %v3982_v17 = vmul.f32 0.5, %v3938_v55 }
 0x9f4   :  { %v4065_v3 = vpack.c.bf16 %v4050_v46, %v4049_v9 }
 0x9f5   :  { %v5431_v13 = vpop.eup %5430  ;;  %5436 = verf.f32 %v4000_v42 }
 0x9f6   :  { %v4033_v11 = vadd.f32 1.0, %v5431_v13  ;;  %v3942_v26 = vpop.f32.mrb[216].mxu0  ;;  %4888 = vmatmul.mubr.bf16.gmra.mrb[172].mxu1 %v4065_v3 }
 0x9f7   :  { %v5433_v30 = vpop.eup %5432  ;;  %v3943_v61 = vadd.f32 %v8593_v23, %v3942_v26  ;;  %v4849_v58 = vpop.f32.mrb[217].mxu0  ;;  %4891 = vmatprep.mubr.msk.bf16.mxu1 %vm5509_vm0, %v9568_v25 }
 0x9f8   :  { %v4034_v28 = vadd.f32 1.0, %v5433_v30  ;;  %v3945_v48 = vpop.f32.mrb[218].mxu0  ;;  %v4051_v32 = vmul.f32 %v4033_v11, %v3979_v10 }
 0x9f9   :  { %v4001_v2 = vmul.f32 0.70710677, %v3943_v61  ;;  %v3946_v44 = vadd.f32 %v8593_v23, %v3945_v48  ;;  %v4850_v22 = vpop.f32.mrb[219].mxu0  ;;  %v3983_v45 = vmul.f32 0.5, %v3943_v61 }
 0x9fa   :  { %v4052_v60 = vmul.f32 %v4034_v28, %v3980_v8 }
 0x9fb   :  { %5438 = verf.f32 %v4001_v2  ;;  %v4002_v37 = vmul.f32 0.70710677, %v3946_v44  ;;  %v3984_v55 = vmul.f32 0.5, %v3946_v44 }
 0x9fc   :  { %v4066_v18 = vpack.c.bf16 %v4052_v60, %v4051_v32 }
 0x9fd   :  { %v5435_v1 = vpop.eup %5434  ;;  %5440 = verf.f32 %v4002_v37 }
 0x9fe   :  { %v4035_v57 = vadd.f32 1.0, %v5435_v1  ;;  %v3950_v33 = vpop.f32.mrb[220].mxu0  ;;  %4892 = vmatmul.mubr.bf16.gmra.mrb[176].mxu1 %v4066_v18 }
 0x9ff   :  { %v5437_v6 = vpop.eup %5436  ;;  %v3951_v51 = vadd.f32 %v8593_v23, %v3950_v33  ;;  %v4853_v20 = vpop.f32.mrb[221].mxu0  ;;  %4895 = vmatprep.mubr.msk.bf16.mxu1 %vm5509_vm0, %v9568_v25 }
 0xa00   :  { %v4036_v49 = vadd.f32 1.0, %v5437_v6  ;;  %v3953_v39 = vpop.f32.mrb[222].mxu0  ;;  %v4053_v27 = vmul.f32 %v4035_v57, %v3981_v63 }
 0xa01   :  { %v4003_v52 = vmul.f32 0.70710677, %v3951_v51  ;;  %v3954_v62 = vadd.f32 %v8593_v23, %v3953_v39  ;;  %v4854_v50 = vpop.f32.mrb[223].mxu0  ;;  %v3985_v2 = vmul.f32 0.5, %v3951_v51 }
 0xa02   :  { %v4054_v36 = vmul.f32 %v4036_v49, %v3982_v17 }
 0xa03   :  { %5442 = verf.f32 %v4003_v52  ;;  %v4004_v56 = vmul.f32 0.70710677, %v3954_v62  ;;  %v3986_v44 = vmul.f32 0.5, %v3954_v62 }
 0xa04   :  { %v4067_v31 = vpack.c.bf16 %v4054_v36, %v4053_v27 }
 0xa05   :  { %v5439_v24 = vpop.eup %5438  ;;  %5444 = verf.f32 %v4004_v56 }
 0xa06   :  { %v4037_v43 = vadd.f32 1.0, %v5439_v24  ;;  %4896 = vmatmul.mubr.bf16.gmra.mrb[180].mxu1 %v4067_v31 }
 0xa07   :  { %v5441_v34 = vpop.eup %5440  ;;  %4899 = vmatprep.mubr.msk.bf16.mxu1 %vm5509_vm0, %v9568_v25 }
 0xa08   :  { %v4038_v21 = vadd.f32 1.0, %v5441_v34  ;;  %v4055_v46 = vmul.f32 %v4037_v43, %v3983_v45 }
 0xa0a   :  { %v3958_v9 = vpop.f32.mrb[224].mxu0  ;;  %v4056_v42 = vmul.f32 %v4038_v21, %v3984_v55 }
 0xa0b   :  { %v3959_v3 = vadd.f32 %v8593_v23, %v3958_v9  ;;  %v4857_v13 = vpop.f32.mrb[225].mxu0 }
 0xa0c   :  { %v3961_v11 = vpop.f32.mrb[226].mxu0  ;;  %v4068_v10 = vpack.c.bf16 %v4056_v42, %v4055_v46  ;;  %v8632_v46 = vld [vmem:[%s8996_s10] ss:$0 sm:$0xff] }
 0xa0d   :  { %v4005_v26 = vmul.f32 0.70710677, %v3959_v3  ;;  %v3962_v30 = vadd.f32 %v8593_v23, %v3961_v11  ;;  %v4858_v58 = vpop.f32.mrb[227].mxu0  ;;  %v5443_v8 = vpop.eup %5442  ;;  %v3987_v52 = vmul.f32 0.5, %v3959_v3 }
 0xa0e   :  { %v4039_v28 = vadd.f32 1.0, %v5443_v8  ;;  %4900 = vmatmul.mubr.bf16.gmra.mrb[184].mxu1 %v4068_v10 }
 0xa0f   :  { %5446 = verf.f32 %v4005_v26  ;;  %v4006_v48 = vmul.f32 0.70710677, %v3962_v30  ;;  %v5445_v61 = vpop.eup %5444  ;;  %4903 = vmatprep.mubr.msk.bf16.mxu1 %vm5509_vm0, %v9568_v25  ;;  %v3988_v62 = vmul.f32 0.5, %v3962_v30 }
 0xa10   :  { %v4040_v22 = vadd.f32 1.0, %v5445_v61  ;;  %v4057_v60 = vmul.f32 %v4039_v28, %v3985_v2 }
 0xa11   :  { %5448 = verf.f32 %v4006_v48 }
 0xa12   :  { %v3966_v32 = vpop.f32.mrb[228].mxu0  ;;  %v4058_v37 = vmul.f32 %v4040_v22, %v3986_v44 }
 0xa13   :  { %v3967_v18 = vadd.f32 %v8593_v23, %v3966_v32  ;;  %v4861_v1 = vpop.f32.mrb[229].mxu0 }
 0xa14   :  { %v3969_v57 = vpop.f32.mrb[230].mxu0  ;;  %v4069_v63 = vpack.c.bf16 %v4058_v37, %v4057_v60 }
 0xa15   :  { %v4007_v33 = vmul.f32 0.70710677, %v3967_v18  ;;  %v3970_v6 = vadd.f32 %v8593_v23, %v3969_v57  ;;  %v4862_v20 = vpop.f32.mrb[231].mxu0  ;;  %v3989_v43 = vmul.f32 0.5, %v3967_v18 }
 0xa16   :  { %4904 = vmatmul.mubr.bf16.gmra.mrb[188].mxu1 %v4069_v63 }
 0xa17   :  { %5450 = verf.f32 %v4007_v33  ;;  %v4008_v17 = vmul.f32 0.70710677, %v3970_v6  ;;  %4907 = vmatprep.mubr.msk.bf16.mxu1 %vm5509_vm0, %v9568_v25  ;;  %v3990_v34 = vmul.f32 0.5, %v3970_v6 }
 0xa19   :  { %v5447_v51 = vpop.eup %5446  ;;  %5452 = verf.f32 %v4008_v17 }
 0xa1a   :  { %v4041_v49 = vadd.f32 1.0, %v5447_v51 }
 0xa1b   :  { %v5449_v39 = vpop.eup %5448 }
 0xa1c   :  { %v4042_v50 = vadd.f32 1.0, %v5449_v39  ;;  %v4059_v27 = vmul.f32 %v4041_v49, %v3987_v52 }
 0xa1e   :  { %v4060_v36 = vmul.f32 %v4042_v50, %v3988_v62 }
 0xa20   :  { %v4070_v56 = vpack.c.bf16 %v4060_v36, %v4059_v27 }
 0xa21   :  { %v5451_v31 = vpop.eup %5450 }
 0xa22   :  { %v4043_v23 = vadd.f32 1.0, %v5451_v31  ;;  %4908 = vmatmul.mubr.bf16.gmra.mrb[192].mxu1 %v4070_v56 }
 0xa23   :  { %v5453_v24 = vpop.eup %5452  ;;  %4911 = vmatprep.mubr.msk.bf16.mxu1 %vm5509_vm0, %v9568_v25 }
 0xa24   :  { %v4044_v45 = vadd.f32 1.0, %v5453_v24  ;;  %v4061_v55 = vmul.f32 %v4043_v23, %v3989_v43 }
 0xa26   :  { %v4062_v21 = vmul.f32 %v4044_v45, %v3990_v34 }
 0xa28   :  { %v4071_v9 = vpack.c.bf16 %v4062_v21, %v4061_v55 }
 0xa2a   :  { %4912 = vmatmul.mubr.bf16.gmra.mrb[196].mxu1 %v4071_v9 }
 0xab8   :  { %v4177_v42 = vpop.f32.mrb[164].mxu1 }
 0xab9   :  { %v4178_v3 = vadd.f32 %v8632_v46, %v4177_v42  ;;  %v4881_v13 = vpop.f32.mrb[165].mxu1 }
 0xaba   :  { %v4180_v11 = vpop.f32.mrb[166].mxu1 }
 0xabb   :  { %v8636_v26 = vadd.f32 %v4178_v3, %v8439_v41  ;;  %v4181_v25 = vadd.f32 %v8632_v46, %v4180_v11  ;;  %v4882_v30 = vpop.f32.mrb[167].mxu1 }
 0xabd   :  { %v8640_v58 = vadd.f32 %v4181_v25, %v8442_v5  ;;  %v4268_v10 = vsel %vm95_vm1, %v8636_v26, 0.0 }
 0xabe   :  { %4269 = vadd.xlane.f32.xlu0 %v4268_v10 }
 0xabf   :  { %v4271_v8 = vsel %vm95_vm1, %v8640_v58, 0.0 }
 0xac0   :  { %4272 = vadd.xlane.f32.xlu1 %v4271_v8  ;;  %v4185_v28 = vpop.f32.mrb[168].mxu1 }
 0xac1   :  { %v4186_v48 = vadd.f32 %v8632_v46, %v4185_v28  ;;  %v4885_v61 = vpop.f32.mrb[169].mxu1 }
 0xac2   :  { %v4188_v41 = vpop.f32.mrb[170].mxu1 }
 0xac3   :  { %v8648_v2 = vadd.f32 %v4186_v48, %v8454_v38  ;;  %v4189_v44 = vadd.f32 %v8632_v46, %v4188_v41  ;;  %v4886_v5 = vpop.f32.mrb[171].mxu1 }
 0xac5   :  { %v8652_v22 = vadd.f32 %v4189_v44, %v8457_v29  ;;  %v4274_v32 = vsel %vm95_vm1, %v8648_v2, 0.0 }
 0xac6   :  { %4275 = vadd.xlane.f32.xlu0 %v4274_v32 }
 0xac7   :  { %v4277_v60 = vsel %vm95_vm1, %v8652_v22, 0.0 }
 0xac8   :  { %4278 = vadd.xlane.f32.xlu1 %v4277_v60 }
 0xac9   :  { %v4193_v37 = vpop.f32.mrb[172].mxu1 }
 0xaca   :  { %v4194_v18 = vadd.f32 %v8632_v46, %v4193_v37  ;;  %v4889_v1 = vpop.f32.mrb[173].mxu1 }
 0xacb   :  { %v4196_v38 = vpop.f32.mrb[174].mxu1 }
 0xacc   :  { %v8660_v57 = vadd.f32 %v4194_v18, %v8469_v40  ;;  %v4197_v33 = vadd.f32 %v8632_v46, %v4196_v38  ;;  %v4890_v29 = vpop.f32.mrb[175].mxu1 }
 0xace   :  { %v8664_v6 = vadd.f32 %v4197_v33, %v8472_v14  ;;  %v4280_v20 = vsel %vm95_vm1, %v8660_v57, 0.0 }
 0xacf   :  { %4281 = vadd.xlane.f32.xlu0 %v4280_v20 }
 0xad0   :  { %v4283_v63 = vsel %vm95_vm1, %v8664_v6, 0.0 }
 0xad1   :  { %4284 = vadd.xlane.f32.xlu1 %v4283_v63  ;;  %v4201_v17 = vpop.f32.mrb[176].mxu1 }
 0xad2   :  { %v4202_v51 = vadd.f32 %v8632_v46, %v4201_v17  ;;  %v4893_v49 = vpop.f32.mrb[177].mxu1 }
 0xad3   :  { %v4204_v40 = vpop.f32.mrb[178].mxu1 }
 0xad4   :  { %v8672_v39 = vadd.f32 %v4202_v51, %v8484_v19  ;;  %v4205_v52 = vadd.f32 %v8632_v46, %v4204_v40  ;;  %v4894_v14 = vpop.f32.mrb[179].mxu1 }
 0xad6   :  { %v8676_v62 = vadd.f32 %v4205_v52, %v8487_v54  ;;  %v4286_v50 = vsel %vm95_vm1, %v8672_v39, 0.0 }
 0xad7   :  { %4287 = vadd.xlane.f32.xlu0 %v4286_v50 }
 0xad8   :  { %v4289_v27 = vsel %vm95_vm1, %v8676_v62, 0.0 }
 0xad9   :  { %4290 = vadd.xlane.f32.xlu1 %v4289_v27  ;;  %v4209_v36 = vpop.f32.mrb[180].mxu1 }
 0xada   :  { %v4210_v56 = vadd.f32 %v8632_v46, %v4209_v36  ;;  %v4897_v31 = vpop.f32.mrb[181].mxu1 }
 0xadb   :  { %v4212_v19 = vpop.f32.mrb[182].mxu1 }
 0xadc   :  { %v8684_v23 = vadd.f32 %v4210_v56, %v8499_v7  ;;  %v4213_v24 = vadd.f32 %v8632_v46, %v4212_v19  ;;  %v4898_v54 = vpop.f32.mrb[183].mxu1 }
 0xade   :  { %v8688_v43 = vadd.f32 %v4213_v24, %v8502_v12  ;;  %v4292_v34 = vsel %vm95_vm1, %v8684_v23, 0.0 }
 0xadf   :  { %4293 = vadd.xlane.f32.xlu0 %v4292_v34 }
 0xae0   :  { %v4295_v45 = vsel %vm95_vm1, %v8688_v43, 0.0 }
 0xae1   :  { %4296 = vadd.xlane.f32.xlu1 %v4295_v45  ;;  %v4217_v55 = vpop.f32.mrb[184].mxu1 }
 0xae2   :  { %v4218_v21 = vadd.f32 %v8632_v46, %v4217_v55  ;;  %v4901_v9 = vpop.f32.mrb[185].mxu1 }
 0xae3   :  { %v4220_v7 = vpop.f32.mrb[186].mxu1 }
 0xae4   :  { %v8696_v42 = vadd.f32 %v4218_v21, %v8514_v4  ;;  %v4221_v3 = vadd.f32 %v8632_v46, %v4220_v7  ;;  %v4902_v12 = vpop.f32.mrb[187].mxu1 }
 0xae6   :  { %v8700_v13 = vadd.f32 %v4221_v3, %v8517_v53  ;;  %v4298_v11 = vsel %vm95_vm1, %v8696_v42, 0.0 }
 0xae7   :  { %4299 = vadd.xlane.f32.xlu0 %v4298_v11 }
 0xae8   :  { %v4301_v25 = vsel %vm95_vm1, %v8700_v13, 0.0 }
 0xae9   :  { %4302 = vadd.xlane.f32.xlu1 %v4301_v25  ;;  %v4225_v30 = vpop.f32.mrb[188].mxu1 }
 0xaea   :  { %v4226_v10 = vadd.f32 %v8632_v46, %v4225_v30  ;;  %v4905_v8 = vpop.f32.mrb[189].mxu1 }
 0xaeb   :  { %v4228_v4 = vpop.f32.mrb[190].mxu1 }
 0xaec   :  { %v8708_v28 = vadd.f32 %v4226_v10, %v8529_v35  ;;  %v4229_v48 = vadd.f32 %v8632_v46, %v4228_v4  ;;  %v4906_v53 = vpop.f32.mrb[191].mxu1 }
 0xaee   :  { %v8712_v61 = vadd.f32 %v4229_v48, %v8532_v15  ;;  %v4304_v41 = vsel %vm95_vm1, %v8708_v28, 0.0 }
 0xaef   :  { %4305 = vadd.xlane.f32.xlu0 %v4304_v41 }
 0xaf0   :  { %v4307_v44 = vsel %vm95_vm1, %v8712_v61, 0.0 }
 0xaf1   :  { %4308 = vadd.xlane.f32.xlu1 %v4307_v44 }
 0xaf5   :  { %v4233_v5 = vpop.f32.mrb[192].mxu1 }
 0xaf6   :  { %v4234_v32 = vadd.f32 %v8632_v46, %v4233_v5  ;;  %v4909_v60 = vpop.f32.mrb[193].mxu1 }
 0xaf7   :  { %v4236_v35 = vpop.f32.mrb[194].mxu1 }
 0xaf8   :  { %v8720_v37 = vadd.f32 %v4234_v32, %v8544_v0  ;;  %v4237_v18 = vadd.f32 %v8632_v46, %v4236_v35  ;;  %v4910_v15 = vpop.f32.mrb[195].mxu1 }
 0xafa   :  { %v8724_v1 = vadd.f32 %v4237_v18, %v8547_v47  ;;  %v4310_v38 = vsel %vm95_vm1, %v8720_v37, 0.0 }
 0xafb   :  { %4311 = vadd.xlane.f32.xlu0 %v4310_v38 }
 0xafc   :  { %v4313_v33 = vsel %vm95_vm1, %v8724_v1, 0.0 }
 0xafd   :  { %4314 = vadd.xlane.f32.xlu1 %v4313_v33  ;;  %v4241_v29 = vpop.f32.mrb[196].mxu1 }
 0xafe   :  { %v4242_v20 = vadd.f32 %v8632_v46, %v4241_v29  ;;  %v4913_v63 = vpop.f32.mrb[197].mxu1 }
 0xaff   :  { %v4244_v0 = vpop.f32.mrb[198].mxu1 }
 0xb00   :  { %v8732_v17 = vadd.f32 %v4242_v20, %v8559_v16  ;;  %v4245_v51 = vadd.f32 %v8632_v46, %v4244_v0  ;;  %v4914_v47 = vpop.f32.mrb[199].mxu1 }
 0xb02   :  { %v8736_v49 = vadd.f32 %v4245_v51, %v8562_v59  ;;  %v4316_v40 = vsel %vm95_vm1, %v8732_v17, 0.0 }
 0xb03   :  { %4317 = vadd.xlane.f32.xlu0 %v4316_v40 }
 0xb04   :  { %v4319_v52 = vsel %vm3576_vm9, %v8736_v49, 0.0 }
 0xb05   :  { %4320 = vadd.xlane.f32.xlu1 %v4319_v52 }
 0xb4b   :  { %v4270_v14 = vpop.xlane.xlu0 %4269 }
 0xb4c   :  { %v4322_v50 = vmul.f32 0.03125, %v4270_v14 }
 0xb4d   :  { %v4273_v27 = vpop.xlane.xlu1 %4272 }
 0xb4e   :  { %v8743_v16 = vsub.f32 %v8636_v26, %v4322_v50  ;;  %v4323_v36 = vmul.f32 0.03125, %v4273_v27 }
 0xb50   :  { %v8746_v46 = vsub.f32 %v8640_v58, %v4323_v36  ;;  %v4358_v59 = vmul.f32 %v8743_v16, %v8743_v16 }
 0xb52   :  { %v4376_v56 = vsel %vm95_vm1, %v4358_v59, 0.0  ;;  %v4359_v31 = vmul.f32 %v8746_v46, %v8746_v46 }
 0xb53   :  { %v4276_v19 = vpop.xlane.xlu0 %4275  ;;  %4377 = vadd.xlane.f32.xlu0 %v4376_v56 }
 0xb54   :  { %v4324_v24 = vmul.f32 0.03125, %v4276_v19  ;;  %v4379_v54 = vsel %vm95_vm1, %v4359_v31, 0.0 }
 0xb55   :  { %v4279_v34 = vpop.xlane.xlu1 %4278  ;;  %4380 = vadd.xlane.f32.xlu1 %v4379_v54 }
 0xb56   :  { %v8755_v26 = vsub.f32 %v8648_v2, %v4324_v24  ;;  %v4325_v58 = vmul.f32 0.03125, %v4279_v34 }
 0xb58   :  { %v8758_v45 = vsub.f32 %v8652_v22, %v4325_v58  ;;  %v4360_v55 = vmul.f32 %v8755_v26, %v8755_v26 }
 0xb5a   :  { %v4382_v21 = vsel %vm95_vm1, %v4360_v55, 0.0  ;;  %v4361_v9 = vmul.f32 %v8758_v45, %v8758_v45 }
 0xb5b   :  { %4383 = vadd.xlane.f32.xlu0 %v4382_v21 }
 0xb5c   :  { %v4282_v7 = vpop.xlane.xlu0 %4281  ;;  %v4385_v3 = vsel %vm95_vm1, %v4361_v9, 0.0 }
 0xb5d   :  { %v4326_v12 = vmul.f32 0.03125, %v4282_v7  ;;  %4386 = vadd.xlane.f32.xlu1 %v4385_v3 }
 0xb5e   :  { %v4285_v2 = vpop.xlane.xlu1 %4284 }
 0xb5f   :  { %v8767_v11 = vsub.f32 %v8660_v57, %v4326_v12  ;;  %v4327_v22 = vmul.f32 0.03125, %v4285_v2 }
 0xb61   :  { %v8770_v25 = vsub.f32 %v8664_v6, %v4327_v22  ;;  %v4362_v30 = vmul.f32 %v8767_v11, %v8767_v11 }
 0xb63   :  { %v4388_v10 = vsel %vm95_vm1, %v4362_v30, 0.0  ;;  %v4363_v8 = vmul.f32 %v8770_v25, %v8770_v25 }
 0xb64   :  { %v4288_v4 = vpop.xlane.xlu0 %4287  ;;  %4389 = vadd.xlane.f32.xlu0 %v4388_v10 }
 0xb65   :  { %v4328_v48 = vmul.f32 0.03125, %v4288_v4  ;;  %v4391_v53 = vsel %vm95_vm1, %v4363_v8, 0.0 }
 0xb66   :  { %v4291_v41 = vpop.xlane.xlu1 %4290  ;;  %4392 = vadd.xlane.f32.xlu1 %v4391_v53 }
 0xb67   :  { %v8779_v57 = vsub.f32 %v8672_v39, %v4328_v48  ;;  %v4329_v6 = vmul.f32 0.03125, %v4291_v41 }
 0xb69   :  { %v8782_v44 = vsub.f32 %v8676_v62, %v4329_v6  ;;  %v4364_v5 = vmul.f32 %v8779_v57, %v8779_v57 }
 0xb6b   :  { %v4394_v32 = vsel %vm95_vm1, %v4364_v5, 0.0  ;;  %v4365_v60 = vmul.f32 %v8782_v44, %v8782_v44 }
 0xb6c   :  { %v4294_v35 = vpop.xlane.xlu0 %4293  ;;  %4395 = vadd.xlane.f32.xlu0 %v4394_v32 }
 0xb6d   :  { %v4330_v18 = vmul.f32 0.03125, %v4294_v35  ;;  %v4397_v15 = vsel %vm95_vm1, %v4365_v60, 0.0 }
 0xb6e   :  { %v4297_v38 = vpop.xlane.xlu1 %4296  ;;  %4398 = vadd.xlane.f32.xlu1 %v4397_v15 }
 0xb6f   :  { %v8791_v39 = vsub.f32 %v8684_v23, %v4330_v18  ;;  %v4331_v62 = vmul.f32 0.03125, %v4297_v38 }
 0xb71   :  { %v8794_v33 = vsub.f32 %v8688_v43, %v4331_v62  ;;  %v4366_v29 = vmul.f32 %v8791_v39, %v8791_v39 }
 0xb73   :  { %v4400_v20 = vsel %vm95_vm1, %v4366_v29, 0.0  ;;  %v4367_v63 = vmul.f32 %v8794_v33, %v8794_v33 }
 0xb74   :  { %v4300_v0 = vpop.xlane.xlu0 %4299  ;;  %4401 = vadd.xlane.f32.xlu0 %v4400_v20 }
 0xb75   :  { %v4332_v51 = vmul.f32 0.03125, %v4300_v0  ;;  %v4403_v47 = vsel %vm95_vm1, %v4367_v63, 0.0  ;;  %v8853_v0 = vld [vmem:[%s8997_s11] ss:$0 sm:$0xff] }
 0xb76   :  { %v4303_v40 = vpop.xlane.xlu1 %4302  ;;  %4404 = vadd.xlane.f32.xlu1 %v4403_v47 }
 0xb77   :  { %v8803_v23 = vsub.f32 %v8696_v42, %v4332_v51  ;;  %v4333_v43 = vmul.f32 0.03125, %v4303_v40  ;;  %v8859_v40 = vld [vmem:[%s8998_s12] ss:$0 sm:$0xff] }
 0xb79   :  { %v8806_v52 = vsub.f32 %v8700_v13, %v4333_v43  ;;  %v4368_v14 = vmul.f32 %v8803_v23, %v8803_v23 }
 0xb7b   :  { %v4406_v50 = vsel %vm95_vm1, %v4368_v14, 0.0  ;;  %v4369_v27 = vmul.f32 %v8806_v52, %v8806_v52 }
 0xb7c   :  { %v4306_v36 = vpop.xlane.xlu0 %4305  ;;  %4407 = vadd.xlane.f32.xlu0 %v4406_v50 }
 0xb7d   :  { %v4334_v59 = vmul.f32 0.03125, %v4306_v36  ;;  %v4409_v56 = vsel %vm95_vm1, %v4369_v27, 0.0 }
 0xb7e   :  { %v4309_v31 = vpop.xlane.xlu1 %4308  ;;  %4410 = vadd.xlane.f32.xlu1 %v4409_v56 }
 0xb7f   :  { %v8815_v42 = vsub.f32 %v8708_v28, %v4334_v59  ;;  %v4335_v13 = vmul.f32 0.03125, %v4309_v31 }
 0xb81   :  { %v8818_v19 = vsub.f32 %v8712_v61, %v4335_v13  ;;  %v4370_v24 = vmul.f32 %v8815_v42, %v8815_v42 }
 0xb83   :  { %v4412_v54 = vsel %vm95_vm1, %v4370_v24, 0.0  ;;  %v4371_v34 = vmul.f32 %v8818_v19, %v8818_v19 }
 0xb84   :  { %4413 = vadd.xlane.f32.xlu0 %v4412_v54 }
 0xb85   :  { %v4415_v58 = vsel %vm95_vm1, %v4371_v34, 0.0 }
 0xb86   :  { %4416 = vadd.xlane.f32.xlu1 %v4415_v58 }
 0xb88   :  { %v4312_v55 = vpop.xlane.xlu0 %4311 }
 0xb89   :  { %v4336_v21 = vmul.f32 0.03125, %v4312_v55 }
 0xb8a   :  { %v4315_v28 = vpop.xlane.xlu1 %4314 }
 0xb8b   :  { %v8827_v9 = vsub.f32 %v8720_v37, %v4336_v21  ;;  %v4337_v61 = vmul.f32 0.03125, %v4315_v28 }
 0xb8d   :  { %v8830_v7 = vsub.f32 %v8724_v1, %v4337_v61  ;;  %v4372_v3 = vmul.f32 %v8827_v9, %v8827_v9 }
 0xb8f   :  { %v4418_v12 = vsel %vm95_vm1, %v4372_v3, 0.0  ;;  %v4373_v2 = vmul.f32 %v8830_v7, %v8830_v7 }
 0xb90   :  { %4419 = vadd.xlane.f32.xlu0 %v4418_v12  ;;  %v4318_v22 = vpop.xlane.xlu0 %4317 }
 0xb91   :  { %v4338_v30 = vmul.f32 0.03125, %v4318_v22  ;;  %v4421_v10 = vsel %vm95_vm1, %v4373_v2, 0.0 }
 0xb92   :  { %4422 = vadd.xlane.f32.xlu1 %v4421_v10  ;;  %v4321_v37 = vpop.xlane.xlu1 %4320 }
 0xb93   :  { %v8839_v8 = vsub.f32 %v8732_v17, %v4338_v30  ;;  %v4339_v1 = vmul.f32 0.03125, %v4321_v37 }
 0xb95   :  { %v8842_v4 = vsub.f32 %v8736_v49, %v4339_v1  ;;  %v4374_v48 = vmul.f32 %v8839_v8, %v8839_v8 }
 0xb97   :  { %v4424_v53 = vsel %vm95_vm1, %v4374_v48, 0.0  ;;  %v4375_v41 = vmul.f32 %v8842_v4, %v8842_v4 }
 0xb98   :  { %4425 = vadd.xlane.f32.xlu0 %v4424_v53 }
 0xb99   :  { %v4427_v6 = vsel %vm3576_vm9, %v4375_v41, 0.0 }
 0xb9a   :  { %4428 = vadd.xlane.f32.xlu1 %v4427_v6 }
 0xbe0   :  { %v4378_v5 = vpop.xlane.xlu0 %4377 }
 0xbe1   :  { %v4430_v32 = vmul.f32 0.03125, %v4378_v5 }
 0xbe2   :  { %v4381_v17 = vpop.xlane.xlu1 %4380 }
 0xbe3   :  { %v4448_v60 = vadd.f32 1e-05, %v4430_v32  ;;  %v4431_v35 = vmul.f32 0.03125, %v4381_v17 }
 0xbe5   :  { %5454 = vrsqrt.f32 %v4448_v60  ;;  %v4449_v49 = vadd.f32 1e-05, %v4431_v35 }
 0xbe7   :  { %5456 = vrsqrt.f32 %v4449_v49 }
 0xbe8   :  { %v4384_v18 = vpop.xlane.xlu0 %4383 }
 0xbe9   :  { %v4432_v15 = vmul.f32 0.03125, %v4384_v18 }
 0xbea   :  { %v4387_v38 = vpop.xlane.xlu1 %4386 }
 0xbeb   :  { %v4450_v62 = vadd.f32 1e-05, %v4432_v15  ;;  %v4433_v29 = vmul.f32 0.03125, %v4387_v38 }
 0xbed   :  { %5458 = vrsqrt.f32 %v4450_v62  ;;  %v4451_v20 = vadd.f32 1e-05, %v4433_v29 }
 0xbef   :  { %v5455_v63 = vpop.eup %5454  ;;  %5460 = vrsqrt.f32 %v4451_v20 }
 0xbf0   :  { %v4484_v51 = vmul.f32 %v5455_v63, %v8743_v16 }
 0xbf1   :  { %v5457_v47 = vpop.eup %5456  ;;  %v4390_v43 = vpop.xlane.xlu0 %4389 }
 0xbf2   :  { %v4508_v14 = vmul.f32 %v8853_v0, %v4484_v51  ;;  %v4485_v50 = vmul.f32 %v5457_v47, %v8746_v46  ;;  %v4434_v27 = vmul.f32 0.03125, %v4390_v43 }
 0xbf3   :  { %v4393_v36 = vpop.xlane.xlu1 %4392 }
 0xbf4   :  { %v4532_v59 = vadd.f32 %v8859_v40, %v4508_v14  ;;  %v4509_v56 = vmul.f32 %v8853_v0, %v4485_v50  ;;  %v4452_v31 = vadd.f32 1e-05, %v4434_v27  ;;  %v4435_v13 = vmul.f32 0.03125, %v4393_v36 }
 0xbf6   :  { %4550 = vst.msk [vmem:[%s8999_s13] sm:$0xff] %vm95_vm1, %v4532_v59  ;;  %v4533_v16 = vadd.f32 %v8859_v40, %v4509_v56  ;;  %5462 = vrsqrt.f32 %v4452_v31  ;;  %v4453_v24 = vadd.f32 1e-05, %v4435_v13 }
 0xbf7   :  { %v5459_v54 = vpop.eup %5458 }
 0xbf8   :  { %4551 = vst.msk [vmem:[%s8999_s13 + $0x8] sm:$0xff] %vm95_vm1, %v4533_v16  ;;  %v4486_v46 = vmul.f32 %v5459_v54, %v8755_v26  ;;  %5464 = vrsqrt.f32 %v4453_v24 }
 0xbf9   :  { %v5461_v34 = vpop.eup %5460  ;;  %v4396_v58 = vpop.xlane.xlu0 %4395 }
 0xbfa   :  { %v4510_v55 = vmul.f32 %v8853_v0, %v4486_v46  ;;  %v4487_v21 = vmul.f32 %v5461_v34, %v8758_v45  ;;  %v4436_v28 = vmul.f32 0.03125, %v4396_v58 }
 0xbfb   :  { %v4399_v61 = vpop.xlane.xlu1 %4398 }
 0xbfc   :  { %v4534_v3 = vadd.f32 %v8859_v40, %v4510_v55  ;;  %v4511_v12 = vmul.f32 %v8853_v0, %v4487_v21  ;;  %v4454_v2 = vadd.f32 1e-05, %v4436_v28  ;;  %v4437_v22 = vmul.f32 0.03125, %v4399_v61 }
 0xbfe   :  { %4552 = vst.msk [vmem:[%s8999_s13 + $0x10] sm:$0xff] %vm95_vm1, %v4534_v3  ;;  %v4535_v26 = vadd.f32 %v8859_v40, %v4511_v12  ;;  %5466 = vrsqrt.f32 %v4454_v2  ;;  %v4455_v30 = vadd.f32 1e-05, %v4437_v22 }
 0xc00   :  { %v5463_v10 = vpop.eup %5462  ;;  %4553 = vst.msk [vmem:[%s8999_s13 + $0x18] sm:$0xff] %vm95_vm1, %v4535_v26  ;;  %5468 = vrsqrt.f32 %v4455_v30 }
 0xc01   :  { %v4488_v45 = vmul.f32 %v5463_v10, %v8767_v11  ;;  %v4402_v37 = vpop.xlane.xlu0 %4401 }
 0xc02   :  { %v5465_v1 = vpop.eup %5464  ;;  %v4438_v48 = vmul.f32 0.03125, %v4402_v37 }
 0xc03   :  { %v4512_v53 = vmul.f32 %v8853_v0, %v4488_v45  ;;  %v4489_v41 = vmul.f32 %v5465_v1, %v8770_v25  ;;  %v4405_v6 = vpop.xlane.xlu1 %4404 }
 0xc04   :  { %v4456_v5 = vadd.f32 1e-05, %v4438_v48  ;;  %v4439_v32 = vmul.f32 0.03125, %v4405_v6 }
 0xc05   :  { %v4536_v17 = vadd.f32 %v8859_v40, %v4512_v53  ;;  %v4513_v60 = vmul.f32 %v8853_v0, %v4489_v41 }
 0xc06   :  { %5470 = vrsqrt.f32 %v4456_v5  ;;  %v4457_v35 = vadd.f32 1e-05, %v4439_v32 }
 0xc07   :  { %4554 = vst.msk [vmem:[%s8999_s13 + $0x20] sm:$0xff] %vm95_vm1, %v4536_v17  ;;  %v4537_v11 = vadd.f32 %v8859_v40, %v4513_v60 }
 0xc08   :  { %v5467_v49 = vpop.eup %5466  ;;  %5472 = vrsqrt.f32 %v4457_v35 }
 0xc09   :  { %4555 = vst.msk [vmem:[%s8999_s13 + $0x28] sm:$0xff] %vm95_vm1, %v4537_v11  ;;  %v4490_v25 = vmul.f32 %v5467_v49, %v8779_v57  ;;  %v4408_v18 = vpop.xlane.xlu0 %4407 }
 0xc0a   :  { %v5469_v15 = vpop.eup %5468  ;;  %v4440_v38 = vmul.f32 0.03125, %v4408_v18 }
 0xc0b   :  { %v4514_v62 = vmul.f32 %v8853_v0, %v4490_v25  ;;  %v4491_v29 = vmul.f32 %v5469_v15, %v8782_v44  ;;  %v4411_v20 = vpop.xlane.xlu1 %4410 }
 0xc0c   :  { %v4458_v63 = vadd.f32 1e-05, %v4440_v38  ;;  %v4441_v51 = vmul.f32 0.03125, %v4411_v20 }
 0xc0d   :  { %v4538_v47 = vadd.f32 %v8859_v40, %v4514_v62  ;;  %v4515_v43 = vmul.f32 %v8853_v0, %v4491_v29 }
 0xc0e   :  { %5474 = vrsqrt.f32 %v4458_v63  ;;  %v4459_v14 = vadd.f32 1e-05, %v4441_v51 }
 0xc0f   :  { %4556 = vst.msk [vmem:[%s8999_s13 + $0x30] sm:$0xff] %vm95_vm1, %v4538_v47  ;;  %v4539_v57 = vadd.f32 %v8859_v40, %v4515_v43 }
 0xc10   :  { %v5471_v50 = vpop.eup %5470  ;;  %5476 = vrsqrt.f32 %v4459_v14 }
 0xc11   :  { %4557 = vst.msk [vmem:[%s8999_s13 + $0x38] sm:$0xff] %vm95_vm1, %v4539_v57  ;;  %v4492_v44 = vmul.f32 %v5471_v50, %v8791_v39  ;;  %v4414_v27 = vpop.xlane.xlu0 %4413 }
 0xc12   :  { %v5473_v36 = vpop.eup %5472  ;;  %v4442_v59 = vmul.f32 0.03125, %v4414_v27 }
 0xc13   :  { %v4516_v56 = vmul.f32 %v8853_v0, %v4492_v44  ;;  %v4493_v31 = vmul.f32 %v5473_v36, %v8794_v33  ;;  %v4417_v13 = vpop.xlane.xlu1 %4416 }
 0xc14   :  { %v4460_v16 = vadd.f32 1e-05, %v4442_v59  ;;  %v4443_v24 = vmul.f32 0.03125, %v4417_v13 }
 0xc15   :  { %v4540_v54 = vadd.f32 %v8859_v40, %v4516_v56  ;;  %v4517_v46 = vmul.f32 %v8853_v0, %v4493_v31 }
 0xc16   :  { %5478 = vrsqrt.f32 %v4460_v16  ;;  %v4461_v34 = vadd.f32 1e-05, %v4443_v24 }
 0xc17   :  { %4558 = vst.msk [vmem:[%s8999_s13 + $0x40] sm:$0xff] %vm95_vm1, %v4540_v54  ;;  %v4541_v39 = vadd.f32 %v8859_v40, %v4517_v46 }
 0xc18   :  { %v5475_v58 = vpop.eup %5474  ;;  %5480 = vrsqrt.f32 %v4461_v34 }
 0xc19   :  { %4559 = vst.msk [vmem:[%s8999_s13 + $0x48] sm:$0xff] %vm95_vm1, %v4541_v39  ;;  %v4494_v33 = vmul.f32 %v5475_v58, %v8803_v23 }
 0xc1a   :  { %v5477_v55 = vpop.eup %5476 }
 0xc1b   :  { %v4518_v21 = vmul.f32 %v8853_v0, %v4494_v33  ;;  %v4495_v28 = vmul.f32 %v5477_v55, %v8806_v52 }
 0xc1d   :  { %v4420_v61 = vpop.xlane.xlu0 %4419  ;;  %v4542_v3 = vadd.f32 %v8859_v40, %v4518_v21  ;;  %v4519_v12 = vmul.f32 %v8853_v0, %v4495_v28 }
 0xc1e   :  { %v4444_v2 = vmul.f32 0.03125, %v4420_v61 }
 0xc1f   :  { %v4423_v22 = vpop.xlane.xlu1 %4422  ;;  %4560 = vst.msk [vmem:[%s8999_s13 + $0x50] sm:$0xff] %vm95_vm1, %v4542_v3  ;;  %v4543_v26 = vadd.f32 %v8859_v40, %v4519_v12 }
 0xc20   :  { %v4462_v23 = vadd.f32 1e-05, %v4444_v2  ;;  %v4445_v30 = vmul.f32 0.03125, %v4423_v22  ;;  %v5479_v10 = vpop.eup %5478 }
 0xc21   :  { %4561 = vst.msk [vmem:[%s8999_s13 + $0x58] sm:$0xff] %vm95_vm1, %v4543_v26  ;;  %v4496_v52 = vmul.f32 %v5479_v10, %v8815_v42 }
 0xc22   :  { %5482 = vrsqrt.f32 %v4462_v23  ;;  %v4463_v45 = vadd.f32 1e-05, %v4445_v30  ;;  %v5481_v37 = vpop.eup %5480 }
 0xc23   :  { %v4520_v1 = vmul.f32 %v8853_v0, %v4496_v52  ;;  %v4497_v48 = vmul.f32 %v5481_v37, %v8818_v19 }
 0xc24   :  { %5484 = vrsqrt.f32 %v4463_v45 }
 0xc25   :  { %v4426_v53 = vpop.xlane.xlu0 %4425  ;;  %v4544_v41 = vadd.f32 %v8859_v40, %v4520_v1  ;;  %v4521_v6 = vmul.f32 %v8853_v0, %v4497_v48 }
 0xc26   :  { %v4446_v5 = vmul.f32 0.03125, %v4426_v53 }
 0xc27   :  { %v4429_v32 = vpop.xlane.xlu1 %4428  ;;  %4562 = vst.msk [vmem:[%s8999_s13 + $0x60] sm:$0xff] %vm95_vm1, %v4544_v41  ;;  %v4545_v42 = vadd.f32 %v8859_v40, %v4521_v6 }
 0xc28   :  { %v4464_v17 = vadd.f32 1e-05, %v4446_v5  ;;  %v4447_v60 = vmul.f32 0.03125, %v4429_v32 }
 0xc29   :  { %4563 = vst.msk [vmem:[%s8999_s13 + $0x68] sm:$0xff] %vm95_vm1, %v4545_v42 }
 0xc2a   :  { %5486 = vrsqrt.f32 %v4464_v17  ;;  %v4465_v19 = vadd.f32 1e-05, %v4447_v60 }
 0xc2c   :  { %v5483_v35 = vpop.eup %5482  ;;  %5488 = vrsqrt.f32 %v4465_v19 }
 0xc2d   :  { %v4498_v11 = vmul.f32 %v5483_v35, %v8827_v9 }
 0xc2e   :  { %v5485_v49 = vpop.eup %5484 }
 0xc2f   :  { %v4522_v25 = vmul.f32 %v8853_v0, %v4498_v11  ;;  %v4499_v18 = vmul.f32 %v5485_v49, %v8830_v7 }
 0xc31   :  { %v4546_v15 = vadd.f32 %v8859_v40, %v4522_v25  ;;  %v4523_v38 = vmul.f32 %v8853_v0, %v4499_v18 }
 0xc33   :  { %4564 = vst.msk [vmem:[%s8999_s13 + $0x70] sm:$0xff] %vm95_vm1, %v4546_v15  ;;  %v4547_v62 = vadd.f32 %v8859_v40, %v4523_v38 }
 0xc34   :  { %v5487_v29 = vpop.eup %5486 }
 0xc35   :  { %4565 = vst.msk [vmem:[%s8999_s13 + $0x78] sm:$0xff] %vm95_vm1, %v4547_v62  ;;  %v4500_v9 = vmul.f32 %v5487_v29, %v8839_v8 }
 0xc36   :  { %v5489_v7 = vpop.eup %5488 }
 0xc37   :  { %v4524_v20 = vmul.f32 %v8853_v0, %v4500_v9  ;;  %v4501_v63 = vmul.f32 %v5489_v7, %v8842_v4 }
 0xc39   :  { %v4548_v51 = vadd.f32 %v8859_v40, %v4524_v20  ;;  %v4525_v47 = vmul.f32 %v8853_v0, %v4501_v63 }
 0xc3b   :  { %4566 = vst.msk [vmem:[%s8999_s13 + $0x80] sm:$0xff] %vm95_vm1, %v4548_v51  ;;  %v4549_v43 = vadd.f32 %v8859_v40, %v4525_v47 }
 0xc3d   :  { %4567 = vst.msk [vmem:[%s8999_s13 + $0x88] sm:$0x3] %vm3576_vm9, %v4549_v43 }

// kernel: dofa_wrapper_forward.7
= control target key start
LH: loop header
LB: loop body
LE: loop exit
PB: predicated region body
PF: predicated region fallthrough
CT: control target
= control target key end

     0   :  { %s1552_s12 = smov 0   ;;  %s1690_s0 = inlined_call_operand.vmem [shape: f32[18,12,12], index: 0, kind: input, shape index: {}]   ;;  %s1691_s1 = inlined_call_operand.vmem [shape: f32[12,16], index: 1, kind: input, shape index: {}]   ;;  %s1692_s2 = inlined_call_operand.vmem [shape: f32[16,12], index: 2, kind: input, shape index: {}]   ;;  %s1693_s3 = inlined_call_operand.vmem [shape: f32[18,16,16], index: 3, kind: output, shape index: {}]  }
   0x1 LB: > { %s1241_s13 = sadd.s32 4294967295, %s1529_s12   ;;  %p1245_p0 = scmp.ge.s32.totalorder %s1529_s12, 1  ;;  %s1529_s12 = sphi %s1552_s12, %s13_s12  }
   0x2   : > { %p139_p1 = scmp.lt.s32.totalorder %s1529_s12, 4 }
   0x4   : > { %p140_p2 = pnand %p1245_p0, %p139_p1 }
   0x5   : > { %v179_v0 = vld [vmem:[%s1691_s1] sm:$0xff] (!%p140_p2)  ;;  %v180_v1 = vld [vmem:[%s1691_s1 + $0x8] sm:$0xf] (!%p140_p2)  ;;  %vm192_vm0 = vcmask (!%p140_p2), 1043456   ;;  %s165_s18 = smul.u32 (!%p140_p2), 6, %s1241_s13  ;;  %vm1531_vm1 = vmmov (!%p140_p2), 1  }
   0x6   : > { %143 = sbr.rel (%p140_p2) target bundleno = 471 (0x1d7), region = 32  ;;  %v1442_v2 = vpack.c.bf16 (!%p140_p2), %v180_v1, %v179_v0  ;;  %vm1566_vm2 = vmpackc.low (!%p140_p2), %vm192_vm0, %vm1531_vm1  ;;  %vm185_vm3 = vcmask (!%p140_p2), 97280   ;;  %v181_v16 = vld [vmem:[%s1692_s2] sm:$0xff] (!%p140_p2)  ;;  %v182_v22 = vld [vmem:[%s1692_s2 + $0x8] sm:$0xff] (!%p140_p2)  ;;  %vm355_vm4 = vcmask (!%p140_p2), 130048  }
   0x7   : > { %p166_p3 = scmp.lt.s32.totalorder (!%p140_p2), %s165_s18, 17  ;;  %1369 = vmatprep.mubr.msk.f32.mxu1 (!%p140_p2), %vm185_vm3, %v181_v16 }
   0x8   : > { %1444 = vmatprep.subr.msk.bf16.mxu0 (!%p140_p2), %vm1566_vm2, %v1442_v2 }
   0x9   : > { %1447 = vmatpush3.bf16.msk.msra.mxu0 (!%p140_p2), %vm1566_vm2, %v1442_v2 }
   0xa   : > { %1456 = vmatprep.subr.msk.bf16.mxu0 (!%p140_p2), %vm1566_vm2, %v1442_v2 }
   0xd   : > { %s1697_s18 = smov (!%p166_p3, %s165_s18), 17 }
   0xe   : > { %s1308_s19 = sshll.u32 %s1697_s18, 4 }
   0xf   : > { %s1584_s22 = scalar_lea.vmem %s1690_s0, %s1308_s19  ;;  %s177_s29 = scalar_lea.vmem %s1693_s3, %s1308_s19 }
  0x10   : > { %v183_v4 = vld [vmem:[%s1584_s22] sm:$0xff]  ;;  %v184_v5 = vld [vmem:[%s1584_s22 + $0x8] sm:$0xf]  ;;  %v1256_v6 = vld [vmem:[%s1584_s22 + $0x10] sm:$0xff] }
  0x11   : > { %1362 = vmatprep.mubr.msk.f32.mxu0 %vm185_vm3, %v183_v4  ;;  %v1257_v7 = vld [vmem:[%s1584_s22 + $0x18] sm:$0xf]  ;;  %v1266_v8 = vld [vmem:[%s1584_s22 + $0x20] sm:$0xff]  ;;  %v1267_v9 = vld [vmem:[%s1584_s22 + $0x28] sm:$0xf] }
  0x12   : > { %1363 = vmatmul.mubr.msk.f32.vlgmr.msra.gmra.mrb[0].mxu0 %vm185_vm3, %v184_v5  ;;  %v1276_v10 = vld [vmem:[%s1584_s22 + $0x30] sm:$0xff]  ;;  %v1277_v11 = vld [vmem:[%s1584_s22 + $0x38] sm:$0xf]  ;;  %v1286_v12 = vld [vmem:[%s1584_s22 + $0x40] sm:$0xff] }
  0x13   : > { %1459 = vmatpush3.bf16.msk.msra.mxu0 %vm1566_vm2, %v1442_v2  ;;  %1376 = vmatprep.mubr.msk.f32.mxu0 %vm185_vm3, %v1256_v6  ;;  %v1287_v13 = vld [vmem:[%s1584_s22 + $0x48] sm:$0xf]  ;;  %v1296_v14 = vld [vmem:[%s1584_s22 + $0x50] sm:$0xff]  ;;  %v1297_v15 = vld [vmem:[%s1584_s22 + $0x58] sm:$0xf] }
  0x14   : > { %1468 = vmatprep.subr.msk.bf16.mxu0 %vm1566_vm2, %v1442_v2 }
  0x16   : > { %1377 = vmatmul.mubr.msk.f32.vlgmr.msra.gmra.mrb[2].mxu0 %vm185_vm3, %v1257_v7 }
  0x17   : > { %1471 = vmatpush3.bf16.msk.msra.mxu0 %vm1566_vm2, %v1442_v2  ;;  %1390 = vmatprep.mubr.msk.f32.mxu0 %vm185_vm3, %v1266_v8 }
  0x18   : > { %1480 = vmatprep.subr.msk.bf16.mxu0 %vm1566_vm2, %v1442_v2 }
  0x1a   : > { %1391 = vmatmul.mubr.msk.f32.vlgmr.msra.gmra.mrb[4].mxu0 %vm185_vm3, %v1267_v9 }
  0x1b   : > { %1483 = vmatpush3.bf16.msk.msra.mxu0 %vm1566_vm2, %v1442_v2  ;;  %1404 = vmatprep.mubr.msk.f32.mxu0 %vm185_vm3, %v1276_v10 }
  0x1c   : > { %1492 = vmatprep.subr.msk.bf16.mxu0 %vm1566_vm2, %v1442_v2 }
  0x1e   : > { %1405 = vmatmul.mubr.msk.f32.vlgmr.msra.gmra.mrb[6].mxu0 %vm185_vm3, %v1277_v11 }
  0x1f   : > { %1495 = vmatpush3.bf16.msk.msra.mxu0 %vm1566_vm2, %v1442_v2  ;;  %1418 = vmatprep.mubr.msk.f32.mxu0 %vm185_vm3, %v1286_v12 }
  0x20   : > { %1504 = vmatprep.subr.msk.bf16.mxu0 %vm1566_vm2, %v1442_v2 }
  0x22   : > { %1419 = vmatmul.mubr.msk.f32.vlgmr.msra.gmra.mrb[8].mxu0 %vm185_vm3, %v1287_v13 }
  0x23   : > { %1507 = vmatpush3.bf16.msk.msra.mxu0 %vm1566_vm2, %v1442_v2  ;;  %1432 = vmatprep.mubr.msk.f32.mxu0 %vm185_vm3, %v1296_v14 }
  0x26   : > { %1433 = vmatmul.mubr.msk.f32.vlgmr.msra.gmra.mrb[10].mxu0 %vm185_vm3, %v1297_v15 }
  0xe5   : > { %v1364_v17 = vpop.f32.mrb[0].mxu0 }
  0xe6   : > { %v262_v18 = vpop.f32.mrb[1].mxu0 }
  0xe7   : > { %v1448_v19 = vpack.c.bf16 %v1364_v17, %v262_v18 }
  0xe9   : > { %1450 = vmatprep.subr.msk.bf16.mxu1 %vm1566_vm2, %v1448_v19  ;;  %v1378_v20 = vpop.f32.mrb[2].mxu0 }
  0xea   : > { %1453 = vmatpush3.bf16.msk.msra.mxu1 %vm1566_vm2, %v1448_v19  ;;  %v433_v21 = vpop.f32.mrb[3].mxu0 }
  0xeb   : > { %v1460_v23 = vpack.c.bf16 %v1378_v20, %v433_v21 }
  0xed   : > { %1370 = vmatmul.mubr.msk.f32.vlgmr.msra.gmra.mrb[0].mxu1 %vm185_vm3, %v182_v22  ;;  %1462 = vmatprep.subr.msk.bf16.mxu1 %vm1566_vm2, %v1460_v23  ;;  %v1392_v24 = vpop.f32.mrb[4].mxu0 }
  0xee   : > { %1465 = vmatpush3.bf16.msk.msra.mxu1 %vm1566_vm2, %v1460_v23  ;;  %v598_v25 = vpop.f32.mrb[5].mxu0  ;;  %1383 = vmatprep.mubr.msk.f32.mxu1 %vm185_vm3, %v181_v16 }
  0xef   : > { %v1472_v26 = vpack.c.bf16 %v1392_v24, %v598_v25 }
  0xf1   : > { %1384 = vmatmul.mubr.msk.f32.vlgmr.msra.gmra.mrb[2].mxu1 %vm185_vm3, %v182_v22  ;;  %1474 = vmatprep.subr.msk.bf16.mxu1 %vm1566_vm2, %v1472_v26  ;;  %v1406_v27 = vpop.f32.mrb[6].mxu0 }
  0xf2   : > { %1477 = vmatpush3.bf16.msk.msra.mxu1 %vm1566_vm2, %v1472_v26  ;;  %v763_v28 = vpop.f32.mrb[7].mxu0  ;;  %1397 = vmatprep.mubr.msk.f32.mxu1 %vm185_vm3, %v181_v16 }
  0xf3   : > { %v1484_v29 = vpack.c.bf16 %v1406_v27, %v763_v28 }
  0xf5   : > { %1398 = vmatmul.mubr.msk.f32.vlgmr.msra.gmra.mrb[4].mxu1 %vm185_vm3, %v182_v22  ;;  %1486 = vmatprep.subr.msk.bf16.mxu1 %vm1566_vm2, %v1484_v29  ;;  %v1420_v30 = vpop.f32.mrb[8].mxu0 }
  0xf6   : > { %1489 = vmatpush3.bf16.msk.msra.mxu1 %vm1566_vm2, %v1484_v29  ;;  %v928_v31 = vpop.f32.mrb[9].mxu0  ;;  %1411 = vmatprep.mubr.msk.f32.mxu1 %vm185_vm3, %v181_v16 }
  0xf7   : > { %v1496_v32 = vpack.c.bf16 %v1420_v30, %v928_v31 }
  0xf9   : > { %1412 = vmatmul.mubr.msk.f32.vlgmr.msra.gmra.mrb[6].mxu1 %vm185_vm3, %v182_v22  ;;  %1498 = vmatprep.subr.msk.bf16.mxu1 %vm1566_vm2, %v1496_v32  ;;  %v1434_v33 = vpop.f32.mrb[10].mxu0 }
  0xfa   : > { %1501 = vmatpush3.bf16.msk.msra.mxu1 %vm1566_vm2, %v1496_v32  ;;  %v1093_v34 = vpop.f32.mrb[11].mxu0  ;;  %1425 = vmatprep.mubr.msk.f32.mxu1 %vm185_vm3, %v181_v16 }
  0xfb   : > { %v1508_v35 = vpack.c.bf16 %v1434_v33, %v1093_v34 }
  0xfd   : > { %1426 = vmatmul.mubr.msk.f32.vlgmr.msra.gmra.mrb[8].mxu1 %vm185_vm3, %v182_v22  ;;  %1510 = vmatprep.subr.msk.bf16.mxu1 %vm1566_vm2, %v1508_v35 }
  0xfe   : > { %1513 = vmatpush3.bf16.msk.msra.mxu1 %vm1566_vm2, %v1508_v35  ;;  %1439 = vmatprep.mubr.msk.f32.mxu1 %vm185_vm3, %v181_v16 }
 0x101   : > { %1440 = vmatmul.mubr.msk.f32.vlgmr.msra.gmra.mrb[10].mxu1 %vm185_vm3, %v182_v22 }
 0x1c0   : > { %v1371_v36 = vpop.f32.mrb[0].mxu1 }
 0x1c1   : > { %357 = vst.msk [vmem:[%s177_s29 + $0x8] sm:$0xff] %vm355_vm4, %v1371_v36  ;;  %v346_v37 = vpop.f32.mrb[1].mxu1 }
 0x1c2   : > { %356 = vst.msk [vmem:[%s177_s29] sm:$0xff] %vm355_vm4, %v346_v37 }
 0x1c4   : > { %v1385_v38 = vpop.f32.mrb[2].mxu1 }
 0x1c5   : > { %1265 = vst.msk [vmem:[%s177_s29 + $0x18] sm:$0xff] %vm355_vm4, %v1385_v38  ;;  %v511_v39 = vpop.f32.mrb[3].mxu1 }
 0x1c6   : > { %1264 = vst.msk [vmem:[%s177_s29 + $0x10] sm:$0xff] %vm355_vm4, %v511_v39 }
 0x1c8   : > { %v1399_v40 = vpop.f32.mrb[4].mxu1 }
 0x1c9   : > { %1275 = vst.msk [vmem:[%s177_s29 + $0x28] sm:$0xff] %vm355_vm4, %v1399_v40  ;;  %v676_v41 = vpop.f32.mrb[5].mxu1 }
 0x1ca   : > { %1274 = vst.msk [vmem:[%s177_s29 + $0x20] sm:$0xff] %vm355_vm4, %v676_v41 }
 0x1cc   : > { %v1413_v42 = vpop.f32.mrb[6].mxu1 }
 0x1cd   : > { %1285 = vst.msk [vmem:[%s177_s29 + $0x38] sm:$0xff] %vm355_vm4, %v1413_v42  ;;  %v841_v43 = vpop.f32.mrb[7].mxu1 }
 0x1ce   : > { %1284 = vst.msk [vmem:[%s177_s29 + $0x30] sm:$0xff] %vm355_vm4, %v841_v43 }
 0x1d0   : > { %v1427_v44 = vpop.f32.mrb[8].mxu1 }
 0x1d1   : > { %1295 = vst.msk [vmem:[%s177_s29 + $0x48] sm:$0xff] %vm355_vm4, %v1427_v44  ;;  %v1006_v45 = vpop.f32.mrb[9].mxu1 }
 0x1d2   : > { %1294 = vst.msk [vmem:[%s177_s29 + $0x40] sm:$0xff] %vm355_vm4, %v1006_v45 }
 0x1d4   : > { %v1441_v46 = vpop.f32.mrb[10].mxu1 }
 0x1d5   : > { %1305 = vst.msk [vmem:[%s177_s29 + $0x58] sm:$0xff] %vm355_vm4, %v1441_v46  ;;  %v1171_v47 = vpop.f32.mrb[11].mxu1 }
 0x1d6   : > { %1304 = vst.msk [vmem:[%s177_s29 + $0x50] sm:$0xff] %vm355_vm4, %v1171_v47 }
 0x1d7 PF: > { %s13_s12 = sadd.s32 1, %s1529_s12  }
 0x1d8   : > { %p10_p4 = scmp.ge.s32.totalorder %s13_s12, 5  }
 0x1da   :  { %12 = sbr.rel (!%p10_p4) target bundleno = 1 (0x1), region = 72 }

// kernel: dofa_wrapper_forward.12
= control target key start
LH: loop header
LB: loop body
LE: loop exit
PB: predicated region body
PF: predicated region fallthrough
CT: control target
= control target key end

     0   :  { %v606_v35 = vmov 0.0   ;;  %vm607_vm0 = vmmov 0   ;;  %vm330_vm1 = vcmask 523264   ;;  %s753_s1 = inlined_call_operand.vmem [shape: bf16[576,64], index: 1, kind: input, shape index: {}]   ;;  %s754_s0 = inlined_call_operand.vmem [shape: bf16[8,576], index: 0, kind: input, shape index: {}]   ;;  %s755_s2 = inlined_call_operand.vmem [shape: f32[1,64], index: 2, kind: input, shape index: {}]   ;;  %s756_s3 = inlined_call_operand.vmem [shape: f32[8,64], index: 3, kind: output, shape index: {}]  }
   0x1   :  { %v565_v0 = vld [vmem:[%s753_s1 + $0x40] sm:$0xff]   ;;  %v569_v4 = vld [vmem:[%s753_s1 + $0x48] sm:$0xff]   ;;  %v573_v8 = vld [vmem:[%s753_s1 + $0x50] sm:$0xff]  }
   0x2   :  { %v566_v1 = vld [vmem:[%s753_s1] sm:$0xff]   ;;  %502 = vmatprep.subr.bf16.mxu0 %v565_v0  ;;  %v570_v5 = vld [vmem:[%s753_s1 + $0x8] sm:$0xff]   ;;  %v574_v9 = vld [vmem:[%s753_s1 + $0x10] sm:$0xff]  }
   0x3   :  { %v567_v2 = vld [vmem:[%s753_s1 + $0xc0] sm:$0xff]   ;;  %503 = vmatpush3.bf16.msra.mxu0 %v566_v1  ;;  %v571_v6 = vld [vmem:[%s753_s1 + $0xc8] sm:$0xff]   ;;  %v575_v10 = vld [vmem:[%s753_s1 + $0xd0] sm:$0xff]  }
   0x4   :  { %v568_v3 = vld [vmem:[%s753_s1 + $0x80] sm:$0xff]   ;;  %524 = vmatprep.subr.bf16.mxu1 %v567_v2  ;;  %504 = vmatprep.subr.bf16.mxu0 %v569_v4  ;;  %v572_v7 = vld [vmem:[%s753_s1 + $0x88] sm:$0xff]   ;;  %v576_v11 = vld [vmem:[%s753_s1 + $0x90] sm:$0xff]  }
   0x5   :  { %525 = vmatpush3.bf16.msra.mxu1 %v568_v3  ;;  %v577_v12 = vld [vmem:[%s753_s1 + $0x58] sm:$0xff]   ;;  %v581_v16 = vld [vmem:[%s753_s1 + $0x60] sm:$0xff]   ;;  %v585_v20 = vld [vmem:[%s753_s1 + $0x68] sm:$0xff]  }
   0x6   :  { %526 = vmatprep.subr.bf16.mxu1 %v571_v6  ;;  %v578_v13 = vld [vmem:[%s753_s1 + $0x18] sm:$0xff]   ;;  %v582_v17 = vld [vmem:[%s753_s1 + $0x20] sm:$0xff]   ;;  %v586_v21 = vld [vmem:[%s753_s1 + $0x28] sm:$0xff]  }
   0x7   :  { %505 = vmatpush3.bf16.msra.mxu0 %v570_v5  ;;  %v579_v14 = vld [vmem:[%s753_s1 + $0xd8] sm:$0xff]   ;;  %v583_v18 = vld [vmem:[%s753_s1 + $0xe0] sm:$0xff]   ;;  %v587_v22 = vld [vmem:[%s753_s1 + $0xe8] sm:$0xff]  }
   0x8   :  { %506 = vmatprep.subr.bf16.mxu0 %v573_v8  ;;  %v580_v15 = vld [vmem:[%s753_s1 + $0x98] sm:$0xff]   ;;  %v584_v19 = vld [vmem:[%s753_s1 + $0xa0] sm:$0xff]   ;;  %v588_v23 = vld [vmem:[%s753_s1 + $0xa8] sm:$0xff]  }
   0x9   :  { %527 = vmatpush3.bf16.msra.mxu1 %v572_v7  ;;  %v589_v24 = vld [vmem:[%s753_s1 + $0x70] sm:$0xff]   ;;  %v593_v28 = vld [vmem:[%s753_s1 + $0x78] sm:$0xff]   ;;  %v15_v31 = vld [vmem:[%s754_s0] sm:$0xff] }
   0xa   :  { %528 = vmatprep.subr.bf16.mxu1 %v575_v10  ;;  %v590_v25 = vld [vmem:[%s753_s1 + $0x30] sm:$0xff]   ;;  %v594_v29 = vld [vmem:[%s753_s1 + $0x38] sm:$0xff]   ;;  %v460_v32 = vcombine.low %v15_v31, %v15_v31  ;;  %v461_v33 = vcombine.high %v15_v31, %v15_v31  ;;  %v16_v36 = vld [vmem:[%s754_s0 + $0x8] sm:$0xff] }
   0xb   :  { %507 = vmatpush3.bf16.msra.mxu0 %v574_v9  ;;  %v591_v26 = vld [vmem:[%s753_s1 + $0xf0] sm:$0xff]   ;;  %v595_v30 = vld [vmem:[%s753_s1 + $0xf8] sm:$0xff]   ;;  %v462_v37 = vcombine.low %v16_v36, %v16_v36  ;;  %v463_v38 = vcombine.high %v16_v36, %v16_v36  ;;  %v602_v39 = vld [vmem:[%s753_s1 + $0x100] sm:$0xff]  }
   0xc   :  { %508 = vmatprep.subr.bf16.mxu0 %v577_v12  ;;  %v592_v27 = vld [vmem:[%s753_s1 + $0xb0] sm:$0xff]   ;;  %v599_v34 = vld [vmem:[%s753_s1 + $0xb8] sm:$0xff]   ;;  %366 = vmatprep.mubr.bf16.mxu0 %v461_v33  ;;  %v603_v40 = vld [vmem:[%s753_s1 + $0x108] sm:$0xff]  }
   0xd   :  { %529 = vmatpush3.bf16.msra.mxu1 %v576_v11  ;;  %406 = vmatprep.mubr.bf16.mxu1 %v463_v38  ;;  %v604_v41 = vld [vmem:[%s753_s1 + $0x110] sm:$0xff]   ;;  %v605_v42 = vld [vmem:[%s753_s1 + $0x118] sm:$0xff]   ;;  %v459_v45 = vld [vmem:[%s755_s2] ss:$0 sm:$0xff] }
   0xe   :  { %530 = vmatprep.subr.bf16.mxu1 %v579_v14  ;;  %v598_v43 = vld [vmem:[%s754_s0 + $0x10] ss:$0 sps:$4 sm:$0xff]  }
   0xf   :  { %509 = vmatpush3.bf16.msra.mxu0 %v578_v13 }
  0x10   :  { %510 = vmatprep.subr.bf16.mxu0 %v581_v16 }
  0x11   :  { %531 = vmatpush3.bf16.msra.mxu1 %v580_v15 }
  0x12   :  { %532 = vmatprep.subr.bf16.mxu1 %v583_v18 }
  0x13   :  { %511 = vmatpush3.bf16.msra.mxu0 %v582_v17 }
  0x14   :  { %512 = vmatprep.subr.bf16.mxu0 %v585_v20 }
  0x15   :  { %533 = vmatpush3.bf16.msra.mxu1 %v584_v19 }
  0x16   :  { %534 = vmatprep.subr.bf16.mxu1 %v587_v22 }
  0x17   :  { %513 = vmatpush3.bf16.msra.mxu0 %v586_v21 }
  0x18   :  { %514 = vmatprep.subr.bf16.mxu0 %v589_v24 }
  0x19   :  { %535 = vmatpush3.bf16.msra.mxu1 %v588_v23 }
  0x1a   :  { %536 = vmatprep.subr.bf16.mxu1 %v591_v26 }
  0x1b   :  { %515 = vmatpush3.bf16.msra.mxu0 %v590_v25 }
  0x1c   :  { %516 = vmatprep.subr.bf16.mxu0 %v593_v28 }
  0x1d   :  { %537 = vmatpush3.bf16.msra.mxu1 %v592_v27 }
  0x1e   :  { %538 = vmatprep.subr.bf16.mxu1 %v595_v30 }
  0x1f   :  { %517 = vmatpush3.bf16.msra.mxu0 %v594_v29 }
  0x20   :  { %551 = vmatprep.subr.bf16.mxu0 %v606_v35 }
  0x21   :  { %539 = vmatpush3.bf16.msra.mxu1 %v599_v34 }
  0x22   :  { %367 = vmatmul.mubr.bf16.vlgmr.msra.gmra.mrb[0].mxu0 %v460_v32 }
  0x23   :  { %552 = vmatpush3.bf16.msra.mxu0 %v602_v39  ;;  %559 = vmatprep.mubr.msk.bf16.mxu0 %vm607_vm0, %v606_v35 }
  0x24   :  { %407 = vmatmul.mubr.bf16.vlgmr.msra.gmra.mrb[0].mxu1 %v462_v37  ;;  %553 = vmatprep.subr.bf16.mxu0 %v606_v35 }
  0x27   :  { %554 = vmatpush3.bf16.msra.mxu0 %v603_v40 }
  0x28   :  { %555 = vmatprep.subr.bf16.mxu0 %v606_v35 }
  0x2b   :  { %556 = vmatpush3.bf16.msra.mxu0 %v604_v41 }
  0x2c   :  { %557 = vmatprep.subr.bf16.mxu0 %v606_v35 }
  0x2f   :  { %558 = vmatpush3.bf16.msra.mxu0 %v605_v42 }
  0x32   :  { %560 = vmatmul.mubr.msk.bf16.vlgmr.msra.gmra.mrb[4].mxu0 %vm330_vm1, %v598_v43 }
  0xf5   :  { %v518_v44 = vpop.f32.mrb[0].mxu0 }
  0xf6   :  { %v519_v46 = vpop.f32.mrb[1].mxu0 }
  0xf7   :  { %v520_v47 = vadd.f32 %v519_v46, %v518_v44  ;;  %v521_v48 = vpop.f32.mrb[2].mxu0  ;;  %v540_v49 = vpop.f32.mrb[0].mxu1 }
  0xf8   :  { %v522_v50 = vpop.f32.mrb[3].mxu0  ;;  %v541_v51 = vpop.f32.mrb[1].mxu1 }
  0xf9   :  { %v369_v52 = vadd.f32 %v520_v47, %v459_v45  ;;  %v542_v53 = vadd.f32 %v541_v51, %v540_v49  ;;  %v543_v54 = vpop.f32.mrb[2].mxu1 }
  0xfa   :  { %v544_v55 = vpop.f32.mrb[3].mxu1 }
  0xfb   :  { %v409_v56 = vadd.f32 %v542_v53, %v369_v52 }
 0x105   :  { %v448_v57 = vpop.f32.mrb[4].mxu0 }
 0x106   :  { %v449_v58 = vadd.f32 %v448_v57, %v409_v56  ;;  %v561_v59 = vpop.f32.mrb[5].mxu0 }
 0x107   :  { %v451_v60 = vpop.f32.mrb[6].mxu0 }
 0x108   :  { %454 = vst.msk [vmem:[%s756_s3] sm:$0xff] %vm330_vm1, %v449_v58  ;;  %v562_v61 = vpop.f32.mrb[7].mxu0 }

// kernel: dofa_wrapper_forward.13
= control target key start
LH: loop header
LB: loop body
LE: loop exit
PB: predicated region body
PF: predicated region fallthrough
CT: control target
= control target key end

     0   :  { %s3766_s0 = inlined_call_operand.vmem [shape: f32[2,5,64], index: 0, kind: input, shape index: {}]   ;;  %s3767_s1 = inlined_call_operand.vmem [shape: f32[1,5,64], index: 1, kind: input, shape index: {}]   ;;  %s3768_s2 = inlined_call_operand.vmem [shape: f32[2,1,64], index: 2, kind: input, shape index: {}]   ;;  %s3769_s3 = inlined_call_operand.vmem [shape: f32[2,1,64], index: 3, kind: input, shape index: {}]   ;;  %s3770_s4 = inlined_call_operand.vmem [shape: bf16[2,64,192], index: 4, kind: input, shape index: {}]   ;;  %s3771_s5 = inlined_call_operand.vmem [shape: f32[2,1,192], index: 5, kind: input, shape index: {}]   ;;  %s3772_s6 = inlined_call_operand.vmem [shape: bf16[2,64,64], index: 6, kind: input, shape index: {}]   ;;  %s3773_s7 = inlined_call_operand.vmem [shape: f32[2,1,64], index: 7, kind: input, shape index: {}]   ;;  %s3774_s8 = inlined_call_operand.vmem [shape: f32[2,1,64], index: 8, kind: input, shape index: {}]   ;;  %s3775_s9 = inlined_call_operand.vmem [shape: f32[2,1,64], index: 9, kind: input, shape index: {}]   ;;  %s3776_s10 = inlined_call_operand.vmem [shape: bf16[2,64,256], index: 10, kind: input, shape index: {}]   ;;  %s3777_s11 = inlined_call_operand.vmem [shape: f32[2,1,256], index: 11, kind: input, shape index: {}]   ;;  %s3778_s12 = inlined_call_operand.vmem [shape: bf16[2,256,64], index: 12, kind: input, shape index: {}]   ;;  %s3779_s13 = inlined_call_operand.vmem [shape: f32[2,1,64], index: 13, kind: input, shape index: {}]   ;;  %s3780_s14 = inlined_call_operand.hbm [shape: f32[2,1,64], index: 14, kind: output, shape index: {}]  }
   0x1   :  { %3784 = sst [smem:[#allocation10_spill]] %s3768_s2 }
   0x2   :  { %3785 = sst [smem:[#allocation11_spill]] %s3769_s3 }
   0x3   :  { %3786 = sst [smem:[#allocation12_spill]] %s3770_s4 }
   0x4   :  { %3787 = sst [smem:[#allocation13_spill]] %s3771_s5 }
   0x5   :  { %3788 = sst [smem:[#allocation14_spill]] %s3780_s14 }
   0x6   :  { %19 = vsyncpa [#allocation4], 0  ;;  %s3178_s29 = smov 0   ;;  %s3180_s30 = smov 0  }
   0x7   :  { %s3182_s15 = smov 0  }
   0x8 LB: > { %3789 = sst [smem:[#allocation6_spill]] %s3084_s30  ;;  %s34_s17 = sadd.s32 1, %s3084_s30  ;;  %s3088_s15 = sphi %s3182_s15, %s25_s15   ;;  %s3084_s30 = sphi %s3180_s30, %s3810_s30   ;;  %s3080_s29 = sphi %s3178_s29, %s3809_s29  }
   0x9   : > { %3790 = sst [smem:[#allocation7_spill]] %s3088_s15  ;;  %p35_p0 = scmp.ge.s32.totalorder %s34_s17, 2 }
   0xa   : > { %p2609_p1 = scmp.ge.s32.totalorder %s3088_s15, 1  ;;  %p532_p2 = scmp.lt.s32.totalorder %s3088_s15, 3 }
   0xb   : > { %s3812_s17 = smov (%p35_p0, %s34_s17), 0 }
   0xc   : > { %3791 = sst [smem:[#allocation8_spill]] %s3812_s17  ;;  %p533_p3 = pnand %p2609_p1, %p532_p2 }
   0xe   : > { %536 = sbr.rel (%p533_p3) target bundleno = 4458 (0x116a), region = 76 }
  0x15   : > { %p625_p4 = scmp.lt.s32.totalorder %s3080_s29, 1  ;;  %s3794_s4 = sld [smem:[#allocation12_spill]] }
  0x16   : > { %s3795_s5 = sld [smem:[#allocation13_spill]]  ;;  %p2620_p5 = scmp.ne.s32.totalorder %s3080_s29, 0 }
  0x17   : > { %s3201_s18 = scalar_select %p625_p4, %s3080_s29, 1 }
  0x18   : > { %v677_v0 = vld [vmem:[%s3767_s1] sm:$0x1f] (!%p2620_p5)  ;;  %vm680_vm0 = vcmask (!%p2620_p5), 520192   ;;  %v2621_v3 = vld [vmem:[%s3766_s0 + $0x8] sm:$0x1f] (!%p2620_p5) }
  0x19   : > { %s2691_s25 = sshll.u32 %s3201_s18, 6  ;;  %s2612_s26 = sshll.u32 %s3201_s18, 1  ;;  %v678_v1 = vld [vmem:[%s3766_s0] sm:$0x1f] (!%p2620_p5)  ;;  %v684_v4 = vadd.f32 (!%p2620_p5), %v2621_v3, %v677_v0 }
  0x1a   : > { %s2692_s30 = sshll.u32 %s3201_s18, 5  ;;  %s653_s16 = scalar_lea.vmem %s3775_s9, %s3201_s18  ;;  %v679_v2 = vadd.f32 (!%p2620_p5), %v678_v1, %v677_v0 }
  0x1b   : > { %s3216_s19 = scalar_lea.vmem %s3794_s4, %s2691_s25  ;;  %s3231_s23 = scalar_lea.vmem %s3772_s6, %s2692_s30  ;;  %686 = vst.msk [vmem:[#allocation2 + $0x8] sm:$0x1f] (!%p2620_p5), %vm680_vm0, %v684_v4 }
  0x1c   : > { %s3221_s17 = scalar_lea.vmem %s3795_s5, %s2612_s26  ;;  %s3249_s21 = scalar_lea.vmem %s3777_s11, %s2612_s26  ;;  %681 = vst.msk [vmem:[#allocation2] sm:$0x1f] (!%p2620_p5), %vm680_vm0, %v679_v2 }
  0x1d   : > { %3796 = sst [smem:[#allocation9_spill]] %s3221_s17  ;;  %s3244_s17 = scalar_lea.vmem %s3776_s10, %s2691_s25 }
  0x1e   : > { %s2694_s2 = sshll.u32 %s3201_s18, 7  ;;  %s670_s4 = scalar_lea.vmem %s3779_s13, %s3201_s18 }
  0x1f   : > { %s3255_s3 = scalar_lea.vmem %s3778_s12, %s2694_s2  ;;  %676 = sbr.rel (%p2620_p5) target bundleno = 38 (0x26), region = 80 }
  0x26 PF: > { %v3271_v5 = vld [vmem:[#allocation2] sm:$0x1f]  ;;  %vm752_vm1 = vcmask 520192   ;;  %v3284_v14 = vld [vmem:[%s3216_s19 + $0x14] ss:$8 sps:$4 sm:$0xff]   ;;  %v3090_v16 = vmov 0   ;;  %v783_v31 = vlaneseq }
  0x27   : > { %v753_v6 = vsel %vm752_vm1, %v3271_v5, 0.0  ;;  %v3278_v12 = vld [vmem:[%s3216_s19 + $0x4] ss:$8 sps:$4 sm:$0xff]   ;;  %v3281_v13 = vld [vmem:[%s3216_s19] ss:$8 sps:$4 sm:$0xff]   ;;  %869 = vmatprep.mubr.bf16.mxu1 %v3090_v16  ;;  %s3797_s27 = sld [smem:[#allocation9_spill]] }
  0x28   : > { %754 = vadd.xlane.f32.xlu0 %v753_v6  ;;  %837 = vmatprep.subr.bf16.mxu1 %v3278_v12  ;;  %v3289_v15 = vld [vmem:[%s3216_s19 + $0x10] ss:$8 sps:$4 sm:$0xff]   ;;  %v3294_v17 = vld [vmem:[%s3216_s19 + $0x24] ss:$8 sps:$4 sm:$0xff]   ;;  %v3298_v18 = vld [vmem:[%s3216_s19 + $0x20] ss:$8 sps:$4 sm:$0xff]  }
  0x29   : > { %838 = vmatpush1.bf16.msra.mxu1 %v3281_v13  ;;  %v3302_v19 = vld [vmem:[%s3216_s19 + $0x34] ss:$8 sps:$4 sm:$0xff]   ;;  %v3306_v20 = vld [vmem:[%s3216_s19 + $0x30] ss:$8 sps:$4 sm:$0xff]   ;;  %s3798_s30 = sld [smem:[#allocation10_spill]]  ;;  %s3800_s5 = sld [smem:[#allocation11_spill]] }
  0x2a   : > { %839 = vmatprep.subr.bf16.mxu1 %v3284_v14  ;;  %vm833_vm2 = vcmask 523264   ;;  %v3327_v32 = vshrl.u32 %v783_v31, 7  ;;  %v3091_v33 = vmov 0.0   ;;  %vm3092_vm3 = vmmov 0   ;;  %s3093_s28 = smov 112   ;;  %s3094_s26 = smov 64  }
  0x2b   : > { %2793 = vmatprep.subr.bf16.mxu0 %v3091_v33  ;;  %2795 = vmatprep.mubr.msk.bf16.mxu0 %vm3092_vm3, %v3091_v33  ;;  %s3095_s20 = smov 48   ;;  %s3096_s14 = smov 32   ;;  %vm883_vm4 = vcmask 130048   ;;  %vm948_vm5 = vcmask 1041408   ;;  %vm949_vm6 = vcmask 1042432   ;;  %v3100_v48 = vmov 65535  }
  0x2c   : > { %v785_v34 = vsub.s32 0, %v3327_v32  ;;  %s3098_s15 = smov 16   ;;  %s3099_s2 = smov 80   ;;  %v789_v43 = vsub.s32 1, %v3327_v32  ;;  %v950_v49 = vsel %vm948_vm5, 4294967295, %v3100_v48  ;;  %vm931_vm7 = vcmask 36864  }
  0x2d   : > { %840 = vmatpush1.bf16.msra.mxu1 %v3289_v15  ;;  %v697_v35 = vld [vmem:[%s3797_s27] sm:$0x3]  ;;  %s3097_s27 = smov 96   ;;  %v3360_v53 = vsel %vm949_vm6, %v950_v49, 0  ;;  %vm944_vm8 = vcmask 39936   ;;  %vm1345_vm9 = vcmask 261120   ;;  %s3803_s19 = scalar_lea.vmem %s3774_s8, %s3201_s18 }
  0x2e   : > { %841 = vmatprep.subr.bf16.mxu1 %v3294_v17  ;;  %v3335_v36 = vrot.slane %v697_v35, %v785_v34  ;;  %v3352_v44 = vrot.slane %v697_v35, %v789_v43  ;;  %vm1348_vm10 = vcmask 392192   ;;  %p2686_p6 = scmp.ne.s32.totalorder %s3080_s29, 1 }
  0x2f   : > { %s3799_s22 = scalar_lea.vmem %s3798_s30, %s3201_s18  ;;  %s3801_s25 = scalar_lea.vmem %s3800_s5, %s3201_s18  ;;  %vm2411_vm11 = vcmask (!%p2686_p6), 516096  }
  0x30   : > { %v3315_v25 = vld [vmem:[%s3799_s22] ss:$0 sm:$0xff]  ;;  %s3802_s22 = scalar_lea.vmem %s3773_s7, %s3201_s18 }
  0x31   : > { %842 = vmatpush1.bf16.msra.mxu1 %v3298_v18  ;;  %v3322_v27 = vld [vmem:[%s3801_s25] ss:$0 sm:$0xff] }
  0x32   : > { %843 = vmatprep.subr.bf16.mxu1 %v3302_v19 }
  0x35   : > { %844 = vmatpush1.bf16.msra.mxu1 %v3306_v20 }
  0x36   : > { %2781 = vmatprep.subr.bf16.mxu1 %v3091_v33 }
  0xb5   : > { %v755_v7 = vpop.xlane.xlu0 %754 }
  0xb6   : > { %v757_v8 = vmul.f32 0.015625, %v755_v7 }
  0xb8   : > { %v758_v9 = vsub.f32 %v3271_v5, %v757_v8 }
  0xba   : > { %v759_v10 = vmul.f32 %v758_v9, %v758_v9 }
  0xbc   : > { %v760_v11 = vsel %vm752_vm1, %v759_v10, 0.0 }
  0xbd   : > { %761 = vadd.xlane.f32.xlu0 %v760_v11 }
 0x14a   : > { %v762_v21 = vpop.xlane.xlu0 %761 }
 0x14b   : > { %v763_v22 = vmul.f32 0.015625, %v762_v21 }
 0x14d   : > { %v764_v23 = vadd.f32 1e-06, %v763_v22 }
 0x14f   : > { %2988 = vrsqrt.f32 %v764_v23 }
 0x159   : > { %v2989_v24 = vpop.eup %2988 }
 0x15a   : > { %v766_v26 = vmul.f32 %v2989_v24, %v758_v9 }
 0x15c   : > { %v773_v28 = vmul.f32 %v3315_v25, %v766_v26 }
 0x15e   : > { %v780_v29 = vadd.f32 %v3322_v27, %v773_v28 }
 0x160   : > { %v781_v30 = vpack.c.bf16 %v780_v29, %v780_v29 }
 0x162   : > { %2632 = vmatmul.mubr.msk.bf16.vlgmr.msra.gmra.mrb[0].mxu1 %vm833_vm2, %v781_v30 }
 0x163   : > { %2783 = vmatprep.mubr.msk.bf16.mxu1 %vm3092_vm3, %v3091_v33 }
 0x235   : > { %v871_v37 = vpop.f32.mrb[0].mxu1 }
 0x236   : > { %v872_v38 = vadd.f32 %v871_v37, %v3335_v36  ;;  %v873_v39 = vpop.f32.mrb[1].mxu1 }
 0x237   : > { %v875_v40 = vpop.f32.mrb[2].mxu1  ;;  %v874_v45 = vadd.f32 %v873_v39, %v3352_v44 }
 0x238   : > { %v878_v41 = vpack.c.bf16 %v872_v38, %v872_v38  ;;  %v876_v42 = vpop.f32.mrb[3].mxu1 }
 0x239   : > { %v3357_v50 = vpack.c.bf16 %v874_v45, %v874_v45 }
 0x23a   : > { %996 = vrot.lane.b32.xlu0 %v878_v41, %s3093_s28  ;;  %881 = vrot.lane.b32.xlu1 %v878_v41, %s3094_s26 }
 0x23b   : > { %v953_v55 = vand.u32 %v3360_v53, %v3357_v50 }
 0x23e   : > { %998 = vrot.lane.b32.xlu1 %v878_v41, %s3095_s20 }
 0x242   : > { %1111 = vrot.lane.b32.xlu1 %v878_v41, %s3096_s14 }
 0x246   : > { %1109 = vrot.lane.b32.xlu1 %v878_v41, %s3097_s27 }
 0x24a   : > { %1223 = vrot.lane.b32.xlu1 %v878_v41, %s3098_s15 }
 0x24e   : > { %1221 = vrot.lane.b32.xlu1 %v878_v41, %s3099_s2 }
 0x2ac   : > { %v882_v46 = vpop.permute.xlu1 %881  ;;  %v997_v56 = vpop.permute.xlu0 %996 }
 0x2ad   : > { %v888_v47 = vsel %vm883_vm4, %v882_v46, 0 }
 0x2ae   : > { %2782 = vmatpush3.bf16.xpose.msra.mxu1 %v888_v47 }
 0x2af   : > { %2787 = vmatprep.subr.bf16.mxu1 %v3091_v33 }
 0x2b0   : > { %v999_v51 = vpop.permute.xlu1 %998 }
 0x2b1   : > { %v1004_v52 = vsel %vm883_vm4, %v999_v51, 0 }
 0x2b2   : > { %2794 = vmatpush3.bf16.xpose.msra.mxu0 %v1004_v52 }
 0x2b3   : > { %2805 = vmatprep.subr.bf16.mxu0 %v3091_v33 }
 0x2b4   : > { %v1112_v54 = vpop.permute.xlu1 %1111 }
 0x2b5   : > { %2784 = vmatmul.mubr.msk.bf16.vlgmr.msra.gmra.mrb[4].mxu1 %vm883_vm4, %v878_v41  ;;  %v1117_v58 = vsel %vm883_vm4, %v1112_v54, 0 }
 0x2b6   : > { %2788 = vmatpush3.bf16.msra.mxu1 %v953_v55  ;;  %2789 = vmatprep.mubr.msk.bf16.mxu1 %vm3092_vm3, %v3091_v33 }
 0x2b7   : > { %2799 = vmatprep.subr.bf16.mxu1 %v3091_v33 }
 0x2b8   : > { %v1110_v57 = vpop.permute.xlu1 %1109 }
 0x2b9   : > { %2796 = vmatmul.mubr.msk.bf16.vlgmr.msra.gmra.mrb[0].mxu0 %vm883_vm4, %v997_v56 }
 0x2ba   : > { %2806 = vmatpush3.bf16.xpose.msra.mxu0 %v1117_v58  ;;  %2807 = vmatprep.mubr.msk.bf16.mxu0 %vm3092_vm3, %v3091_v33 }
 0x2bb   : > { %2817 = vmatprep.subr.bf16.mxu0 %v3091_v33 }
 0x2bc   : > { %v1224_v59 = vpop.permute.xlu1 %1223 }
 0x2bd   : > { %v1229_v60 = vsel %vm883_vm4, %v1224_v59, 0 }
 0x2c0   : > { %v1222_v61 = vpop.permute.xlu1 %1221 }
 0x2c1   : > { %2808 = vmatmul.mubr.msk.bf16.vlgmr.msra.gmra.mrb[4].mxu0 %vm883_vm4, %v1110_v57 }
 0x2c2   : > { %2818 = vmatpush3.bf16.xpose.msra.mxu0 %v1229_v60  ;;  %2819 = vmatprep.mubr.msk.bf16.mxu0 %vm3092_vm3, %v3091_v33 }
 0x2c3   : > { %2829 = vmatprep.subr.bf16.mxu0 %v3091_v33 }
 0x2c9   : > { %2820 = vmatmul.mubr.msk.bf16.vlgmr.msra.gmra.mrb[8].mxu0 %vm883_vm4, %v1222_v61 }
 0x2ca   : > { %2837 = vmatprep.mubr.msk.bf16.mxu0 %vm3092_vm3, %v3091_v33 }
 0x388   : > { %v924_v62 = vpop.f32.mrb[4].mxu1 }
 0x389   : > { %v930_v63 = vmul.f32 0.25, %v924_v62  ;;  %v2785_v0 = vpop.f32.mrb[5].mxu1 }
 0x38a   : > { %v927_v1 = vpop.f32.mrb[6].mxu1 }
 0x38b   : > { %v2786_v2 = vpop.f32.mrb[7].mxu1  ;;  %v932_v3 = vsel %vm931_vm7, %v930_v63, -inf }
 0x38c   : > { %933 = vmax.xlane.f32.xlu1 %v932_v3  ;;  %v1040_v4 = vpop.f32.mrb[0].mxu0 }
 0x38d   : > { %v1046_v6 = vmul.f32 0.25, %v1040_v4  ;;  %v2797_v7 = vpop.f32.mrb[1].mxu0 }
 0x38e   : > { %v1043_v8 = vpop.f32.mrb[2].mxu0 }
 0x38f   : > { %v2798_v9 = vpop.f32.mrb[3].mxu0  ;;  %v1047_v10 = vsel %vm931_vm7, %v1046_v6, -inf }
 0x390   : > { %1048 = vmax.xlane.f32.xlu0 %v1047_v10 }
 0x394   : > { %v1153_v11 = vpop.f32.mrb[4].mxu0 }
 0x395   : > { %v1159_v21 = vmul.f32 0.25, %v1153_v11  ;;  %v2809_v22 = vpop.f32.mrb[5].mxu0 }
 0x396   : > { %v1156_v23 = vpop.f32.mrb[6].mxu0 }
 0x397   : > { %v2810_v24 = vpop.f32.mrb[7].mxu0  ;;  %v1160_v26 = vsel %vm931_vm7, %v1159_v21, -inf }
 0x398   : > { %1161 = vmax.xlane.f32.xlu1 %v1160_v26 }
 0x39c   : > { %v1265_v28 = vpop.f32.mrb[8].mxu0 }
 0x39d   : > { %v1271_v29 = vmul.f32 0.25, %v1265_v28  ;;  %v2821_v30 = vpop.f32.mrb[9].mxu0 }
 0x39e   : > { %v1268_v31 = vpop.f32.mrb[10].mxu0 }
 0x39f   : > { %v2822_v35 = vpop.f32.mrb[11].mxu0  ;;  %v1272_v37 = vsel %vm931_vm7, %v1271_v29, -inf  ;;  %v3413_v31 = vld [vmem:[%s3231_s23] sm:$0xff]  }
 0x3a0   : > { %1273 = vmax.xlane.f32.xlu0 %v1272_v37  ;;  %2830 = vmatpush3.bf16.msra.mxu0 %v3413_v31  ;;  %v3417_v37 = vld [vmem:[%s3231_s23 + $0x8] sm:$0xff]  }
 0x3a1   : > { %2831 = vmatprep.subr.bf16.mxu0 %v3091_v33 }
 0x3a4   : > { %2832 = vmatpush3.bf16.msra.mxu0 %v3417_v37 }
 0x3a5   : > { %2833 = vmatprep.subr.bf16.mxu0 %v3091_v33 }
 0x419   : > { %v934_v38 = vpop.xlane.xlu1 %933 }
 0x41a   : > { %v935_v39 = vsub.f32 %v930_v63, %v934_v38 }
 0x41c   : > { %v936_v40 = vmul.f32 1.442695, %v935_v39 }
 0x41d   : > { %v1049_v41 = vpop.xlane.xlu0 %1048 }
 0x41e   : > { %2990 = vpow2.f32 %v936_v40  ;;  %v1050_v42 = vsub.f32 %v1046_v6, %v1049_v41 }
 0x420   : > { %v1051_v45 = vmul.f32 1.442695, %v1050_v42 }
 0x422   : > { %2992 = vpow2.f32 %v1051_v45 }
 0x425   : > { %v1162_v57 = vpop.xlane.xlu1 %1161 }
 0x426   : > { %v1163_v58 = vsub.f32 %v1159_v21, %v1162_v57 }
 0x428   : > { %v2991_v46 = vpop.eup %2990  ;;  %v1164_v59 = vmul.f32 1.442695, %v1163_v58 }
 0x429   : > { %v938_v47 = vsel %vm931_vm7, %v2991_v46, 0.0 }
 0x42a   : > { %939 = vadd.xlane.f32.xlu1 %v938_v47 }
 0x42c   : > { %v2993_v48 = vpop.eup %2992 }
 0x42d   : > { %v1274_v49 = vpop.xlane.xlu0 %1273  ;;  %v1053_v51 = vsel %vm931_vm7, %v2993_v48, 0.0 }
 0x42e   : > { %v1275_v52 = vsub.f32 %v1271_v29, %v1274_v49  ;;  %1054 = vadd.xlane.f32.xlu0 %v1053_v51  ;;  %v3428_v49 = vld [vmem:[%s3231_s23 + $0x18] sm:$0xff]  }
 0x430   : > { %v1276_v54 = vmul.f32 1.442695, %v1275_v52 }
 0x432   : > { %2994 = vpow2.f32 %v1276_v54 }
 0x433   : > { %2996 = vpow2.f32 %v1164_v59 }
 0x43b   : > { %1060 = vrot.lane.b32.xlu1 %v3357_v50, %s3093_s28 }
 0x43c   : > { %v2995_v55 = vpop.eup %2994 }
 0x43d   : > { %v1278_v56 = vsel %vm931_vm7, %v2995_v55, 0.0  ;;  %v2997_v60 = vpop.eup %2996 }
 0x43e   : > { %1279 = vadd.xlane.f32.xlu0 %v1278_v56  ;;  %v1166_v61 = vsel %vm931_vm7, %v2997_v60, 0.0 }
 0x454   : > { %1172 = vrot.lane.b32.xlu0 %v3357_v50, %s3097_s27 }
 0x45f   : > { %1167 = vadd.xlane.f32.xlu1 %v1166_v61 }
 0x470   : > { %1284 = vrot.lane.b32.xlu1 %v3357_v50, %s3099_s2 }
 0x4b7   : > { %v940_v62 = vpop.xlane.xlu1 %939 }
 0x4b8   : > { %2998 = vrcp.f32 %v940_v62 }
 0x4bb   : > { %v1055_v63 = vpop.xlane.xlu0 %1054  ;;  %v1061_v2 = vpop.permute.xlu1 %1060 }
 0x4bc   : > { %3000 = vrcp.f32 %v1055_v63  ;;  %v1066_v6 = vand.u32 %v1061_v2, %v3360_v53 }
 0x4c2   : > { %v2999_v0 = vpop.eup %2998 }
 0x4c3   : > { %v942_v1 = vmul.f32 %v2999_v0, %v2991_v46 }
 0x4c5   : > { %v943_v3 = vpack.c.bf16 %v942_v1, %v942_v1 }
 0x4c6   : > { %v3001_v4 = vpop.eup %3000 }
 0x4c7   : > { %2790 = vmatmul.mubr.msk.bf16.vlgmr.msra.gmra.mrb[8].mxu1 %vm944_vm8, %v943_v3  ;;  %v1057_v7 = vmul.f32 %v3001_v4, %v2993_v48  ;;  %v3424_v48 = vld [vmem:[%s3231_s23 + $0x10] sm:$0xff]  }
 0x4c8   : > { %2800 = vmatpush3.bf16.msra.mxu1 %v1066_v6  ;;  %2801 = vmatprep.mubr.msk.bf16.mxu1 %vm3092_vm3, %v3091_v33  ;;  %v3438_v6 = vld [vmem:[#allocation2 + $0x8] sm:$0x1f] }
 0x4c9   : > { %2811 = vmatprep.subr.bf16.mxu1 %v3091_v33  ;;  %v1058_v8 = vpack.c.bf16 %v1057_v7, %v1057_v7  ;;  %2834 = vmatpush3.bf16.msra.mxu0 %v3424_v48  ;;  %v1706_v7 = vsel %vm752_vm1, %v3438_v6, 0.0 }
 0x4ca   : > { %2835 = vmatprep.subr.bf16.mxu0 %v3091_v33 }
 0x4cb   : > { %v1280_v50 = vpop.xlane.xlu0 %1279 }
 0x4cd   : > { %2836 = vmatpush3.bf16.msra.mxu0 %v3428_v49 }
 0x4cf   : > { %v1173_v9 = vpop.permute.xlu0 %1172  ;;  %2802 = vmatmul.mubr.msk.bf16.vlgmr.msra.gmra.mrb[12].mxu1 %vm944_vm8, %v1058_v8 }
 0x4d0   : > { %v1178_v10 = vand.u32 %v1173_v9, %v3360_v53  ;;  %2813 = vmatprep.mubr.msk.bf16.mxu1 %vm3092_vm3, %v3091_v33 }
 0x4d2   : > { %2812 = vmatpush3.bf16.msra.mxu1 %v1178_v10 }
 0x4d3   : > { %2823 = vmatprep.subr.bf16.mxu1 %v3091_v33 }
 0x4ec   : > { %v1168_v11 = vpop.xlane.xlu1 %1167 }
 0x4ed   : > { %3002 = vrcp.f32 %v1168_v11 }
 0x4ee   : > { %3004 = vrcp.f32 %v1280_v50  ;;  %v3447_v50 = vld [vmem:[%s3802_s22] ss:$0 sm:$0xff] }
 0x4f0   : > { %v1285_v23 = vpop.permute.xlu1 %1284 }
 0x4f1   : > { %v1290_v28 = vand.u32 %v1285_v23, %v3360_v53 }
 0x4f7   : > { %v3003_v21 = vpop.eup %3002 }
 0x4f8   : > { %v1170_v22 = vmul.f32 %v3003_v21, %v2997_v60  ;;  %v3005_v26 = vpop.eup %3004 }
 0x4f9   : > { %v1282_v29 = vmul.f32 %v3005_v26, %v2995_v55 }
 0x4fa   : > { %v1171_v24 = vpack.c.bf16 %v1170_v22, %v1170_v22 }
 0x4fb   : > { %v1283_v30 = vpack.c.bf16 %v1282_v29, %v1282_v29 }
 0x4fc   : > { %2814 = vmatmul.mubr.msk.bf16.vlgmr.msra.gmra.mrb[16].mxu1 %vm944_vm8, %v1171_v24 }
 0x4fd   : > { %2824 = vmatpush3.bf16.msra.mxu1 %v1290_v28  ;;  %2825 = vmatprep.mubr.msk.bf16.mxu1 %vm3092_vm3, %v3091_v33 }
 0x504   : > { %2826 = vmatmul.mubr.msk.bf16.vlgmr.msra.gmra.mrb[20].mxu1 %vm944_vm8, %v1283_v30 }
 0x505   : > { %1539 = vmatprep.mubr.bf16.mxu1 %v3090_v16 }
 0x59a   : > { %v989_v35 = vpop.f32.mrb[8].mxu1 }
 0x59b   : > { %v2791_v38 = vpop.f32.mrb[9].mxu1  ;;  %v995_v63 = vpack.c.bf16 %v989_v35, %v989_v35 }
 0x59c   : > { %v992_v39 = vpop.f32.mrb[10].mxu1 }
 0x59d   : > { %v2792_v40 = vpop.f32.mrb[11].mxu1 }
 0x5a2   : > { %v1102_v41 = vpop.f32.mrb[12].mxu1 }
 0x5a3   : > { %v1108_v42 = vpack.c.bf16 %v1102_v41, %v1102_v41  ;;  %v2803_v45 = vpop.f32.mrb[13].mxu1  ;;  %v3460_v41 = vld [vmem:[%s3244_s17 + $0x4] ss:$8 sps:$4 sm:$0xff]  }
 0x5a4   : > { %v1105_v46 = vpop.f32.mrb[14].mxu1  ;;  %1507 = vmatprep.subr.bf16.mxu1 %v3460_v41  ;;  %v3468_v45 = vld [vmem:[%s3244_s17 + $0x14] ss:$8 sps:$4 sm:$0xff]  }
 0x5a5   : > { %1334 = vrot.lane.b32.xlu1 %v1108_v42, %s3098_s15  ;;  %v2804_v47 = vpop.f32.mrb[15].mxu1  ;;  %v3463_v42 = vld [vmem:[%s3244_s17] ss:$8 sps:$4 sm:$0xff]   ;;  %v3471_v46 = vld [vmem:[%s3244_s17 + $0x10] ss:$8 sps:$4 sm:$0xff]  }
 0x5a6   : > { %1508 = vmatpush1.bf16.msra.mxu1 %v3463_v42  ;;  %v3476_v47 = vld [vmem:[%s3244_s17 + $0x24] ss:$8 sps:$4 sm:$0xff]  }
 0x5a7   : > { %1509 = vmatprep.subr.bf16.mxu1 %v3468_v45 }
 0x5aa   : > { %1510 = vmatpush1.bf16.msra.mxu1 %v3471_v46 }
 0x5ab   : > { %1511 = vmatprep.subr.bf16.mxu1 %v3476_v47 }
 0x5cf   : > { %v1214_v51 = vpop.f32.mrb[16].mxu1 }
 0x5d0   : > { %v1220_v52 = vpack.c.bf16 %v1214_v51, %v1214_v51  ;;  %v2815_v54 = vpop.f32.mrb[17].mxu1  ;;  %v3479_v51 = vld [vmem:[%s3244_s17 + $0x20] ss:$8 sps:$4 sm:$0xff]  }
 0x5d1   : > { %v1217_v55 = vpop.f32.mrb[18].mxu1  ;;  %1512 = vmatpush1.bf16.msra.mxu1 %v3479_v51  ;;  %v3487_v54 = vld [vmem:[%s3244_s17 + $0x30] ss:$8 sps:$4 sm:$0xff]  }
 0x5d2   : > { %1337 = vrot.lane.b32.xlu0 %v1220_v52, %s3096_s14  ;;  %v2816_v56 = vpop.f32.mrb[19].mxu1  ;;  %v3484_v52 = vld [vmem:[%s3244_s17 + $0x34] ss:$8 sps:$4 sm:$0xff]   ;;  %v3493_v55 = vld [vmem:[%s3255_s3 + $0x40] sm:$0xff]  }
 0x5d3   : > { %1513 = vmatprep.subr.bf16.mxu1 %v3484_v52  ;;  %v3496_v56 = vld [vmem:[%s3255_s3] sm:$0xff]   ;;  %2716 = vmatprep.subr.bf16.mxu0 %v3493_v55 }
 0x5d5   : > { %1514 = vmatpush1.bf16.msra.mxu1 %v3487_v54 }
 0x5d6   : > { %1725 = vmatprep.subr.bf16.mxu1 %v3278_v12 }
 0x5d7   : > { %v1326_v57 = vpop.f32.mrb[20].mxu1 }
 0x5d8   : > { %v1332_v58 = vpack.c.bf16 %v1326_v57, %v1326_v57  ;;  %v2827_v59 = vpop.f32.mrb[21].mxu1  ;;  %v3499_v57 = vld [vmem:[%s3255_s3 + $0x48] sm:$0xff]  }
 0x5d9   : > { %v1329_v60 = vpop.f32.mrb[22].mxu1 }
 0x5da   : > { %1340 = vrot.lane.b32.xlu1 %v1332_v58, %s3095_s20  ;;  %v2828_v61 = vpop.f32.mrb[23].mxu1  ;;  %v3504_v58 = vld [vmem:[%s3255_s3 + $0x8] sm:$0xff]  }
 0x5fe   : > { %1707 = vadd.xlane.f32.xlu1 %v1706_v7 }
 0x617   : > { %v1335_v62 = vpop.permute.xlu1 %1334 }
 0x618   : > { %v1344_v1 = vsel %vm883_vm4, %v995_v63, %v1335_v62 }
 0x644   : > { %v1338_v0 = vpop.permute.xlu0 %1337 }
 0x645   : > { %v1347_v2 = vsel %vm1345_vm9, %v1344_v1, %v1338_v0  ;;  %v3513_v1 = vld [vmem:[%s3803_s19] ss:$0 sm:$0xff] }
 0x64c   : > { %v1341_v3 = vpop.permute.xlu1 %1340 }
 0x64d   : > { %v1350_v4 = vsel %vm1348_vm10, %v1347_v2, %v1341_v3  ;;  %v3520_v3 = vld [vmem:[%s653_s16] ss:$0 sm:$0xff] }
 0x64e   : > { %2838 = vmatmul.mubr.msk.bf16.vlgmr.msra.gmra.mrb[12].mxu0 %vm833_vm2, %v1350_v4 }
 0x64f   : > { %2717 = vmatpush3.bf16.msra.mxu0 %v3496_v56 }
 0x650   : > { %2718 = vmatprep.subr.bf16.mxu0 %v3499_v57 }
 0x653   : > { %2719 = vmatpush3.bf16.msra.mxu0 %v3504_v58 }
 0x68b   : > { %v1708_v24 = vpop.xlane.xlu1 %1707 }
 0x68c   : > { %v1709_v26 = vmul.f32 0.015625, %v1708_v24  ;;  %v3575_v24 = vld [vmem:[%s3255_s3 + $0x30] sm:$0xff]  }
 0x721   : > { %v1411_v8 = vpop.f32.mrb[12].mxu0 }
 0x722   : > { %v1417_v9 = vadd.f32 %v1411_v8, %v3271_v5  ;;  %v2839_v10 = vpop.f32.mrb[13].mxu0  ;;  %v1710_v5 = vsub.f32 %v3438_v6, %v1709_v26  ;;  %v3580_v26 = vld [vmem:[%s3255_s3 + $0x78] sm:$0xff]  }
 0x723   : > { %v1414_v11 = vpop.f32.mrb[14].mxu0 }
 0x724   : > { %v3451_v21 = vadd.f32 %v3447_v50, %v1417_v9  ;;  %v2840_v22 = vpop.f32.mrb[15].mxu0  ;;  %v1711_v38 = vmul.f32 %v1710_v5, %v1710_v5 }
 0x726   : > { %v1425_v23 = vsel %vm752_vm1, %v3451_v21, 0.0  ;;  %v1712_v40 = vsel %vm752_vm1, %v1711_v38, 0.0 }
 0x727   : > { %1426 = vadd.xlane.f32.xlu0 %v1425_v23  ;;  %v3572_v23 = vld [vmem:[%s3255_s3 + $0x70] sm:$0xff]  }
 0x7b4   : > { %v1427_v28 = vpop.xlane.xlu0 %1426 }
 0x7b5   : > { %v1428_v29 = vmul.f32 0.015625, %v1427_v28  ;;  %v3583_v28 = vld [vmem:[%s3255_s3 + $0x38] sm:$0xff]  }
 0x7b7   : > { %v1429_v30 = vsub.f32 %v3451_v21, %v1428_v29  ;;  %v717_v29 = vld [vmem:[%s3249_s21] sm:$0x3] }
 0x7b9   : > { %v1430_v35 = vmul.f32 %v1429_v30, %v1429_v30 }
 0x7bb   : > { %v1431_v39 = vsel %vm752_vm1, %v1430_v35, 0.0 }
 0x7bc   : > { %1432 = vadd.xlane.f32.xlu0 %v1431_v39 }
 0x7c0   : > { %1713 = vadd.xlane.f32.xlu0 %v1712_v40 }
 0x849   : > { %v1433_v59 = vpop.xlane.xlu0 %1432 }
 0x84a   : > { %v1434_v12 = vmul.f32 0.015625, %v1433_v59 }
 0x84c   : > { %v1435_v60 = vadd.f32 1e-06, %v1434_v12 }
 0x84d   : > { %v1714_v61 = vpop.xlane.xlu0 %1713 }
 0x84e   : > { %3006 = vrsqrt.f32 %v1435_v60  ;;  %v1715_v62 = vmul.f32 0.015625, %v1714_v61 }
 0x850   : > { %v1716_v63 = vadd.f32 1e-06, %v1715_v62 }
 0x852   : > { %3008 = vrsqrt.f32 %v1716_v63 }
 0x858   : > { %v3007_v0 = vpop.eup %3006 }
 0x859   : > { %v1437_v2 = vmul.f32 %v3007_v0, %v1429_v30  ;;  %v3595_v30 = vrot.slane %v717_v29, %v789_v43 }
 0x85b   : > { %v1444_v4 = vmul.f32 %v3513_v1, %v1437_v2 }
 0x85c   : > { %v3009_v9 = vpop.eup %3008 }
 0x85d   : > { %v1451_v7 = vadd.f32 %v3520_v3, %v1444_v4  ;;  %v1718_v10 = vmul.f32 %v3009_v9, %v1710_v5  ;;  %v3591_v5 = vrot.slane %v717_v29, %v785_v34 }
 0x85f   : > { %v1452_v8 = vpack.c.bf16 %v1451_v7, %v1451_v7  ;;  %v1719_v11 = vmul.f32 %v3315_v25, %v1718_v10  ;;  %v3564_v25 = vld [vmem:[%s3255_s3 + $0x68] sm:$0xff]  }
 0x861   : > { %2657 = vmatmul.mubr.msk.bf16.vlgmr.msra.gmra.mrb[24].mxu1 %vm833_vm2, %v1452_v8 }
 0x862   : > { %1726 = vmatpush1.bf16.msra.mxu1 %v3281_v13  ;;  %1757 = vmatprep.mubr.bf16.mxu1 %v3090_v16  ;;  %v1720_v13 = vadd.f32 %v3322_v27, %v1719_v11  ;;  %v3567_v27 = vld [vmem:[%s3255_s3 + $0x28] sm:$0xff]  }
 0x863   : > { %1727 = vmatprep.subr.bf16.mxu1 %v3284_v14  ;;  %v3540_v14 = vld [vmem:[%s3255_s3 + $0x50] sm:$0xff]  }
 0x864   : > { %v1721_v22 = vpack.c.bf16 %v1720_v13, %v1720_v13  ;;  %2720 = vmatprep.subr.bf16.mxu0 %v3540_v14 }
 0x866   : > { %1728 = vmatpush1.bf16.msra.mxu1 %v3289_v15  ;;  %v3543_v15 = vld [vmem:[%s3255_s3 + $0x10] sm:$0xff]  }
 0x867   : > { %1729 = vmatprep.subr.bf16.mxu1 %v3294_v17  ;;  %2721 = vmatpush3.bf16.msra.mxu0 %v3543_v15  ;;  %v3548_v17 = vld [vmem:[%s3255_s3 + $0x58] sm:$0xff]  }
 0x868   : > { %2722 = vmatprep.subr.bf16.mxu0 %v3548_v17 }
 0x86a   : > { %1730 = vmatpush1.bf16.msra.mxu1 %v3298_v18  ;;  %v3551_v18 = vld [vmem:[%s3255_s3 + $0x18] sm:$0xff]  }
 0x86b   : > { %1731 = vmatprep.subr.bf16.mxu1 %v3302_v19  ;;  %2723 = vmatpush3.bf16.msra.mxu0 %v3551_v18  ;;  %v3556_v19 = vld [vmem:[%s3255_s3 + $0x60] sm:$0xff]  }
 0x86c   : > { %2724 = vmatprep.subr.bf16.mxu0 %v3556_v19 }
 0x86e   : > { %1732 = vmatpush1.bf16.msra.mxu1 %v3306_v20  ;;  %v3559_v20 = vld [vmem:[%s3255_s3 + $0x20] sm:$0xff]  }
 0x86f   : > { %2841 = vmatprep.subr.bf16.mxu1 %v3091_v33  ;;  %2725 = vmatpush3.bf16.msra.mxu0 %v3559_v20 }
 0x870   : > { %2726 = vmatprep.subr.bf16.mxu0 %v3564_v25 }
 0x871   : > { %2675 = vmatmul.mubr.msk.bf16.vlgmr.msra.gmra.mrb[28].mxu1 %vm833_vm2, %v1721_v22 }
 0x872   : > { %2843 = vmatprep.mubr.msk.bf16.mxu1 %vm3092_vm3, %v3091_v33 }
 0x873   : > { %2727 = vmatpush3.bf16.msra.mxu0 %v3567_v27 }
 0x874   : > { %2728 = vmatprep.subr.bf16.mxu0 %v3572_v23 }
 0x877   : > { %2729 = vmatpush3.bf16.msra.mxu0 %v3575_v24 }
 0x878   : > { %2730 = vmatprep.subr.bf16.mxu0 %v3580_v26 }
 0x87b   : > { %2731 = vmatpush3.bf16.msra.mxu0 %v3583_v28 }
 0x87c   : > { %2853 = vmatprep.subr.bf16.mxu0 %v3091_v33 }
 0x934   : > { %v1541_v35 = vpop.f32.mrb[24].mxu1 }
 0x935   : > { %v1542_v38 = vadd.f32 %v1541_v35, %v3591_v5  ;;  %v1543_v39 = vpop.f32.mrb[25].mxu1 }
 0x936   : > { %v1544_v40 = vadd.f32 %v1543_v39, %v3595_v30  ;;  %v1545_v59 = vpop.f32.mrb[26].mxu1 }
 0x937   : > { %v1550_v12 = vmul.f32 0.70710677, %v1542_v38  ;;  %v1546_v60 = vpop.f32.mrb[27].mxu1  ;;  %v1548_v34 = vmul.f32 0.5, %v1542_v38 }
 0x938   : > { %v1551_v61 = vmul.f32 0.70710677, %v1544_v40  ;;  %v1549_v32 = vmul.f32 0.5, %v1544_v40 }
 0x939   : > { %3010 = verf.f32 %v1550_v12 }
 0x93a   : > { %3012 = verf.f32 %v1551_v61 }
 0x943   : > { %v3011_v62 = vpop.eup %3010 }
 0x944   : > { %v3013_v63 = vpop.eup %3012  ;;  %v1554_v0 = vadd.f32 1.0, %v3011_v62  ;;  %v1759_v2 = vpop.f32.mrb[28].mxu1 }
 0x945   : > { %v1555_v43 = vadd.f32 1.0, %v3013_v63  ;;  %v1760_v4 = vadd.f32 %v1759_v2, %v3335_v36  ;;  %v1761_v7 = vpop.f32.mrb[29].mxu1 }
 0x946   : > { %v1556_v8 = vmul.f32 %v1554_v0, %v1548_v34  ;;  %v1763_v9 = vpop.f32.mrb[30].mxu1  ;;  %v1762_v36 = vadd.f32 %v1761_v7, %v3352_v44 }
 0x947   : > { %v1766_v10 = vpack.c.bf16 %v1760_v4, %v1760_v4  ;;  %v1764_v11 = vpop.f32.mrb[31].mxu1  ;;  %v1557_v13 = vmul.f32 %v1555_v43, %v1549_v32 }
 0x948   : > { %v1558_v29 = vpack.c.bf16 %v1556_v8, %v1556_v8  ;;  %v3614_v59 = vpack.c.bf16 %v1762_v36, %v1762_v36 }
 0x949   : > { %1879 = vrot.lane.b32.xlu0 %v1766_v10, %s3095_s20  ;;  %1769 = vrot.lane.b32.xlu1 %v1766_v10, %s3094_s26  ;;  %v1559_v22 = vpack.c.bf16 %v1557_v13, %v1557_v13 }
 0x94a   : > { %v1834_v61 = vand.u32 %v3614_v59, %v3360_v53 }
 0x94b   : > { %1694 = vmatprep.mubr.bf16.mxu0 %v1559_v22 }
 0x94c   : > { %1695 = vmatmul.mubr.bf16.vlgmr.msra.gmra.mrb[16].mxu0 %v1558_v29 }
 0x94d   : > { %1990 = vrot.lane.b32.xlu0 %v1766_v10, %s3097_s27  ;;  %1877 = vrot.lane.b32.xlu1 %v1766_v10, %s3093_s28 }
 0x94e   : > { %2855 = vmatprep.mubr.msk.bf16.mxu0 %vm3092_vm3, %v3091_v33 }
 0x951   : > { %2102 = vrot.lane.b32.xlu0 %v1766_v10, %s3099_s2  ;;  %1992 = vrot.lane.b32.xlu1 %v1766_v10, %s3096_s14 }
 0x955   : > { %2104 = vrot.lane.b32.xlu1 %v1766_v10, %s3098_s15 }
 0x9bb   : > { %v1880_v35 = vpop.permute.xlu0 %1879  ;;  %v1770_v38 = vpop.permute.xlu1 %1769 }
 0x9bc   : > { %v1885_v39 = vsel %vm883_vm4, %v1880_v35, 0  ;;  %v1775_v40 = vsel %vm883_vm4, %v1770_v38, 0 }
 0x9bd   : > { %2842 = vmatpush3.bf16.xpose.msra.mxu1 %v1775_v40  ;;  %2854 = vmatpush3.bf16.xpose.msra.mxu0 %v1885_v39 }
 0x9be   : > { %2847 = vmatprep.subr.bf16.mxu1 %v3091_v33  ;;  %2865 = vmatprep.subr.bf16.mxu0 %v3091_v33 }
 0x9bf   : > { %v1878_v12 = vpop.permute.xlu1 %1877  ;;  %v1991_v63 = vpop.permute.xlu0 %1990 }
 0x9c3   : > { %v1993_v60 = vpop.permute.xlu1 %1992  ;;  %v2103_v0 = vpop.permute.xlu0 %2102 }
 0x9c4   : > { %v1998_v44 = vsel %vm883_vm4, %v1993_v60, 0  ;;  %2844 = vmatmul.mubr.msk.bf16.vlgmr.msra.gmra.mrb[32].mxu1 %vm883_vm4, %v1766_v10  ;;  %2856 = vmatmul.mubr.msk.bf16.vlgmr.msra.gmra.mrb[20].mxu0 %vm883_vm4, %v1878_v12 }
 0x9c5   : > { %2848 = vmatpush3.bf16.msra.mxu1 %v1834_v61  ;;  %2866 = vmatpush3.bf16.xpose.msra.mxu0 %v1998_v44 }
 0x9c6   : > { %2867 = vmatprep.mubr.msk.bf16.mxu0 %vm3092_vm3, %v3091_v33  ;;  %2877 = vmatprep.subr.bf16.mxu0 %v3091_v33 }
 0x9c7   : > { %2849 = vmatprep.mubr.msk.bf16.mxu1 %vm3092_vm3, %v3091_v33  ;;  %2859 = vmatprep.subr.bf16.mxu1 %v3091_v33  ;;  %v2105_v62 = vpop.permute.xlu1 %2104 }
 0x9c8   : > { %v2110_v34 = vsel %vm883_vm4, %v2105_v62, 0 }
 0x9cc   : > { %2868 = vmatmul.mubr.msk.bf16.vlgmr.msra.gmra.mrb[24].mxu0 %vm883_vm4, %v1991_v63 }
 0x9cd   : > { %2878 = vmatpush3.bf16.xpose.msra.mxu0 %v2110_v34  ;;  %2879 = vmatprep.mubr.msk.bf16.mxu0 %vm3092_vm3, %v3091_v33 }
 0x9ce   : > { %2889 = vmatprep.subr.bf16.mxu0 %v3091_v33 }
 0x9d4   : > { %2880 = vmatmul.mubr.msk.bf16.vlgmr.msra.gmra.mrb[28].mxu0 %vm883_vm4, %v2103_v0 }
 0x9d5   : > { %2890 = vmatpush3.bf16.msra.mxu0 %v3413_v31  ;;  %2897 = vmatprep.mubr.msk.bf16.mxu0 %vm3092_vm3, %v3091_v33  ;;  %v3648_v31 = vld [vmem:[%s670_s4] ss:$0 sm:$0xff] }
 0x9d6   : > { %2891 = vmatprep.subr.bf16.mxu0 %v3091_v33 }
 0x9d9   : > { %2892 = vmatpush3.bf16.msra.mxu0 %v3417_v37 }
 0x9da   : > { %2893 = vmatprep.subr.bf16.mxu0 %v3091_v33 }
 0x9dd   : > { %2894 = vmatpush3.bf16.msra.mxu0 %v3424_v48 }
 0x9de   : > { %2895 = vmatprep.subr.bf16.mxu0 %v3091_v33 }
 0x9e1   : > { %2896 = vmatpush3.bf16.msra.mxu0 %v3428_v49 }
 0x9e2   : > { %2759 = vmatprep.subr.bf16.mxu0 %v3493_v55 }
 0xa1f   : > { %v2732_v2 = vpop.f32.mrb[16].mxu0 }
 0xa20   : > { %v2733_v32 = vpop.f32.mrb[17].mxu0 }
 0xa21   : > { %v2734_v43 = vadd.f32 %v2733_v32, %v2732_v2  ;;  %v2735_v37 = vpop.f32.mrb[18].mxu0 }
 0xa22   : > { %v2736_v4 = vpop.f32.mrb[19].mxu0 }
 0xa23   : > { %v1697_v7 = vadd.f32 %v2734_v43, %v3648_v31 }
 0xa25   : > { %v1702_v48 = vadd.f32 %v1697_v7, %v3451_v21 }
 0xa27   : > { %1703 = vst.msk [vmem:[#allocation2] sm:$0x1f] %vm752_vm1, %v1702_v48 }
 0xa97   : > { %v1811_v49 = vpop.f32.mrb[32].mxu1  ;;  %v1921_v8 = vpop.f32.mrb[20].mxu0 }
 0xa98   : > { %v1817_v55 = vmul.f32 0.25, %v1811_v49  ;;  %v1927_v9 = vmul.f32 0.25, %v1921_v8  ;;  %v2845_v10 = vpop.f32.mrb[33].mxu1  ;;  %v2857_v11 = vpop.f32.mrb[21].mxu0 }
 0xa99   : > { %v1814_v13 = vpop.f32.mrb[34].mxu1  ;;  %v1924_v22 = vpop.f32.mrb[22].mxu0 }
 0xa9a   : > { %v2846_v29 = vpop.f32.mrb[35].mxu1  ;;  %v2858_v36 = vpop.f32.mrb[23].mxu0  ;;  %v1818_v35 = vsel %vm931_vm7, %v1817_v55, -inf  ;;  %v1928_v38 = vsel %vm931_vm7, %v1927_v9, -inf }
 0xa9b   : > { %1819 = vmax.xlane.f32.xlu1 %v1818_v35  ;;  %1929 = vmax.xlane.f32.xlu0 %v1928_v38 }
 0xa9f   : > { %v2034_v39 = vpop.f32.mrb[24].mxu0 }
 0xaa0   : > { %v2040_v21 = vmul.f32 0.25, %v2034_v39  ;;  %v2869_v40 = vpop.f32.mrb[25].mxu0 }
 0xaa1   : > { %v2037_v12 = vpop.f32.mrb[26].mxu0 }
 0xaa2   : > { %v2870_v60 = vpop.f32.mrb[27].mxu0  ;;  %v2041_v61 = vsel %vm931_vm7, %v2040_v21, -inf }
 0xaa3   : > { %2042 = vmax.xlane.f32.xlu0 %v2041_v61 }
 0xaa7   : > { %v2146_v44 = vpop.f32.mrb[28].mxu0 }
 0xaa8   : > { %v2152_v62 = vmul.f32 0.25, %v2146_v44  ;;  %v2881_v63 = vpop.f32.mrb[29].mxu0 }
 0xaa9   : > { %v2149_v34 = vpop.f32.mrb[30].mxu0 }
 0xaaa   : > { %v2882_v0 = vpop.f32.mrb[31].mxu0  ;;  %v2153_v2 = vsel %vm931_vm7, %v2152_v62, -inf }
 0xaab   : > { %2154 = vmax.xlane.f32.xlu1 %v2153_v2 }
 0xb28   : > { %v1930_v32 = vpop.xlane.xlu0 %1929  ;;  %v1820_v43 = vpop.xlane.xlu1 %1819 }
 0xb29   : > { %v1931_v37 = vsub.f32 %v1927_v9, %v1930_v32  ;;  %v1821_v4 = vsub.f32 %v1817_v55, %v1820_v43 }
 0xb2b   : > { %v1932_v7 = vmul.f32 1.442695, %v1931_v37  ;;  %v1822_v48 = vmul.f32 1.442695, %v1821_v4 }
 0xb2d   : > { %3014 = vpow2.f32 %v1932_v7 }
 0xb2e   : > { %3016 = vpow2.f32 %v1822_v48 }
 0xb30   : > { %v2043_v49 = vpop.xlane.xlu0 %2042 }
 0xb31   : > { %v2044_v8 = vsub.f32 %v2040_v21, %v2043_v49 }
 0xb33   : > { %v2045_v10 = vmul.f32 1.442695, %v2044_v8 }
 0xb35   : > { %3018 = vpow2.f32 %v2045_v10 }
 0xb37   : > { %v3015_v11 = vpop.eup %3014 }
 0xb38   : > { %v3017_v13 = vpop.eup %3016  ;;  %v1934_v22 = vsel %vm931_vm7, %v3015_v11, 0.0  ;;  %v2155_v55 = vpop.xlane.xlu1 %2154 }
 0xb39   : > { %1935 = vadd.xlane.f32.xlu1 %v1934_v22  ;;  %v1824_v29 = vsel %vm931_vm7, %v3017_v13, 0.0  ;;  %v2156_v35 = vsub.f32 %v2152_v62, %v2155_v55 }
 0xb3a   : > { %1825 = vadd.xlane.f32.xlu0 %v1824_v29 }
 0xb3b   : > { %v2157_v38 = vmul.f32 1.442695, %v2156_v35 }
 0xb3d   : > { %3020 = vpow2.f32 %v2157_v38 }
 0xb3f   : > { %v3019_v36 = vpop.eup %3018 }
 0xb40   : > { %v2047_v9 = vsel %vm931_vm7, %v3019_v36, 0.0 }
 0xb41   : > { %2048 = vadd.xlane.f32.xlu0 %v2047_v9 }
 0xb47   : > { %v3021_v39 = vpop.eup %3020 }
 0xb48   : > { %v2159_v21 = vsel %vm931_vm7, %v3021_v39, 0.0 }
 0xb4a   : > { %2053 = vrot.lane.b32.xlu1 %v3614_v59, %s3097_s27 }
 0xb57   : > { %1941 = vrot.lane.b32.xlu0 %v3614_v59, %s3093_s28 }
 0xb6e   : > { %2160 = vadd.xlane.f32.xlu1 %v2159_v21 }
 0xb7f   : > { %2165 = vrot.lane.b32.xlu1 %v3614_v59, %s3099_s2 }
 0xbc6   : > { %v1936_v12 = vpop.xlane.xlu1 %1935 }
 0xbc7   : > { %v1826_v40 = vpop.xlane.xlu0 %1825 }
 0xbc8   : > { %3022 = vrcp.f32 %v1826_v40 }
 0xbc9   : > { %3024 = vrcp.f32 %v1936_v12 }
 0xbca   : > { %v2054_v2 = vpop.permute.xlu1 %2053 }
 0xbcb   : > { %v2059_v37 = vand.u32 %v2054_v2, %v3360_v53 }
 0xbce   : > { %v2049_v60 = vpop.xlane.xlu0 %2048 }
 0xbcf   : > { %3026 = vrcp.f32 %v2049_v60 }
 0xbd2   : > { %v3023_v61 = vpop.eup %3022  ;;  %v1942_v44 = vpop.permute.xlu0 %1941 }
 0xbd3   : > { %v1828_v63 = vmul.f32 %v3023_v61, %v3017_v13  ;;  %v1947_v62 = vand.u32 %v1942_v44, %v3360_v53  ;;  %v3025_v0 = vpop.eup %3024 }
 0xbd4   : > { %v1938_v59 = vmul.f32 %v3025_v0, %v3015_v11 }
 0xbd5   : > { %v1829_v34 = vpack.c.bf16 %v1828_v63, %v1828_v63 }
 0xbd6   : > { %v1939_v32 = vpack.c.bf16 %v1938_v59, %v1938_v59 }
 0xbd7   : > { %2850 = vmatmul.mubr.msk.bf16.vlgmr.msra.gmra.mrb[36].mxu1 %vm944_vm8, %v1829_v34 }
 0xbd8   : > { %2860 = vmatpush3.bf16.msra.mxu1 %v1947_v62  ;;  %2861 = vmatprep.mubr.msk.bf16.mxu1 %vm3092_vm3, %v3091_v33 }
 0xbd9   : > { %2871 = vmatprep.subr.bf16.mxu1 %v3091_v33  ;;  %v3027_v43 = vpop.eup %3026 }
 0xbda   : > { %v2051_v4 = vmul.f32 %v3027_v43, %v3019_v36 }
 0xbdc   : > { %v2052_v7 = vpack.c.bf16 %v2051_v4, %v2051_v4 }
 0xbdf   : > { %2862 = vmatmul.mubr.msk.bf16.vlgmr.msra.gmra.mrb[40].mxu1 %vm944_vm8, %v1939_v32 }
 0xbe0   : > { %2872 = vmatpush3.bf16.msra.mxu1 %v2059_v37  ;;  %2873 = vmatprep.mubr.msk.bf16.mxu1 %vm3092_vm3, %v3091_v33 }
 0xbe1   : > { %2883 = vmatprep.subr.bf16.mxu1 %v3091_v33 }
 0xbe7   : > { %2874 = vmatmul.mubr.msk.bf16.vlgmr.msra.gmra.mrb[44].mxu1 %vm944_vm8, %v2052_v7 }
 0xbe8   : > { %2885 = vmatprep.mubr.msk.bf16.mxu1 %vm3092_vm3, %v3091_v33 }
 0xbfb   : > { %v2161_v48 = vpop.xlane.xlu1 %2160 }
 0xbfc   : > { %3028 = vrcp.f32 %v2161_v48 }
 0xbff   : > { %v2166_v49 = vpop.permute.xlu1 %2165 }
 0xc00   : > { %v2171_v8 = vand.u32 %v2166_v49, %v3360_v53 }
 0xc02   : > { %2884 = vmatpush3.bf16.msra.mxu1 %v2171_v8 }
 0xc03   : > { %2293 = vmatprep.subr.bf16.mxu1 %v3460_v41 }
 0xc06   : > { %v3029_v10 = vpop.eup %3028 }
 0xc07   : > { %v2163_v11 = vmul.f32 %v3029_v10, %v3021_v39 }
 0xc09   : > { %v2164_v13 = vpack.c.bf16 %v2163_v11, %v2163_v11 }
 0xc0b   : > { %2886 = vmatmul.mubr.msk.bf16.vlgmr.msra.gmra.mrb[48].mxu1 %vm944_vm8, %v2164_v13 }
 0xc0c   : > { %2294 = vmatpush1.bf16.msra.mxu1 %v3463_v42  ;;  %2325 = vmatprep.mubr.bf16.mxu1 %v3090_v16 }
 0xc0d   : > { %2295 = vmatprep.subr.bf16.mxu1 %v3468_v45 }
 0xc10   : > { %2296 = vmatpush1.bf16.msra.mxu1 %v3471_v46 }
 0xc11   : > { %2297 = vmatprep.subr.bf16.mxu1 %v3476_v47 }
 0xc14   : > { %2298 = vmatpush1.bf16.msra.mxu1 %v3479_v51 }
 0xc15   : > { %2299 = vmatprep.subr.bf16.mxu1 %v3484_v52 }
 0xc18   : > { %2300 = vmatpush1.bf16.msra.mxu1 %v3487_v54 }
 0xcaa   : > { %v1870_v33 = vpop.f32.mrb[36].mxu1 }
 0xcab   : > { %v2851_v53 = vpop.f32.mrb[37].mxu1  ;;  %v1876_v40 = vpack.c.bf16 %v1870_v33, %v1870_v33 }
 0xcac   : > { %v1873_v41 = vpop.f32.mrb[38].mxu1 }
 0xcad   : > { %v2852_v22 = vpop.f32.mrb[39].mxu1 }
 0xcb2   : > { %v1983_v29 = vpop.f32.mrb[40].mxu1 }
 0xcb3   : > { %v1989_v42 = vpack.c.bf16 %v1983_v29, %v1983_v29  ;;  %v2863_v36 = vpop.f32.mrb[41].mxu1 }
 0xcb4   : > { %v1986_v16 = vpop.f32.mrb[42].mxu1 }
 0xcb5   : > { %2215 = vrot.lane.b32.xlu0 %v1989_v42, %s3098_s15  ;;  %v2864_v45 = vpop.f32.mrb[43].mxu1 }
 0xcb6   : > { %v2392_v45 = vld [vmem:[#allocation2] sm:$0x1f] (!%p2686_p6) }
 0xcba   : > { %v2095_v46 = vpop.f32.mrb[44].mxu1 }
 0xcbb   : > { %v2101_v9 = vpack.c.bf16 %v2095_v46, %v2095_v46  ;;  %v2875_v47 = vpop.f32.mrb[45].mxu1 }
 0xcbc   : > { %v2098_v55 = vpop.f32.mrb[46].mxu1 }
 0xcbd   : > { %2218 = vrot.lane.b32.xlu1 %v2101_v9, %s3096_s14  ;;  %v2876_v51 = vpop.f32.mrb[47].mxu1  ;;  %v2394_v9 = vsel (!%p2686_p6), %vm752_vm1, %v2392_v45, 0.0 }
 0xcbe   : > { %v2395_v55 = vrot.slane (!%p2686_p6), %v2394_v9, 4 }
 0xcde   : > { %v2207_v52 = vpop.f32.mrb[48].mxu1 }
 0xcdf   : > { %v2213_v54 = vpack.c.bf16 %v2207_v52, %v2207_v52  ;;  %v2887_v35 = vpop.f32.mrb[49].mxu1  ;;  %v2396_v52 = vadd.f32 (!%p2686_p6), %v2395_v55, %v2394_v9 }
 0xce0   : > { %v2210_v38 = vpop.f32.mrb[50].mxu1 }
 0xce1   : > { %2221 = vrot.lane.b32.xlu0 %v2213_v54, %s3095_s20  ;;  %v2888_v39 = vpop.f32.mrb[51].mxu1  ;;  %v2397_v35 = vrot.slane (!%p2686_p6), %v2396_v52, 2 }
 0xce3   : > { %v2398_v39 = vadd.f32 (!%p2686_p6), %v2397_v35, %v2396_v52 }
 0xd27   : > { %v2216_v21 = vpop.permute.xlu0 %2215 }
 0xd28   : > { %v2225_v60 = vsel %vm883_vm4, %v1876_v40, %v2216_v21  ;;  %v2399_v21 = vrot.slane (!%p2686_p6), %v2398_v39, 1 }
 0xd2f   : > { %v2219_v12 = vpop.permute.xlu1 %2218 }
 0xd30   : > { %v2227_v61 = vsel %vm1345_vm9, %v2225_v60, %v2219_v12  ;;  %v2400_v12 = vadd.f32 (!%p2686_p6), %v2399_v21, %v2398_v39 }
 0xd53   : > { %v2222_v44 = vpop.permute.xlu0 %2221 }
 0xd54   : > { %v2229_v63 = vsel %vm1348_vm10, %v2227_v61, %v2222_v44  ;;  %v2409_v61 = vmul.f32 (!%p2686_p6), 0.2, %v2400_v12 }
 0xd55   : > { %2898 = vmatmul.mubr.msk.bf16.vlgmr.msra.gmra.mrb[32].mxu0 %vm833_vm2, %v2229_v63 }
 0xd56   : > { %2760 = vmatpush3.bf16.msra.mxu0 %v3496_v56  ;;  %2412 = vst.msk [vmem:[#allocation3] sm:$0x1] (!%p2686_p6), %vm2411_vm11, %v2409_v61 }
 0xd57   : > { %2761 = vmatprep.subr.bf16.mxu0 %v3499_v57 }
 0xd5a   : > { %2762 = vmatpush3.bf16.msra.mxu0 %v3504_v58 }
 0xd5b   : > { %2763 = vmatprep.subr.bf16.mxu0 %v3540_v14 }
 0xd5e   : > { %2764 = vmatpush3.bf16.msra.mxu0 %v3543_v15 }
 0xd5f   : > { %2765 = vmatprep.subr.bf16.mxu0 %v3548_v17 }
 0xd62   : > { %2766 = vmatpush3.bf16.msra.mxu0 %v3551_v18 }
 0xd63   : > { %2767 = vmatprep.subr.bf16.mxu0 %v3556_v19 }
 0xd66   : > { %2768 = vmatpush3.bf16.msra.mxu0 %v3559_v20 }
 0xd67   : > { %2769 = vmatprep.subr.bf16.mxu0 %v3564_v25 }
 0xd6a   : > { %2770 = vmatpush3.bf16.msra.mxu0 %v3567_v27 }
 0xd6b   : > { %2771 = vmatprep.subr.bf16.mxu0 %v3572_v23 }
 0xd6e   : > { %2772 = vmatpush3.bf16.msra.mxu0 %v3575_v24 }
 0xd6f   : > { %2773 = vmatprep.subr.bf16.mxu0 %v3580_v26 }
 0xd72   : > { %2774 = vmatpush3.bf16.msra.mxu0 %v3583_v28 }
 0xe28   : > { %v2266_v56 = vpop.f32.mrb[32].mxu0 }
 0xe29   : > { %v2272_v57 = vadd.f32 %v2266_v56, %v3438_v6  ;;  %v2899_v58 = vpop.f32.mrb[33].mxu0 }
 0xe2a   : > { %v2269_v14 = vpop.f32.mrb[34].mxu0 }
 0xe2b   : > { %v2273_v15 = vadd.f32 %v3447_v50, %v2272_v57  ;;  %v2900_v17 = vpop.f32.mrb[35].mxu0 }
 0xe2d   : > { %v2274_v18 = vsel %vm752_vm1, %v2273_v15, 0.0 }
 0xe2e   : > { %2275 = vadd.xlane.f32.xlu1 %v2274_v18 }
 0xebb   : > { %v2276_v19 = vpop.xlane.xlu1 %2275 }
 0xebc   : > { %v2277_v20 = vmul.f32 0.015625, %v2276_v19 }
 0xebe   : > { %v2278_v25 = vsub.f32 %v2273_v15, %v2277_v20 }
 0xec0   : > { %v2279_v27 = vmul.f32 %v2278_v25, %v2278_v25 }
 0xec2   : > { %v2280_v23 = vsel %vm752_vm1, %v2279_v27, 0.0 }
 0xec3   : > { %2281 = vadd.xlane.f32.xlu0 %v2280_v23 }
 0xf50   : > { %v2282_v24 = vpop.xlane.xlu0 %2281 }
 0xf51   : > { %v2283_v26 = vmul.f32 0.015625, %v2282_v24 }
 0xf53   : > { %v2284_v28 = vadd.f32 1e-06, %v2283_v26 }
 0xf55   : > { %3030 = vrsqrt.f32 %v2284_v28 }
 0xf5f   : > { %v3031_v6 = vpop.eup %3030 }
 0xf60   : > { %v2286_v62 = vmul.f32 %v3031_v6, %v2278_v25 }
 0xf62   : > { %v2287_v34 = vmul.f32 %v3513_v1, %v2286_v62 }
 0xf64   : > { %v2288_v50 = vadd.f32 %v3520_v3, %v2287_v34 }
 0xf66   : > { %v2289_v0 = vpack.c.bf16 %v2288_v50, %v2288_v50 }
 0xf68   : > { %2685 = vmatmul.mubr.msk.bf16.vlgmr.msra.gmra.mrb[52].mxu1 %vm833_vm2, %v2289_v0 }
0x103b   : > { %v2327_v59 = vpop.f32.mrb[52].mxu1 }
0x103c   : > { %v2328_v2 = vadd.f32 %v2327_v59, %v3591_v5  ;;  %v2329_v32 = vpop.f32.mrb[53].mxu1 }
0x103d   : > { %v2330_v43 = vadd.f32 %v2329_v32, %v3595_v30  ;;  %v2331_v37 = vpop.f32.mrb[54].mxu1 }
0x103e   : > { %v2336_v4 = vmul.f32 0.70710677, %v2328_v2  ;;  %v2332_v7 = vpop.f32.mrb[55].mxu1  ;;  %v2334_v1 = vmul.f32 0.5, %v2328_v2 }
0x103f   : > { %v2337_v48 = vmul.f32 0.70710677, %v2330_v43  ;;  %v2335_v3 = vmul.f32 0.5, %v2330_v43 }
0x1040   : > { %3032 = verf.f32 %v2336_v4 }
0x1041   : > { %3034 = verf.f32 %v2337_v48 }
0x104a   : > { %v3033_v49 = vpop.eup %3032 }
0x104b   : > { %v3035_v8 = vpop.eup %3034  ;;  %v2340_v10 = vadd.f32 1.0, %v3033_v49 }
0x104c   : > { %v2341_v11 = vadd.f32 1.0, %v3035_v8 }
0x104d   : > { %v2342_v13 = vmul.f32 %v2340_v10, %v2334_v1 }
0x104e   : > { %v2343_v33 = vmul.f32 %v2341_v11, %v2335_v3 }
0x104f   : > { %v2344_v41 = vpack.c.bf16 %v2342_v13, %v2342_v13 }
0x1050   : > { %v2345_v53 = vpack.c.bf16 %v2343_v33, %v2343_v33 }
0x1052   : > { %2378 = vmatprep.mubr.bf16.mxu0 %v2345_v53 }
0x1053   : > { %2379 = vmatmul.mubr.bf16.vlgmr.msra.gmra.mrb[36].mxu0 %v2344_v41 }
0x1126   : > { %v2775_v5 = vpop.f32.mrb[36].mxu0 }
0x1127   : > { %v2776_v30 = vpop.f32.mrb[37].mxu0 }
0x1128   : > { %v2777_v22 = vadd.f32 %v2776_v30, %v2775_v5  ;;  %v2778_v29 = vpop.f32.mrb[38].mxu0  ;;  %2391 = sbr.rel (%p2686_p6) target bundleno = 4422 (0x1146), region = 84 }
0x1129   : > { %v2779_v42 = vpop.f32.mrb[39].mxu0 }
0x112a   : > { %v2381_v36 = vadd.f32 %v2777_v22, %v3648_v31 }
0x112c   : > { %v2386_v16 = vadd.f32 %v2381_v36, %v2273_v15 }
0x112e   : > { %2387 = vst.msk [vmem:[#allocation2 + $0x8] sm:$0x1f] %vm752_vm1, %v2386_v16 }
0x1135   : > { %v2393_v46 = vld [vmem:[#allocation2 + $0x8] sm:$0x1f] }
0x1136   : > { %v2401_v47 = vsel %vm752_vm1, %v2393_v46, 0.0 }
0x1137   : > { %v2402_v51 = vrot.slane %v2401_v47, 4 }
0x1139   : > { %v2403_v54 = vadd.f32 %v2402_v51, %v2401_v47 }
0x113b   : > { %v2404_v38 = vrot.slane %v2403_v54, 2 }
0x113d   : > { %v2405_v31 = vadd.f32 %v2404_v38, %v2403_v54 }
0x113f   : > { %v2406_v40 = vrot.slane %v2405_v31, 1 }
0x1141   : > { %v2407_v60 = vadd.f32 %v2406_v40, %v2405_v31 }
0x1143   : > { %v2410_v44 = vmul.f32 0.2, %v2407_v60 }
0x1145   : > { %2413 = vst.msk [vmem:[#allocation3 + $0x1] sm:$0x1] %vm2411_vm11, %v2410_v44 }
0x1146 PF: > { %s3804_s29 = sld [smem:[#allocation7_spill]]  ;;  %s3101_s4 = smov [#allocation3]  }
0x1147   : > { %s2423_s28 = sshll.u32 %s3101_s4, 4  ;;  %s2424_s28 = int_to_ptr.vmem [resolvable:$true] %s2423_s28 }
0x1148   : > { %s3036_s26 = scalar_lea.vmem %s2424_s28, 32  ;;  %p3043_p11 = scmp.lt.s32.totalorder %s2424_s28, %s2424_s28 }
0x1149   : > { %p3037_p8 = scmp.ne.s32.totalorder %s2424_s28, %s3036_s26  ;;  %p3044_p12 = scmp.lt.s32.totalorder %s3036_s26, %s3036_s26 }
0x114b   : > { %p3045_p13 = por %p3044_p12, %p3043_p11 }
0x114c   : > { %s3805_s18 = sadd.s32 4294967295, %s3804_s29  }
0x114d   : > { %p3729_p7 = scmp.eq.s32.totalorder %s3805_s18, 1 }
0x114f   : > { %p3038_p9 = pnand %p3037_p8, %p3729_p7 }
0x1151   : > { %p3039_p10 = pneg %p3038_p9 }
0x1153   : > { %p3046_p0 = pnand %p3045_p13, %p3039_p10 }
0x1155   : > { %3049 = shalt.err (!%p3046_p0)
}
0x1156   : > { %s3807_s27 = sld [smem:[#allocation14_spill]] }
0x115c   : > { %s3050_s2 = scalar_lea.hbm %s3807_s27, 32 }
0x115d   : > { %p3051_p1 = scmp.ne.s32.totalorder %s3807_s27, %s3050_s2  ;;  %p3056_p4 = scmp.lt.u32.totalorder %s3050_s2, %s3807_s27 }
0x115f   : > { %p3052_p2 = pnand %p3051_p1, %p3729_p7 }
0x1161   : > { %p3053_p3 = pneg %p3052_p2 }
0x1163   : > { %p3058_p5 = pnand %p3056_p4, %p3053_p3 }
0x1165   : > { %3061 = shalt.err (!%p3058_p5)
}
0x1166   : > { %s3102_s24 = smov 1  }
0x1167   : > { %2902 = dma.vmem_to_hbm [thread:$0]  (%p3729_p7), %s2424_s28, 32, %s3807_s27, [#allocation4], %s3098_s15, %s3098_s15, %s3102_s24  }
0x1168   : > { %3075 = dma.done.wait (%p3729_p7), [#allocation4], 32  }
0x1169   : > { %3077 = vsyncadd (%p3729_p7), [#allocation4], 4294967264 }
0x116a PF: > { %s3808_s25 = sld [smem:[#allocation7_spill]]  ;;  %s3809_s29 = sld [smem:[#allocation6_spill]] }
0x116b   : > { %s3810_s30 = sld [smem:[#allocation8_spill]] }
0x1170   : > { %s25_s15 = sadd.s32 1, %s3808_s25  }
0x1171   : > { %p22_p6 = scmp.ge.s32.totalorder %s25_s15, 4  }
0x1173   :  { %24 = sbr.rel (!%p22_p6) target bundleno = 8 (0x8), region = 151 }
0x117a   :  { %2439 = vsyncpa [#allocation4], 1 }
0x117b   :  { %2441 = vsyncpa [#allocation4 + $0x1], 1 }

</bundles_post_ra>
